<compile_context>
chip_gen: v6e
topology: v6e:2x2x1
jax: 0.10.0
libtpu: 0.0.40
codegen_flags: <defaults>
</compile_context>

<pallas_src>
import functools

import numpy as np
import jax
import jax.numpy as jnp
from jax import lax
from jax.experimental import pallas as pl
from jax.experimental.pallas import tpu as pltpu

HP = 128  # padded per-gate lane stride (vreg lane width)


def _round_up(x, m):
    return ((x + m - 1) // m) * m


# ------------------------------ fused Pallas kernel ------------------------------ #

def make_rnn_kernel(L, B, H, num_layers):
    """Build the fused kernel for fixed (L, B, H, num_layers)."""

    def gru_cell(gi, h, whh, bhh):
        # gi, gh: (B, 3*HP) with gate g occupying lanes [g*HP, g*HP + H); padded lanes are 0.
        gh = jnp.dot(h, whh, preferred_element_type=jnp.float32) + bhh
        r = jax.nn.sigmoid(gi[:, 0:HP] + gh[:, 0:HP])
        z = jax.nn.sigmoid(gi[:, HP:2 * HP] + gh[:, HP:2 * HP])
        n = jnp.tanh(gi[:, 2 * HP:3 * HP] + r * gh[:, 2 * HP:3 * HP])
        # padded lanes: r = z = 0.5, n = 0, h = 0  ->  h_new stays 0 there.
        return (1.0 - z) * n + z * h

    def kernel(*refs):
        # refs = x, [per layer: wih_cat, bih_cat, whh_f, bhh_f, whh_b, bhh_b], agg_w, agg_b,
        #        out, h_scratch
        x_ref = refs[0]
        layer_refs = [refs[1 + 6 * l: 1 + 6 * (l + 1)] for l in range(num_layers)]
        aggw_ref = refs[1 + 6 * num_layers]
        aggb_ref = refs[2 + 6 * num_layers]
        out_ref = refs[3 + 6 * num_layers]
        h_scr = refs[4 + 6 * num_layers]

        cur_in_ref = x_ref            # (L*B, d_in_pad) for the current layer
        acc_f = acc_b = None
        for l in range(num_layers):
            wih_ref, bih_ref, whhf_ref, bhhf_ref, whhb_ref, bhhb_ref = layer_refs[l]
            last = (l == num_layers - 1)

            # Hoisted input projection: all L timesteps, both directions, one matmul.
            # (L*B, d_in_pad) @ (d_in_pad, 6*HP)  -> columns [0:3HP)=fwd gates, [3HP:6HP)=bwd.
            gi_all = jnp.dot(cur_in_ref[...], wih_ref[...],
                             preferred_element_type=jnp.float32) + bih_ref[...]

            whh_f = whhf_ref[...]
            bhh_f = bhhf_ref[...]
            whh_b = whhb_ref[...]
            bhh_b = bhhb_ref[...]

            h_f = jnp.zeros((B, HP), jnp.float32)
            h_b = jnp.zeros((B, HP), jnp.float32)
            if last:
                acc_f = jnp.zeros((B, HP), jnp.float32)
                acc_b = jnp.zeros((B, HP), jnp.float32)

            for s in range(L):                 # fully unrolled: L == 5, static and tiny
                t_f = s                        # forward direction processes t = 0..L-1
                t_b = L - 1 - s                # backward direction processes t = L-1..0
                gi_f = gi_all[t_f * B:(t_f + 1) * B, 0:3 * HP]
                gi_b = gi_all[t_b * B:(t_b + 1) * B, 3 * HP:6 * HP]
                h_f = gru_cell(gi_f, h_f, whh_f, bhh_f)
                h_b = gru_cell(gi_b, h_b, whh_b, bhh_b)
                if last:
                    # Fused Linear(5, 1) over time: acc[b, c] += agg_w[t] * h_t[b, c].
                    acc_f = acc_f + aggw_ref[t_f] * h_f
                    acc_b = acc_b + aggw_ref[t_b] * h_b
                else:
                    # Layer output stays in VMEM scratch as the next layer's input:
                    # fwd hidden in lanes [0:HP), bwd hidden in lanes [HP:2HP) (128-aligned).
                    h_scr[t_f * B:(t_f + 1) * B, 0:HP] = h_f
                    h_scr[t_b * B:(t_b + 1) * B, HP:2 * HP] = h_b

            if not last:
                cur_in_ref = h_scr

        # Dropout on the GRU output is identity at inference.
        bias = aggb_ref[0]
        out_ref[:, 0:H] = (acc_f[:, 0:H] + bias).astype(out_ref.dtype)
        out_ref[:, H:2 * H] = (acc_b[:, 0:H] + bias).astype(out_ref.dtype)

    return kernel


# --------------------------------- JAX wrapper ----------------------------------- #

@functools.partial(jax.jit, static_argnames=("hidden", "num_layers"))
def rnn_forward(x, padded_params, agg_w, agg_b, *, hidden, num_layers):
    """x: (L, B, input_size) time-major -> (B, 2*hidden)."""
    L, B, D = x.shape
    H = hidden
    d0p = _round_up(D, HP)
    x_pad = jnp.zeros((L * B, d0p), jnp.float32).at[:, :D].set(
        x.reshape(L * B, D).astype(jnp.float32))

    kernel = make_rnn_kernel(L, B, H, num_layers)
    n_vmem_in = 1 + 6 * num_layers
    in_specs = ([pl.BlockSpec(memory_space=pltpu.MemorySpace.VMEM)] * n_vmem_in
                + [pl.BlockSpec(memory_space=pltpu.MemorySpace.SMEM)] * 2)

    return pl.pallas_call(
        kernel,
        out_shape=jax.ShapeDtypeStruct((B, 2 * H), jnp.float32),
        in_specs=in_specs,
        out_specs=pl.BlockSpec(memory_space=pltpu.MemorySpace.VMEM),
        scratch_shapes=[pltpu.VMEM((L * B, 2 * HP), jnp.float32)],
    )(x_pad, *padded_params, agg_w, agg_b)


# --------------------------- weight padding / arrangement ------------------------- #

def prepare_padded_params(params, input_size, hidden, num_layers):
    """Arrange raw GRU weights so every gate occupies its own 128-lane slab.

    Per layer produces (in order):
      wih_cat (d_in_pad, 6*HP)  columns [0:3HP)=fwd r,z,n gates, [3HP:6HP)=bwd r,z,n
      bih_cat (1, 6*HP)
      whh_f (HP, 3*HP), bhh_f (1, 3*HP), whh_b (HP, 3*HP), bhh_b (1, 3*HP)
    Padded rows/columns are zero, so padded hidden lanes remain exactly zero.
    """
    H = hidden
    out = []
    for l in range(num_layers):
        p = params["layers"][l]
        d_in = input_size if l == 0 else 2 * H
        d_in_pad = _round_up(input_size, HP) if l == 0 else 2 * HP

        wih_cat = np.zeros((d_in_pad, 6 * HP), np.float32)
        bih_cat = np.zeros((1, 6 * HP), np.float32)
        for d_i, tag in enumerate(("f", "b")):
            wih = np.asarray(p["wih_" + tag])       # (d_in, 3H), gate order r,z,n
            bih = np.asarray(p["bih_" + tag])       # (3H,)
            for g in range(3):
                col = d_i * 3 * HP + g * HP
                wg = wih[:, g * H:(g + 1) * H]
                if l == 0:
                    wih_cat[0:d_in, col:col + H] = wg
                else:
                    # Layer input layout: fwd hidden at lanes [0:H), bwd at [HP:HP+H).
                    wih_cat[0:H, col:col + H] = wg[0:H]
                    wih_cat[HP:HP + H, col:col + H] = wg[H:2 * H]
                bih_cat[0, col:col + H] = bih[g * H:(g + 1) * H]

        def pad_hh(whh, bhh):
            whh = np.asarray(whh)
            bhh = np.asarray(bhh)
            whh_p = np.zeros((HP, 3 * HP), np.float32)
            bhh_p = np.zeros((1, 3 * HP), np.float32)
            for g in range(3):
                whh_p[0:H, g * HP:g * HP + H] = whh[:, g * H:(g + 1) * H]
                bhh_p[0, g * HP:g * HP + H] = bhh[g * H:(g + 1) * H]
            return whh_p, bhh_p

        whh_f, bhh_f = pad_hh(p["whh_f"], p["bhh_f"])
        whh_b, bhh_b = pad_hh(p["whh_b"], p["bhh_b"])
        out.extend([jnp.asarray(wih_cat), jnp.asarray(bih_cat),
                    jnp.asarray(whh_f), jnp.asarray(bhh_f),
                    jnp.asarray(whh_b), jnp.asarray(bhh_b)])
    return out


# ------------------------------- pure-JAX reference -------------------------------- #

def _gru_dir_ref(x, wih_t, whh_t, bih, bhh):
    H = whh_t.shape[0]

    def step(h, x_t):
        gi = x_t @ wih_t + bih
        gh = h @ whh_t + bhh
        r = jax.nn.sigmoid(gi[:, :H] + gh[:, :H])
        z = jax.nn.sigmoid(gi[:, H:2 * H] + gh[:, H:2 * H])
        n = jnp.tanh(gi[:, 2 * H:] + r * gh[:, 2 * H:])
        h_new = (1.0 - z) * n + z * h
        return h_new, h_new

    _, outs = lax.scan(step, jnp.zeros((x.shape[1], H), jnp.float32), x)
    return outs


def rnn_forward_ref(x, params, num_layers):
    h = x
    for layer in range(num_layers):
        p = params["layers"][layer]
        fwd = _gru_dir_ref(h, p["wih_f"], p["whh_f"], p["bih_f"], p["bhh_f"])
        bwd = jnp.flip(
            _gru_dir_ref(jnp.flip(h, axis=0),
                         p["wih_b"], p["whh_b"], p["bih_b"], p["bhh_b"]),
            axis=0,
        )
        h = jnp.concatenate([fwd, bwd], axis=-1)
    # agg: y[b, c] = sum_t w[t] * h[t, b, c] + bias
    return jnp.einsum("lbc,l->bc", h, params["agg_w"]) + params["agg_b"][0]


# --------------------------------- parameter init ---------------------------------- #

def init_params(key, input_size, hidden, num_layers):
    k_h = 1.0 / np.sqrt(hidden)
    layers = []
    for layer in range(num_layers):
        d_in = input_size if layer == 0 else 2 * hidden
        lp = {}
        for tag in ("f", "b"):
            key, k1, k2, k3, k4 = jax.random.split(key, 5)
            lp["wih_" + tag] = jax.random.uniform(k1, (d_in, 3 * hidden), jnp.float32, -k_h, k_h)
            lp["whh_" + tag] = jax.random.uniform(k2, (hidden, 3 * hidden), jnp.float32, -k_h, k_h)
            lp["bih_" + tag] = jax.random.uniform(k3, (3 * hidden,), jnp.float32, -k_h, k_h)
            lp["bhh_" + tag] = jax.random.uniform(k4, (3 * hidden,), jnp.float32, -k_h, k_h)
        layers.append(lp)
    key, ka, kb = jax.random.split(key, 3)
    k_a = 1.0 / np.sqrt(5.0)
    agg_w = jax.random.uniform(ka, (5,), jnp.float32, -k_a, k_a)
    agg_b = jax.random.uniform(kb, (1,), jnp.float32, -k_a, k_a)
    return {"layers": layers, "agg_w": agg_w, "agg_b": agg_b}


# -------------------------------------- main --------------------------------------- #

if __name__ == "__main__":
    L = 5              # fixed by self.agg = nn.Linear(5, 1)
    B = 8              # batch
    input_size = 16
    hidden = 32
    num_layers = 2

    key = jax.random.PRNGKey(0)
    params = init_params(key, input_size, hidden, num_layers)
    padded_params = prepare_padded_params(params, input_size, hidden, num_layers)

    x = jax.random.normal(jax.random.fold_in(key, 1234), (L, B, input_size), dtype=jnp.float32)

    out = rnn_forward(x, padded_params, params["agg_w"], params["agg_b"],
                      hidden=hidden, num_layers=num_layers)
    out = jax.block_until_ready(out)
    assert out.shape == (B, 2 * hidden), out.shape

    ref = rnn_forward_ref(x, params, num_layers)
    np.testing.assert_allclose(np.asarray(out), np.asarray(ref), rtol=1e-4, atol=1e-4)

    print("KERNEL_OK")
</pallas_src>

<mosaic_0001>
module attributes {stable_mosaic.version = 11 : i64} {
  func.func @kernel(%arg0: memref<40x128xf32, #tpu.memory_space<vmem>>, %arg1: memref<128x768xf32, #tpu.memory_space<vmem>>, %arg2: memref<1x768xf32, #tpu.memory_space<vmem>>, %arg3: memref<128x384xf32, #tpu.memory_space<vmem>>, %arg4: memref<1x384xf32, #tpu.memory_space<vmem>>, %arg5: memref<128x384xf32, #tpu.memory_space<vmem>>, %arg6: memref<1x384xf32, #tpu.memory_space<vmem>>, %arg7: memref<256x768xf32, #tpu.memory_space<vmem>>, %arg8: memref<1x768xf32, #tpu.memory_space<vmem>>, %arg9: memref<128x384xf32, #tpu.memory_space<vmem>>, %arg10: memref<1x384xf32, #tpu.memory_space<vmem>>, %arg11: memref<128x384xf32, #tpu.memory_space<vmem>>, %arg12: memref<1x384xf32, #tpu.memory_space<vmem>>, %arg13: memref<5xf32, #tpu.memory_space<smem>>, %arg14: memref<1xf32, #tpu.memory_space<smem>>, %arg15: memref<8x64xf32, #tpu.memory_space<vmem>>, %arg16: memref<40x256xf32, #tpu.memory_space<vmem>>) attributes {dimension_semantics = [], scalar_prefetch = 0 : i64, scratch_operands = 1 : i64, tpu.core_type = #tpu.core_type<tc>} {
    %c0 = arith.constant 0 : index
    %c0_0 = arith.constant 0 : index
    %0 = vector.load %arg0[%c0, %c0_0] : memref<40x128xf32, #tpu.memory_space<vmem>>, vector<40x128xf32>
    %c0_1 = arith.constant 0 : index
    %c0_2 = arith.constant 0 : index
    %1 = vector.load %arg1[%c0_1, %c0_2] : memref<128x768xf32, #tpu.memory_space<vmem>>, vector<128x768xf32>
    %cst = arith.constant dense<0.000000e+00> : vector<40x768xf32>
    %2 = tpu.matmul %0, %1, %cst {dimension_numbers = #tpu.dot_dimension_numbers<[1], [0], [0], [1], [0, 0, 1, 1], [], []>} : vector<40x128xf32>, vector<128x768xf32>, vector<40x768xf32> -> vector<40x768xf32>
    %c0_3 = arith.constant 0 : index
    %c0_4 = arith.constant 0 : index
    %3 = vector.load %arg2[%c0_3, %c0_4] : memref<1x768xf32, #tpu.memory_space<vmem>>, vector<1x768xf32>
    %4 = vector.broadcast %3 : vector<1x768xf32> to vector<40x768xf32>
    %5 = arith.addf %2, %4 : vector<40x768xf32>
    %c0_5 = arith.constant 0 : index
    %c0_6 = arith.constant 0 : index
    %6 = vector.load %arg3[%c0_5, %c0_6] : memref<128x384xf32, #tpu.memory_space<vmem>>, vector<128x384xf32>
    %c0_7 = arith.constant 0 : index
    %c0_8 = arith.constant 0 : index
    %7 = vector.load %arg4[%c0_7, %c0_8] : memref<1x384xf32, #tpu.memory_space<vmem>>, vector<1x384xf32>
    %c0_9 = arith.constant 0 : index
    %c0_10 = arith.constant 0 : index
    %8 = vector.load %arg5[%c0_9, %c0_10] : memref<128x384xf32, #tpu.memory_space<vmem>>, vector<128x384xf32>
    %c0_11 = arith.constant 0 : index
    %c0_12 = arith.constant 0 : index
    %9 = vector.load %arg6[%c0_11, %c0_12] : memref<1x384xf32, #tpu.memory_space<vmem>>, vector<1x384xf32>
    %cst_13 = arith.constant 0.000000e+00 : f32
    %10 = vector.broadcast %cst_13 : f32 to vector<8x128xf32>
    %cst_14 = arith.constant 0.000000e+00 : f32
    %11 = vector.broadcast %cst_14 : f32 to vector<8x128xf32>
    %12 = vector.extract_strided_slice %5 {offsets = [0, 0], sizes = [8, 384], strides = [1, 1]} : vector<40x768xf32> to vector<8x384xf32>
    %13 = vector.extract_strided_slice %5 {offsets = [32, 384], sizes = [8, 384], strides = [1, 1]} : vector<40x768xf32> to vector<8x384xf32>
    %cst_15 = arith.constant dense<0.000000e+00> : vector<8x384xf32>
    %14 = tpu.matmul %10, %6, %cst_15 {dimension_numbers = #tpu.dot_dimension_numbers<[1], [0], [0], [1], [0, 0, 1, 1], [], []>} : vector<8x128xf32>, vector<128x384xf32>, vector<8x384xf32> -> vector<8x384xf32>
    %15 = vector.broadcast %7 : vector<1x384xf32> to vector<8x384xf32>
    %16 = arith.addf %14, %15 : vector<8x384xf32>
    %17 = vector.extract_strided_slice %12 {offsets = [0, 0], sizes = [8, 128], strides = [1, 1]} : vector<8x384xf32> to vector<8x128xf32>
    %18 = vector.extract_strided_slice %16 {offsets = [0, 0], sizes = [8, 128], strides = [1, 1]} : vector<8x384xf32> to vector<8x128xf32>
    %19 = arith.addf %17, %18 : vector<8x128xf32>
    %20 = arith.negf %19 : vector<8x128xf32>
    %21 = math.exp %20 : vector<8x128xf32>
    %cst_16 = arith.constant 1.000000e+00 : f32
    %22 = vector.broadcast %cst_16 : f32 to vector<8x128xf32>
    %23 = arith.addf %22, %21 : vector<8x128xf32>
    %24 = arith.divf %22, %23 : vector<8x128xf32>
    %25 = vector.extract_strided_slice %12 {offsets = [0, 128], sizes = [8, 128], strides = [1, 1]} : vector<8x384xf32> to vector<8x128xf32>
    %26 = vector.extract_strided_slice %16 {offsets = [0, 128], sizes = [8, 128], strides = [1, 1]} : vector<8x384xf32> to vector<8x128xf32>
    %27 = arith.addf %25, %26 : vector<8x128xf32>
    %28 = arith.negf %27 : vector<8x128xf32>
    %29 = math.exp %28 : vector<8x128xf32>
    %cst_17 = arith.constant 1.000000e+00 : f32
    %30 = vector.broadcast %cst_17 : f32 to vector<8x128xf32>
    %31 = arith.addf %30, %29 : vector<8x128xf32>
    %32 = arith.divf %30, %31 : vector<8x128xf32>
    %33 = vector.extract_strided_slice %12 {offsets = [0, 256], sizes = [8, 128], strides = [1, 1]} : vector<8x384xf32> to vector<8x128xf32>
    %34 = vector.extract_strided_slice %16 {offsets = [0, 256], sizes = [8, 128], strides = [1, 1]} : vector<8x384xf32> to vector<8x128xf32>
    %35 = arith.mulf %24, %34 : vector<8x128xf32>
    %36 = arith.addf %33, %35 : vector<8x128xf32>
    %37 = math.tanh %36 : vector<8x128xf32>
    %cst_18 = arith.constant 1.000000e+00 : f32
    %38 = vector.broadcast %cst_18 : f32 to vector<8x128xf32>
    %39 = arith.subf %38, %32 : vector<8x128xf32>
    %40 = arith.mulf %39, %37 : vector<8x128xf32>
    %41 = arith.mulf %32, %10 : vector<8x128xf32>
    %42 = arith.addf %40, %41 : vector<8x128xf32>
    %cst_19 = arith.constant dense<0.000000e+00> : vector<8x384xf32>
    %43 = tpu.matmul %11, %8, %cst_19 {dimension_numbers = #tpu.dot_dimension_numbers<[1], [0], [0], [1], [0, 0, 1, 1], [], []>} : vector<8x128xf32>, vector<128x384xf32>, vector<8x384xf32> -> vector<8x384xf32>
    %44 = vector.broadcast %9 : vector<1x384xf32> to vector<8x384xf32>
    %45 = arith.addf %43, %44 : vector<8x384xf32>
    %46 = vector.extract_strided_slice %13 {offsets = [0, 0], sizes = [8, 128], strides = [1, 1]} : vector<8x384xf32> to vector<8x128xf32>
    %47 = vector.extract_strided_slice %45 {offsets = [0, 0], sizes = [8, 128], strides = [1, 1]} : vector<8x384xf32> to vector<8x128xf32>
    %48 = arith.addf %46, %47 : vector<8x128xf32>
    %49 = arith.negf %48 : vector<8x128xf32>
    %50 = math.exp %49 : vector<8x128xf32>
    %cst_20 = arith.constant 1.000000e+00 : f32
    %51 = vector.broadcast %cst_20 : f32 to vector<8x128xf32>
    %52 = arith.addf %51, %50 : vector<8x128xf32>
    %53 = arith.divf %51, %52 : vector<8x128xf32>
    %54 = vector.extract_strided_slice %13 {offsets = [0, 128], sizes = [8, 128], strides = [1, 1]} : vector<8x384xf32> to vector<8x128xf32>
    %55 = vector.extract_strided_slice %45 {offsets = [0, 128], sizes = [8, 128], strides = [1, 1]} : vector<8x384xf32> to vector<8x128xf32>
    %56 = arith.addf %54, %55 : vector<8x128xf32>
    %57 = arith.negf %56 : vector<8x128xf32>
    %58 = math.exp %57 : vector<8x128xf32>
    %cst_21 = arith.constant 1.000000e+00 : f32
    %59 = vector.broadcast %cst_21 : f32 to vector<8x128xf32>
    %60 = arith.addf %59, %58 : vector<8x128xf32>
    %61 = arith.divf %59, %60 : vector<8x128xf32>
    %62 = vector.extract_strided_slice %13 {offsets = [0, 256], sizes = [8, 128], strides = [1, 1]} : vector<8x384xf32> to vector<8x128xf32>
    %63 = vector.extract_strided_slice %45 {offsets = [0, 256], sizes = [8, 128], strides = [1, 1]} : vector<8x384xf32> to vector<8x128xf32>
    %64 = arith.mulf %53, %63 : vector<8x128xf32>
    %65 = arith.addf %62, %64 : vector<8x128xf32>
    %66 = math.tanh %65 : vector<8x128xf32>
    %cst_22 = arith.constant 1.000000e+00 : f32
    %67 = vector.broadcast %cst_22 : f32 to vector<8x128xf32>
    %68 = arith.subf %67, %61 : vector<8x128xf32>
    %69 = arith.mulf %68, %66 : vector<8x128xf32>
    %70 = arith.mulf %61, %11 : vector<8x128xf32>
    %71 = arith.addf %69, %70 : vector<8x128xf32>
    %c0_23 = arith.constant 0 : index
    %c0_24 = arith.constant 0 : index
    %72 = vector.load %arg16[%c0_23, %c0_24] : memref<40x256xf32, #tpu.memory_space<vmem>>, vector<8x128xf32>
    tpu.vector_store %arg16[%c0_23, %c0_24], %42 {strides = array<i32>} : memref<40x256xf32, #tpu.memory_space<vmem>>, vector<8x128xf32>,
    %c32 = arith.constant 32 : index
    %c128 = arith.constant 128 : index
    %73 = vector.load %arg16[%c32, %c128] : memref<40x256xf32, #tpu.memory_space<vmem>>, vector<8x128xf32>
    tpu.vector_store %arg16[%c32, %c128], %71 {strides = array<i32>} : memref<40x256xf32, #tpu.memory_space<vmem>>, vector<8x128xf32>,
    %74 = vector.extract_strided_slice %5 {offsets = [8, 0], sizes = [8, 384], strides = [1, 1]} : vector<40x768xf32> to vector<8x384xf32>
    %75 = vector.extract_strided_slice %5 {offsets = [24, 384], sizes = [8, 384], strides = [1, 1]} : vector<40x768xf32> to vector<8x384xf32>
    %cst_25 = arith.constant dense<0.000000e+00> : vector<8x384xf32>
    %76 = tpu.matmul %42, %6, %cst_25 {dimension_numbers = #tpu.dot_dimension_numbers<[1], [0], [0], [1], [0, 0, 1, 1], [], []>} : vector<8x128xf32>, vector<128x384xf32>, vector<8x384xf32> -> vector<8x384xf32>
    %77 = vector.broadcast %7 : vector<1x384xf32> to vector<8x384xf32>
    %78 = arith.addf %76, %77 : vector<8x384xf32>
    %79 = vector.extract_strided_slice %74 {offsets = [0, 0], sizes = [8, 128], strides = [1, 1]} : vector<8x384xf32> to vector<8x128xf32>
    %80 = vector.extract_strided_slice %78 {offsets = [0, 0], sizes = [8, 128], strides = [1, 1]} : vector<8x384xf32> to vector<8x128xf32>
    %81 = arith.addf %79, %80 : vector<8x128xf32>
    %82 = arith.negf %81 : vector<8x128xf32>
    %83 = math.exp %82 : vector<8x128xf32>
    %cst_26 = arith.constant 1.000000e+00 : f32
    %84 = vector.broadcast %cst_26 : f32 to vector<8x128xf32>
    %85 = arith.addf %84, %83 : vector<8x128xf32>
    %86 = arith.divf %84, %85 : vector<8x128xf32>
    %87 = vector.extract_strided_slice %74 {offsets = [0, 128], sizes = [8, 128], strides = [1, 1]} : vector<8x384xf32> to vector<8x128xf32>
    %88 = vector.extract_strided_slice %78 {offsets = [0, 128], sizes = [8, 128], strides = [1, 1]} : vector<8x384xf32> to vector<8x128xf32>
    %89 = arith.addf %87, %88 : vector<8x128xf32>
    %90 = arith.negf %89 : vector<8x128xf32>
    %91 = math.exp %90 : vector<8x128xf32>
    %cst_27 = arith.constant 1.000000e+00 : f32
    %92 = vector.broadcast %cst_27 : f32 to vector<8x128xf32>
    %93 = arith.addf %92, %91 : vector<8x128xf32>
    %94 = arith.divf %92, %93 : vector<8x128xf32>
    %95 = vector.extract_strided_slice %74 {offsets = [0, 256], sizes = [8, 128], strides = [1, 1]} : vector<8x384xf32> to vector<8x128xf32>
    %96 = vector.extract_strided_slice %78 {offsets = [0, 256], sizes = [8, 128], strides = [1, 1]} : vector<8x384xf32> to vector<8x128xf32>
    %97 = arith.mulf %86, %96 : vector<8x128xf32>
    %98 = arith.addf %95, %97 : vector<8x128xf32>
    %99 = math.tanh %98 : vector<8x128xf32>
    %cst_28 = arith.constant 1.000000e+00 : f32
    %100 = vector.broadcast %cst_28 : f32 to vector<8x128xf32>
    %101 = arith.subf %100, %94 : vector<8x128xf32>
    %102 = arith.mulf %101, %99 : vector<8x128xf32>
    %103 = arith.mulf %94, %42 : vector<8x128xf32>
    %104 = arith.addf %102, %103 : vector<8x128xf32>
    %cst_29 = arith.constant dense<0.000000e+00> : vector<8x384xf32>
    %105 = tpu.matmul %71, %8, %cst_29 {dimension_numbers = #tpu.dot_dimension_numbers<[1], [0], [0], [1], [0, 0, 1, 1], [], []>} : vector<8x128xf32>, vector<128x384xf32>, vector<8x384xf32> -> vector<8x384xf32>
    %106 = vector.broadcast %9 : vector<1x384xf32> to vector<8x384xf32>
    %107 = arith.addf %105, %106 : vector<8x384xf32>
    %108 = vector.extract_strided_slice %75 {offsets = [0, 0], sizes = [8, 128], strides = [1, 1]} : vector<8x384xf32> to vector<8x128xf32>
    %109 = vector.extract_strided_slice %107 {offsets = [0, 0], sizes = [8, 128], strides = [1, 1]} : vector<8x384xf32> to vector<8x128xf32>
    %110 = arith.addf %108, %109 : vector<8x128xf32>
    %111 = arith.negf %110 : vector<8x128xf32>
    %112 = math.exp %111 : vector<8x128xf32>
    %cst_30 = arith.constant 1.000000e+00 : f32
    %113 = vector.broadcast %cst_30 : f32 to vector<8x128xf32>
    %114 = arith.addf %113, %112 : vector<8x128xf32>
    %115 = arith.divf %113, %114 : vector<8x128xf32>
    %116 = vector.extract_strided_slice %75 {offsets = [0, 128], sizes = [8, 128], strides = [1, 1]} : vector<8x384xf32> to vector<8x128xf32>
    %117 = vector.extract_strided_slice %107 {offsets = [0, 128], sizes = [8, 128], strides = [1, 1]} : vector<8x384xf32> to vector<8x128xf32>
    %118 = arith.addf %116, %117 : vector<8x128xf32>
    %119 = arith.negf %118 : vector<8x128xf32>
    %120 = math.exp %119 : vector<8x128xf32>
    %cst_31 = arith.constant 1.000000e+00 : f32
    %121 = vector.broadcast %cst_31 : f32 to vector<8x128xf32>
    %122 = arith.addf %121, %120 : vector<8x128xf32>
    %123 = arith.divf %121, %122 : vector<8x128xf32>
    %124 = vector.extract_strided_slice %75 {offsets = [0, 256], sizes = [8, 128], strides = [1, 1]} : vector<8x384xf32> to vector<8x128xf32>
    %125 = vector.extract_strided_slice %107 {offsets = [0, 256], sizes = [8, 128], strides = [1, 1]} : vector<8x384xf32> to vector<8x128xf32>
    %126 = arith.mulf %115, %125 : vector<8x128xf32>
    %127 = arith.addf %124, %126 : vector<8x128xf32>
    %128 = math.tanh %127 : vector<8x128xf32>
    %cst_32 = arith.constant 1.000000e+00 : f32
    %129 = vector.broadcast %cst_32 : f32 to vector<8x128xf32>
    %130 = arith.subf %129, %123 : vector<8x128xf32>
    %131 = arith.mulf %130, %128 : vector<8x128xf32>
    %132 = arith.mulf %123, %71 : vector<8x128xf32>
    %133 = arith.addf %131, %132 : vector<8x128xf32>
    %c8 = arith.constant 8 : index
    %c0_33 = arith.constant 0 : index
    %134 = vector.load %arg16[%c8, %c0_33] : memref<40x256xf32, #tpu.memory_space<vmem>>, vector<8x128xf32>
    tpu.vector_store %arg16[%c8, %c0_33], %104 {strides = array<i32>} : memref<40x256xf32, #tpu.memory_space<vmem>>, vector<8x128xf32>,
    %c24 = arith.constant 24 : index
    %c128_34 = arith.constant 128 : index
    %135 = vector.load %arg16[%c24, %c128_34] : memref<40x256xf32, #tpu.memory_space<vmem>>, vector<8x128xf32>
    tpu.vector_store %arg16[%c24, %c128_34], %133 {strides = array<i32>} : memref<40x256xf32, #tpu.memory_space<vmem>>, vector<8x128xf32>,
    %136 = vector.extract_strided_slice %5 {offsets = [16, 0], sizes = [8, 384], strides = [1, 1]} : vector<40x768xf32> to vector<8x384xf32>
    %137 = vector.extract_strided_slice %5 {offsets = [16, 384], sizes = [8, 384], strides = [1, 1]} : vector<40x768xf32> to vector<8x384xf32>
    %cst_35 = arith.constant dense<0.000000e+00> : vector<8x384xf32>
    %138 = tpu.matmul %104, %6, %cst_35 {dimension_numbers = #tpu.dot_dimension_numbers<[1], [0], [0], [1], [0, 0, 1, 1], [], []>} : vector<8x128xf32>, vector<128x384xf32>, vector<8x384xf32> -> vector<8x384xf32>
    %139 = vector.broadcast %7 : vector<1x384xf32> to vector<8x384xf32>
    %140 = arith.addf %138, %139 : vector<8x384xf32>
    %141 = vector.extract_strided_slice %136 {offsets = [0, 0], sizes = [8, 128], strides = [1, 1]} : vector<8x384xf32> to vector<8x128xf32>
    %142 = vector.extract_strided_slice %140 {offsets = [0, 0], sizes = [8, 128], strides = [1, 1]} : vector<8x384xf32> to vector<8x128xf32>
    %143 = arith.addf %141, %142 : vector<8x128xf32>
    %144 = arith.negf %143 : vector<8x128xf32>
    %145 = math.exp %144 : vector<8x128xf32>
    %cst_36 = arith.constant 1.000000e+00 : f32
    %146 = vector.broadcast %cst_36 : f32 to vector<8x128xf32>
    %147 = arith.addf %146, %145 : vector<8x128xf32>
    %148 = arith.divf %146, %147 : vector<8x128xf32>
    %149 = vector.extract_strided_slice %136 {offsets = [0, 128], sizes = [8, 128], strides = [1, 1]} : vector<8x384xf32> to vector<8x128xf32>
    %150 = vector.extract_strided_slice %140 {offsets = [0, 128], sizes = [8, 128], strides = [1, 1]} : vector<8x384xf32> to vector<8x128xf32>
    %151 = arith.addf %149, %150 : vector<8x128xf32>
    %152 = arith.negf %151 : vector<8x128xf32>
    %153 = math.exp %152 : vector<8x128xf32>
    %cst_37 = arith.constant 1.000000e+00 : f32
    %154 = vector.broadcast %cst_37 : f32 to vector<8x128xf32>
    %155 = arith.addf %154, %153 : vector<8x128xf32>
    %156 = arith.divf %154, %155 : vector<8x128xf32>
    %157 = vector.extract_strided_slice %136 {offsets = [0, 256], sizes = [8, 128], strides = [1, 1]} : vector<8x384xf32> to vector<8x128xf32>
    %158 = vector.extract_strided_slice %140 {offsets = [0, 256], sizes = [8, 128], strides = [1, 1]} : vector<8x384xf32> to vector<8x128xf32>
    %159 = arith.mulf %148, %158 : vector<8x128xf32>
    %160 = arith.addf %157, %159 : vector<8x128xf32>
    %161 = math.tanh %160 : vector<8x128xf32>
    %cst_38 = arith.constant 1.000000e+00 : f32
    %162 = vector.broadcast %cst_38 : f32 to vector<8x128xf32>
    %163 = arith.subf %162, %156 : vector<8x128xf32>
    %164 = arith.mulf %163, %161 : vector<8x128xf32>
    %165 = arith.mulf %156, %104 : vector<8x128xf32>
    %166 = arith.addf %164, %165 : vector<8x128xf32>
    %cst_39 = arith.constant dense<0.000000e+00> : vector<8x384xf32>
    %167 = tpu.matmul %133, %8, %cst_39 {dimension_numbers = #tpu.dot_dimension_numbers<[1], [0], [0], [1], [0, 0, 1, 1], [], []>} : vector<8x128xf32>, vector<128x384xf32>, vector<8x384xf32> -> vector<8x384xf32>
    %168 = vector.broadcast %9 : vector<1x384xf32> to vector<8x384xf32>
    %169 = arith.addf %167, %168 : vector<8x384xf32>
    %170 = vector.extract_strided_slice %137 {offsets = [0, 0], sizes = [8, 128], strides = [1, 1]} : vector<8x384xf32> to vector<8x128xf32>
    %171 = vector.extract_strided_slice %169 {offsets = [0, 0], sizes = [8, 128], strides = [1, 1]} : vector<8x384xf32> to vector<8x128xf32>
    %172 = arith.addf %170, %171 : vector<8x128xf32>
    %173 = arith.negf %172 : vector<8x128xf32>
    %174 = math.exp %173 : vector<8x128xf32>
    %cst_40 = arith.constant 1.000000e+00 : f32
    %175 = vector.broadcast %cst_40 : f32 to vector<8x128xf32>
    %176 = arith.addf %175, %174 : vector<8x128xf32>
    %177 = arith.divf %175, %176 : vector<8x128xf32>
    %178 = vector.extract_strided_slice %137 {offsets = [0, 128], sizes = [8, 128], strides = [1, 1]} : vector<8x384xf32> to vector<8x128xf32>
    %179 = vector.extract_strided_slice %169 {offsets = [0, 128], sizes = [8, 128], strides = [1, 1]} : vector<8x384xf32> to vector<8x128xf32>
    %180 = arith.addf %178, %179 : vector<8x128xf32>
    %181 = arith.negf %180 : vector<8x128xf32>
    %182 = math.exp %181 : vector<8x128xf32>
    %cst_41 = arith.constant 1.000000e+00 : f32
    %183 = vector.broadcast %cst_41 : f32 to vector<8x128xf32>
    %184 = arith.addf %183, %182 : vector<8x128xf32>
    %185 = arith.divf %183, %184 : vector<8x128xf32>
    %186 = vector.extract_strided_slice %137 {offsets = [0, 256], sizes = [8, 128], strides = [1, 1]} : vector<8x384xf32> to vector<8x128xf32>
    %187 = vector.extract_strided_slice %169 {offsets = [0, 256], sizes = [8, 128], strides = [1, 1]} : vector<8x384xf32> to vector<8x128xf32>
    %188 = arith.mulf %177, %187 : vector<8x128xf32>
    %189 = arith.addf %186, %188 : vector<8x128xf32>
    %190 = math.tanh %189 : vector<8x128xf32>
    %cst_42 = arith.constant 1.000000e+00 : f32
    %191 = vector.broadcast %cst_42 : f32 to vector<8x128xf32>
    %192 = arith.subf %191, %185 : vector<8x128xf32>
    %193 = arith.mulf %192, %190 : vector<8x128xf32>
    %194 = arith.mulf %185, %133 : vector<8x128xf32>
    %195 = arith.addf %193, %194 : vector<8x128xf32>
    %c16 = arith.constant 16 : index
    %c0_43 = arith.constant 0 : index
    %196 = vector.load %arg16[%c16, %c0_43] : memref<40x256xf32, #tpu.memory_space<vmem>>, vector<8x128xf32>
    tpu.vector_store %arg16[%c16, %c0_43], %166 {strides = array<i32>} : memref<40x256xf32, #tpu.memory_space<vmem>>, vector<8x128xf32>,
    %c16_44 = arith.constant 16 : index
    %c128_45 = arith.constant 128 : index
    %197 = vector.load %arg16[%c16_44, %c128_45] : memref<40x256xf32, #tpu.memory_space<vmem>>, vector<8x128xf32>
    tpu.vector_store %arg16[%c16_44, %c128_45], %195 {strides = array<i32>} : memref<40x256xf32, #tpu.memory_space<vmem>>, vector<8x128xf32>,
    %198 = vector.extract_strided_slice %5 {offsets = [24, 0], sizes = [8, 384], strides = [1, 1]} : vector<40x768xf32> to vector<8x384xf32>
    %199 = vector.extract_strided_slice %5 {offsets = [8, 384], sizes = [8, 384], strides = [1, 1]} : vector<40x768xf32> to vector<8x384xf32>
    %cst_46 = arith.constant dense<0.000000e+00> : vector<8x384xf32>
    %200 = tpu.matmul %166, %6, %cst_46 {dimension_numbers = #tpu.dot_dimension_numbers<[1], [0], [0], [1], [0, 0, 1, 1], [], []>} : vector<8x128xf32>, vector<128x384xf32>, vector<8x384xf32> -> vector<8x384xf32>
    %201 = vector.broadcast %7 : vector<1x384xf32> to vector<8x384xf32>
    %202 = arith.addf %200, %201 : vector<8x384xf32>
    %203 = vector.extract_strided_slice %198 {offsets = [0, 0], sizes = [8, 128], strides = [1, 1]} : vector<8x384xf32> to vector<8x128xf32>
    %204 = vector.extract_strided_slice %202 {offsets = [0, 0], sizes = [8, 128], strides = [1, 1]} : vector<8x384xf32> to vector<8x128xf32>
    %205 = arith.addf %203, %204 : vector<8x128xf32>
    %206 = arith.negf %205 : vector<8x128xf32>
    %207 = math.exp %206 : vector<8x128xf32>
    %cst_47 = arith.constant 1.000000e+00 : f32
    %208 = vector.broadcast %cst_47 : f32 to vector<8x128xf32>
    %209 = arith.addf %208, %207 : vector<8x128xf32>
    %210 = arith.divf %208, %209 : vector<8x128xf32>
    %211 = vector.extract_strided_slice %198 {offsets = [0, 128], sizes = [8, 128], strides = [1, 1]} : vector<8x384xf32> to vector<8x128xf32>
    %212 = vector.extract_strided_slice %202 {offsets = [0, 128], sizes = [8, 128], strides = [1, 1]} : vector<8x384xf32> to vector<8x128xf32>
    %213 = arith.addf %211, %212 : vector<8x128xf32>
    %214 = arith.negf %213 : vector<8x128xf32>
    %215 = math.exp %214 : vector<8x128xf32>
    %cst_48 = arith.constant 1.000000e+00 : f32
    %216 = vector.broadcast %cst_48 : f32 to vector<8x128xf32>
    %217 = arith.addf %216, %215 : vector<8x128xf32>
    %218 = arith.divf %216, %217 : vector<8x128xf32>
    %219 = vector.extract_strided_slice %198 {offsets = [0, 256], sizes = [8, 128], strides = [1, 1]} : vector<8x384xf32> to vector<8x128xf32>
    %220 = vector.extract_strided_slice %202 {offsets = [0, 256], sizes = [8, 128], strides = [1, 1]} : vector<8x384xf32> to vector<8x128xf32>
    %221 = arith.mulf %210, %220 : vector<8x128xf32>
    %222 = arith.addf %219, %221 : vector<8x128xf32>
    %223 = math.tanh %222 : vector<8x128xf32>
    %cst_49 = arith.constant 1.000000e+00 : f32
    %224 = vector.broadcast %cst_49 : f32 to vector<8x128xf32>
    %225 = arith.subf %224, %218 : vector<8x128xf32>
    %226 = arith.mulf %225, %223 : vector<8x128xf32>
    %227 = arith.mulf %218, %166 : vector<8x128xf32>
    %228 = arith.addf %226, %227 : vector<8x128xf32>
    %cst_50 = arith.constant dense<0.000000e+00> : vector<8x384xf32>
    %229 = tpu.matmul %195, %8, %cst_50 {dimension_numbers = #tpu.dot_dimension_numbers<[1], [0], [0], [1], [0, 0, 1, 1], [], []>} : vector<8x128xf32>, vector<128x384xf32>, vector<8x384xf32> -> vector<8x384xf32>
    %230 = vector.broadcast %9 : vector<1x384xf32> to vector<8x384xf32>
    %231 = arith.addf %229, %230 : vector<8x384xf32>
    %232 = vector.extract_strided_slice %199 {offsets = [0, 0], sizes = [8, 128], strides = [1, 1]} : vector<8x384xf32> to vector<8x128xf32>
    %233 = vector.extract_strided_slice %231 {offsets = [0, 0], sizes = [8, 128], strides = [1, 1]} : vector<8x384xf32> to vector<8x128xf32>
    %234 = arith.addf %232, %233 : vector<8x128xf32>
    %235 = arith.negf %234 : vector<8x128xf32>
    %236 = math.exp %235 : vector<8x128xf32>
    %cst_51 = arith.constant 1.000000e+00 : f32
    %237 = vector.broadcast %cst_51 : f32 to vector<8x128xf32>
    %238 = arith.addf %237, %236 : vector<8x128xf32>
    %239 = arith.divf %237, %238 : vector<8x128xf32>
    %240 = vector.extract_strided_slice %199 {offsets = [0, 128], sizes = [8, 128], strides = [1, 1]} : vector<8x384xf32> to vector<8x128xf32>
    %241 = vector.extract_strided_slice %231 {offsets = [0, 128], sizes = [8, 128], strides = [1, 1]} : vector<8x384xf32> to vector<8x128xf32>
    %242 = arith.addf %240, %241 : vector<8x128xf32>
    %243 = arith.negf %242 : vector<8x128xf32>
    %244 = math.exp %243 : vector<8x128xf32>
    %cst_52 = arith.constant 1.000000e+00 : f32
    %245 = vector.broadcast %cst_52 : f32 to vector<8x128xf32>
    %246 = arith.addf %245, %244 : vector<8x128xf32>
    %247 = arith.divf %245, %246 : vector<8x128xf32>
    %248 = vector.extract_strided_slice %199 {offsets = [0, 256], sizes = [8, 128], strides = [1, 1]} : vector<8x384xf32> to vector<8x128xf32>
    %249 = vector.extract_strided_slice %231 {offsets = [0, 256], sizes = [8, 128], strides = [1, 1]} : vector<8x384xf32> to vector<8x128xf32>
    %250 = arith.mulf %239, %249 : vector<8x128xf32>
    %251 = arith.addf %248, %250 : vector<8x128xf32>
    %252 = math.tanh %251 : vector<8x128xf32>
    %cst_53 = arith.constant 1.000000e+00 : f32
    %253 = vector.broadcast %cst_53 : f32 to vector<8x128xf32>
    %254 = arith.subf %253, %247 : vector<8x128xf32>
    %255 = arith.mulf %254, %252 : vector<8x128xf32>
    %256 = arith.mulf %247, %195 : vector<8x128xf32>
    %257 = arith.addf %255, %256 : vector<8x128xf32>
    %c24_54 = arith.constant 24 : index
    %c0_55 = arith.constant 0 : index
    %258 = vector.load %arg16[%c24_54, %c0_55] : memref<40x256xf32, #tpu.memory_space<vmem>>, vector<8x128xf32>
    tpu.vector_store %arg16[%c24_54, %c0_55], %228 {strides = array<i32>} : memref<40x256xf32, #tpu.memory_space<vmem>>, vector<8x128xf32>,
    %c8_56 = arith.constant 8 : index
    %c128_57 = arith.constant 128 : index
    %259 = vector.load %arg16[%c8_56, %c128_57] : memref<40x256xf32, #tpu.memory_space<vmem>>, vector<8x128xf32>
    tpu.vector_store %arg16[%c8_56, %c128_57], %257 {strides = array<i32>} : memref<40x256xf32, #tpu.memory_space<vmem>>, vector<8x128xf32>,
    %260 = vector.extract_strided_slice %5 {offsets = [32, 0], sizes = [8, 384], strides = [1, 1]} : vector<40x768xf32> to vector<8x384xf32>
    %261 = vector.extract_strided_slice %5 {offsets = [0, 384], sizes = [8, 384], strides = [1, 1]} : vector<40x768xf32> to vector<8x384xf32>
    %cst_58 = arith.constant dense<0.000000e+00> : vector<8x384xf32>
    %262 = tpu.matmul %228, %6, %cst_58 {dimension_numbers = #tpu.dot_dimension_numbers<[1], [0], [0], [1], [0, 0, 1, 1], [], []>} : vector<8x128xf32>, vector<128x384xf32>, vector<8x384xf32> -> vector<8x384xf32>
    %263 = vector.broadcast %7 : vector<1x384xf32> to vector<8x384xf32>
    %264 = arith.addf %262, %263 : vector<8x384xf32>
    %265 = vector.extract_strided_slice %260 {offsets = [0, 0], sizes = [8, 128], strides = [1, 1]} : vector<8x384xf32> to vector<8x128xf32>
    %266 = vector.extract_strided_slice %264 {offsets = [0, 0], sizes = [8, 128], strides = [1, 1]} : vector<8x384xf32> to vector<8x128xf32>
    %267 = arith.addf %265, %266 : vector<8x128xf32>
    %268 = arith.negf %267 : vector<8x128xf32>
    %269 = math.exp %268 : vector<8x128xf32>
    %cst_59 = arith.constant 1.000000e+00 : f32
    %270 = vector.broadcast %cst_59 : f32 to vector<8x128xf32>
    %271 = arith.addf %270, %269 : vector<8x128xf32>
    %272 = arith.divf %270, %271 : vector<8x128xf32>
    %273 = vector.extract_strided_slice %260 {offsets = [0, 128], sizes = [8, 128], strides = [1, 1]} : vector<8x384xf32> to vector<8x128xf32>
    %274 = vector.extract_strided_slice %264 {offsets = [0, 128], sizes = [8, 128], strides = [1, 1]} : vector<8x384xf32> to vector<8x128xf32>
    %275 = arith.addf %273, %274 : vector<8x128xf32>
    %276 = arith.negf %275 : vector<8x128xf32>
    %277 = math.exp %276 : vector<8x128xf32>
    %cst_60 = arith.constant 1.000000e+00 : f32
    %278 = vector.broadcast %cst_60 : f32 to vector<8x128xf32>
    %279 = arith.addf %278, %277 : vector<8x128xf32>
    %280 = arith.divf %278, %279 : vector<8x128xf32>
    %281 = vector.extract_strided_slice %260 {offsets = [0, 256], sizes = [8, 128], strides = [1, 1]} : vector<8x384xf32> to vector<8x128xf32>
    %282 = vector.extract_strided_slice %264 {offsets = [0, 256], sizes = [8, 128], strides = [1, 1]} : vector<8x384xf32> to vector<8x128xf32>
    %283 = arith.mulf %272, %282 : vector<8x128xf32>
    %284 = arith.addf %281, %283 : vector<8x128xf32>
    %285 = math.tanh %284 : vector<8x128xf32>
    %cst_61 = arith.constant 1.000000e+00 : f32
    %286 = vector.broadcast %cst_61 : f32 to vector<8x128xf32>
    %287 = arith.subf %286, %280 : vector<8x128xf32>
    %288 = arith.mulf %287, %285 : vector<8x128xf32>
    %289 = arith.mulf %280, %228 : vector<8x128xf32>
    %290 = arith.addf %288, %289 : vector<8x128xf32>
    %cst_62 = arith.constant dense<0.000000e+00> : vector<8x384xf32>
    %291 = tpu.matmul %257, %8, %cst_62 {dimension_numbers = #tpu.dot_dimension_numbers<[1], [0], [0], [1], [0, 0, 1, 1], [], []>} : vector<8x128xf32>, vector<128x384xf32>, vector<8x384xf32> -> vector<8x384xf32>
    %292 = vector.broadcast %9 : vector<1x384xf32> to vector<8x384xf32>
    %293 = arith.addf %291, %292 : vector<8x384xf32>
    %294 = vector.extract_strided_slice %261 {offsets = [0, 0], sizes = [8, 128], strides = [1, 1]} : vector<8x384xf32> to vector<8x128xf32>
    %295 = vector.extract_strided_slice %293 {offsets = [0, 0], sizes = [8, 128], strides = [1, 1]} : vector<8x384xf32> to vector<8x128xf32>
    %296 = arith.addf %294, %295 : vector<8x128xf32>
    %297 = arith.negf %296 : vector<8x128xf32>
    %298 = math.exp %297 : vector<8x128xf32>
    %cst_63 = arith.constant 1.000000e+00 : f32
    %299 = vector.broadcast %cst_63 : f32 to vector<8x128xf32>
    %300 = arith.addf %299, %298 : vector<8x128xf32>
    %301 = arith.divf %299, %300 : vector<8x128xf32>
    %302 = vector.extract_strided_slice %261 {offsets = [0, 128], sizes = [8, 128], strides = [1, 1]} : vector<8x384xf32> to vector<8x128xf32>
    %303 = vector.extract_strided_slice %293 {offsets = [0, 128], sizes = [8, 128], strides = [1, 1]} : vector<8x384xf32> to vector<8x128xf32>
    %304 = arith.addf %302, %303 : vector<8x128xf32>
    %305 = arith.negf %304 : vector<8x128xf32>
    %306 = math.exp %305 : vector<8x128xf32>
    %cst_64 = arith.constant 1.000000e+00 : f32
    %307 = vector.broadcast %cst_64 : f32 to vector<8x128xf32>
    %308 = arith.addf %307, %306 : vector<8x128xf32>
    %309 = arith.divf %307, %308 : vector<8x128xf32>
    %310 = vector.extract_strided_slice %261 {offsets = [0, 256], sizes = [8, 128], strides = [1, 1]} : vector<8x384xf32> to vector<8x128xf32>
    %311 = vector.extract_strided_slice %293 {offsets = [0, 256], sizes = [8, 128], strides = [1, 1]} : vector<8x384xf32> to vector<8x128xf32>
    %312 = arith.mulf %301, %311 : vector<8x128xf32>
    %313 = arith.addf %310, %312 : vector<8x128xf32>
    %314 = math.tanh %313 : vector<8x128xf32>
    %cst_65 = arith.constant 1.000000e+00 : f32
    %315 = vector.broadcast %cst_65 : f32 to vector<8x128xf32>
    %316 = arith.subf %315, %309 : vector<8x128xf32>
    %317 = arith.mulf %316, %314 : vector<8x128xf32>
    %318 = arith.mulf %309, %257 : vector<8x128xf32>
    %319 = arith.addf %317, %318 : vector<8x128xf32>
    %c32_66 = arith.constant 32 : index
    %c0_67 = arith.constant 0 : index
    %320 = vector.load %arg16[%c32_66, %c0_67] : memref<40x256xf32, #tpu.memory_space<vmem>>, vector<8x128xf32>
    tpu.vector_store %arg16[%c32_66, %c0_67], %290 {strides = array<i32>} : memref<40x256xf32, #tpu.memory_space<vmem>>, vector<8x128xf32>,
    %c0_68 = arith.constant 0 : index
    %c128_69 = arith.constant 128 : index
    %321 = vector.load %arg16[%c0_68, %c128_69] : memref<40x256xf32, #tpu.memory_space<vmem>>, vector<8x128xf32>
    tpu.vector_store %arg16[%c0_68, %c128_69], %319 {strides = array<i32>} : memref<40x256xf32, #tpu.memory_space<vmem>>, vector<8x128xf32>,
    %c0_70 = arith.constant 0 : index
    %c0_71 = arith.constant 0 : index
    %322 = vector.load %arg16[%c0_70, %c0_71] : memref<40x256xf32, #tpu.memory_space<vmem>>, vector<40x256xf32>
    %c0_72 = arith.constant 0 : index
    %c0_73 = arith.constant 0 : index
    %323 = vector.load %arg7[%c0_72, %c0_73] : memref<256x768xf32, #tpu.memory_space<vmem>>, vector<256x768xf32>
    %cst_74 = arith.constant dense<0.000000e+00> : vector<40x768xf32>
    %324 = tpu.matmul %322, %323, %cst_74 {dimension_numbers = #tpu.dot_dimension_numbers<[1], [0], [0], [1], [0, 0, 1, 1], [], []>} : vector<40x256xf32>, vector<256x768xf32>, vector<40x768xf32> -> vector<40x768xf32>
    %c0_75 = arith.constant 0 : index
    %c0_76 = arith.constant 0 : index
    %325 = vector.load %arg8[%c0_75, %c0_76] : memref<1x768xf32, #tpu.memory_space<vmem>>, vector<1x768xf32>
    %326 = vector.broadcast %325 : vector<1x768xf32> to vector<40x768xf32>
    %327 = arith.addf %324, %326 : vector<40x768xf32>
    %c0_77 = arith.constant 0 : index
    %c0_78 = arith.constant 0 : index
    %328 = vector.load %arg9[%c0_77, %c0_78] : memref<128x384xf32, #tpu.memory_space<vmem>>, vector<128x384xf32>
    %c0_79 = arith.constant 0 : index
    %c0_80 = arith.constant 0 : index
    %329 = vector.load %arg10[%c0_79, %c0_80] : memref<1x384xf32, #tpu.memory_space<vmem>>, vector<1x384xf32>
    %c0_81 = arith.constant 0 : index
    %c0_82 = arith.constant 0 : index
    %330 = vector.load %arg11[%c0_81, %c0_82] : memref<128x384xf32, #tpu.memory_space<vmem>>, vector<128x384xf32>
    %c0_83 = arith.constant 0 : index
    %c0_84 = arith.constant 0 : index
    %331 = vector.load %arg12[%c0_83, %c0_84] : memref<1x384xf32, #tpu.memory_space<vmem>>, vector<1x384xf32>
    %cst_85 = arith.constant 0.000000e+00 : f32
    %332 = vector.broadcast %cst_85 : f32 to vector<8x128xf32>
    %cst_86 = arith.constant 0.000000e+00 : f32
    %333 = vector.broadcast %cst_86 : f32 to vector<8x128xf32>
    %cst_87 = arith.constant 0.000000e+00 : f32
    %334 = vector.broadcast %cst_87 : f32 to vector<8x128xf32>
    %cst_88 = arith.constant 0.000000e+00 : f32
    %335 = vector.broadcast %cst_88 : f32 to vector<8x128xf32>
    %336 = vector.extract_strided_slice %327 {offsets = [0, 0], sizes = [8, 384], strides = [1, 1]} : vector<40x768xf32> to vector<8x384xf32>
    %337 = vector.extract_strided_slice %327 {offsets = [32, 384], sizes = [8, 384], strides = [1, 1]} : vector<40x768xf32> to vector<8x384xf32>
    %cst_89 = arith.constant dense<0.000000e+00> : vector<8x384xf32>
    %338 = tpu.matmul %332, %328, %cst_89 {dimension_numbers = #tpu.dot_dimension_numbers<[1], [0], [0], [1], [0, 0, 1, 1], [], []>} : vector<8x128xf32>, vector<128x384xf32>, vector<8x384xf32> -> vector<8x384xf32>
    %339 = vector.broadcast %329 : vector<1x384xf32> to vector<8x384xf32>
    %340 = arith.addf %338, %339 : vector<8x384xf32>
    %341 = vector.extract_strided_slice %336 {offsets = [0, 0], sizes = [8, 128], strides = [1, 1]} : vector<8x384xf32> to vector<8x128xf32>
    %342 = vector.extract_strided_slice %340 {offsets = [0, 0], sizes = [8, 128], strides = [1, 1]} : vector<8x384xf32> to vector<8x128xf32>
    %343 = arith.addf %341, %342 : vector<8x128xf32>
    %344 = arith.negf %343 : vector<8x128xf32>
    %345 = math.exp %344 : vector<8x128xf32>
    %cst_90 = arith.constant 1.000000e+00 : f32
    %346 = vector.broadcast %cst_90 : f32 to vector<8x128xf32>
    %347 = arith.addf %346, %345 : vector<8x128xf32>
    %348 = arith.divf %346, %347 : vector<8x128xf32>
    %349 = vector.extract_strided_slice %336 {offsets = [0, 128], sizes = [8, 128], strides = [1, 1]} : vector<8x384xf32> to vector<8x128xf32>
    %350 = vector.extract_strided_slice %340 {offsets = [0, 128], sizes = [8, 128], strides = [1, 1]} : vector<8x384xf32> to vector<8x128xf32>
    %351 = arith.addf %349, %350 : vector<8x128xf32>
    %352 = arith.negf %351 : vector<8x128xf32>
    %353 = math.exp %352 : vector<8x128xf32>
    %cst_91 = arith.constant 1.000000e+00 : f32
    %354 = vector.broadcast %cst_91 : f32 to vector<8x128xf32>
    %355 = arith.addf %354, %353 : vector<8x128xf32>
    %356 = arith.divf %354, %355 : vector<8x128xf32>
    %357 = vector.extract_strided_slice %336 {offsets = [0, 256], sizes = [8, 128], strides = [1, 1]} : vector<8x384xf32> to vector<8x128xf32>
    %358 = vector.extract_strided_slice %340 {offsets = [0, 256], sizes = [8, 128], strides = [1, 1]} : vector<8x384xf32> to vector<8x128xf32>
    %359 = arith.mulf %348, %358 : vector<8x128xf32>
    %360 = arith.addf %357, %359 : vector<8x128xf32>
    %361 = math.tanh %360 : vector<8x128xf32>
    %cst_92 = arith.constant 1.000000e+00 : f32
    %362 = vector.broadcast %cst_92 : f32 to vector<8x128xf32>
    %363 = arith.subf %362, %356 : vector<8x128xf32>
    %364 = arith.mulf %363, %361 : vector<8x128xf32>
    %365 = arith.mulf %356, %332 : vector<8x128xf32>
    %366 = arith.addf %364, %365 : vector<8x128xf32>
    %cst_93 = arith.constant dense<0.000000e+00> : vector<8x384xf32>
    %367 = tpu.matmul %333, %330, %cst_93 {dimension_numbers = #tpu.dot_dimension_numbers<[1], [0], [0], [1], [0, 0, 1, 1], [], []>} : vector<8x128xf32>, vector<128x384xf32>, vector<8x384xf32> -> vector<8x384xf32>
    %368 = vector.broadcast %331 : vector<1x384xf32> to vector<8x384xf32>
    %369 = arith.addf %367, %368 : vector<8x384xf32>
    %370 = vector.extract_strided_slice %337 {offsets = [0, 0], sizes = [8, 128], strides = [1, 1]} : vector<8x384xf32> to vector<8x128xf32>
    %371 = vector.extract_strided_slice %369 {offsets = [0, 0], sizes = [8, 128], strides = [1, 1]} : vector<8x384xf32> to vector<8x128xf32>
    %372 = arith.addf %370, %371 : vector<8x128xf32>
    %373 = arith.negf %372 : vector<8x128xf32>
    %374 = math.exp %373 : vector<8x128xf32>
    %cst_94 = arith.constant 1.000000e+00 : f32
    %375 = vector.broadcast %cst_94 : f32 to vector<8x128xf32>
    %376 = arith.addf %375, %374 : vector<8x128xf32>
    %377 = arith.divf %375, %376 : vector<8x128xf32>
    %378 = vector.extract_strided_slice %337 {offsets = [0, 128], sizes = [8, 128], strides = [1, 1]} : vector<8x384xf32> to vector<8x128xf32>
    %379 = vector.extract_strided_slice %369 {offsets = [0, 128], sizes = [8, 128], strides = [1, 1]} : vector<8x384xf32> to vector<8x128xf32>
    %380 = arith.addf %378, %379 : vector<8x128xf32>
    %381 = arith.negf %380 : vector<8x128xf32>
    %382 = math.exp %381 : vector<8x128xf32>
    %cst_95 = arith.constant 1.000000e+00 : f32
    %383 = vector.broadcast %cst_95 : f32 to vector<8x128xf32>
    %384 = arith.addf %383, %382 : vector<8x128xf32>
    %385 = arith.divf %383, %384 : vector<8x128xf32>
    %386 = vector.extract_strided_slice %337 {offsets = [0, 256], sizes = [8, 128], strides = [1, 1]} : vector<8x384xf32> to vector<8x128xf32>
    %387 = vector.extract_strided_slice %369 {offsets = [0, 256], sizes = [8, 128], strides = [1, 1]} : vector<8x384xf32> to vector<8x128xf32>
    %388 = arith.mulf %377, %387 : vector<8x128xf32>
    %389 = arith.addf %386, %388 : vector<8x128xf32>
    %390 = math.tanh %389 : vector<8x128xf32>
    %cst_96 = arith.constant 1.000000e+00 : f32
    %391 = vector.broadcast %cst_96 : f32 to vector<8x128xf32>
    %392 = arith.subf %391, %385 : vector<8x128xf32>
    %393 = arith.mulf %392, %390 : vector<8x128xf32>
    %394 = arith.mulf %385, %333 : vector<8x128xf32>
    %395 = arith.addf %393, %394 : vector<8x128xf32>
    %c0_97 = arith.constant 0 : index
    %396 = memref.load %arg13[%c0_97] : memref<5xf32, #tpu.memory_space<smem>>
    %397 = vector.broadcast %396 : f32 to vector<8x128xf32>
    %398 = arith.mulf %397, %366 : vector<8x128xf32>
    %399 = arith.addf %334, %398 : vector<8x128xf32>
    %c4 = arith.constant 4 : index
    %400 = memref.load %arg13[%c4] : memref<5xf32, #tpu.memory_space<smem>>
    %401 = vector.broadcast %400 : f32 to vector<8x128xf32>
    %402 = arith.mulf %401, %395 : vector<8x128xf32>
    %403 = arith.addf %335, %402 : vector<8x128xf32>
    %404 = vector.extract_strided_slice %327 {offsets = [8, 0], sizes = [8, 384], strides = [1, 1]} : vector<40x768xf32> to vector<8x384xf32>
    %405 = vector.extract_strided_slice %327 {offsets = [24, 384], sizes = [8, 384], strides = [1, 1]} : vector<40x768xf32> to vector<8x384xf32>
    %cst_98 = arith.constant dense<0.000000e+00> : vector<8x384xf32>
    %406 = tpu.matmul %366, %328, %cst_98 {dimension_numbers = #tpu.dot_dimension_numbers<[1], [0], [0], [1], [0, 0, 1, 1], [], []>} : vector<8x128xf32>, vector<128x384xf32>, vector<8x384xf32> -> vector<8x384xf32>
    %407 = vector.broadcast %329 : vector<1x384xf32> to vector<8x384xf32>
    %408 = arith.addf %406, %407 : vector<8x384xf32>
    %409 = vector.extract_strided_slice %404 {offsets = [0, 0], sizes = [8, 128], strides = [1, 1]} : vector<8x384xf32> to vector<8x128xf32>
    %410 = vector.extract_strided_slice %408 {offsets = [0, 0], sizes = [8, 128], strides = [1, 1]} : vector<8x384xf32> to vector<8x128xf32>
    %411 = arith.addf %409, %410 : vector<8x128xf32>
    %412 = arith.negf %411 : vector<8x128xf32>
    %413 = math.exp %412 : vector<8x128xf32>
    %cst_99 = arith.constant 1.000000e+00 : f32
    %414 = vector.broadcast %cst_99 : f32 to vector<8x128xf32>
    %415 = arith.addf %414, %413 : vector<8x128xf32>
    %416 = arith.divf %414, %415 : vector<8x128xf32>
    %417 = vector.extract_strided_slice %404 {offsets = [0, 128], sizes = [8, 128], strides = [1, 1]} : vector<8x384xf32> to vector<8x128xf32>
    %418 = vector.extract_strided_slice %408 {offsets = [0, 128], sizes = [8, 128], strides = [1, 1]} : vector<8x384xf32> to vector<8x128xf32>
    %419 = arith.addf %417, %418 : vector<8x128xf32>
    %420 = arith.negf %419 : vector<8x128xf32>
    %421 = math.exp %420 : vector<8x128xf32>
    %cst_100 = arith.constant 1.000000e+00 : f32
    %422 = vector.broadcast %cst_100 : f32 to vector<8x128xf32>
    %423 = arith.addf %422, %421 : vector<8x128xf32>
    %424 = arith.divf %422, %423 : vector<8x128xf32>
    %425 = vector.extract_strided_slice %404 {offsets = [0, 256], sizes = [8, 128], strides = [1, 1]} : vector<8x384xf32> to vector<8x128xf32>
    %426 = vector.extract_strided_slice %408 {offsets = [0, 256], sizes = [8, 128], strides = [1, 1]} : vector<8x384xf32> to vector<8x128xf32>
    %427 = arith.mulf %416, %426 : vector<8x128xf32>
    %428 = arith.addf %425, %427 : vector<8x128xf32>
    %429 = math.tanh %428 : vector<8x128xf32>
    %cst_101 = arith.constant 1.000000e+00 : f32
    %430 = vector.broadcast %cst_101 : f32 to vector<8x128xf32>
    %431 = arith.subf %430, %424 : vector<8x128xf32>
    %432 = arith.mulf %431, %429 : vector<8x128xf32>
    %433 = arith.mulf %424, %366 : vector<8x128xf32>
    %434 = arith.addf %432, %433 : vector<8x128xf32>
    %cst_102 = arith.constant dense<0.000000e+00> : vector<8x384xf32>
    %435 = tpu.matmul %395, %330, %cst_102 {dimension_numbers = #tpu.dot_dimension_numbers<[1], [0], [0], [1], [0, 0, 1, 1], [], []>} : vector<8x128xf32>, vector<128x384xf32>, vector<8x384xf32> -> vector<8x384xf32>
    %436 = vector.broadcast %331 : vector<1x384xf32> to vector<8x384xf32>
    %437 = arith.addf %435, %436 : vector<8x384xf32>
    %438 = vector.extract_strided_slice %405 {offsets = [0, 0], sizes = [8, 128], strides = [1, 1]} : vector<8x384xf32> to vector<8x128xf32>
    %439 = vector.extract_strided_slice %437 {offsets = [0, 0], sizes = [8, 128], strides = [1, 1]} : vector<8x384xf32> to vector<8x128xf32>
    %440 = arith.addf %438, %439 : vector<8x128xf32>
    %441 = arith.negf %440 : vector<8x128xf32>
    %442 = math.exp %441 : vector<8x128xf32>
    %cst_103 = arith.constant 1.000000e+00 : f32
    %443 = vector.broadcast %cst_103 : f32 to vector<8x128xf32>
    %444 = arith.addf %443, %442 : vector<8x128xf32>
    %445 = arith.divf %443, %444 : vector<8x128xf32>
    %446 = vector.extract_strided_slice %405 {offsets = [0, 128], sizes = [8, 128], strides = [1, 1]} : vector<8x384xf32> to vector<8x128xf32>
    %447 = vector.extract_strided_slice %437 {offsets = [0, 128], sizes = [8, 128], strides = [1, 1]} : vector<8x384xf32> to vector<8x128xf32>
    %448 = arith.addf %446, %447 : vector<8x128xf32>
    %449 = arith.negf %448 : vector<8x128xf32>
    %450 = math.exp %449 : vector<8x128xf32>
    %cst_104 = arith.constant 1.000000e+00 : f32
    %451 = vector.broadcast %cst_104 : f32 to vector<8x128xf32>
    %452 = arith.addf %451, %450 : vector<8x128xf32>
    %453 = arith.divf %451, %452 : vector<8x128xf32>
    %454 = vector.extract_strided_slice %405 {offsets = [0, 256], sizes = [8, 128], strides = [1, 1]} : vector<8x384xf32> to vector<8x128xf32>
    %455 = vector.extract_strided_slice %437 {offsets = [0, 256], sizes = [8, 128], strides = [1, 1]} : vector<8x384xf32> to vector<8x128xf32>
    %456 = arith.mulf %445, %455 : vector<8x128xf32>
    %457 = arith.addf %454, %456 : vector<8x128xf32>
    %458 = math.tanh %457 : vector<8x128xf32>
    %cst_105 = arith.constant 1.000000e+00 : f32
    %459 = vector.broadcast %cst_105 : f32 to vector<8x128xf32>
    %460 = arith.subf %459, %453 : vector<8x128xf32>
    %461 = arith.mulf %460, %458 : vector<8x128xf32>
    %462 = arith.mulf %453, %395 : vector<8x128xf32>
    %463 = arith.addf %461, %462 : vector<8x128xf32>
    %c1 = arith.constant 1 : index
    %464 = memref.load %arg13[%c1] : memref<5xf32, #tpu.memory_space<smem>>
    %465 = vector.broadcast %464 : f32 to vector<8x128xf32>
    %466 = arith.mulf %465, %434 : vector<8x128xf32>
    %467 = arith.addf %399, %466 : vector<8x128xf32>
    %c3 = arith.constant 3 : index
    %468 = memref.load %arg13[%c3] : memref<5xf32, #tpu.memory_space<smem>>
    %469 = vector.broadcast %468 : f32 to vector<8x128xf32>
    %470 = arith.mulf %469, %463 : vector<8x128xf32>
    %471 = arith.addf %403, %470 : vector<8x128xf32>
    %472 = vector.extract_strided_slice %327 {offsets = [16, 0], sizes = [8, 384], strides = [1, 1]} : vector<40x768xf32> to vector<8x384xf32>
    %473 = vector.extract_strided_slice %327 {offsets = [16, 384], sizes = [8, 384], strides = [1, 1]} : vector<40x768xf32> to vector<8x384xf32>
    %cst_106 = arith.constant dense<0.000000e+00> : vector<8x384xf32>
    %474 = tpu.matmul %434, %328, %cst_106 {dimension_numbers = #tpu.dot_dimension_numbers<[1], [0], [0], [1], [0, 0, 1, 1], [], []>} : vector<8x128xf32>, vector<128x384xf32>, vector<8x384xf32> -> vector<8x384xf32>
    %475 = vector.broadcast %329 : vector<1x384xf32> to vector<8x384xf32>
    %476 = arith.addf %474, %475 : vector<8x384xf32>
    %477 = vector.extract_strided_slice %472 {offsets = [0, 0], sizes = [8, 128], strides = [1, 1]} : vector<8x384xf32> to vector<8x128xf32>
    %478 = vector.extract_strided_slice %476 {offsets = [0, 0], sizes = [8, 128], strides = [1, 1]} : vector<8x384xf32> to vector<8x128xf32>
    %479 = arith.addf %477, %478 : vector<8x128xf32>
    %480 = arith.negf %479 : vector<8x128xf32>
    %481 = math.exp %480 : vector<8x128xf32>
    %cst_107 = arith.constant 1.000000e+00 : f32
    %482 = vector.broadcast %cst_107 : f32 to vector<8x128xf32>
    %483 = arith.addf %482, %481 : vector<8x128xf32>
    %484 = arith.divf %482, %483 : vector<8x128xf32>
    %485 = vector.extract_strided_slice %472 {offsets = [0, 128], sizes = [8, 128], strides = [1, 1]} : vector<8x384xf32> to vector<8x128xf32>
    %486 = vector.extract_strided_slice %476 {offsets = [0, 128], sizes = [8, 128], strides = [1, 1]} : vector<8x384xf32> to vector<8x128xf32>
    %487 = arith.addf %485, %486 : vector<8x128xf32>
    %488 = arith.negf %487 : vector<8x128xf32>
    %489 = math.exp %488 : vector<8x128xf32>
    %cst_108 = arith.constant 1.000000e+00 : f32
    %490 = vector.broadcast %cst_108 : f32 to vector<8x128xf32>
    %491 = arith.addf %490, %489 : vector<8x128xf32>
    %492 = arith.divf %490, %491 : vector<8x128xf32>
    %493 = vector.extract_strided_slice %472 {offsets = [0, 256], sizes = [8, 128], strides = [1, 1]} : vector<8x384xf32> to vector<8x128xf32>
    %494 = vector.extract_strided_slice %476 {offsets = [0, 256], sizes = [8, 128], strides = [1, 1]} : vector<8x384xf32> to vector<8x128xf32>
    %495 = arith.mulf %484, %494 : vector<8x128xf32>
    %496 = arith.addf %493, %495 : vector<8x128xf32>
    %497 = math.tanh %496 : vector<8x128xf32>
    %cst_109 = arith.constant 1.000000e+00 : f32
    %498 = vector.broadcast %cst_109 : f32 to vector<8x128xf32>
    %499 = arith.subf %498, %492 : vector<8x128xf32>
    %500 = arith.mulf %499, %497 : vector<8x128xf32>
    %501 = arith.mulf %492, %434 : vector<8x128xf32>
    %502 = arith.addf %500, %501 : vector<8x128xf32>
    %cst_110 = arith.constant dense<0.000000e+00> : vector<8x384xf32>
    %503 = tpu.matmul %463, %330, %cst_110 {dimension_numbers = #tpu.dot_dimension_numbers<[1], [0], [0], [1], [0, 0, 1, 1], [], []>} : vector<8x128xf32>, vector<128x384xf32>, vector<8x384xf32> -> vector<8x384xf32>
    %504 = vector.broadcast %331 : vector<1x384xf32> to vector<8x384xf32>
    %505 = arith.addf %503, %504 : vector<8x384xf32>
    %506 = vector.extract_strided_slice %473 {offsets = [0, 0], sizes = [8, 128], strides = [1, 1]} : vector<8x384xf32> to vector<8x128xf32>
    %507 = vector.extract_strided_slice %505 {offsets = [0, 0], sizes = [8, 128], strides = [1, 1]} : vector<8x384xf32> to vector<8x128xf32>
    %508 = arith.addf %506, %507 : vector<8x128xf32>
    %509 = arith.negf %508 : vector<8x128xf32>
    %510 = math.exp %509 : vector<8x128xf32>
    %cst_111 = arith.constant 1.000000e+00 : f32
    %511 = vector.broadcast %cst_111 : f32 to vector<8x128xf32>
    %512 = arith.addf %511, %510 : vector<8x128xf32>
    %513 = arith.divf %511, %512 : vector<8x128xf32>
    %514 = vector.extract_strided_slice %473 {offsets = [0, 128], sizes = [8, 128], strides = [1, 1]} : vector<8x384xf32> to vector<8x128xf32>
    %515 = vector.extract_strided_slice %505 {offsets = [0, 128], sizes = [8, 128], strides = [1, 1]} : vector<8x384xf32> to vector<8x128xf32>
    %516 = arith.addf %514, %515 : vector<8x128xf32>
    %517 = arith.negf %516 : vector<8x128xf32>
    %518 = math.exp %517 : vector<8x128xf32>
    %cst_112 = arith.constant 1.000000e+00 : f32
    %519 = vector.broadcast %cst_112 : f32 to vector<8x128xf32>
    %520 = arith.addf %519, %518 : vector<8x128xf32>
    %521 = arith.divf %519, %520 : vector<8x128xf32>
    %522 = vector.extract_strided_slice %473 {offsets = [0, 256], sizes = [8, 128], strides = [1, 1]} : vector<8x384xf32> to vector<8x128xf32>
    %523 = vector.extract_strided_slice %505 {offsets = [0, 256], sizes = [8, 128], strides = [1, 1]} : vector<8x384xf32> to vector<8x128xf32>
    %524 = arith.mulf %513, %523 : vector<8x128xf32>
    %525 = arith.addf %522, %524 : vector<8x128xf32>
    %526 = math.tanh %525 : vector<8x128xf32>
    %cst_113 = arith.constant 1.000000e+00 : f32
    %527 = vector.broadcast %cst_113 : f32 to vector<8x128xf32>
    %528 = arith.subf %527, %521 : vector<8x128xf32>
    %529 = arith.mulf %528, %526 : vector<8x128xf32>
    %530 = arith.mulf %521, %463 : vector<8x128xf32>
    %531 = arith.addf %529, %530 : vector<8x128xf32>
    %c2 = arith.constant 2 : index
    %532 = memref.load %arg13[%c2] : memref<5xf32, #tpu.memory_space<smem>>
    %533 = vector.broadcast %532 : f32 to vector<8x128xf32>
    %534 = arith.mulf %533, %502 : vector<8x128xf32>
    %535 = arith.addf %467, %534 : vector<8x128xf32>
    %c2_114 = arith.constant 2 : index
    %536 = memref.load %arg13[%c2_114] : memref<5xf32, #tpu.memory_space<smem>>
    %537 = vector.broadcast %536 : f32 to vector<8x128xf32>
    %538 = arith.mulf %537, %531 : vector<8x128xf32>
    %539 = arith.addf %471, %538 : vector<8x128xf32>
    %540 = vector.extract_strided_slice %327 {offsets = [24, 0], sizes = [8, 384], strides = [1, 1]} : vector<40x768xf32> to vector<8x384xf32>
    %541 = vector.extract_strided_slice %327 {offsets = [8, 384], sizes = [8, 384], strides = [1, 1]} : vector<40x768xf32> to vector<8x384xf32>
    %cst_115 = arith.constant dense<0.000000e+00> : vector<8x384xf32>
    %542 = tpu.matmul %502, %328, %cst_115 {dimension_numbers = #tpu.dot_dimension_numbers<[1], [0], [0], [1], [0, 0, 1, 1], [], []>} : vector<8x128xf32>, vector<128x384xf32>, vector<8x384xf32> -> vector<8x384xf32>
    %543 = vector.broadcast %329 : vector<1x384xf32> to vector<8x384xf32>
    %544 = arith.addf %542, %543 : vector<8x384xf32>
    %545 = vector.extract_strided_slice %540 {offsets = [0, 0], sizes = [8, 128], strides = [1, 1]} : vector<8x384xf32> to vector<8x128xf32>
    %546 = vector.extract_strided_slice %544 {offsets = [0, 0], sizes = [8, 128], strides = [1, 1]} : vector<8x384xf32> to vector<8x128xf32>
    %547 = arith.addf %545, %546 : vector<8x128xf32>
    %548 = arith.negf %547 : vector<8x128xf32>
    %549 = math.exp %548 : vector<8x128xf32>
    %cst_116 = arith.constant 1.000000e+00 : f32
    %550 = vector.broadcast %cst_116 : f32 to vector<8x128xf32>
    %551 = arith.addf %550, %549 : vector<8x128xf32>
    %552 = arith.divf %550, %551 : vector<8x128xf32>
    %553 = vector.extract_strided_slice %540 {offsets = [0, 128], sizes = [8, 128], strides = [1, 1]} : vector<8x384xf32> to vector<8x128xf32>
    %554 = vector.extract_strided_slice %544 {offsets = [0, 128], sizes = [8, 128], strides = [1, 1]} : vector<8x384xf32> to vector<8x128xf32>
    %555 = arith.addf %553, %554 : vector<8x128xf32>
    %556 = arith.negf %555 : vector<8x128xf32>
    %557 = math.exp %556 : vector<8x128xf32>
    %cst_117 = arith.constant 1.000000e+00 : f32
    %558 = vector.broadcast %cst_117 : f32 to vector<8x128xf32>
    %559 = arith.addf %558, %557 : vector<8x128xf32>
    %560 = arith.divf %558, %559 : vector<8x128xf32>
    %561 = vector.extract_strided_slice %540 {offsets = [0, 256], sizes = [8, 128], strides = [1, 1]} : vector<8x384xf32> to vector<8x128xf32>
    %562 = vector.extract_strided_slice %544 {offsets = [0, 256], sizes = [8, 128], strides = [1, 1]} : vector<8x384xf32> to vector<8x128xf32>
    %563 = arith.mulf %552, %562 : vector<8x128xf32>
    %564 = arith.addf %561, %563 : vector<8x128xf32>
    %565 = math.tanh %564 : vector<8x128xf32>
    %cst_118 = arith.constant 1.000000e+00 : f32
    %566 = vector.broadcast %cst_118 : f32 to vector<8x128xf32>
    %567 = arith.subf %566, %560 : vector<8x128xf32>
    %568 = arith.mulf %567, %565 : vector<8x128xf32>
    %569 = arith.mulf %560, %502 : vector<8x128xf32>
    %570 = arith.addf %568, %569 : vector<8x128xf32>
    %cst_119 = arith.constant dense<0.000000e+00> : vector<8x384xf32>
    %571 = tpu.matmul %531, %330, %cst_119 {dimension_numbers = #tpu.dot_dimension_numbers<[1], [0], [0], [1], [0, 0, 1, 1], [], []>} : vector<8x128xf32>, vector<128x384xf32>, vector<8x384xf32> -> vector<8x384xf32>
    %572 = vector.broadcast %331 : vector<1x384xf32> to vector<8x384xf32>
    %573 = arith.addf %571, %572 : vector<8x384xf32>
    %574 = vector.extract_strided_slice %541 {offsets = [0, 0], sizes = [8, 128], strides = [1, 1]} : vector<8x384xf32> to vector<8x128xf32>
    %575 = vector.extract_strided_slice %573 {offsets = [0, 0], sizes = [8, 128], strides = [1, 1]} : vector<8x384xf32> to vector<8x128xf32>
    %576 = arith.addf %574, %575 : vector<8x128xf32>
    %577 = arith.negf %576 : vector<8x128xf32>
    %578 = math.exp %577 : vector<8x128xf32>
    %cst_120 = arith.constant 1.000000e+00 : f32
    %579 = vector.broadcast %cst_120 : f32 to vector<8x128xf32>
    %580 = arith.addf %579, %578 : vector<8x128xf32>
    %581 = arith.divf %579, %580 : vector<8x128xf32>
    %582 = vector.extract_strided_slice %541 {offsets = [0, 128], sizes = [8, 128], strides = [1, 1]} : vector<8x384xf32> to vector<8x128xf32>
    %583 = vector.extract_strided_slice %573 {offsets = [0, 128], sizes = [8, 128], strides = [1, 1]} : vector<8x384xf32> to vector<8x128xf32>
    %584 = arith.addf %582, %583 : vector<8x128xf32>
    %585 = arith.negf %584 : vector<8x128xf32>
    %586 = math.exp %585 : vector<8x128xf32>
    %cst_121 = arith.constant 1.000000e+00 : f32
    %587 = vector.broadcast %cst_121 : f32 to vector<8x128xf32>
    %588 = arith.addf %587, %586 : vector<8x128xf32>
    %589 = arith.divf %587, %588 : vector<8x128xf32>
    %590 = vector.extract_strided_slice %541 {offsets = [0, 256], sizes = [8, 128], strides = [1, 1]} : vector<8x384xf32> to vector<8x128xf32>
    %591 = vector.extract_strided_slice %573 {offsets = [0, 256], sizes = [8, 128], strides = [1, 1]} : vector<8x384xf32> to vector<8x128xf32>
    %592 = arith.mulf %581, %591 : vector<8x128xf32>
    %593 = arith.addf %590, %592 : vector<8x128xf32>
    %594 = math.tanh %593 : vector<8x128xf32>
    %cst_122 = arith.constant 1.000000e+00 : f32
    %595 = vector.broadcast %cst_122 : f32 to vector<8x128xf32>
    %596 = arith.subf %595, %589 : vector<8x128xf32>
    %597 = arith.mulf %596, %594 : vector<8x128xf32>
    %598 = arith.mulf %589, %531 : vector<8x128xf32>
    %599 = arith.addf %597, %598 : vector<8x128xf32>
    %c3_123 = arith.constant 3 : index
    %600 = memref.load %arg13[%c3_123] : memref<5xf32, #tpu.memory_space<smem>>
    %601 = vector.broadcast %600 : f32 to vector<8x128xf32>
    %602 = arith.mulf %601, %570 : vector<8x128xf32>
    %603 = arith.addf %535, %602 : vector<8x128xf32>
    %c1_124 = arith.constant 1 : index
    %604 = memref.load %arg13[%c1_124] : memref<5xf32, #tpu.memory_space<smem>>
    %605 = vector.broadcast %604 : f32 to vector<8x128xf32>
    %606 = arith.mulf %605, %599 : vector<8x128xf32>
    %607 = arith.addf %539, %606 : vector<8x128xf32>
    %608 = vector.extract_strided_slice %327 {offsets = [32, 0], sizes = [8, 384], strides = [1, 1]} : vector<40x768xf32> to vector<8x384xf32>
    %609 = vector.extract_strided_slice %327 {offsets = [0, 384], sizes = [8, 384], strides = [1, 1]} : vector<40x768xf32> to vector<8x384xf32>
    %cst_125 = arith.constant dense<0.000000e+00> : vector<8x384xf32>
    %610 = tpu.matmul %570, %328, %cst_125 {dimension_numbers = #tpu.dot_dimension_numbers<[1], [0], [0], [1], [0, 0, 1, 1], [], []>} : vector<8x128xf32>, vector<128x384xf32>, vector<8x384xf32> -> vector<8x384xf32>
    %611 = vector.broadcast %329 : vector<1x384xf32> to vector<8x384xf32>
    %612 = arith.addf %610, %611 : vector<8x384xf32>
    %613 = vector.extract_strided_slice %608 {offsets = [0, 0], sizes = [8, 128], strides = [1, 1]} : vector<8x384xf32> to vector<8x128xf32>
    %614 = vector.extract_strided_slice %612 {offsets = [0, 0], sizes = [8, 128], strides = [1, 1]} : vector<8x384xf32> to vector<8x128xf32>
    %615 = arith.addf %613, %614 : vector<8x128xf32>
    %616 = arith.negf %615 : vector<8x128xf32>
    %617 = math.exp %616 : vector<8x128xf32>
    %cst_126 = arith.constant 1.000000e+00 : f32
    %618 = vector.broadcast %cst_126 : f32 to vector<8x128xf32>
    %619 = arith.addf %618, %617 : vector<8x128xf32>
    %620 = arith.divf %618, %619 : vector<8x128xf32>
    %621 = vector.extract_strided_slice %608 {offsets = [0, 128], sizes = [8, 128], strides = [1, 1]} : vector<8x384xf32> to vector<8x128xf32>
    %622 = vector.extract_strided_slice %612 {offsets = [0, 128], sizes = [8, 128], strides = [1, 1]} : vector<8x384xf32> to vector<8x128xf32>
    %623 = arith.addf %621, %622 : vector<8x128xf32>
    %624 = arith.negf %623 : vector<8x128xf32>
    %625 = math.exp %624 : vector<8x128xf32>
    %cst_127 = arith.constant 1.000000e+00 : f32
    %626 = vector.broadcast %cst_127 : f32 to vector<8x128xf32>
    %627 = arith.addf %626, %625 : vector<8x128xf32>
    %628 = arith.divf %626, %627 : vector<8x128xf32>
    %629 = vector.extract_strided_slice %608 {offsets = [0, 256], sizes = [8, 128], strides = [1, 1]} : vector<8x384xf32> to vector<8x128xf32>
    %630 = vector.extract_strided_slice %612 {offsets = [0, 256], sizes = [8, 128], strides = [1, 1]} : vector<8x384xf32> to vector<8x128xf32>
    %631 = arith.mulf %620, %630 : vector<8x128xf32>
    %632 = arith.addf %629, %631 : vector<8x128xf32>
    %633 = math.tanh %632 : vector<8x128xf32>
    %cst_128 = arith.constant 1.000000e+00 : f32
    %634 = vector.broadcast %cst_128 : f32 to vector<8x128xf32>
    %635 = arith.subf %634, %628 : vector<8x128xf32>
    %636 = arith.mulf %635, %633 : vector<8x128xf32>
    %637 = arith.mulf %628, %570 : vector<8x128xf32>
    %638 = arith.addf %636, %637 : vector<8x128xf32>
    %cst_129 = arith.constant dense<0.000000e+00> : vector<8x384xf32>
    %639 = tpu.matmul %599, %330, %cst_129 {dimension_numbers = #tpu.dot_dimension_numbers<[1], [0], [0], [1], [0, 0, 1, 1], [], []>} : vector<8x128xf32>, vector<128x384xf32>, vector<8x384xf32> -> vector<8x384xf32>
    %640 = vector.broadcast %331 : vector<1x384xf32> to vector<8x384xf32>
    %641 = arith.addf %639, %640 : vector<8x384xf32>
    %642 = vector.extract_strided_slice %609 {offsets = [0, 0], sizes = [8, 128], strides = [1, 1]} : vector<8x384xf32> to vector<8x128xf32>
    %643 = vector.extract_strided_slice %641 {offsets = [0, 0], sizes = [8, 128], strides = [1, 1]} : vector<8x384xf32> to vector<8x128xf32>
    %644 = arith.addf %642, %643 : vector<8x128xf32>
    %645 = arith.negf %644 : vector<8x128xf32>
    %646 = math.exp %645 : vector<8x128xf32>
    %cst_130 = arith.constant 1.000000e+00 : f32
    %647 = vector.broadcast %cst_130 : f32 to vector<8x128xf32>
    %648 = arith.addf %647, %646 : vector<8x128xf32>
    %649 = arith.divf %647, %648 : vector<8x128xf32>
    %650 = vector.extract_strided_slice %609 {offsets = [0, 128], sizes = [8, 128], strides = [1, 1]} : vector<8x384xf32> to vector<8x128xf32>
    %651 = vector.extract_strided_slice %641 {offsets = [0, 128], sizes = [8, 128], strides = [1, 1]} : vector<8x384xf32> to vector<8x128xf32>
    %652 = arith.addf %650, %651 : vector<8x128xf32>
    %653 = arith.negf %652 : vector<8x128xf32>
    %654 = math.exp %653 : vector<8x128xf32>
    %cst_131 = arith.constant 1.000000e+00 : f32
    %655 = vector.broadcast %cst_131 : f32 to vector<8x128xf32>
    %656 = arith.addf %655, %654 : vector<8x128xf32>
    %657 = arith.divf %655, %656 : vector<8x128xf32>
    %658 = vector.extract_strided_slice %609 {offsets = [0, 256], sizes = [8, 128], strides = [1, 1]} : vector<8x384xf32> to vector<8x128xf32>
    %659 = vector.extract_strided_slice %641 {offsets = [0, 256], sizes = [8, 128], strides = [1, 1]} : vector<8x384xf32> to vector<8x128xf32>
    %660 = arith.mulf %649, %659 : vector<8x128xf32>
    %661 = arith.addf %658, %660 : vector<8x128xf32>
    %662 = math.tanh %661 : vector<8x128xf32>
    %cst_132 = arith.constant 1.000000e+00 : f32
    %663 = vector.broadcast %cst_132 : f32 to vector<8x128xf32>
    %664 = arith.subf %663, %657 : vector<8x128xf32>
    %665 = arith.mulf %664, %662 : vector<8x128xf32>
    %666 = arith.mulf %657, %599 : vector<8x128xf32>
    %667 = arith.addf %665, %666 : vector<8x128xf32>
    %c4_133 = arith.constant 4 : index
    %668 = memref.load %arg13[%c4_133] : memref<5xf32, #tpu.memory_space<smem>>
    %669 = vector.broadcast %668 : f32 to vector<8x128xf32>
    %670 = arith.mulf %669, %638 : vector<8x128xf32>
    %671 = arith.addf %603, %670 : vector<8x128xf32>
    %c0_134 = arith.constant 0 : index
    %672 = memref.load %arg13[%c0_134] : memref<5xf32, #tpu.memory_space<smem>>
    %673 = vector.broadcast %672 : f32 to vector<8x128xf32>
    %674 = arith.mulf %673, %667 : vector<8x128xf32>
    %675 = arith.addf %607, %674 : vector<8x128xf32>
    %c0_135 = arith.constant 0 : index
    %676 = memref.load %arg14[%c0_135] : memref<1xf32, #tpu.memory_space<smem>>
    %677 = vector.extract_strided_slice %671 {offsets = [0, 0], sizes = [8, 32], strides = [1, 1]} : vector<8x128xf32> to vector<8x32xf32>
    %678 = vector.broadcast %676 : f32 to vector<8x32xf32>
    %679 = arith.addf %677, %678 : vector<8x32xf32>
    %c0_136 = arith.constant 0 : index
    %c0_137 = arith.constant 0 : index
    %680 = vector.load %arg15[%c0_136, %c0_137] : memref<8x64xf32, #tpu.memory_space<vmem>>, vector<8x32xf32>
    tpu.vector_store %arg15[%c0_136, %c0_137], %679 {strides = array<i32>} : memref<8x64xf32, #tpu.memory_space<vmem>>, vector<8x32xf32>,
    %681 = vector.extract_strided_slice %675 {offsets = [0, 0], sizes = [8, 32], strides = [1, 1]} : vector<8x128xf32> to vector<8x32xf32>
    %682 = vector.broadcast %676 : f32 to vector<8x32xf32>
    %683 = arith.addf %681, %682 : vector<8x32xf32>
    %c0_138 = arith.constant 0 : index
    %c32_139 = arith.constant 32 : index
    %684 = vector.load %arg15[%c0_138, %c32_139] : memref<8x64xf32, #tpu.memory_space<vmem>>, vector<8x32xf32>
    tpu.vector_store %arg15[%c0_138, %c32_139], %683 {strides = array<i32>} : memref<8x64xf32, #tpu.memory_space<vmem>>, vector<8x32xf32>,
    return
  }
}

</mosaic_0001>

<bundles_post_ra>
// kernel: rnn_forward.1
= control target key start
LH: loop header
LB: loop body
LE: loop exit
PB: predicated region body
PF: predicated region fallthrough
CT: control target
= control target key end

     0   :  { %21 = vsyncpa [#allocation5], 0  ;;  %s9120_s0 = inlined_call_operand.vmem [shape: f32[40,128], index: 0, kind: input, shape index: {}]   ;;  %s9121_s1 = inlined_call_operand.hbm [shape: f32[128,768], index: 1, kind: input, shape index: {}]   ;;  %s9122_s2 = inlined_call_operand.vmem [shape: f32[1,768], index: 2, kind: input, shape index: {}]   ;;  %s9123_s3 = inlined_call_operand.hbm [shape: f32[128,384], index: 3, kind: input, shape index: {}]   ;;  %s9124_s4 = inlined_call_operand.vmem [shape: f32[1,384], index: 4, kind: input, shape index: {}]   ;;  %s9125_s5 = inlined_call_operand.hbm [shape: f32[128,384], index: 5, kind: input, shape index: {}]   ;;  %s9126_s6 = inlined_call_operand.vmem [shape: f32[1,384], index: 6, kind: input, shape index: {}]   ;;  %s9127_s7 = inlined_call_operand.hbm [shape: f32[256,768], index: 7, kind: input, shape index: {}]   ;;  %s9128_s8 = inlined_call_operand.vmem [shape: f32[1,768], index: 8, kind: input, shape index: {}]   ;;  %s9129_s9 = inlined_call_operand.hbm [shape: f32[128,384], index: 9, kind: input, shape index: {}]   ;;  %s9130_s10 = inlined_call_operand.vmem [shape: f32[1,384], index: 10, kind: input, shape index: {}]   ;;  %s9131_s11 = inlined_call_operand.hbm [shape: f32[128,384], index: 11, kind: input, shape index: {}]   ;;  %s9132_s12 = inlined_call_operand.vmem [shape: f32[1,384], index: 12, kind: input, shape index: {}]   ;;  %s9133_s13 = inlined_call_operand.vmem [shape: f32[5], index: 13, kind: input, shape index: {}]   ;;  %s9134_s14 = inlined_call_operand.<no memory space> [shape: f32[1], index: 14, kind: input, shape index: {}]   ;;  %s9135_s15 = inlined_call_operand.hbm [shape: f32[8,64], index: 15, kind: output, shape index: {}]  }
   0x1   :  { %22 = vsyncpa [#allocation9], 0 }
   0x2   :  { %23 = vsyncpa [#allocation12], 0 }
   0x3   :  { %24 = vsyncpa [#allocation15], 0 }
   0x4   :  { %25 = vsyncpa [#allocation7], 0 }
   0x5   :  { %26 = vsyncpa [#allocation6], 0  ;;  %s6310_s18 = smov [#allocation8]  }
   0x6   :  { %s48_s19 = sshll.u32 %s6310_s18, 4  ;;  %s49_s19 = int_to_ptr.vmem [resolvable:$true] %s48_s19 }
   0x7   :  { %s6154_s20 = scalar_lea.vmem %s49_s19, 6144  ;;  %p6159_p1 = scmp.lt.s32.totalorder %s49_s19, %s49_s19 }
   0x8   :  { %p6155_p0 = scmp.ne.s32.totalorder %s49_s19, %s6154_s20  ;;  %p6160_p2 = scmp.lt.s32.totalorder %s6154_s20, %s6154_s20 }
   0xa   :  { %p6161_p3 = por %p6160_p2, %p6159_p1 }
   0xc   :  { %p6162_p4 = pnand %p6161_p3, %p6155_p0 }
   0xe   :  { %6165 = shalt.err (!%p6162_p4)
}
   0xf   :  { %s6311_s21 = smov 384   ;;  %s6312_s22 = smov 24  }
  0x10   :  { %54 = dma.hbm_to_vmem [thread:$0]  %s9123_s3, 6144, %s49_s19, [#allocation9], %s6311_s21, %s6311_s21, %s6312_s22  }
  0x11   :  { %s6313_s25 = smov [#allocation11]   ;;  %s6314_s27 = smov [#allocation4]  }
  0x12   :  { %s76_s26 = sshll.u32 %s6313_s25, 4  ;;  %s34_s28 = sshll.u32 %s6314_s27, 4  ;;  %s77_s26 = int_to_ptr.vmem [resolvable:$true] %s76_s26  ;;  %s35_s28 = int_to_ptr.vmem [resolvable:$true] %s34_s28 }
  0x13   :  { %s6174_s29 = scalar_lea.vmem %s77_s26, 24576  ;;  %p6179_p6 = scmp.lt.s32.totalorder %s77_s26, %s77_s26 }
  0x14   :  { %p6175_p5 = scmp.ne.s32.totalorder %s77_s26, %s6174_s29  ;;  %p6180_p7 = scmp.lt.s32.totalorder %s6174_s29, %s6174_s29 }
  0x16   :  { %p6181_p8 = por %p6180_p7, %p6179_p6 }
  0x18   :  { %p6182_p9 = pnand %p6181_p8, %p6175_p5 }
  0x1a   :  { %6185 = shalt.err (!%p6182_p9)
}
  0x1b   :  { %s6315_s30 = smov 768   ;;  %s6316_s16 = smov 48  }
  0x1c   :  { %82 = dma.hbm_to_vmem [thread:$0]  %s9127_s7, 24576, %s77_s26, [#allocation12], %s6315_s30, %s6315_s30, %s6316_s16  }
  0x1d   :  { %s6194_s3 = scalar_lea.vmem %s35_s28, 12288  ;;  %p6199_p11 = scmp.lt.s32.totalorder %s35_s28, %s35_s28 }
  0x1e   :  { %p6195_p10 = scmp.ne.s32.totalorder %s35_s28, %s6194_s3  ;;  %p6200_p12 = scmp.lt.s32.totalorder %s6194_s3, %s6194_s3 }
  0x20   :  { %p6201_p13 = por %p6200_p12, %p6199_p11 }
  0x22   :  { %p6202_p0 = pnand %p6201_p13, %p6195_p10 }
  0x24   :  { %6205 = shalt.err (!%p6202_p0)
}
  0x25   :  { %40 = dma.hbm_to_vmem [thread:$0]  %s9121_s1, 12288, %s35_s28, [#allocation5], %s6315_s30, %s6315_s30, %s6316_s16  }
  0x26   :  { %s6317_s23 = smov [#allocation10]   ;;  %s6318_s25 = smov [#allocation13]  }
  0x27   :  { %s62_s24 = sshll.u32 %s6317_s23, 4  ;;  %s90_s27 = sshll.u32 %s6318_s25, 4  ;;  %s63_s24 = int_to_ptr.vmem [resolvable:$true] %s62_s24  ;;  %s91_s27 = int_to_ptr.vmem [resolvable:$true] %s90_s27 }
  0x28   :  { %s6214_s29 = scalar_lea.vmem %s63_s24, 6144  ;;  %p6219_p2 = scmp.lt.s32.totalorder %s63_s24, %s63_s24 }
  0x29   :  { %p6215_p1 = scmp.ne.s32.totalorder %s63_s24, %s6214_s29  ;;  %p6220_p3 = scmp.lt.s32.totalorder %s6214_s29, %s6214_s29 }
  0x2b   :  { %p6221_p4 = por %p6220_p3, %p6219_p2 }
  0x2d   :  { %p6222_p5 = pnand %p6221_p4, %p6215_p1 }
  0x2f   :  { %6225 = shalt.err (!%p6222_p5)
}
  0x30   :  { %68 = dma.hbm_to_vmem [thread:$0]  %s9125_s5, 6144, %s63_s24, [#allocation9], %s6311_s21, %s6311_s21, %s6312_s22  }
  0x31   :  { %s6234_s1 = scalar_lea.vmem %s91_s27, 6144  ;;  %p6239_p7 = scmp.lt.s32.totalorder %s91_s27, %s91_s27 }
  0x32   :  { %p6235_p6 = scmp.ne.s32.totalorder %s91_s27, %s6234_s1  ;;  %p6240_p8 = scmp.lt.s32.totalorder %s6234_s1, %s6234_s1 }
  0x34   :  { %p6241_p9 = por %p6240_p8, %p6239_p7 }
  0x36   :  { %p6242_p10 = pnand %p6241_p9, %p6235_p6 }
  0x38   :  { %6245 = shalt.err (!%p6242_p10)
}
  0x39   :  { %96 = dma.hbm_to_vmem [thread:$0]  %s9129_s9, 6144, %s91_s27, [#allocation12], %s6311_s21, %s6311_s21, %s6312_s22  }
  0x3a   :  { %s6319_s16 = smov [#allocation14]   ;;  %s119_s5 = sshll.u32 %s9133_s13, 4  ;;  %s120_s5 = int_to_ptr.vmem [resolvable:$true] %s119_s5 }
  0x3b   :  { %s104_s17 = sshll.u32 %s6319_s16, 4  ;;  %s105_s17 = int_to_ptr.vmem [resolvable:$true] %s104_s17 }
  0x3c   :  { %s6254_s19 = scalar_lea.vmem %s105_s17, 6144  ;;  %p6259_p12 = scmp.lt.s32.totalorder %s105_s17, %s105_s17 }
  0x3d   :  { %p6255_p11 = scmp.ne.s32.totalorder %s105_s17, %s6254_s19  ;;  %p6260_p13 = scmp.lt.s32.totalorder %s6254_s19, %s6254_s19 }
  0x3f   :  { %p6261_p0 = por %p6260_p13, %p6259_p12 }
  0x41   :  { %p6262_p1 = pnand %p6261_p0, %p6255_p11 }
  0x43   :  { %6265 = shalt.err (!%p6262_p1)
}
  0x44   :  { %110 = dma.hbm_to_vmem [thread:$0]  %s9131_s11, 6144, %s105_s17, [#allocation15], %s6311_s21, %s6311_s21, %s6312_s22  }
  0x45   :  { %s6266_s23 = scalar_lea.vmem %s120_s5, 16  ;;  %p6271_p3 = scmp.lt.s32.totalorder %s120_s5, %s120_s5 }
  0x46   :  { %p6267_p2 = scmp.ne.s32.totalorder %s120_s5, %s6266_s23  ;;  %p6272_p4 = scmp.lt.s32.totalorder %s6266_s23, %s6266_s23 }
  0x48   :  { %p6273_p5 = por %p6272_p4, %p6271_p3 }
  0x4a   :  { %p6274_p6 = pnand %p6273_p5, %p6267_p2 }
  0x4c   :  { %6277 = shalt.err (!%p6274_p6)
}
  0x4d   :  { %s6320_s13 = smov [#allocation16]  }
  0x4e   :  { %122 = dma.vmem_to_smem %s120_s5, 16, %s6320_s13, [#allocation7]  }
  0x4f   :  { %6298 = dma.done.wait [#allocation5], 12288  }
  0x50   :  { %6299 = vsyncadd [#allocation5], 4294955008 }
  0x51   :  { %6300 = dma.done.wait [#allocation9], 12288  }
  0x52   :  { %6301 = vsyncadd [#allocation9], 4294955008 }
  0x53   :  { %6302 = dma.done.wait [#allocation12], 30720  }
  0x54   :  { %6303 = vsyncadd [#allocation12], 4294936576 }
  0x55   :  { %6304 = dma.done.wait [#allocation15], 6144  }
  0x56   :  { %6305 = vsyncadd [#allocation15], 4294961152 }
  0x57   :  { %6306 = dma.done.wait [#allocation7], 16  }
  0x58   :  { %6307 = vsyncadd [#allocation7], 4294967280 }
  0x59   :  { %146 = sfence }
  0x5a   :  { %v243_v0 = vld [vmem:[#allocation4 + $0x2d8] sm:$0xff]  ;;  %v245_v1 = vld [vmem:[#allocation4 + $0x2e8] sm:$0xff]  ;;  %v242_v2 = vld [vmem:[#allocation4 + $0x2d0] sm:$0xff]  ;;  %vm6322_vm0 = vmmov 0   ;;  %s9085_s5 = sld [smem:[#allocation16]]  ;;  %vm4627_vm1 = vcmask 261120  }
  0x5b   :  { %280 = vmatprep.subr.mxu0 %v243_v0  ;;  %375 = vmatprep.subr.mxu1 %v245_v1  ;;  %v244_v3 = vld [vmem:[#allocation4 + $0x2e0] sm:$0xff]  ;;  %v237_v4 = vld [vmem:[#allocation4 + $0x2a8] sm:$0xff]  ;;  %v239_v5 = vld [vmem:[#allocation4 + $0x2b8] sm:$0xff]  ;;  %s9087_s19 = sld [smem:[#allocation16 + $0x2]]  ;;  %s6324_s11 = smov [#allocation17]   ;;  %vm4634_vm2 = vcmask 523520  }
  0x5c   :  { %281 = vmatpush1.msra.mxu0 %v242_v2  ;;  %376 = vmatpush1.msra.mxu1 %v244_v3  ;;  %v236_v6 = vld [vmem:[#allocation4 + $0x2a0] sm:$0xff]  ;;  %v238_v7 = vld [vmem:[#allocation4 + $0x2b0] sm:$0xff]  ;;  %v231_v8 = vld [vmem:[#allocation4 + $0x278] sm:$0xff]  ;;  %v9158_v3 = vmov 0.0   ;;  %s9089_s20 = sld [smem:[#allocation16 + $0x3]]  ;;  %s4642_s21 = sshll.u32 %s6324_s11, 4  ;;  %s4643_s21 = int_to_ptr.vmem [resolvable:$true] %s4642_s21 }
  0x5d   :  { %282 = vmatprep.subr.mxu0 %v237_v4  ;;  %377 = vmatprep.subr.mxu1 %v239_v5  ;;  %v233_v9 = vld [vmem:[#allocation4 + $0x288] sm:$0xff]  ;;  %v230_v10 = vld [vmem:[#allocation4 + $0x270] sm:$0xff]  ;;  %v232_v11 = vld [vmem:[#allocation4 + $0x280] sm:$0xff]  ;;  %s9093_s9 = sld [smem:[#allocation16 + $0x4]]  ;;  %s6278_s22 = scalar_lea.vmem %s4643_s21, 128 }
  0x5e   :  { %283 = vmatpush1.msra.mxu0 %v236_v6  ;;  %378 = vmatpush1.msra.mxu1 %v238_v7  ;;  %v225_v12 = vld [vmem:[#allocation4 + $0x248] sm:$0xff]  ;;  %v227_v13 = vld [vmem:[#allocation4 + $0x258] sm:$0xff]  ;;  %v224_v14 = vld [vmem:[#allocation4 + $0x240] sm:$0xff]  ;;  %p6279_p7 = scmp.ne.s32.totalorder %s4643_s21, %s6278_s22  ;;  %p6283_p8 = scmp.lt.s32.totalorder %s4643_s21, %s4643_s21 }
  0x5f   :  { %284 = vmatprep.subr.mxu0 %v231_v8  ;;  %379 = vmatprep.subr.mxu1 %v233_v9  ;;  %v226_v15 = vld [vmem:[#allocation4 + $0x250] sm:$0xff]  ;;  %v219_v16 = vld [vmem:[#allocation4 + $0x218] sm:$0xff]  ;;  %v221_v17 = vld [vmem:[#allocation4 + $0x228] sm:$0xff]  ;;  %p6284_p9 = scmp.lt.s32.totalorder %s6278_s22, %s6278_s22 }
  0x60   :  { %285 = vmatpush1.msra.mxu0 %v230_v10  ;;  %380 = vmatpush1.msra.mxu1 %v232_v11  ;;  %v218_v18 = vld [vmem:[#allocation4 + $0x210] sm:$0xff]  ;;  %v220_v19 = vld [vmem:[#allocation4 + $0x220] sm:$0xff]  ;;  %v213_v20 = vld [vmem:[#allocation4 + $0x1e8] sm:$0xff] }
  0x61   :  { %286 = vmatprep.subr.mxu0 %v225_v12  ;;  %381 = vmatprep.subr.mxu1 %v227_v13  ;;  %v215_v21 = vld [vmem:[#allocation4 + $0x1f8] sm:$0xff]  ;;  %v212_v22 = vld [vmem:[#allocation4 + $0x1e0] sm:$0xff]  ;;  %v214_v23 = vld [vmem:[#allocation4 + $0x1f0] sm:$0xff]  ;;  %p6285_p10 = por %p6284_p9, %p6283_p8 }
  0x62   :  { %287 = vmatpush1.msra.mxu0 %v224_v14  ;;  %382 = vmatpush1.msra.mxu1 %v226_v15  ;;  %v207_v24 = vld [vmem:[#allocation4 + $0x1b8] sm:$0xff]  ;;  %v209_v25 = vld [vmem:[#allocation4 + $0x1c8] sm:$0xff]  ;;  %v206_v26 = vld [vmem:[#allocation4 + $0x1b0] sm:$0xff] }
  0x63   :  { %288 = vmatprep.subr.mxu0 %v219_v16  ;;  %383 = vmatprep.subr.mxu1 %v221_v17  ;;  %v208_v27 = vld [vmem:[#allocation4 + $0x1c0] sm:$0xff]  ;;  %v201_v28 = vld [vmem:[#allocation4 + $0x188] sm:$0xff]  ;;  %v203_v29 = vld [vmem:[#allocation4 + $0x198] sm:$0xff]  ;;  %p6286_p11 = pnand %p6285_p10, %p6279_p7 }
  0x64   :  { %289 = vmatpush1.msra.mxu0 %v218_v18  ;;  %384 = vmatpush1.msra.mxu1 %v220_v19  ;;  %v200_v30 = vld [vmem:[#allocation4 + $0x180] sm:$0xff]  ;;  %v202_v31 = vld [vmem:[#allocation4 + $0x190] sm:$0xff]  ;;  %v195_v32 = vld [vmem:[#allocation4 + $0x158] sm:$0xff] }
  0x65   :  { %290 = vmatprep.subr.mxu0 %v213_v20  ;;  %385 = vmatprep.subr.mxu1 %v215_v21  ;;  %v197_v33 = vld [vmem:[#allocation4 + $0x168] sm:$0xff]  ;;  %v194_v34 = vld [vmem:[#allocation4 + $0x150] sm:$0xff]  ;;  %v196_v35 = vld [vmem:[#allocation4 + $0x160] sm:$0xff] }
  0x66   :  { %291 = vmatpush1.msra.mxu0 %v212_v22  ;;  %386 = vmatpush1.msra.mxu1 %v214_v23  ;;  %v189_v36 = vld [vmem:[#allocation4 + $0x128] sm:$0xff]  ;;  %v191_v37 = vld [vmem:[#allocation4 + $0x138] sm:$0xff]  ;;  %v188_v38 = vld [vmem:[#allocation4 + $0x120] sm:$0xff] }
  0x67   :  { %292 = vmatprep.subr.mxu0 %v207_v24  ;;  %387 = vmatprep.subr.mxu1 %v209_v25  ;;  %v190_v39 = vld [vmem:[#allocation4 + $0x130] sm:$0xff]  ;;  %v183_v40 = vld [vmem:[#allocation4 + $0xf8] sm:$0xff]  ;;  %v185_v41 = vld [vmem:[#allocation4 + $0x108] sm:$0xff] }
  0x68   :  { %293 = vmatpush1.msra.mxu0 %v206_v26  ;;  %388 = vmatpush1.msra.mxu1 %v208_v27  ;;  %v182_v42 = vld [vmem:[#allocation4 + $0xf0] sm:$0xff]  ;;  %v184_v43 = vld [vmem:[#allocation4 + $0x100] sm:$0xff]  ;;  %v177_v44 = vld [vmem:[#allocation4 + $0xc8] sm:$0xff] }
  0x69   :  { %294 = vmatprep.subr.mxu0 %v201_v28  ;;  %389 = vmatprep.subr.mxu1 %v203_v29  ;;  %v179_v45 = vld [vmem:[#allocation4 + $0xd8] sm:$0xff]  ;;  %v176_v46 = vld [vmem:[#allocation4 + $0xc0] sm:$0xff]  ;;  %v178_v47 = vld [vmem:[#allocation4 + $0xd0] sm:$0xff] }
  0x6a   :  { %295 = vmatpush1.msra.mxu0 %v200_v30  ;;  %390 = vmatpush1.msra.mxu1 %v202_v31  ;;  %v171_v48 = vld [vmem:[#allocation4 + $0x98] sm:$0xff]  ;;  %v173_v49 = vld [vmem:[#allocation4 + $0xa8] sm:$0xff]  ;;  %v170_v50 = vld [vmem:[#allocation4 + $0x90] sm:$0xff] }
  0x6b   :  { %296 = vmatprep.subr.mxu0 %v195_v32  ;;  %391 = vmatprep.subr.mxu1 %v197_v33  ;;  %v172_v51 = vld [vmem:[#allocation4 + $0xa0] sm:$0xff]  ;;  %v165_v52 = vld [vmem:[#allocation4 + $0x68] sm:$0xff]  ;;  %v167_v53 = vld [vmem:[#allocation4 + $0x78] sm:$0xff] }
  0x6c   :  { %297 = vmatpush1.msra.mxu0 %v194_v34  ;;  %392 = vmatpush1.msra.mxu1 %v196_v35  ;;  %v164_v54 = vld [vmem:[#allocation4 + $0x60] sm:$0xff]  ;;  %v166_v55 = vld [vmem:[#allocation4 + $0x70] sm:$0xff]  ;;  %v159_v56 = vld [vmem:[#allocation4 + $0x38] sm:$0xff] }
  0x6d   :  { %298 = vmatprep.subr.mxu0 %v189_v36  ;;  %393 = vmatprep.subr.mxu1 %v191_v37  ;;  %v161_v57 = vld [vmem:[#allocation4 + $0x48] sm:$0xff]  ;;  %v158_v58 = vld [vmem:[#allocation4 + $0x30] sm:$0xff]  ;;  %v160_v59 = vld [vmem:[#allocation4 + $0x40] sm:$0xff] }
  0x6e   :  { %299 = vmatpush1.msra.mxu0 %v188_v38  ;;  %394 = vmatpush1.msra.mxu1 %v190_v39  ;;  %v153_v60 = vld [vmem:[#allocation4 + $0x8] sm:$0xff]  ;;  %v155_v61 = vld [vmem:[#allocation4 + $0x18] sm:$0xff]  ;;  %v152_v62 = vld [vmem:[#allocation4] sm:$0xff] }
  0x6f   :  { %300 = vmatprep.subr.mxu0 %v183_v40  ;;  %395 = vmatprep.subr.mxu1 %v185_v41  ;;  %v154_v63 = vld [vmem:[#allocation4 + $0x10] sm:$0xff]  ;;  %v6441_v0 = vld [vmem:[%s9120_s0] sm:$0xff]  ;;  %v247_v1 = vld [vmem:[#allocation4 + $0x2f8] sm:$0xff] }
  0x70   :  { %301 = vmatpush1.msra.mxu0 %v182_v42  ;;  %396 = vmatpush1.msra.mxu1 %v184_v43  ;;  %v6443_v2 = vld [vmem:[#allocation8 + $0x170] sm:$0xff]  ;;  %v6447_v5 = vld [vmem:[#allocation8 + $0x168] sm:$0xff]  ;;  %v6450_v7 = vld [vmem:[#allocation8 + $0x158] sm:$0xff] }
  0x71   :  { %302 = vmatprep.subr.mxu0 %v177_v44  ;;  %397 = vmatprep.subr.mxu1 %v179_v45  ;;  %v246_v4 = vld [vmem:[#allocation4 + $0x2f0] sm:$0xff]  ;;  %v241_v6 = vld [vmem:[#allocation4 + $0x2c8] sm:$0xff]  ;;  %v240_v8 = vld [vmem:[#allocation4 + $0x2c0] sm:$0xff] }
  0x72   :  { %303 = vmatpush1.msra.mxu0 %v176_v46  ;;  %398 = vmatpush1.msra.mxu1 %v178_v47  ;;  %v6454_v9 = vld [vmem:[#allocation8 + $0x150] sm:$0xff]  ;;  %v235_v10 = vld [vmem:[#allocation4 + $0x298] sm:$0xff]  ;;  %v6457_v11 = vld [vmem:[#allocation8 + $0x140] sm:$0xff] }
  0x73   :  { %304 = vmatprep.subr.mxu0 %v171_v48  ;;  %399 = vmatprep.subr.mxu1 %v173_v49  ;;  %v234_v12 = vld [vmem:[#allocation4 + $0x290] sm:$0xff]  ;;  %v6460_v13 = vld [vmem:[#allocation8 + $0x138] sm:$0xff]  ;;  %v229_v14 = vld [vmem:[#allocation4 + $0x268] sm:$0xff] }
  0x74   :  { %305 = vmatpush1.msra.mxu0 %v170_v50  ;;  %400 = vmatpush1.msra.mxu1 %v172_v51  ;;  %v6463_v15 = vld [vmem:[#allocation8 + $0x128] sm:$0xff]  ;;  %v228_v16 = vld [vmem:[#allocation4 + $0x260] sm:$0xff]  ;;  %v223_v18 = vld [vmem:[#allocation4 + $0x238] sm:$0xff] }
  0x75   :  { %306 = vmatprep.subr.mxu0 %v165_v52  ;;  %401 = vmatprep.subr.mxu1 %v167_v53  ;;  %v6466_v17 = vld [vmem:[#allocation8 + $0x120] sm:$0xff]  ;;  %v6469_v19 = vld [vmem:[#allocation8 + $0x110] sm:$0xff]  ;;  %v6472_v21 = vld [vmem:[#allocation8 + $0x108] sm:$0xff] }
  0x76   :  { %307 = vmatpush1.msra.mxu0 %v164_v54  ;;  %402 = vmatpush1.msra.mxu1 %v166_v55  ;;  %v222_v20 = vld [vmem:[#allocation4 + $0x230] sm:$0xff]  ;;  %v217_v22 = vld [vmem:[#allocation4 + $0x208] sm:$0xff]  ;;  %v6475_v23 = vld [vmem:[#allocation8 + $0xf8] sm:$0xff] }
  0x77   :  { %308 = vmatprep.subr.mxu0 %v159_v56  ;;  %403 = vmatprep.subr.mxu1 %v161_v57  ;;  %v216_v24 = vld [vmem:[#allocation4 + $0x200] sm:$0xff]  ;;  %v6478_v25 = vld [vmem:[#allocation8 + $0xf0] sm:$0xff]  ;;  %v211_v26 = vld [vmem:[#allocation4 + $0x1d8] sm:$0xff] }
  0x78   :  { %309 = vmatpush1.msra.mxu0 %v158_v58  ;;  %404 = vmatpush1.msra.mxu1 %v160_v59  ;;  %v6481_v27 = vld [vmem:[#allocation8 + $0xe0] sm:$0xff]  ;;  %v210_v28 = vld [vmem:[#allocation4 + $0x1d0] sm:$0xff]  ;;  %v6484_v29 = vld [vmem:[#allocation8 + $0xd8] sm:$0xff] }
  0x79   :  { %310 = vmatprep.subr.mxu0 %v153_v60  ;;  %405 = vmatprep.subr.mxu1 %v155_v61  ;;  %v205_v30 = vld [vmem:[#allocation4 + $0x1a8] sm:$0xff]  ;;  %v204_v33 = vld [vmem:[#allocation4 + $0x1a0] sm:$0xff]  ;;  %v199_v35 = vld [vmem:[#allocation4 + $0x178] sm:$0xff] }
  0x7a   :  { %311 = vmatpush1.msra.mxu0 %v152_v62  ;;  %406 = vmatpush1.msra.mxu1 %v154_v63  ;;  %v6488_v31 = vld [vmem:[#allocation8 + $0xc8] sm:$0xff]  ;;  %v6496_v34 = vld [vmem:[#allocation8 + $0xc0] sm:$0xff]  ;;  %v6501_v36 = vld [vmem:[#allocation8 + $0xb0] sm:$0xff] }
  0x7b   :  { %439 = vmatprep.mubr.f32.mxu1 %v9158_v3  ;;  %344 = vmatprep.mubr.f32.mxu0 %v9158_v3  ;;  %v6493_v32 = vld [vmem:[%s9120_s0 + $0x8] sm:$0xff]  ;;  %v198_v37 = vld [vmem:[#allocation4 + $0x170] sm:$0xff]  ;;  %v6509_v40 = vld [vmem:[#allocation8 + $0x98] sm:$0xff] }
  0x7c   :  { %440 = vmatmul.mubr.f32.vlgmr.msra.gmra.mxu1 %v6441_v0  ;;  %470 = vmatprep.subr.mxu0 %v247_v1  ;;  %v6504_v38 = vld [vmem:[#allocation8 + $0xa8] sm:$0xff]  ;;  %v6514_v41 = vld [vmem:[%s9120_s0 + $0x10] sm:$0xff]  ;;  %v192_v42 = vld [vmem:[#allocation4 + $0x140] sm:$0xff] }
  0x7d   :  { %679 = vmatprep.subr.mxu1 %v6443_v2  ;;  %345 = vmatmul.mubr.f32.vlgmr.msra.gmra.mxu0 %v6441_v0  ;;  %v193_v39 = vld [vmem:[#allocation4 + $0x148] sm:$0xff]  ;;  %v6517_v43 = vld [vmem:[#allocation8 + $0x90] sm:$0xff]  ;;  %v187_v44 = vld [vmem:[#allocation4 + $0x118] sm:$0xff] }
  0x7e   :  { %471 = vmatpush1.msra.mxu0 %v246_v4  ;;  %680 = vmatpush1.msra.mxu1 %v6447_v5  ;;  %v6522_v45 = vld [vmem:[#allocation8 + $0x80] sm:$0xff]  ;;  %v186_v46 = vld [vmem:[#allocation4 + $0x110] sm:$0xff]  ;;  %v6525_v47 = vld [vmem:[#allocation8 + $0x78] sm:$0xff] }
  0x7f   :  { %472 = vmatprep.subr.mxu0 %v241_v6  ;;  %681 = vmatprep.subr.mxu1 %v6450_v7  ;;  %v181_v48 = vld [vmem:[#allocation4 + $0xe8] sm:$0xff]  ;;  %v6535_v50 = vld [vmem:[%s9120_s0 + $0x18] sm:$0xff]  ;;  %v180_v51 = vld [vmem:[#allocation4 + $0xe0] sm:$0xff] }
  0x80   :  { %473 = vmatpush1.msra.mxu0 %v240_v8  ;;  %682 = vmatpush1.msra.mxu1 %v6454_v9  ;;  %v6530_v49 = vld [vmem:[#allocation8 + $0x68] sm:$0xff]  ;;  %v6538_v52 = vld [vmem:[#allocation8 + $0x60] sm:$0xff]  ;;  %v175_v53 = vld [vmem:[#allocation4 + $0xb8] sm:$0xff] }
  0x81   :  { %474 = vmatprep.subr.mxu0 %v235_v10  ;;  %683 = vmatprep.subr.mxu1 %v6457_v11  ;;  %v6543_v54 = vld [vmem:[#allocation8 + $0x50] sm:$0xff]  ;;  %v6546_v56 = vld [vmem:[#allocation8 + $0x48] sm:$0xff]  ;;  %v6551_v58 = vld [vmem:[#allocation8 + $0x38] sm:$0xff] }
  0x82   :  { %475 = vmatpush1.msra.mxu0 %v234_v12  ;;  %684 = vmatpush1.msra.mxu1 %v6460_v13  ;;  %v174_v55 = vld [vmem:[#allocation4 + $0xb0] sm:$0xff]  ;;  %v169_v57 = vld [vmem:[#allocation4 + $0x88] sm:$0xff]  ;;  %v6556_v59 = vld [vmem:[%s9120_s0 + $0x20] sm:$0xff] }
  0x83   :  { %476 = vmatprep.subr.mxu0 %v229_v14  ;;  %685 = vmatprep.subr.mxu1 %v6463_v15  ;;  %v168_v60 = vld [vmem:[#allocation4 + $0x80] sm:$0xff]  ;;  %v6559_v61 = vld [vmem:[#allocation8 + $0x30] sm:$0xff]  ;;  %v163_v62 = vld [vmem:[#allocation4 + $0x58] sm:$0xff] }
  0x84   :  { %477 = vmatpush1.msra.mxu0 %v228_v16  ;;  %686 = vmatpush1.msra.mxu1 %v6466_v17  ;;  %v6564_v63 = vld [vmem:[#allocation8 + $0x20] sm:$0xff]  ;;  %v162_v1 = vld [vmem:[#allocation4 + $0x50] sm:$0xff]  ;;  %v6567_v4 = vld [vmem:[#allocation8 + $0x18] sm:$0xff] }
  0x85   :  { %478 = vmatprep.subr.mxu0 %v223_v18  ;;  %687 = vmatprep.subr.mxu1 %v6469_v19  ;;  %v157_v6 = vld [vmem:[#allocation4 + $0x28] sm:$0xff]  ;;  %v156_v10 = vld [vmem:[#allocation4 + $0x20] sm:$0xff]  ;;  %v6579_v14 = vld [vmem:[#allocation10 + $0x170] sm:$0xff] }
  0x86   :  { %479 = vmatpush1.msra.mxu0 %v222_v20  ;;  %688 = vmatpush1.msra.mxu1 %v6472_v21  ;;  %v6570_v8 = vld [vmem:[#allocation8 + $0x8] sm:$0xff]  ;;  %v6574_v12 = vld [vmem:[#allocation8] sm:$0xff]  ;;  %v6583_v16 = vld [vmem:[#allocation8 + $0x178] sm:$0xff] }
  0x87   :  { %480 = vmatprep.subr.mxu0 %v217_v22  ;;  %689 = vmatprep.subr.mxu1 %v6475_v23  ;;  %v6585_v18 = vld [vmem:[#allocation10 + $0x168] sm:$0xff]  ;;  %v6589_v20 = vld [vmem:[#allocation10 + $0x158] sm:$0xff]  ;;  %v6593_v22 = vld [vmem:[#allocation8 + $0x160] sm:$0xff] }
  0x88   :  { %481 = vmatpush1.msra.mxu0 %v216_v24  ;;  %690 = vmatpush1.msra.mxu1 %v6478_v25  ;;  %v6595_v24 = vld [vmem:[#allocation10 + $0x150] sm:$0xff] }
  0x89   :  { %482 = vmatprep.subr.mxu0 %v211_v26  ;;  %691 = vmatprep.subr.mxu1 %v6481_v27  ;;  %v6599_v26 = vld [vmem:[#allocation10 + $0x140] sm:$0xff] }
  0x8a   :  { %483 = vmatpush1.msra.mxu0 %v210_v28  ;;  %692 = vmatpush1.msra.mxu1 %v6484_v29  ;;  %v6603_v28 = vld [vmem:[#allocation8 + $0x148] sm:$0xff] }
  0x8b   :  { %445 = vmatprep.mubr.f32.mxu1 %v9158_v3  ;;  %484 = vmatprep.subr.mxu0 %v205_v30  ;;  %v6605_v30 = vld [vmem:[#allocation10 + $0x138] sm:$0xff] }
  0x8c   :  { %693 = vmatprep.subr.mxu1 %v6488_v31  ;;  %446 = vmatmul.mubr.f32.gmra.mxu1 %v6493_v32 }
  0x8d   :  { %485 = vmatpush1.msra.mxu0 %v204_v33  ;;  %694 = vmatpush1.msra.mxu1 %v6496_v34  ;;  %v6613_v33 = vld [vmem:[#allocation8 + $0x130] sm:$0xff] }
  0x8e   :  { %350 = vmatprep.mubr.f32.mxu0 %v9158_v3  ;;  %486 = vmatprep.subr.mxu0 %v199_v35  ;;  %v6615_v35 = vld [vmem:[#allocation10 + $0x120] sm:$0xff] }
  0x8f   :  { %695 = vmatprep.subr.mxu1 %v6501_v36  ;;  %351 = vmatmul.mubr.f32.gmra.mxu0 %v6493_v32 }
  0x90   :  { %487 = vmatpush1.msra.mxu0 %v198_v37  ;;  %696 = vmatpush1.msra.mxu1 %v6504_v38  ;;  %v6619_v37 = vld [vmem:[#allocation10 + $0x110] sm:$0xff] }
  0x91   :  { %451 = vmatprep.mubr.f32.mxu1 %v9158_v3  ;;  %488 = vmatprep.subr.mxu0 %v193_v39  ;;  %v6623_v39 = vld [vmem:[#allocation8 + $0x118] sm:$0xff] }
  0x92   :  { %697 = vmatprep.subr.mxu1 %v6509_v40  ;;  %452 = vmatmul.mubr.f32.gmra.mxu1 %v6514_v41 }
  0x93   :  { %489 = vmatpush1.msra.mxu0 %v192_v42  ;;  %698 = vmatpush1.msra.mxu1 %v6517_v43  ;;  %v6625_v42 = vld [vmem:[#allocation10 + $0x108] sm:$0xff] }
  0x94   :  { %356 = vmatprep.mubr.f32.mxu0 %v9158_v3  ;;  %490 = vmatprep.subr.mxu0 %v187_v44  ;;  %9416 = vst [vmem:[#allocation24_spill] sm:$0xff] %v6625_v42  ;;  %v6629_v44 = vld [vmem:[#allocation10 + $0xf8] sm:$0xff] }
  0x95   :  { %699 = vmatprep.subr.mxu1 %v6522_v45  ;;  %357 = vmatmul.mubr.f32.gmra.mxu0 %v6514_v41  ;;  %9417 = vst [vmem:[#allocation25_spill] sm:$0xff] %v6629_v44 }
  0x96   :  { %491 = vmatpush1.msra.mxu0 %v186_v46  ;;  %700 = vmatpush1.msra.mxu1 %v6525_v47  ;;  %v6633_v46 = vld [vmem:[#allocation8 + $0x100] sm:$0xff] }
  0x97   :  { %457 = vmatprep.mubr.f32.mxu1 %v9158_v3  ;;  %492 = vmatprep.subr.mxu0 %v181_v48  ;;  %v6635_v48 = vld [vmem:[#allocation10 + $0xf0] sm:$0xff] }
  0x98   :  { %701 = vmatprep.subr.mxu1 %v6530_v49  ;;  %458 = vmatmul.mubr.f32.gmra.mxu1 %v6535_v50  ;;  %9418 = vst [vmem:[#allocation26_spill] sm:$0xff] %v6635_v48 }
  0x99   :  { %493 = vmatpush1.msra.mxu0 %v180_v51  ;;  %702 = vmatpush1.msra.mxu1 %v6538_v52  ;;  %v6639_v51 = vld [vmem:[#allocation10 + $0xe0] sm:$0xff] }
  0x9a   :  { %362 = vmatprep.mubr.f32.mxu0 %v9158_v3  ;;  %494 = vmatprep.subr.mxu0 %v175_v53  ;;  %9419 = vst [vmem:[#allocation27_spill] sm:$0xff] %v6639_v51  ;;  %v6643_v53 = vld [vmem:[#allocation8 + $0xe8] sm:$0xff] }
  0x9b   :  { %703 = vmatprep.subr.mxu1 %v6543_v54  ;;  %363 = vmatmul.mubr.f32.gmra.mxu0 %v6535_v50 }
  0x9c   :  { %495 = vmatpush1.msra.mxu0 %v174_v55  ;;  %704 = vmatpush1.msra.mxu1 %v6546_v56  ;;  %v6645_v55 = vld [vmem:[#allocation10 + $0xd8] sm:$0xff] }
  0x9d   :  { %463 = vmatprep.mubr.f32.mxu1 %v9158_v3  ;;  %496 = vmatprep.subr.mxu0 %v169_v57  ;;  %9420 = vst [vmem:[#allocation28_spill] sm:$0xff] %v6645_v55  ;;  %v6649_v57 = vld [vmem:[#allocation10 + $0xc8] sm:$0xff] }
  0x9e   :  { %705 = vmatprep.subr.mxu1 %v6551_v58  ;;  %464 = vmatmul.mubr.f32.gmra.mxu1 %v6556_v59  ;;  %9421 = vst [vmem:[#allocation29_spill] sm:$0xff] %v6649_v57 }
  0x9f   :  { %497 = vmatpush1.msra.mxu0 %v168_v60  ;;  %706 = vmatpush1.msra.mxu1 %v6559_v61  ;;  %v6653_v60 = vld [vmem:[#allocation8 + $0xd0] sm:$0xff] }
  0xa0   :  { %368 = vmatprep.mubr.f32.mxu0 %v9158_v3  ;;  %498 = vmatprep.subr.mxu0 %v163_v62  ;;  %v6655_v62 = vld [vmem:[#allocation10 + $0xc0] sm:$0xff] }
  0xa1   :  { %707 = vmatprep.subr.mxu1 %v6564_v63  ;;  %369 = vmatmul.mubr.f32.gmra.mxu0 %v6556_v59  ;;  %9422 = vst [vmem:[#allocation30_spill] sm:$0xff] %v6655_v62 }
  0xa2   :  { %499 = vmatpush1.msra.mxu0 %v162_v1  ;;  %708 = vmatpush1.msra.mxu1 %v6567_v4  ;;  %v6661_v1 = vld [vmem:[#allocation10 + $0xb0] sm:$0xff] }
  0xa3   :  { %500 = vmatprep.subr.mxu0 %v157_v6  ;;  %709 = vmatprep.subr.mxu1 %v6570_v8  ;;  %9423 = vst [vmem:[#allocation31_spill] sm:$0xff] %v6661_v1  ;;  %v6665_v6 = vld [vmem:[#allocation8 + $0xb8] sm:$0xff] }
  0xa4   :  { %501 = vmatpush1.msra.mxu0 %v156_v10  ;;  %710 = vmatpush1.msra.mxu1 %v6574_v12  ;;  %v6667_v10 = vld [vmem:[#allocation10 + $0xa8] sm:$0xff] }
  0xa5   :  { %743 = vmatprep.mubr.f32.mxu1 %v9158_v3  ;;  %534 = vmatprep.mubr.f32.mxu0 %v9158_v3  ;;  %9424 = vst [vmem:[#allocation32_spill] sm:$0xff] %v6667_v10 }
  0xa6   :  { %744 = vmatmul.mubr.f32.vlgmr.msra.gmra.mxu1 %v9158_v3  ;;  %5039 = vmatprep.subr.mxu0 %v9158_v3 }
  0xa7   :  { %857 = vmatprep.subr.mxu1 %v6579_v14  ;;  %535 = vmatmul.mubr.f32.vlgmr.msra.gmra.mxu0 %v6441_v0  ;;  %v6609_v0 = vld [vmem:[#allocation10 + $0x128] sm:$0xff] }
  0xa8   :  { %5040 = vmatpush3.msra.mxu0 %v6583_v16  ;;  %858 = vmatpush1.msra.mxu1 %v6585_v18 }
  0xa9   :  { %5041 = vmatprep.subr.mxu0 %v9158_v3  ;;  %859 = vmatprep.subr.mxu1 %v6589_v20 }
  0xaa   :  { %5042 = vmatpush3.msra.mxu0 %v6593_v22  ;;  %860 = vmatpush1.msra.mxu1 %v6595_v24 }
  0xab   :  { %5043 = vmatprep.subr.mxu0 %v9158_v3  ;;  %861 = vmatprep.subr.mxu1 %v6599_v26 }
  0xac   :  { %5044 = vmatpush3.msra.mxu0 %v6603_v28  ;;  %862 = vmatpush1.msra.mxu1 %v6605_v30 }
  0xad   :  { %5045 = vmatprep.subr.mxu0 %v9158_v3  ;;  %863 = vmatprep.subr.mxu1 %v6609_v0 }
  0xae   :  { %5046 = vmatpush3.msra.mxu0 %v6613_v33  ;;  %864 = vmatpush1.msra.mxu1 %v6615_v35 }
  0xaf   :  { %5047 = vmatprep.subr.mxu0 %v9158_v3  ;;  %865 = vmatprep.subr.mxu1 %v6619_v37 }
  0xb0   :  { %5048 = vmatpush3.msra.mxu0 %v6623_v39  ;;  %866 = vmatpush1.msra.mxu1 %v6625_v42  ;;  %v6737_v42 = vld [vmem:[#allocation10 + $0x8] sm:$0xff] }
  0xb1   :  { %5049 = vmatprep.subr.mxu0 %v9158_v3  ;;  %867 = vmatprep.subr.mxu1 %v6629_v44  ;;  %v6715_v44 = vld [vmem:[#allocation10 + $0x38] sm:$0xff]  ;;  %9441 = vst [vmem:[#allocation49_spill] sm:$0xff] %v6737_v42 }
  0xb2   :  { %5050 = vmatpush3.msra.mxu0 %v6633_v46  ;;  %868 = vmatpush1.msra.mxu1 %v6635_v48  ;;  %v6693_v48 = vld [vmem:[#allocation10 + $0x68] sm:$0xff]  ;;  %9437 = vst [vmem:[#allocation45_spill] sm:$0xff] %v6715_v44 }
  0xb3   :  { %5051 = vmatprep.subr.mxu0 %v9158_v3  ;;  %869 = vmatprep.subr.mxu1 %v6639_v51  ;;  %v6671_v51 = vld [vmem:[#allocation10 + $0x98] sm:$0xff]  ;;  %9431 = vst [vmem:[#allocation39_spill] sm:$0xff] %v6693_v48 }
  0xb4   :  { %5052 = vmatpush3.msra.mxu0 %v6643_v53  ;;  %870 = vmatpush1.msra.mxu1 %v6645_v55  ;;  %9425 = vst [vmem:[#allocation33_spill] sm:$0xff] %v6671_v51  ;;  %v6677_v55 = vld [vmem:[#allocation10 + $0x90] sm:$0xff] }
  0xb5   :  { %5053 = vmatprep.subr.mxu0 %v9158_v3  ;;  %871 = vmatprep.subr.mxu1 %v6649_v57  ;;  %v6675_v57 = vld [vmem:[#allocation8 + $0xa0] sm:$0xff]  ;;  %9427 = vst [vmem:[#allocation35_spill] sm:$0xff] %v6677_v55 }
  0xb6   :  { %5054 = vmatpush3.msra.mxu0 %v6653_v60  ;;  %872 = vmatpush1.msra.mxu1 %v6655_v62  ;;  %9426 = vst [vmem:[#allocation34_spill] sm:$0xff] %v6675_v57  ;;  %v6683_v62 = vld [vmem:[#allocation10 + $0x80] sm:$0xff] }
  0xb7   :  { %540 = vmatprep.mubr.f32.mxu0 %v9158_v3  ;;  %5055 = vmatprep.subr.mxu0 %v9158_v3  ;;  %9428 = vst [vmem:[#allocation36_spill] sm:$0xff] %v6683_v62 }
  0xb8   :  { %873 = vmatprep.subr.mxu1 %v6661_v1  ;;  %541 = vmatmul.mubr.f32.gmra.mxu0 %v6493_v32  ;;  %v6687_v1 = vld [vmem:[#allocation8 + $0x88] sm:$0xff]  ;;  %v6689_v32 = vld [vmem:[#allocation10 + $0x78] sm:$0xff] }
  0xb9   :  { %5056 = vmatpush3.msra.mxu0 %v6665_v6  ;;  %874 = vmatpush1.msra.mxu1 %v6667_v10  ;;  %9429 = vst [vmem:[#allocation37_spill] sm:$0xff] %v6687_v1  ;;  %9430 = vst [vmem:[#allocation38_spill] sm:$0xff] %v6689_v32  ;;  %v6699_v10 = vld [vmem:[#allocation10 + $0x60] sm:$0xff] }
  0xba   :  { %5057 = vmatprep.subr.mxu0 %v9158_v3  ;;  %875 = vmatprep.subr.mxu1 %v6671_v51  ;;  %v6697_v51 = vld [vmem:[#allocation8 + $0x70] sm:$0xff]  ;;  %9433 = vst [vmem:[#allocation41_spill] sm:$0xff] %v6699_v10 }
  0xbb   :  { %5058 = vmatpush3.msra.mxu0 %v6675_v57  ;;  %876 = vmatpush1.msra.mxu1 %v6677_v55  ;;  %9432 = vst [vmem:[#allocation40_spill] sm:$0xff] %v6697_v51  ;;  %v6705_v55 = vld [vmem:[#allocation10 + $0x50] sm:$0xff] }
  0xbc   :  { %546 = vmatprep.mubr.f32.mxu0 %v9158_v3  ;;  %5059 = vmatprep.subr.mxu0 %v9158_v3  ;;  %9434 = vst [vmem:[#allocation42_spill] sm:$0xff] %v6705_v55 }
  0xbd   :  { %877 = vmatprep.subr.mxu1 %v6683_v62  ;;  %547 = vmatmul.mubr.f32.gmra.mxu0 %v6514_v41  ;;  %v6709_v62 = vld [vmem:[#allocation8 + $0x58] sm:$0xff]  ;;  %v6711_v41 = vld [vmem:[#allocation10 + $0x48] sm:$0xff] }
  0xbe   :  { %5060 = vmatpush3.msra.mxu0 %v6687_v1  ;;  %878 = vmatpush1.msra.mxu1 %v6689_v32  ;;  %9435 = vst [vmem:[#allocation43_spill] sm:$0xff] %v6709_v62  ;;  %9436 = vst [vmem:[#allocation44_spill] sm:$0xff] %v6711_v41  ;;  %v6721_v32 = vld [vmem:[#allocation10 + $0x30] sm:$0xff] }
  0xbf   :  { %5061 = vmatprep.subr.mxu0 %v9158_v3  ;;  %879 = vmatprep.subr.mxu1 %v6693_v48  ;;  %v6719_v48 = vld [vmem:[#allocation8 + $0x40] sm:$0xff] }
  0xc0   :  { %5062 = vmatpush3.msra.mxu0 %v6697_v51  ;;  %880 = vmatpush1.msra.mxu1 %v6699_v10  ;;  %9438 = vst [vmem:[#allocation46_spill] sm:$0xff] %v6719_v48  ;;  %v6727_v10 = vld [vmem:[#allocation10 + $0x20] sm:$0xff] }
  0xc1   :  { %552 = vmatprep.mubr.f32.mxu0 %v9158_v3  ;;  %5063 = vmatprep.subr.mxu0 %v9158_v3 }
  0xc2   :  { %881 = vmatprep.subr.mxu1 %v6705_v55  ;;  %553 = vmatmul.mubr.f32.gmra.mxu0 %v6535_v50  ;;  %v6731_v55 = vld [vmem:[#allocation8 + $0x28] sm:$0xff]  ;;  %v6733_v50 = vld [vmem:[#allocation10 + $0x18] sm:$0xff] }
  0xc3   :  { %5064 = vmatpush3.msra.mxu0 %v6709_v62  ;;  %882 = vmatpush1.msra.mxu1 %v6711_v41  ;;  %9439 = vst [vmem:[#allocation47_spill] sm:$0xff] %v6731_v55  ;;  %9440 = vst [vmem:[#allocation48_spill] sm:$0xff] %v6733_v50  ;;  %v6743_v41 = vld [vmem:[#allocation10] sm:$0xff] }
  0xc4   :  { %5065 = vmatprep.subr.mxu0 %v9158_v3  ;;  %883 = vmatprep.subr.mxu1 %v6715_v44  ;;  %v6741_v44 = vld [vmem:[#allocation8 + $0x10] sm:$0xff]  ;;  %9443 = vst [vmem:[#allocation51_spill] sm:$0xff] %v6743_v41 }
  0xc5   :  { %5066 = vmatpush3.msra.mxu0 %v6719_v48  ;;  %884 = vmatpush1.msra.mxu1 %v6721_v32  ;;  %9442 = vst [vmem:[#allocation50_spill] sm:$0xff] %v6741_v44 }
  0xc6   :  { %558 = vmatprep.mubr.f32.mxu0 %v9158_v3  ;;  %5067 = vmatprep.subr.mxu0 %v9158_v3 }
  0xc7   :  { %885 = vmatprep.subr.mxu1 %v6727_v10  ;;  %559 = vmatmul.mubr.f32.gmra.mxu0 %v6556_v59  ;;  %v6754_v59 = vld [vmem:[#allocation10 + $0x178] sm:$0xff] }
  0xc8   :  { %5068 = vmatpush3.msra.mxu0 %v6731_v55  ;;  %886 = vmatpush1.msra.mxu1 %v6733_v50  ;;  %v6759_v50 = vld [vmem:[#allocation10 + $0x160] sm:$0xff] }
  0xc9   :  { %5069 = vmatprep.subr.mxu0 %v9158_v3  ;;  %887 = vmatprep.subr.mxu1 %v6737_v42  ;;  %v6772_v42 = vld [vmem:[#allocation10 + $0x130] sm:$0xff] }
  0xca   :  { %5070 = vmatpush3.msra.mxu0 %v6741_v44  ;;  %888 = vmatpush1.msra.mxu1 %v6743_v41  ;;  %v6766_v41 = vld [vmem:[#allocation10 + $0x148] sm:$0xff] }
  0xcb   :  { %921 = vmatprep.mubr.f32.mxu1 %v9158_v3  ;;  %5071 = vmatprep.mubr.msk.f32.mxu0 %vm6322_vm0, %v9158_v3 }
  0xcc   :  { %922 = vmatmul.mubr.f32.vlgmr.msra.gmra.mxu1 %v9158_v3  ;;  %5074 = vmatprep.subr.mxu0 %v9158_v3 }
  0xcd   :  { %5072 = vmatmul.mubr.f32.vlgmr.msra.gmra.mxu0 %v9158_v3  ;;  %1021 = vmatprep.subr.mxu1 %v6443_v2  ;;  %v6778_v2 = vld [vmem:[#allocation10 + $0x118] sm:$0xff] }
  0xce   :  { %5075 = vmatpush3.msra.mxu0 %v6754_v59  ;;  %5106 = vmatprep.mubr.msk.f32.mxu0 %vm6322_vm0, %v9158_v3 }
  0xcf   :  { %5076 = vmatprep.subr.mxu0 %v9158_v3  ;;  %1022 = vmatpush1.msra.mxu1 %v6447_v5  ;;  %v6784_v5 = vld [vmem:[#allocation10 + $0x100] sm:$0xff] }
  0xd0   :  { %5077 = vmatpush3.msra.mxu0 %v6759_v50  ;;  %1023 = vmatprep.subr.mxu1 %v6450_v7  ;;  %v6790_v7 = vld [vmem:[#allocation10 + $0xe8] sm:$0xff] }
  0xd1   :  { %5078 = vmatprep.subr.mxu0 %v9158_v3  ;;  %1024 = vmatpush1.msra.mxu1 %v6454_v9  ;;  %v6796_v9 = vld [vmem:[#allocation10 + $0xd0] sm:$0xff] }
  0xd2   :  { %5079 = vmatpush3.msra.mxu0 %v6766_v41  ;;  %1025 = vmatprep.subr.mxu1 %v6457_v11  ;;  %v6802_v11 = vld [vmem:[#allocation10 + $0xb8] sm:$0xff] }
  0xd3   :  { %5080 = vmatprep.subr.mxu0 %v9158_v3  ;;  %1026 = vmatpush1.msra.mxu1 %v6460_v13  ;;  %v6808_v13 = vld [vmem:[#allocation10 + $0xa0] sm:$0xff] }
  0xd4   :  { %5081 = vmatpush3.msra.mxu0 %v6772_v42  ;;  %1027 = vmatprep.subr.mxu1 %v6463_v15  ;;  %v6814_v15 = vld [vmem:[#allocation10 + $0x88] sm:$0xff] }
  0xd5   :  { %5082 = vmatprep.subr.mxu0 %v9158_v3  ;;  %1028 = vmatpush1.msra.mxu1 %v6466_v17  ;;  %v6820_v17 = vld [vmem:[#allocation10 + $0x70] sm:$0xff] }
  0xd6   :  { %5083 = vmatpush3.msra.mxu0 %v6778_v2  ;;  %1029 = vmatprep.subr.mxu1 %v6469_v19  ;;  %v6826_v19 = vld [vmem:[#allocation10 + $0x58] sm:$0xff] }
  0xd7   :  { %5084 = vmatprep.subr.mxu0 %v9158_v3  ;;  %1030 = vmatpush1.msra.mxu1 %v6472_v21  ;;  %v6832_v21 = vld [vmem:[#allocation10 + $0x40] sm:$0xff] }
  0xd8   :  { %5085 = vmatpush3.msra.mxu0 %v6784_v5  ;;  %1031 = vmatprep.subr.mxu1 %v6475_v23  ;;  %v6838_v23 = vld [vmem:[#allocation10 + $0x28] sm:$0xff] }
  0xd9   :  { %5086 = vmatprep.subr.mxu0 %v9158_v3  ;;  %1032 = vmatpush1.msra.mxu1 %v6478_v25  ;;  %v6844_v25 = vld [vmem:[#allocation10 + $0x10] sm:$0xff] }
  0xda   :  { %5087 = vmatpush3.msra.mxu0 %v6790_v7  ;;  %1033 = vmatprep.subr.mxu1 %v6481_v27  ;;  %v250_v27 = vlaneseq }
  0xdb   :  { %5088 = vmatprep.subr.mxu0 %v9158_v3  ;;  %1034 = vmatpush1.msra.mxu1 %v6484_v29 }
  0xdc   :  { %5089 = vmatpush3.msra.mxu0 %v6796_v9  ;;  %1035 = vmatprep.subr.mxu1 %v6488_v31  ;;  %v6892_v29 = vshrl.u32 %v250_v27, 7 }
  0xdd   :  { %5090 = vmatprep.subr.mxu0 %v9158_v3  ;;  %1036 = vmatpush1.msra.mxu1 %v6496_v34  ;;  %v248_v34 = vld [vmem:[%s9122_s2] sm:$0x3f] }
  0xde   :  { %5091 = vmatpush3.msra.mxu0 %v6802_v11  ;;  %1037 = vmatprep.subr.mxu1 %v6501_v36  ;;  %9444 = vst [vmem:[#allocation52_spill] sm:$0xff] %v6892_v29  ;;  %v9157_v31 = vsub.s32 3, %v6892_v29 }
  0xdf   :  { %5092 = vmatprep.subr.mxu0 %v9158_v3  ;;  %1038 = vmatpush1.msra.mxu1 %v6504_v38 }
  0xe0   :  { %5093 = vmatpush3.msra.mxu0 %v6808_v13  ;;  %1039 = vmatprep.subr.mxu1 %v6509_v40  ;;  %v6900_v36 = vrot.slane %v248_v34, %v9157_v31 }
  0xe1   :  { %5094 = vmatprep.subr.mxu0 %v9158_v3  ;;  %1040 = vmatpush1.msra.mxu1 %v6517_v43 }
  0xe2   :  { %5095 = vmatpush3.msra.mxu0 %v6814_v15  ;;  %1041 = vmatprep.subr.mxu1 %v6522_v45  ;;  %v6908_v45 = vsub.s32 2, %v6892_v29 }
  0xe3   :  { %5096 = vmatprep.subr.mxu0 %v9158_v3  ;;  %1042 = vmatpush1.msra.mxu1 %v6525_v47 }
  0xe4   :  { %5097 = vmatpush3.msra.mxu0 %v6820_v17  ;;  %1043 = vmatprep.subr.mxu1 %v6530_v49  ;;  %9446 = vst [vmem:[#allocation54_spill] sm:$0xff] %v6908_v45  ;;  %v6911_v49 = vsub.s32 0, %v6892_v29 }
  0xe5   :  { %5098 = vmatprep.subr.mxu0 %v9158_v3  ;;  %1044 = vmatpush1.msra.mxu1 %v6538_v52  ;;  %v6914_v52 = vrot.slane %v248_v34, %v6908_v45 }
  0xe6   :  { %5099 = vmatpush3.msra.mxu0 %v6826_v19  ;;  %1045 = vmatprep.subr.mxu1 %v6543_v54  ;;  %9447 = vst [vmem:[#allocation55_spill] sm:$0xff] %v6911_v49  ;;  %v6917_v54 = vsub.s32 1, %v6892_v29 }
  0xe7   :  { %5100 = vmatprep.subr.mxu0 %v9158_v3  ;;  %1046 = vmatpush1.msra.mxu1 %v6546_v56 }
  0xe8   :  { %5101 = vmatpush3.msra.mxu0 %v6832_v21  ;;  %1047 = vmatprep.subr.mxu1 %v6551_v58  ;;  %9448 = vst [vmem:[#allocation56_spill] sm:$0xff] %v6917_v54 }
  0xe9   :  { %5102 = vmatprep.subr.mxu0 %v9158_v3  ;;  %1048 = vmatpush1.msra.mxu1 %v6559_v61 }
  0xea   :  { %5103 = vmatpush3.msra.mxu0 %v6838_v23  ;;  %1049 = vmatprep.subr.mxu1 %v6564_v63  ;;  %v253_v63 = vrot.slane %v248_v34, %v6911_v49 }
  0xeb   :  { %5104 = vmatprep.subr.mxu0 %v9158_v3  ;;  %1050 = vmatpush1.msra.mxu1 %v6567_v4 }
  0xec   :  { %5105 = vmatpush3.msra.mxu0 %v6844_v25  ;;  %1051 = vmatprep.subr.mxu1 %v6570_v8 }
  0xed   :  { %5107 = vmatmul.mubr.f32.vlgmr.msra.gmra.mxu0 %v9158_v3  ;;  %5109 = vmatprep.subr.mxu0 %v9158_v3 }
  0xee   :  { %5110 = vmatpush3.msra.mxu0 %v6583_v16  ;;  %1052 = vmatpush1.msra.mxu1 %v6574_v12 }
  0xef   :  { %5111 = vmatprep.subr.mxu0 %v9158_v3  ;;  %1085 = vmatprep.mubr.f32.mxu1 %v9158_v3 }
  0xf0   :  { %5112 = vmatpush3.msra.mxu0 %v6593_v22  ;;  %5141 = vmatprep.mubr.msk.f32.mxu0 %vm6322_vm0, %v9158_v3 }
  0xf1   :  { %5113 = vmatprep.subr.mxu0 %v9158_v3  ;;  %1183 = vmatprep.subr.mxu1 %v6579_v14  ;;  %v257_v14 = vrot.slane %v248_v34, %v6917_v54 }
  0xf2   :  { %5114 = vmatpush3.msra.mxu0 %v6603_v28 }
  0xf3   :  { %5115 = vmatprep.subr.mxu0 %v9158_v3 }
  0xf4   :  { %5116 = vmatpush3.msra.mxu0 %v6613_v33 }
  0xf5   :  { %5117 = vmatprep.subr.mxu0 %v9158_v3 }
  0xf6   :  { %5118 = vmatpush3.msra.mxu0 %v6623_v39 }
  0xf7   :  { %5119 = vmatprep.subr.mxu0 %v9158_v3 }
  0xf8   :  { %5120 = vmatpush3.msra.mxu0 %v6633_v46 }
  0xf9   :  { %5121 = vmatprep.subr.mxu0 %v9158_v3 }
  0xfa   :  { %5122 = vmatpush3.msra.mxu0 %v6643_v53 }
  0xfb   :  { %5123 = vmatprep.subr.mxu0 %v9158_v3 }
  0xfc   :  { %5124 = vmatpush3.msra.mxu0 %v6653_v60 }
  0xfd   :  { %5125 = vmatprep.subr.mxu0 %v9158_v3 }
  0xfe   :  { %5126 = vmatpush3.msra.mxu0 %v6665_v6 }
  0xff   :  { %5127 = vmatprep.subr.mxu0 %v9158_v3 }
 0x100   :  { %5128 = vmatpush3.msra.mxu0 %v6675_v57 }
 0x101   :  { %5129 = vmatprep.subr.mxu0 %v9158_v3 }
 0x102   :  { %5130 = vmatpush3.msra.mxu0 %v6687_v1 }
 0x103   :  { %5131 = vmatprep.subr.mxu0 %v9158_v3 }
 0x104   :  { %5132 = vmatpush3.msra.mxu0 %v6697_v51 }
 0x105   :  { %5133 = vmatprep.subr.mxu0 %v9158_v3 }
 0x106   :  { %5134 = vmatpush3.msra.mxu0 %v6709_v62 }
 0x107   :  { %5135 = vmatprep.subr.mxu0 %v9158_v3 }
 0x108   :  { %5136 = vmatpush3.msra.mxu0 %v6719_v48 }
 0x109   :  { %5137 = vmatprep.subr.mxu0 %v9158_v3 }
 0x10a   :  { %5138 = vmatpush3.msra.mxu0 %v6731_v55 }
 0x10b   :  { %5139 = vmatprep.subr.mxu0 %v9158_v3 }
 0x10c   :  { %5140 = vmatpush3.msra.mxu0 %v6741_v44 }
 0x10d   :  { %5144 = vmatprep.subr.mxu0 %v9158_v3 }
 0x13c   :  { %v6902_v38 = vpop.f32.mrf.mxu1 }
 0x13d   :  { %v346_v47 = vpop.f32.mrf.mxu0 }
 0x13e   :  { %v443_v40 = vpop.f32.mrf.mxu1 }
 0x13f   :  { %v6905_v43 = vadd.f32 %v443_v40, %v6900_v36  ;;  %v348_v58 = vpop.f32.mrf.mxu0 }
 0x141   :  { %9445 = vst [vmem:[#allocation53_spill] sm:$0xff] %v6905_v43 }
 0x14c   :  { %v447_v56 = vpop.f32.mrf.mxu1 }
 0x14d   :  { %v6920_v61 = vadd.f32 %v447_v56, %v6914_v52 }
 0x14e   :  { %v449_v4 = vpop.f32.mrf.mxu1 }
 0x14f   :  { %9449 = vst [vmem:[#allocation57_spill] sm:$0xff] %v6920_v61  ;;  %v352_v8 = vpop.f32.mrf.mxu0  ;;  %v6924_v12 = vadd.f32 %v449_v4, %v6900_v36 }
 0x150   :  { %v6927_v27 = vadd.f32 %v352_v8, %v253_v63 }
 0x151   :  { %9450 = vst [vmem:[#allocation58_spill] sm:$0xff] %v6924_v12  ;;  %v354_v40 = vpop.f32.mrf.mxu0 }
 0x152   :  { %9451 = vst [vmem:[#allocation59_spill] sm:$0xff] %v6927_v27  ;;  %v6929_v31 = vadd.f32 %v354_v40, %v257_v14  ;;  %v453_v3 = vpop.f32.mrf.mxu1 }
 0x153   :  { %v6932_v43 = vadd.f32 %v453_v3, %v6914_v52 }
 0x154   :  { %9452 = vst [vmem:[#allocation60_spill] sm:$0xff] %v6929_v31  ;;  %v455_v56 = vpop.f32.mrf.mxu1 }
 0x155   :  { %9453 = vst [vmem:[#allocation61_spill] sm:$0xff] %v6932_v43  ;;  %v358_v61 = vpop.f32.mrf.mxu0  ;;  %v6935_v44 = vadd.f32 %v455_v56, %v6900_v36 }
 0x156   :  { %v6937_v55 = vadd.f32 %v358_v61, %v253_v63 }
 0x157   :  { %9454 = vst [vmem:[#allocation62_spill] sm:$0xff] %v6935_v44  ;;  %v360_v4 = vpop.f32.mrf.mxu0 }
 0x158   :  { %9455 = vst [vmem:[#allocation63_spill] sm:$0xff] %v6937_v55  ;;  %v6939_v12 = vadd.f32 %v360_v4, %v257_v14  ;;  %v459_v48 = vpop.f32.mrf.mxu1  ;;  %v613_v4 = vld [vmem:[%s9124_s4] sm:$0x7]  ;;  %v347_v55 = vadd.f32 %v346_v47, %v253_v63 }
 0x159   :  { %v6942_v8 = vadd.f32 %v459_v48, %v6914_v52  ;;  %v9167_v48 = vsub.s32 4, %v6892_v29 }
 0x15a   :  { %9456 = vst [vmem:[#allocation64_spill] sm:$0xff] %v6939_v12  ;;  %v461_v40 = vpop.f32.mrf.mxu1 }
 0x15b   :  { %9457 = vst [vmem:[#allocation65_spill] sm:$0xff] %v6942_v8  ;;  %v364_v31 = vpop.f32.mrf.mxu0  ;;  %v6945_v27 = vadd.f32 %v461_v40, %v6900_v36 }
 0x15c   :  { %v6947_v3 = vadd.f32 %v364_v31, %v253_v63  ;;  %v9168_v31 = vsub.s32 5, %v6892_v29 }
 0x15d   :  { %9458 = vst [vmem:[#allocation66_spill] sm:$0xff] %v6945_v27  ;;  %v366_v43 = vpop.f32.mrf.mxu0 }
 0x15e   :  { %9459 = vst [vmem:[#allocation67_spill] sm:$0xff] %v6947_v3  ;;  %v6949_v62 = vadd.f32 %v366_v43, %v257_v14  ;;  %v465_v56 = vpop.f32.mrf.mxu1  ;;  %v6962_v43 = vrot.slane %v613_v4, %v6911_v49  ;;  %v6970_v12 = vrot.slane %v248_v34, %v9168_v31  ;;  %v349_v31 = vadd.f32 %v348_v58, %v257_v14 }
 0x15f   :  { %v6952_v61 = vadd.f32 %v465_v56, %v6914_v52  ;;  %v269_v56 = vrot.slane %v248_v34, %v9167_v48 }
 0x160   :  { %9460 = vst [vmem:[#allocation68_spill] sm:$0xff] %v6949_v62  ;;  %v467_v40 = vpop.f32.mrf.mxu1  ;;  %9463 = vst [vmem:[#allocation71_spill] sm:$0xff] %v6962_v43 }
 0x161   :  { %9461 = vst [vmem:[#allocation69_spill] sm:$0xff] %v6952_v61  ;;  %v370_v8 = vpop.f32.mrf.mxu0 }
 0x162   :  { %v6958_v44 = vadd.f32 %v370_v8, %v253_v63 }
 0x163   :  { %v372_v3 = vpop.f32.mrf.mxu0 }
 0x164   :  { %9462 = vst [vmem:[#allocation70_spill] sm:$0xff] %v6958_v44  ;;  %v6964_v62 = vadd.f32 %v372_v3, %v257_v14 }
 0x166   :  { %9464 = vst [vmem:[#allocation72_spill] sm:$0xff] %v6964_v62  ;;  %v745_v61 = vpop.f32.mrf.mxu1  ;;  %v6979_v62 = vrot.slane %v613_v4, %v6917_v54 }
 0x167   :  { %v746_v8 = vadd.f32 %v745_v61, %v6962_v43  ;;  %v536_v44 = vpop.f32.mrf.mxu0 }
 0x168   :  { %v6973_v27 = vadd.f32 %v536_v44, %v269_v56  ;;  %9467 = vst [vmem:[#allocation75_spill] sm:$0xff] %v6979_v62  ;;  %v747_v48 = vpop.f32.mrf.mxu1 }
 0x169   :  { %v820_v51 = vadd.f32 %v746_v8, %v347_v55  ;;  %v538_v1 = vpop.f32.mrf.mxu0  ;;  %v748_v34 = vadd.f32 %v747_v48, %v6979_v62 }
 0x16a   :  { %9465 = vst [vmem:[#allocation73_spill] sm:$0xff] %v6973_v27  ;;  %v6976_v57 = vadd.f32 %v538_v1, %v6970_v12 }
 0x16b   :  { %v4655_v3 = vmul.f32 -1.442695, %v820_v51  ;;  %v827_v47 = vadd.f32 %v748_v34, %v349_v31 }
 0x16c   :  { %9466 = vst [vmem:[#allocation74_spill] sm:$0xff] %v6976_v57 }
 0x16d   :  { %5754 = vpow2.f32 %v4655_v3  ;;  %v4656_v63 = vmul.f32 -1.442695, %v827_v47  ;;  %v662_v47 = vld [vmem:[%s9126_s6] sm:$0x7] }
 0x16f   :  { %5756 = vpow2.f32 %v4656_v63 }
 0x178   :  { %v542_v61 = vpop.f32.mrf.mxu0 }
 0x179   :  { %v6982_v29 = vadd.f32 %v542_v61, %v269_v56 }
 0x17a   :  { %v5755_v44 = vpop.eup %5754  ;;  %v544_v55 = vpop.f32.mrf.mxu0 }
 0x17b   :  { %9468 = vst [vmem:[#allocation76_spill] sm:$0xff] %v6982_v29  ;;  %v6985_v8 = vadd.f32 %v544_v55, %v6970_v12  ;;  %v824_v1 = vadd.f32 1.0, %v5755_v44  ;;  %v7003_v55 = vrot.slane %v662_v47, %v6911_v49  ;;  %v7011_v29 = vrot.slane %v662_v47, %v6917_v54 }
 0x17c   :  { %v5757_v61 = vpop.eup %5756 }
 0x17d   :  { %9469 = vst [vmem:[#allocation77_spill] sm:$0xff] %v6985_v8  ;;  %v548_v51 = vpop.f32.mrf.mxu0  ;;  %5758 = vrcp.f32 %v824_v1  ;;  %9474 = vst [vmem:[#allocation82_spill] sm:$0xff] %v7003_v55  ;;  %v7006_v1 = vrot.slane %v613_v4, %v6908_v45  ;;  %v442_v4 = vadd.f32 %v6902_v38, %v6914_v52  ;;  %v7030_v52 = vrot.slane %v662_v47, %v6908_v45  ;;  %v9485_v47 = vld [vmem:[#allocation31_spill] sm:$0xff] }
 0x17e   :  { %v6987_v57 = vadd.f32 %v548_v51, %v269_v56  ;;  %v831_v51 = vadd.f32 1.0, %v5757_v61 }
 0x17f   :  { %v550_v3 = vpop.f32.mrf.mxu0  ;;  %9475 = vst [vmem:[#allocation83_spill] sm:$0xff] %v7006_v1 }
 0x180   :  { %9470 = vst [vmem:[#allocation78_spill] sm:$0xff] %v6987_v57  ;;  %v6990_v48 = vadd.f32 %v550_v3, %v6970_v12  ;;  %5760 = vrcp.f32 %v831_v51  ;;  %v9490_v51 = vld [vmem:[#allocation38_spill] sm:$0xff] }
 0x182   :  { %9471 = vst [vmem:[#allocation79_spill] sm:$0xff] %v6990_v48  ;;  %v554_v58 = vpop.f32.mrf.mxu0 }
 0x183   :  { %v6992_v14 = vadd.f32 %v554_v58, %v269_v56 }
 0x184   :  { %v556_v31 = vpop.f32.mrf.mxu0 }
 0x185   :  { %9472 = vst [vmem:[#allocation80_spill] sm:$0xff] %v6992_v14  ;;  %v6995_v34 = vadd.f32 %v556_v31, %v6970_v12  ;;  %v468_v31 = vadd.f32 %v467_v40, %v6900_v36 }
 0x187   :  { %9473 = vst [vmem:[#allocation81_spill] sm:$0xff] %v6995_v34  ;;  %v560_v63 = vpop.f32.mrf.mxu0 }
 0x188   :  { %v561_v40 = vadd.f32 %v560_v63, %v269_v56  ;;  %v9480_v56 = vld [vmem:[#allocation26_spill] sm:$0xff]  ;;  %v9486_v63 = vld [vmem:[#allocation32_spill] sm:$0xff] }
 0x189   :  { %v7000_v44 = vpop.f32.mrf.mxu0 }
 0x18a   :  { %v5759_v58 = vpop.eup %5758 }
 0x18c   :  { %v923_v3 = vpop.f32.mrf.mxu1 }
 0x18d   :  { %v924_v27 = vadd.f32 %v923_v3, %v7003_v55  ;;  %v816_v8 = vpop.f32.mrf.mxu0  ;;  %v5761_v55 = vpop.eup %5760 }
 0x18e   :  { %v817_v48 = vadd.f32 %v816_v8, %v7006_v1  ;;  %v925_v57 = vpop.f32.mrf.mxu1  ;;  %v837_v1 = vsub.f32 1.0, %v5761_v55  ;;  %v839_v43 = vmul.f32 0.0, %v5761_v55  ;;  %v9488_v55 = vld [vmem:[#allocation35_spill] sm:$0xff] }
 0x18f   :  { %v998_v34 = vadd.f32 %v924_v27, %v468_v31  ;;  %v5073_v49 = vpop.f32.mrf.mxu0  ;;  %v926_v62 = vadd.f32 %v925_v57, %v7011_v29  ;;  %v9477_v57 = vmov 0.0  }
 0x190   :  { %v834_v61 = vmul.f32 %v5759_v58, %v817_v48  ;;  %v9491_v58 = vld [vmem:[#allocation39_spill] sm:$0xff] }
 0x191   :  { %v4657_v14 = vmul.f32 -1.442695, %v998_v34  ;;  %v1005_v3 = vadd.f32 %v926_v62, %v561_v40  ;;  %v9483_v34 = vld [vmem:[#allocation29_spill] sm:$0xff]  ;;  %v9494_v40 = vld [vmem:[#allocation44_spill] sm:$0xff] }
 0x192   :  { %v835_v36 = vadd.f32 %v834_v61, %v442_v4  ;;  %v9492_v4 = vld [vmem:[#allocation41_spill] sm:$0xff] }
 0x193   :  { %5762 = vpow2.f32 %v4657_v14  ;;  %v4658_v54 = vmul.f32 -1.442695, %v1005_v3  ;;  %v9482_v14 = vld [vmem:[#allocation28_spill] sm:$0xff]  ;;  %v9495_v3 = vld [vmem:[#allocation45_spill] sm:$0xff] }
 0x194   :  { %5764 = vtanh.f32 %v835_v36  ;;  %v9493_v36 = vld [vmem:[#allocation42_spill] sm:$0xff] }
 0x195   :  { %5766 = vpow2.f32 %v4658_v54  ;;  %v9479_v54 = vld [vmem:[#allocation25_spill] sm:$0xff] }
 0x1a0   :  { %v5763_v8 = vpop.eup %5762 }
 0x1a1   :  { %v5765_v27 = vpop.eup %5764  ;;  %v1002_v49 = vadd.f32 1.0, %v5763_v8 }
 0x1a2   :  { %v838_v31 = vmul.f32 %v5765_v27, %v837_v1  ;;  %v5767_v62 = vpop.eup %5766  ;;  %v9489_v1 = vld [vmem:[#allocation36_spill] sm:$0xff] }
 0x1a3   :  { %5768 = vrcp.f32 %v1002_v49 }
 0x1a4   :  { %v7017_v38 = vadd.f32 %v839_v43, %v838_v31  ;;  %v9496_v31 = vld [vmem:[#allocation48_spill] sm:$0xff] }
 0x1a6   :  { %9476 = vst [vmem:[#allocation84_spill] sm:$0xff] %v7017_v38  ;;  %1086 = vmatmul.mubr.f32.vlgmr.msra.gmra.mxu1 %v7017_v38  ;;  %5142 = vmatmul.mubr.f32.vlgmr.msra.gmra.mxu0 %v7017_v38 }
 0x1a7   :  { %1184 = vmatpush1.msra.mxu1 %v6585_v18  ;;  %5145 = vmatpush3.msra.mxu0 %v6754_v59  ;;  %v1009_v18 = vadd.f32 1.0, %v5767_v62 }
 0x1a8   :  { %1185 = vmatprep.subr.mxu1 %v6589_v20  ;;  %5146 = vmatprep.subr.mxu0 %v9477_v57 }
 0x1a9   :  { %1186 = vmatpush1.msra.mxu1 %v6595_v24  ;;  %5147 = vmatpush3.msra.mxu0 %v6759_v50  ;;  %5770 = vrcp.f32 %v1009_v18  ;;  %v9497_v18 = vld [vmem:[#allocation49_spill] sm:$0xff] }
 0x1aa   :  { %1187 = vmatprep.subr.mxu1 %v6599_v26  ;;  %5148 = vmatprep.subr.mxu0 %v9477_v57 }
 0x1ab   :  { %1188 = vmatpush1.msra.mxu1 %v6605_v30  ;;  %5149 = vmatpush3.msra.mxu0 %v6766_v41  ;;  %v9478_v30 = vld [vmem:[#allocation24_spill] sm:$0xff] }
 0x1ac   :  { %1189 = vmatprep.subr.mxu1 %v6609_v0  ;;  %5150 = vmatprep.subr.mxu0 %v9477_v57 }
 0x1ad   :  { %v994_v20 = vpop.f32.mrf.mxu0  ;;  %1190 = vmatpush1.msra.mxu1 %v6615_v35  ;;  %5151 = vmatpush3.msra.mxu0 %v6772_v42  ;;  %v563_v35 = vadd.f32 %v7000_v44, %v6970_v12  ;;  %v9484_v12 = vld [vmem:[#allocation30_spill] sm:$0xff]  ;;  %v9487_v44 = vld [vmem:[#allocation33_spill] sm:$0xff] }
 0x1ae   :  { %v995_v24 = vadd.f32 %v994_v20, %v7030_v52  ;;  %1191 = vmatprep.subr.mxu1 %v6619_v37  ;;  %5152 = vmatprep.subr.mxu0 %v9477_v57  ;;  %v9481_v37 = vld [vmem:[#allocation27_spill] sm:$0xff] }
 0x1af   :  { %v5108_v26 = vpop.f32.mrf.mxu0  ;;  %1192 = vmatpush1.msra.mxu1 %v9478_v30  ;;  %5153 = vmatpush3.msra.mxu0 %v6778_v2  ;;  %v9498_v20 = vld [vmem:[#allocation51_spill] sm:$0xff]  ;;  %v7108_v30 = vld [vmem:[#allocation8 + $0x150] sm:$0xff] }
 0x1b0   :  { %v5769_v0 = vpop.eup %5768  ;;  %1193 = vmatprep.subr.mxu1 %v9479_v54  ;;  %5154 = vmatprep.subr.mxu0 %v9477_v57  ;;  %v7104_v26 = vld [vmem:[#allocation8 + $0x158] sm:$0xff] }
 0x1b1   :  { %v1012_v43 = vmul.f32 %v5769_v0, %v995_v24  ;;  %1194 = vmatpush1.msra.mxu1 %v9480_v56  ;;  %5155 = vmatpush3.msra.mxu0 %v6784_v5  ;;  %v7100_v24 = vld [vmem:[#allocation8 + $0x168] sm:$0xff]  ;;  %v7112_v0 = vld [vmem:[#allocation8 + $0x140] sm:$0xff]  ;;  %v7116_v54 = vld [vmem:[#allocation8 + $0x138] sm:$0xff] }
 0x1b2   :  { %1195 = vmatprep.subr.mxu1 %v9481_v37  ;;  %5156 = vmatprep.subr.mxu0 %v9477_v57  ;;  %9500 = vst [vmem:[#allocation25_spill] sm:$0xff] %v7116_v54  ;;  %v7140_v56 = vld [vmem:[#allocation8 + $0xf0] sm:$0xff]  ;;  %v7148_v37 = vld [vmem:[#allocation8 + $0xd8] sm:$0xff] }
 0x1b3   :  { %v1013_v48 = vadd.f32 %v1012_v43, %v563_v35  ;;  %1196 = vmatpush1.msra.mxu1 %v9482_v14  ;;  %5157 = vmatpush3.msra.mxu0 %v6790_v7  ;;  %v7124_v35 = vld [vmem:[#allocation8 + $0x120] sm:$0xff]  ;;  %v7132_v43 = vld [vmem:[#allocation8 + $0x108] sm:$0xff]  ;;  %9506 = vst [vmem:[#allocation31_spill] sm:$0xff] %v7140_v56  ;;  %9508 = vst [vmem:[#allocation33_spill] sm:$0xff] %v7148_v37 }
 0x1b4   :  { %1197 = vmatprep.subr.mxu1 %v9483_v34  ;;  %5158 = vmatprep.subr.mxu0 %v9477_v57  ;;  %9502 = vst [vmem:[#allocation27_spill] sm:$0xff] %v7124_v35  ;;  %9504 = vst [vmem:[#allocation29_spill] sm:$0xff] %v7132_v43  ;;  %v7164_v14 = vld [vmem:[#allocation8 + $0xa8] sm:$0xff]  ;;  %v7172_v34 = vld [vmem:[#allocation8 + $0x90] sm:$0xff] }
 0x1b5   :  { %5772 = vtanh.f32 %v1013_v48  ;;  %1198 = vmatpush1.msra.mxu1 %v9484_v12  ;;  %5159 = vmatpush3.msra.mxu0 %v6796_v9  ;;  %v7156_v48 = vld [vmem:[#allocation8 + $0xc0] sm:$0xff]  ;;  %9512 = vst [vmem:[#allocation39_spill] sm:$0xff] %v7164_v14  ;;  %9514 = vst [vmem:[#allocation42_spill] sm:$0xff] %v7172_v34 }
 0x1b6   :  { %1199 = vmatprep.subr.mxu1 %v9485_v47  ;;  %5160 = vmatprep.subr.mxu0 %v9477_v57  ;;  %v5771_v61 = vpop.eup %5770  ;;  %9510 = vst [vmem:[#allocation36_spill] sm:$0xff] %v7156_v48  ;;  %v7176_v12 = vld [vmem:[#allocation8 + $0x80] sm:$0xff]  ;;  %v7180_v47 = vld [vmem:[#allocation8 + $0x78] sm:$0xff] }
 0x1b7   :  { %1200 = vmatpush1.msra.mxu1 %v9486_v63  ;;  %5161 = vmatpush3.msra.mxu0 %v6802_v11  ;;  %v1015_v8 = vsub.f32 1.0, %v5771_v61  ;;  %v1017_v62 = vmul.f32 0.0, %v5771_v61  ;;  %9516 = vst [vmem:[#allocation44_spill] sm:$0xff] %v7176_v12  ;;  %9517 = vst [vmem:[#allocation45_spill] sm:$0xff] %v7180_v47  ;;  %v7184_v63 = vld [vmem:[#allocation8 + $0x68] sm:$0xff]  ;;  %v7204_v61 = vld [vmem:[#allocation8 + $0x30] sm:$0xff] }
 0x1b8   :  { %1201 = vmatprep.subr.mxu1 %v9487_v44  ;;  %5162 = vmatprep.subr.mxu0 %v9477_v57  ;;  %9519 = vst [vmem:[#allocation48_spill] sm:$0xff] %v7184_v63  ;;  %v7188_v44 = vld [vmem:[#allocation8 + $0x60] sm:$0xff] }
 0x1b9   :  { %1202 = vmatpush1.msra.mxu1 %v9488_v55  ;;  %5163 = vmatpush3.msra.mxu0 %v6808_v13  ;;  %9520 = vst [vmem:[#allocation49_spill] sm:$0xff] %v7188_v44  ;;  %v9521_v55 = vld [vmem:[#allocation40_spill] sm:$0xff] }
 0x1ba   :  { %1203 = vmatprep.subr.mxu1 %v9489_v1  ;;  %5164 = vmatprep.subr.mxu0 %v9477_v57  ;;  %v7192_v1 = vld [vmem:[#allocation8 + $0x50] sm:$0xff]  ;;  %9526 = vst [vmem:[#allocation40_spill] sm:$0xff] %v7204_v61 }
 0x1bb   :  { %1204 = vmatpush1.msra.mxu1 %v9490_v51  ;;  %5165 = vmatpush3.msra.mxu0 %v6814_v15  ;;  %9522 = vst [vmem:[#allocation51_spill] sm:$0xff] %v7192_v1  ;;  %v7196_v51 = vld [vmem:[#allocation8 + $0x48] sm:$0xff] }
 0x1bc   :  { %1205 = vmatprep.subr.mxu1 %v9491_v58  ;;  %5166 = vmatprep.subr.mxu0 %v9477_v57  ;;  %v9524_v58 = vld [vmem:[#allocation43_spill] sm:$0xff] }
 0x1bd   :  { %1206 = vmatpush1.msra.mxu1 %v9492_v4  ;;  %5167 = vmatpush3.msra.mxu0 %v6820_v17  ;;  %v7200_v4 = vld [vmem:[#allocation8 + $0x38] sm:$0xff] }
 0x1be   :  { %1207 = vmatprep.subr.mxu1 %v9493_v36  ;;  %5168 = vmatprep.subr.mxu0 %v9477_v57  ;;  %v9527_v36 = vld [vmem:[#allocation46_spill] sm:$0xff] }
 0x1bf   :  { %1208 = vmatpush1.msra.mxu1 %v9494_v40  ;;  %5169 = vmatpush3.msra.mxu0 %v6826_v19  ;;  %v7208_v40 = vld [vmem:[#allocation8 + $0x20] sm:$0xff] }
 0x1c0   :  { %1209 = vmatprep.subr.mxu1 %v9495_v3  ;;  %5170 = vmatprep.subr.mxu0 %v9477_v57  ;;  %9528 = vst [vmem:[#allocation43_spill] sm:$0xff] %v7208_v40  ;;  %v7212_v3 = vld [vmem:[#allocation8 + $0x18] sm:$0xff] }
 0x1c1   :  { %1210 = vmatpush1.msra.mxu1 %v6721_v32  ;;  %5171 = vmatpush3.msra.mxu0 %v6832_v21  ;;  %9529 = vst [vmem:[#allocation46_spill] sm:$0xff] %v7212_v3 }
 0x1c2   :  { %v5773_v27 = vpop.eup %5772  ;;  %1211 = vmatprep.subr.mxu1 %v6727_v10  ;;  %5172 = vmatprep.subr.mxu0 %v9477_v57  ;;  %v7096_v10 = vld [vmem:[#allocation8 + $0x170] sm:$0xff] }
 0x1c3   :  { %v1016_v49 = vmul.f32 %v5773_v27, %v1015_v8  ;;  %1212 = vmatpush1.msra.mxu1 %v9496_v31  ;;  %5173 = vmatpush3.msra.mxu0 %v6838_v23  ;;  %v9530_v8 = vld [vmem:[#allocation47_spill] sm:$0xff]  ;;  %v7216_v27 = vld [vmem:[#allocation8 + $0x8] sm:$0xff]  ;;  %v9533_v31 = vld [vmem:[#allocation50_spill] sm:$0xff] }
 0x1c4   :  { %1213 = vmatprep.subr.mxu1 %v9497_v18  ;;  %5174 = vmatprep.subr.mxu0 %v9477_v57  ;;  %9531 = vst [vmem:[#allocation47_spill] sm:$0xff] %v7216_v27 }
 0x1c5   :  { %1214 = vmatpush1.msra.mxu1 %v9498_v20  ;;  %1247 = vmatprep.mubr.f32.mxu1 %v9477_v57  ;;  %v7089_v32 = vadd.f32 %v1017_v62, %v1016_v49  ;;  %v7220_v49 = vld [vmem:[#allocation8] sm:$0xff]  ;;  %v7227_v62 = vld [vmem:[#allocation10 + $0x170] sm:$0xff] }
 0x1c6   :  { %5175 = vmatpush3.msra.mxu0 %v6844_v25  ;;  %5176 = vmatprep.mubr.msk.f32.mxu0 %vm6322_vm0, %v9477_v57  ;;  %9532 = vst [vmem:[#allocation85_spill] sm:$0xff] %v7220_v49  ;;  %9534 = vst [vmem:[#allocation50_spill] sm:$0xff] %v7227_v62 }
 0x1c7   :  { %9499 = vst [vmem:[#allocation24_spill] sm:$0xff] %v7089_v32  ;;  %1248 = vmatmul.mubr.f32.vlgmr.msra.gmra.mxu1 %v7089_v32  ;;  %5177 = vmatmul.mubr.f32.vlgmr.msra.gmra.mxu0 %v7089_v32 }
 0x1c8   :  { %1347 = vmatprep.subr.mxu1 %v7096_v10  ;;  %5179 = vmatprep.subr.mxu0 %v9477_v57 }
 0x1c9   :  { %1348 = vmatpush1.msra.mxu1 %v7100_v24  ;;  %5180 = vmatpush3.msra.mxu0 %v6583_v16  ;;  %v7120_v16 = vld [vmem:[#allocation8 + $0x128] sm:$0xff] }
 0x1ca   :  { %1349 = vmatprep.subr.mxu1 %v7104_v26  ;;  %5181 = vmatprep.subr.mxu0 %v9477_v57  ;;  %9501 = vst [vmem:[#allocation26_spill] sm:$0xff] %v7120_v16 }
 0x1cb   :  { %1350 = vmatpush1.msra.mxu1 %v7108_v30  ;;  %5182 = vmatpush3.msra.mxu0 %v6593_v22  ;;  %v7128_v22 = vld [vmem:[#allocation8 + $0x110] sm:$0xff] }
 0x1cc   :  { %1351 = vmatprep.subr.mxu1 %v7112_v0  ;;  %5183 = vmatprep.subr.mxu0 %v9477_v57  ;;  %9503 = vst [vmem:[#allocation28_spill] sm:$0xff] %v7128_v22 }
 0x1cd   :  { %1352 = vmatpush1.msra.mxu1 %v7116_v54  ;;  %5184 = vmatpush3.msra.mxu0 %v6603_v28  ;;  %v7136_v28 = vld [vmem:[#allocation8 + $0xf8] sm:$0xff] }
 0x1ce   :  { %1353 = vmatprep.subr.mxu1 %v7120_v16  ;;  %5185 = vmatprep.subr.mxu0 %v9477_v57  ;;  %9505 = vst [vmem:[#allocation30_spill] sm:$0xff] %v7136_v28 }
 0x1cf   :  { %1354 = vmatpush1.msra.mxu1 %v7124_v35  ;;  %5186 = vmatpush3.msra.mxu0 %v6613_v33  ;;  %v7144_v33 = vld [vmem:[#allocation8 + $0xe0] sm:$0xff] }
 0x1d0   :  { %1355 = vmatprep.subr.mxu1 %v7128_v22  ;;  %5187 = vmatprep.subr.mxu0 %v9477_v57  ;;  %9507 = vst [vmem:[#allocation32_spill] sm:$0xff] %v7144_v33 }
 0x1d1   :  { %1356 = vmatpush1.msra.mxu1 %v7132_v43  ;;  %5188 = vmatpush3.msra.mxu0 %v6623_v39  ;;  %v7152_v39 = vld [vmem:[#allocation8 + $0xc8] sm:$0xff] }
 0x1d2   :  { %1357 = vmatprep.subr.mxu1 %v7136_v28  ;;  %5189 = vmatprep.subr.mxu0 %v9477_v57  ;;  %9509 = vst [vmem:[#allocation35_spill] sm:$0xff] %v7152_v39 }
 0x1d3   :  { %1358 = vmatpush1.msra.mxu1 %v7140_v56  ;;  %5190 = vmatpush3.msra.mxu0 %v6633_v46  ;;  %v7160_v46 = vld [vmem:[#allocation8 + $0xb0] sm:$0xff] }
 0x1d4   :  { %1359 = vmatprep.subr.mxu1 %v7144_v33  ;;  %5191 = vmatprep.subr.mxu0 %v9477_v57  ;;  %9511 = vst [vmem:[#allocation38_spill] sm:$0xff] %v7160_v46 }
 0x1d5   :  { %1360 = vmatpush1.msra.mxu1 %v7148_v37  ;;  %5192 = vmatpush3.msra.mxu0 %v6643_v53  ;;  %v7168_v53 = vld [vmem:[#allocation8 + $0x98] sm:$0xff] }
 0x1d6   :  { %1361 = vmatprep.subr.mxu1 %v7152_v39  ;;  %5193 = vmatprep.subr.mxu0 %v9477_v57  ;;  %9513 = vst [vmem:[#allocation41_spill] sm:$0xff] %v7168_v53 }
 0x1d7   :  { %1362 = vmatpush1.msra.mxu1 %v7156_v48  ;;  %5194 = vmatpush3.msra.mxu0 %v6653_v60  ;;  %v9515_v60 = vld [vmem:[#allocation34_spill] sm:$0xff] }
 0x1d8   :  { %1363 = vmatprep.subr.mxu1 %v7160_v46  ;;  %5195 = vmatprep.subr.mxu0 %v9477_v57  ;;  %9523 = vst [vmem:[#allocation34_spill] sm:$0xff] %v7196_v51 }
 0x1d9   :  { %1364 = vmatpush1.msra.mxu1 %v7164_v14  ;;  %5196 = vmatpush3.msra.mxu0 %v6665_v6  ;;  %v9518_v6 = vld [vmem:[#allocation37_spill] sm:$0xff] }
 0x1da   :  { %1365 = vmatprep.subr.mxu1 %v7168_v53  ;;  %5197 = vmatprep.subr.mxu0 %v9477_v57  ;;  %9525 = vst [vmem:[#allocation37_spill] sm:$0xff] %v7200_v4 }
 0x1db   :  { %1366 = vmatpush1.msra.mxu1 %v7172_v34  ;;  %5198 = vmatpush3.msra.mxu0 %v9515_v60  ;;  %v9535_v60 = vld [vmem:[#allocation71_spill] sm:$0xff] }
 0x1dc   :  { %1367 = vmatprep.subr.mxu1 %v7176_v12  ;;  %5199 = vmatprep.subr.mxu0 %v9477_v57 }
 0x1dd   :  { %1368 = vmatpush1.msra.mxu1 %v7180_v47  ;;  %5200 = vmatpush3.msra.mxu0 %v9518_v6 }
 0x1de   :  { %1369 = vmatprep.subr.mxu1 %v7184_v63  ;;  %5201 = vmatprep.subr.mxu0 %v9477_v57 }
 0x1df   :  { %1370 = vmatpush1.msra.mxu1 %v7188_v44  ;;  %5202 = vmatpush3.msra.mxu0 %v9521_v55 }
 0x1e0   :  { %1371 = vmatprep.subr.mxu1 %v7192_v1  ;;  %5203 = vmatprep.subr.mxu0 %v9477_v57 }
 0x1e1   :  { %1372 = vmatpush1.msra.mxu1 %v7196_v51  ;;  %5204 = vmatpush3.msra.mxu0 %v9524_v58 }
 0x1e2   :  { %1373 = vmatprep.subr.mxu1 %v7200_v4  ;;  %5205 = vmatprep.subr.mxu0 %v9477_v57 }
 0x1e3   :  { %1374 = vmatpush1.msra.mxu1 %v7204_v61  ;;  %5206 = vmatpush3.msra.mxu0 %v9527_v36  ;;  %v9536_v36 = vld [vmem:[#allocation59_spill] sm:$0xff] }
 0x1e4   :  { %1375 = vmatprep.subr.mxu1 %v7208_v40  ;;  %5207 = vmatprep.subr.mxu0 %v9477_v57 }
 0x1e5   :  { %1376 = vmatpush1.msra.mxu1 %v7212_v3  ;;  %5208 = vmatpush3.msra.mxu0 %v9530_v8 }
 0x1e6   :  { %1377 = vmatprep.subr.mxu1 %v7216_v27  ;;  %5209 = vmatprep.subr.mxu0 %v9477_v57  ;;  %v9538_v27 = vld [vmem:[#allocation60_spill] sm:$0xff] }
 0x1e7   :  { %1378 = vmatpush1.msra.mxu1 %v7220_v49  ;;  %1411 = vmatprep.mubr.f32.mxu1 %v9477_v57  ;;  %v9537_v49 = vld [vmem:[#allocation75_spill] sm:$0xff] }
 0x1e8   :  { %5210 = vmatpush3.msra.mxu0 %v9533_v31  ;;  %5211 = vmatprep.mubr.msk.f32.mxu0 %vm6322_vm0, %v9477_v57 }
 0x1e9   :  { %1509 = vmatprep.subr.mxu1 %v7227_v62  ;;  %5214 = vmatprep.subr.mxu0 %v9477_v57 }
 0x266   :  { %v1087_v18 = vpop.f32.mrf.mxu1  ;;  %v1158_v20 = vpop.f32.mrf.mxu0 }
 0x267   :  { %v1088_v6 = vadd.f32 %v1087_v18, %v9535_v60  ;;  %v9539_v18 = vld [vmem:[#allocation82_spill] sm:$0xff] }
 0x268   :  { %v1089_v55 = vpop.f32.mrf.mxu1  ;;  %v5143_v58 = vpop.f32.mrf.mxu0 }
 0x269   :  { %v1162_v8 = vadd.f32 %v1088_v6, %v9536_v36  ;;  %v1090_v31 = vadd.f32 %v1089_v55, %v9537_v49  ;;  %v9540_v58 = vld [vmem:[#allocation83_spill] sm:$0xff]  ;;  %v9541_v55 = vld [vmem:[#allocation66_spill] sm:$0xff] }
 0x26a   :  { %v1159_v63 = vadd.f32 %v1158_v20, %v9540_v58 }
 0x26b   :  { %v4659_v45 = vmul.f32 -1.442695, %v1162_v8  ;;  %v1169_v3 = vadd.f32 %v1090_v31, %v9538_v27 }
 0x26d   :  { %5774 = vpow2.f32 %v4659_v45  ;;  %v4660_v40 = vmul.f32 -1.442695, %v1169_v3 }
 0x26f   :  { %5776 = vpow2.f32 %v4660_v40 }
 0x27a   :  { %v5775_v61 = vpop.eup %5774 }
 0x27b   :  { %v1166_v62 = vadd.f32 1.0, %v5775_v61  ;;  %v9542_v61 = vld [vmem:[#allocation57_spill] sm:$0xff] }
 0x27c   :  { %v5777_v4 = vpop.eup %5776 }
 0x27d   :  { %5778 = vrcp.f32 %v1166_v62  ;;  %v1173_v51 = vadd.f32 1.0, %v5777_v4  ;;  %v9543_v4 = vld [vmem:[#allocation80_spill] sm:$0xff] }
 0x27f   :  { %5780 = vrcp.f32 %v1173_v51 }
 0x287   :  { %v1249_v1 = vpop.f32.mrf.mxu1  ;;  %v1320_v44 = vpop.f32.mrf.mxu0 }
 0x288   :  { %v1250_v60 = vadd.f32 %v1249_v1, %v9539_v18 }
 0x289   :  { %v1251_v6 = vpop.f32.mrf.mxu1  ;;  %v5178_v36 = vpop.f32.mrf.mxu0 }
 0x28a   :  { %v5779_v8 = vpop.eup %5778  ;;  %v1324_v45 = vadd.f32 %v1250_v60, %v9541_v55  ;;  %v1252_v40 = vadd.f32 %v1251_v6, %v7011_v29  ;;  %v7250_v60 = vld [vmem:[#allocation10 + $0x158] sm:$0xff]  ;;  %v7266_v6 = vld [vmem:[#allocation10 + $0x128] sm:$0xff]  ;;  %v7274_v55 = vld [vmem:[#allocation10 + $0x110] sm:$0xff] }
 0x28b   :  { %v1176_v49 = vmul.f32 %v5779_v8, %v1159_v63  ;;  %v7270_v8 = vld [vmem:[#allocation10 + $0x120] sm:$0xff] }
 0x28c   :  { %v4661_v3 = vmul.f32 -1.442695, %v1324_v45  ;;  %v1331_v62 = vadd.f32 %v1252_v40, %v9543_v4  ;;  %v5781_v1 = vpop.eup %5780  ;;  %v7279_v45 = vld [vmem:[#allocation10 + $0x108] sm:$0xff]  ;;  %v7283_v40 = vld [vmem:[#allocation10 + $0xf8] sm:$0xff] }
 0x28d   :  { %v1177_v27 = vadd.f32 %v1176_v49, %v9542_v61  ;;  %v1179_v58 = vsub.f32 1.0, %v5781_v1  ;;  %v1181_v63 = vmul.f32 %v5781_v1, %v7017_v38  ;;  %v7246_v49 = vld [vmem:[#allocation10 + $0x168] sm:$0xff]  ;;  %v7287_v61 = vld [vmem:[#allocation10 + $0xf0] sm:$0xff]  ;;  %v7296_v4 = vld [vmem:[#allocation10 + $0xd8] sm:$0xff] }
 0x28e   :  { %5782 = vpow2.f32 %v4661_v3  ;;  %v4662_v31 = vmul.f32 -1.442695, %v1331_v62  ;;  %v7300_v62 = vld [vmem:[#allocation10 + $0xc8] sm:$0xff]  ;;  %v7316_v1 = vld [vmem:[#allocation10 + $0x98] sm:$0xff] }
 0x28f   :  { %5784 = vtanh.f32 %v1177_v27  ;;  %v7365_v38 = vld [vmem:[#allocation10 + $0x8] sm:$0xff] }
 0x290   :  { %5786 = vpow2.f32 %v4662_v31  ;;  %v7308_v31 = vld [vmem:[#allocation10 + $0xb0] sm:$0xff] }
 0x29b   :  { %v5783_v20 = vpop.eup %5782 }
 0x29c   :  { %v5785_v36 = vpop.eup %5784  ;;  %v1328_v18 = vadd.f32 1.0, %v5783_v20  ;;  %v7320_v20 = vld [vmem:[#allocation10 + $0x90] sm:$0xff] }
 0x29d   :  { %v1180_v47 = vmul.f32 %v5785_v36, %v1179_v58  ;;  %v7254_v58 = vld [vmem:[#allocation10 + $0x150] sm:$0xff]  ;;  %v7328_v36 = vld [vmem:[#allocation10 + $0x78] sm:$0xff] }
 0x29e   :  { %5788 = vrcp.f32 %v1328_v18  ;;  %v7258_v18 = vld [vmem:[#allocation10 + $0x140] sm:$0xff] }
 0x29f   :  { %v7242_v51 = vadd.f32 %v1181_v63, %v1180_v47  ;;  %v5787_v47 = vpop.eup %5786  ;;  %v7336_v63 = vld [vmem:[#allocation10 + $0x60] sm:$0xff] }
 0x2a1   :  { %9544 = vst [vmem:[#allocation59_spill] sm:$0xff] %v7242_v51  ;;  %1412 = vmatmul.mubr.f32.vlgmr.msra.gmra.mxu1 %v7242_v51  ;;  %5212 = vmatmul.mubr.f32.vlgmr.msra.gmra.mxu0 %v7242_v51 }
 0x2a2   :  { %1510 = vmatpush1.msra.mxu1 %v7246_v49  ;;  %5215 = vmatpush3.msra.mxu0 %v6754_v59  ;;  %v7262_v59 = vld [vmem:[#allocation10 + $0x138] sm:$0xff] }
 0x2a3   :  { %1511 = vmatprep.subr.mxu1 %v7250_v60  ;;  %5216 = vmatprep.subr.mxu0 %v9477_v57 }
 0x2a4   :  { %1512 = vmatpush1.msra.mxu1 %v7254_v58  ;;  %5217 = vmatpush3.msra.mxu0 %v6759_v50  ;;  %v1335_v50 = vadd.f32 1.0, %v5787_v47  ;;  %v7340_v47 = vld [vmem:[#allocation10 + $0x50] sm:$0xff] }
 0x2a5   :  { %1513 = vmatprep.subr.mxu1 %v7258_v18  ;;  %5218 = vmatprep.subr.mxu0 %v9477_v57 }
 0x2a6   :  { %1514 = vmatpush1.msra.mxu1 %v7262_v59  ;;  %5219 = vmatpush3.msra.mxu0 %v6766_v41  ;;  %v1321_v41 = vadd.f32 %v1320_v44, %v7030_v52  ;;  %5790 = vrcp.f32 %v1335_v50  ;;  %v7291_v44 = vld [vmem:[#allocation10 + $0xe0] sm:$0xff]  ;;  %v7348_v50 = vld [vmem:[#allocation10 + $0x38] sm:$0xff] }
 0x2a7   :  { %1515 = vmatprep.subr.mxu1 %v7266_v6  ;;  %5220 = vmatprep.subr.mxu0 %v9477_v57  ;;  %9546 = vst [vmem:[#allocation60_spill] sm:$0xff] %v7348_v50 }
 0x2a8   :  { %1516 = vmatpush1.msra.mxu1 %v7270_v8  ;;  %5221 = vmatpush3.msra.mxu0 %v6772_v42 }
 0x2a9   :  { %1517 = vmatprep.subr.mxu1 %v7274_v55  ;;  %5222 = vmatprep.subr.mxu0 %v9477_v57 }
 0x2aa   :  { %1518 = vmatpush1.msra.mxu1 %v7279_v45  ;;  %5223 = vmatpush3.msra.mxu0 %v6778_v2  ;;  %v9545_v2 = vld [vmem:[#allocation81_spill] sm:$0xff] }
 0x2ab   :  { %v5789_v3 = vpop.eup %5788  ;;  %1519 = vmatprep.subr.mxu1 %v7283_v40  ;;  %5224 = vmatprep.subr.mxu0 %v9477_v57  ;;  %9550 = vst [vmem:[#allocation81_spill] sm:$0xff] %v7365_v38 }
 0x2ac   :  { %v1338_v42 = vmul.f32 %v5789_v3, %v1321_v41  ;;  %1520 = vmatpush1.msra.mxu1 %v7287_v61  ;;  %5225 = vmatpush3.msra.mxu0 %v6784_v5  ;;  %v7304_v5 = vld [vmem:[#allocation10 + $0xc0] sm:$0xff] }
 0x2ad   :  { %1521 = vmatprep.subr.mxu1 %v7291_v44  ;;  %5226 = vmatprep.subr.mxu0 %v9477_v57 }
 0x2ae   :  { %v1339_v27 = vadd.f32 %v1338_v42, %v9545_v2  ;;  %1522 = vmatpush1.msra.mxu1 %v7296_v4  ;;  %5227 = vmatpush3.msra.mxu0 %v6790_v7  ;;  %v7312_v7 = vld [vmem:[#allocation10 + $0xa8] sm:$0xff]  ;;  %v7356_v42 = vld [vmem:[#allocation10 + $0x20] sm:$0xff] }
 0x2af   :  { %1523 = vmatprep.subr.mxu1 %v7300_v62  ;;  %5228 = vmatprep.subr.mxu0 %v9477_v57  ;;  %9548 = vst [vmem:[#allocation57_spill] sm:$0xff] %v7356_v42 }
 0x2b0   :  { %5792 = vtanh.f32 %v1339_v27  ;;  %1524 = vmatpush1.msra.mxu1 %v7304_v5  ;;  %5229 = vmatpush3.msra.mxu0 %v6796_v9  ;;  %v7324_v9 = vld [vmem:[#allocation10 + $0x80] sm:$0xff] }
 0x2b1   :  { %1525 = vmatprep.subr.mxu1 %v7308_v31  ;;  %5230 = vmatprep.subr.mxu0 %v9477_v57 }
 0x2b2   :  { %1526 = vmatpush1.msra.mxu1 %v7312_v7  ;;  %5231 = vmatpush3.msra.mxu0 %v6802_v11  ;;  %v7332_v11 = vld [vmem:[#allocation10 + $0x68] sm:$0xff] }
 0x2b3   :  { %1527 = vmatprep.subr.mxu1 %v7316_v1  ;;  %5232 = vmatprep.subr.mxu0 %v9477_v57 }
 0x2b4   :  { %1528 = vmatpush1.msra.mxu1 %v7320_v20  ;;  %5233 = vmatpush3.msra.mxu0 %v6808_v13  ;;  %v5791_v13 = vpop.eup %5790 }
 0x2b5   :  { %1529 = vmatprep.subr.mxu1 %v7324_v9  ;;  %5234 = vmatprep.subr.mxu0 %v9477_v57  ;;  %v1341_v41 = vsub.f32 1.0, %v5791_v13  ;;  %v1343_v27 = vmul.f32 %v5791_v13, %v7089_v32  ;;  %v7395_v13 = vld [vmem:[#allocation8 + $0x148] sm:$0xff]  ;;  %v7425_v32 = vld [vmem:[#allocation8 + $0xd0] sm:$0xff] }
 0x2b6   :  { %1530 = vmatpush1.msra.mxu1 %v7328_v36  ;;  %5235 = vmatpush3.msra.mxu0 %v6814_v15  ;;  %v7344_v15 = vld [vmem:[#allocation10 + $0x48] sm:$0xff]  ;;  %9553 = vst [vmem:[#allocation88_spill] sm:$0xff] %v7395_v13  ;;  %9558 = vst [vmem:[#allocation93_spill] sm:$0xff] %v7425_v32 }
 0x2b7   :  { %1531 = vmatprep.subr.mxu1 %v7332_v11  ;;  %5236 = vmatprep.subr.mxu0 %v9477_v57 }
 0x2b8   :  { %1532 = vmatpush1.msra.mxu1 %v7336_v63  ;;  %5237 = vmatpush3.msra.mxu0 %v6820_v17  ;;  %v7352_v17 = vld [vmem:[#allocation10 + $0x30] sm:$0xff] }
 0x2b9   :  { %1533 = vmatprep.subr.mxu1 %v7340_v47  ;;  %5238 = vmatprep.subr.mxu0 %v9477_v57  ;;  %9547 = vst [vmem:[#allocation66_spill] sm:$0xff] %v7352_v17 }
 0x2ba   :  { %1534 = vmatpush1.msra.mxu1 %v7344_v15  ;;  %5239 = vmatpush3.msra.mxu0 %v6826_v19  ;;  %v7360_v19 = vld [vmem:[#allocation10 + $0x18] sm:$0xff] }
 0x2bb   :  { %1535 = vmatprep.subr.mxu1 %v7348_v50  ;;  %5240 = vmatprep.subr.mxu0 %v9477_v57  ;;  %9549 = vst [vmem:[#allocation80_spill] sm:$0xff] %v7360_v19 }
 0x2bc   :  { %1536 = vmatpush1.msra.mxu1 %v7352_v17  ;;  %5241 = vmatpush3.msra.mxu0 %v6832_v21  ;;  %v7369_v21 = vld [vmem:[#allocation10] sm:$0xff] }
 0x2bd   :  { %v5793_v3 = vpop.eup %5792  ;;  %1537 = vmatprep.subr.mxu1 %v7356_v42  ;;  %5242 = vmatprep.subr.mxu0 %v9477_v57  ;;  %9551 = vst [vmem:[#allocation86_spill] sm:$0xff] %v7369_v21 }
 0x2be   :  { %1538 = vmatpush1.msra.mxu1 %v7360_v19  ;;  %5243 = vmatpush3.msra.mxu0 %v6838_v23  ;;  %v1342_v2 = vmul.f32 %v5793_v3, %v1341_v41  ;;  %v7383_v23 = vld [vmem:[#allocation8 + $0x178] sm:$0xff]  ;;  %v7401_v41 = vld [vmem:[#allocation8 + $0x130] sm:$0xff] }
 0x2bf   :  { %1539 = vmatprep.subr.mxu1 %v7365_v38  ;;  %5244 = vmatprep.subr.mxu0 %v9477_v57  ;;  %9554 = vst [vmem:[#allocation89_spill] sm:$0xff] %v7401_v41  ;;  %v7407_v3 = vld [vmem:[#allocation8 + $0x118] sm:$0xff] }
 0x2c0   :  { %1540 = vmatpush1.msra.mxu1 %v7369_v21  ;;  %1573 = vmatprep.mubr.f32.mxu1 %v9477_v57  ;;  %v7373_v42 = vadd.f32 %v1343_v27, %v1342_v2  ;;  %9555 = vst [vmem:[#allocation90_spill] sm:$0xff] %v7407_v3  ;;  %v7413_v2 = vld [vmem:[#allocation8 + $0x100] sm:$0xff]  ;;  %v7419_v27 = vld [vmem:[#allocation8 + $0xe8] sm:$0xff] }
 0x2c1   :  { %5245 = vmatpush3.msra.mxu0 %v6844_v25  ;;  %5246 = vmatprep.mubr.msk.f32.mxu0 %vm6322_vm0, %v9477_v57  ;;  %v7389_v25 = vld [vmem:[#allocation8 + $0x160] sm:$0xff]  ;;  %9556 = vst [vmem:[#allocation91_spill] sm:$0xff] %v7413_v2  ;;  %9557 = vst [vmem:[#allocation92_spill] sm:$0xff] %v7419_v27 }
 0x2c2   :  { %9552 = vst [vmem:[#allocation87_spill] sm:$0xff] %v7373_v42  ;;  %1574 = vmatmul.mubr.f32.vlgmr.msra.gmra.mxu1 %v7373_v42  ;;  %5247 = vmatmul.mubr.f32.vlgmr.msra.gmra.mxu0 %v7373_v42 }
 0x2c3   :  { %1673 = vmatprep.subr.mxu1 %v7096_v10  ;;  %5249 = vmatprep.subr.mxu0 %v9477_v57 }
 0x2c4   :  { %1674 = vmatpush1.msra.mxu1 %v7100_v24  ;;  %5250 = vmatpush3.msra.mxu0 %v7383_v23 }
 0x2c5   :  { %1675 = vmatprep.subr.mxu1 %v7104_v26  ;;  %5251 = vmatprep.subr.mxu0 %v9477_v57 }
 0x2c6   :  { %1676 = vmatpush1.msra.mxu1 %v7108_v30  ;;  %5252 = vmatpush3.msra.mxu0 %v7389_v25 }
 0x2c7   :  { %1677 = vmatprep.subr.mxu1 %v7112_v0  ;;  %5253 = vmatprep.subr.mxu0 %v9477_v57 }
 0x2c8   :  { %1678 = vmatpush1.msra.mxu1 %v7116_v54  ;;  %5254 = vmatpush3.msra.mxu0 %v7395_v13 }
 0x2c9   :  { %1679 = vmatprep.subr.mxu1 %v7120_v16  ;;  %5255 = vmatprep.subr.mxu0 %v9477_v57 }
 0x2ca   :  { %1680 = vmatpush1.msra.mxu1 %v7124_v35  ;;  %5256 = vmatpush3.msra.mxu0 %v7401_v41 }
 0x2cb   :  { %1681 = vmatprep.subr.mxu1 %v7128_v22  ;;  %5257 = vmatprep.subr.mxu0 %v9477_v57 }
 0x2cc   :  { %1682 = vmatpush1.msra.mxu1 %v7132_v43  ;;  %5258 = vmatpush3.msra.mxu0 %v7407_v3 }
 0x2cd   :  { %1683 = vmatprep.subr.mxu1 %v7136_v28  ;;  %5259 = vmatprep.subr.mxu0 %v9477_v57 }
 0x2ce   :  { %1684 = vmatpush1.msra.mxu1 %v7140_v56  ;;  %5260 = vmatpush3.msra.mxu0 %v7413_v2  ;;  %v9581_v2 = vld [vmem:[#allocation75_spill] sm:$0xff] }
 0x2cf   :  { %1685 = vmatprep.subr.mxu1 %v7144_v33  ;;  %5261 = vmatprep.subr.mxu0 %v9477_v57 }
 0x2d0   :  { %1686 = vmatpush1.msra.mxu1 %v7148_v37  ;;  %5262 = vmatpush3.msra.mxu0 %v7419_v27  ;;  %v7431_v37 = vld [vmem:[#allocation8 + $0xb8] sm:$0xff] }
 0x2d1   :  { %1687 = vmatprep.subr.mxu1 %v7152_v39  ;;  %5263 = vmatprep.subr.mxu0 %v9477_v57  ;;  %9559 = vst [vmem:[#allocation94_spill] sm:$0xff] %v7431_v37 }
 0x2d2   :  { %1688 = vmatpush1.msra.mxu1 %v7156_v48  ;;  %5264 = vmatpush3.msra.mxu0 %v7425_v32  ;;  %v7437_v48 = vld [vmem:[#allocation8 + $0xa0] sm:$0xff] }
 0x2d3   :  { %1689 = vmatprep.subr.mxu1 %v7160_v46  ;;  %5265 = vmatprep.subr.mxu0 %v9477_v57  ;;  %9560 = vst [vmem:[#allocation95_spill] sm:$0xff] %v7437_v48  ;;  %v9561_v46 = vld [vmem:[#allocation45_spill] sm:$0xff] }
 0x2d4   :  { %1690 = vmatpush1.msra.mxu1 %v7164_v14  ;;  %5266 = vmatpush3.msra.mxu0 %v7431_v37  ;;  %v7443_v14 = vld [vmem:[#allocation8 + $0x88] sm:$0xff] }
 0x2d5   :  { %1691 = vmatprep.subr.mxu1 %v7168_v53  ;;  %5267 = vmatprep.subr.mxu0 %v9477_v57  ;;  %9562 = vst [vmem:[#allocation96_spill] sm:$0xff] %v7443_v14  ;;  %v9563_v37 = vld [vmem:[#allocation48_spill] sm:$0xff]  ;;  %v9564_v53 = vld [vmem:[#allocation49_spill] sm:$0xff] }
 0x2d6   :  { %1692 = vmatpush1.msra.mxu1 %v7172_v34  ;;  %5268 = vmatpush3.msra.mxu0 %v7437_v48  ;;  %v7449_v34 = vld [vmem:[#allocation8 + $0x70] sm:$0xff]  ;;  %v9566_v48 = vld [vmem:[#allocation51_spill] sm:$0xff] }
 0x2d7   :  { %1693 = vmatprep.subr.mxu1 %v7176_v12  ;;  %5269 = vmatprep.subr.mxu0 %v9477_v57  ;;  %9565 = vst [vmem:[#allocation97_spill] sm:$0xff] %v7449_v34  ;;  %v9567_v12 = vld [vmem:[#allocation34_spill] sm:$0xff] }
 0x2d8   :  { %1694 = vmatpush1.msra.mxu1 %v9561_v46  ;;  %5270 = vmatpush3.msra.mxu0 %v7443_v14  ;;  %v7455_v46 = vld [vmem:[#allocation8 + $0x58] sm:$0xff]  ;;  %v9569_v14 = vld [vmem:[#allocation37_spill] sm:$0xff] }
 0x2d9   :  { %1695 = vmatprep.subr.mxu1 %v9563_v37  ;;  %5271 = vmatprep.subr.mxu0 %v9477_v57  ;;  %9568 = vst [vmem:[#allocation98_spill] sm:$0xff] %v7455_v46  ;;  %v9570_v37 = vld [vmem:[#allocation40_spill] sm:$0xff] }
 0x2da   :  { %1696 = vmatpush1.msra.mxu1 %v9564_v53  ;;  %5272 = vmatpush3.msra.mxu0 %v7449_v34  ;;  %v7461_v53 = vld [vmem:[#allocation8 + $0x40] sm:$0xff] }
 0x2db   :  { %1697 = vmatprep.subr.mxu1 %v9566_v48  ;;  %5273 = vmatprep.subr.mxu0 %v9477_v57  ;;  %9571 = vst [vmem:[#allocation99_spill] sm:$0xff] %v7461_v53  ;;  %v9572_v34 = vld [vmem:[#allocation43_spill] sm:$0xff]  ;;  %v9573_v48 = vld [vmem:[#allocation46_spill] sm:$0xff] }
 0x2dc   :  { %1698 = vmatpush1.msra.mxu1 %v9567_v12  ;;  %5274 = vmatpush3.msra.mxu0 %v7455_v46  ;;  %v7467_v12 = vld [vmem:[#allocation8 + $0x28] sm:$0xff]  ;;  %v9575_v46 = vld [vmem:[#allocation47_spill] sm:$0xff] }
 0x2dd   :  { %1699 = vmatprep.subr.mxu1 %v9569_v14  ;;  %5275 = vmatprep.subr.mxu0 %v9477_v57  ;;  %9574 = vst [vmem:[#allocation100_spill] sm:$0xff] %v7467_v12  ;;  %v9576_v14 = vld [vmem:[#allocation85_spill] sm:$0xff] }
 0x2de   :  { %1700 = vmatpush1.msra.mxu1 %v9570_v37  ;;  %5276 = vmatpush3.msra.mxu0 %v7461_v53  ;;  %v7474_v37 = vld [vmem:[#allocation8 + $0x10] sm:$0xff] }
 0x2df   :  { %1701 = vmatprep.subr.mxu1 %v9572_v34  ;;  %5277 = vmatprep.subr.mxu0 %v9477_v57  ;;  %9577 = vst [vmem:[#allocation101_spill] sm:$0xff] %v7474_v37 }
 0x2e0   :  { %1702 = vmatpush1.msra.mxu1 %v9573_v48  ;;  %5278 = vmatpush3.msra.mxu0 %v7467_v12  ;;  %v9578_v48 = vld [vmem:[#allocation50_spill] sm:$0xff] }
 0x2e1   :  { %1703 = vmatprep.subr.mxu1 %v9575_v46  ;;  %5279 = vmatprep.subr.mxu0 %v9477_v57  ;;  %v9579_v46 = vld [vmem:[#allocation71_spill] sm:$0xff] }
 0x2e2   :  { %1704 = vmatpush1.msra.mxu1 %v9576_v14  ;;  %1737 = vmatprep.mubr.f32.mxu1 %v9477_v57  ;;  %v9580_v14 = vld [vmem:[#allocation63_spill] sm:$0xff] }
 0x2e3   :  { %5280 = vmatpush3.msra.mxu0 %v7474_v37  ;;  %5281 = vmatprep.mubr.msk.f32.mxu0 %vm6322_vm0, %v9477_v57  ;;  %v9582_v37 = vld [vmem:[#allocation64_spill] sm:$0xff] }
 0x2e4   :  { %1835 = vmatprep.subr.mxu1 %v9578_v48  ;;  %5284 = vmatprep.subr.mxu0 %v9477_v57 }
 0x361   :  { %v1413_v12 = vpop.f32.mrf.mxu1  ;;  %v1484_v34 = vpop.f32.mrf.mxu0 }
 0x362   :  { %v1414_v53 = vadd.f32 %v1413_v12, %v9579_v46  ;;  %v9583_v12 = vld [vmem:[#allocation82_spill] sm:$0xff] }
 0x363   :  { %v1415_v32 = vpop.f32.mrf.mxu1  ;;  %v5213_v39 = vpop.f32.mrf.mxu0 }
 0x364   :  { %v1488_v27 = vadd.f32 %v1414_v53, %v9580_v14  ;;  %v1416_v56 = vadd.f32 %v1415_v32, %v9581_v2  ;;  %v9584_v39 = vld [vmem:[#allocation83_spill] sm:$0xff]  ;;  %v9585_v32 = vld [vmem:[#allocation62_spill] sm:$0xff] }
 0x365   :  { %v1485_v13 = vadd.f32 %v1484_v34, %v9584_v39 }
 0x366   :  { %v4663_v33 = vmul.f32 -1.442695, %v1488_v27  ;;  %v1495_v28 = vadd.f32 %v1416_v56, %v9582_v37 }
 0x368   :  { %5794 = vpow2.f32 %v4663_v33  ;;  %v4664_v3 = vmul.f32 -1.442695, %v1495_v28 }
 0x36a   :  { %5796 = vpow2.f32 %v4664_v3 }
 0x375   :  { %v5795_v43 = vpop.eup %5794 }
 0x376   :  { %v1492_v48 = vadd.f32 1.0, %v5795_v43  ;;  %v9586_v43 = vld [vmem:[#allocation61_spill] sm:$0xff] }
 0x377   :  { %v5797_v22 = vpop.eup %5796 }
 0x378   :  { %5798 = vrcp.f32 %v1492_v48  ;;  %v1499_v41 = vadd.f32 1.0, %v5797_v22  ;;  %v9587_v22 = vld [vmem:[#allocation78_spill] sm:$0xff] }
 0x37a   :  { %5800 = vrcp.f32 %v1499_v41  ;;  %v7497_v41 = vld [vmem:[#allocation10 + $0x178] sm:$0xff] }
 0x382   :  { %v1575_v35 = vpop.f32.mrf.mxu1  ;;  %v1646_v16 = vpop.f32.mrf.mxu0 }
 0x383   :  { %v1576_v46 = vadd.f32 %v1575_v35, %v9583_v12 }
 0x384   :  { %v1577_v14 = vpop.f32.mrf.mxu1  ;;  %v5248_v53 = vpop.f32.mrf.mxu0 }
 0x385   :  { %v5799_v27 = vpop.eup %5798  ;;  %v1650_v33 = vadd.f32 %v1576_v46, %v9585_v32  ;;  %v1578_v56 = vadd.f32 %v1577_v14, %v7011_v29  ;;  %v7515_v14 = vld [vmem:[#allocation10 + $0x130] sm:$0xff]  ;;  %v7522_v32 = vld [vmem:[#allocation10 + $0x118] sm:$0xff] }
 0x386   :  { %v1502_v2 = vmul.f32 %v5799_v27, %v1485_v13  ;;  %v1647_v27 = vadd.f32 %v1646_v16, %v7030_v52  ;;  %v9588_v16 = vld [vmem:[#allocation79_spill] sm:$0xff] }
 0x387   :  { %v4665_v28 = vmul.f32 -1.442695, %v1650_v33  ;;  %v1657_v48 = vadd.f32 %v1578_v56, %v9587_v22  ;;  %v5801_v35 = vpop.eup %5800  ;;  %v7528_v56 = vld [vmem:[#allocation10 + $0x100] sm:$0xff]  ;;  %v7541_v22 = vld [vmem:[#allocation10 + $0xd0] sm:$0xff] }
 0x388   :  { %v1503_v37 = vadd.f32 %v1502_v2, %v9586_v43  ;;  %v1505_v39 = vsub.f32 1.0, %v5801_v35  ;;  %v1507_v46 = vmul.f32 %v5801_v35, %v7242_v51  ;;  %v7503_v2 = vld [vmem:[#allocation10 + $0x160] sm:$0xff]  ;;  %v7559_v35 = vld [vmem:[#allocation10 + $0x88] sm:$0xff] }
 0x389   :  { %5802 = vpow2.f32 %v4665_v28  ;;  %v4666_v3 = vmul.f32 -1.442695, %v1657_v48  ;;  %v7547_v48 = vld [vmem:[#allocation10 + $0xb8] sm:$0xff] }
 0x38a   :  { %5804 = vtanh.f32 %v1503_v37  ;;  %v7535_v37 = vld [vmem:[#allocation10 + $0xe8] sm:$0xff] }
 0x38b   :  { %5806 = vpow2.f32 %v4666_v3  ;;  %v7553_v3 = vld [vmem:[#allocation10 + $0xa0] sm:$0xff] }
 0x396   :  { %v5803_v34 = vpop.eup %5802 }
 0x397   :  { %v5805_v53 = vpop.eup %5804  ;;  %v1654_v12 = vadd.f32 1.0, %v5803_v34  ;;  %v7565_v34 = vld [vmem:[#allocation10 + $0x70] sm:$0xff] }
 0x398   :  { %v1506_v54 = vmul.f32 %v5805_v53, %v1505_v39 }
 0x399   :  { %5808 = vrcp.f32 %v1654_v12  ;;  %v7509_v12 = vld [vmem:[#allocation10 + $0x148] sm:$0xff] }
 0x39a   :  { %v7492_v13 = vadd.f32 %v1507_v46, %v1506_v54  ;;  %v5807_v54 = vpop.eup %5806  ;;  %v7571_v46 = vld [vmem:[#allocation10 + $0x58] sm:$0xff] }
 0x39b   :  { %v1661_v39 = vadd.f32 1.0, %v5807_v54  ;;  %v7577_v54 = vld [vmem:[#allocation10 + $0x40] sm:$0xff] }
 0x39c   :  { %1738 = vmatmul.mubr.f32.vlgmr.msra.gmra.mxu1 %v7492_v13  ;;  %5282 = vmatmul.mubr.f32.vlgmr.msra.gmra.mxu0 %v7492_v13  ;;  %9589 = vst [vmem:[#allocation63_spill] sm:$0xff] %v7577_v54 }
 0x39d   :  { %1836 = vmatpush1.msra.mxu1 %v7246_v49  ;;  %5285 = vmatpush3.msra.mxu0 %v7497_v41  ;;  %5810 = vrcp.f32 %v1661_v39 }
 0x39e   :  { %1837 = vmatprep.subr.mxu1 %v7250_v60  ;;  %5286 = vmatprep.subr.mxu0 %v9477_v57 }
 0x39f   :  { %1838 = vmatpush1.msra.mxu1 %v7254_v58  ;;  %5287 = vmatpush3.msra.mxu0 %v7503_v2 }
 0x3a0   :  { %1839 = vmatprep.subr.mxu1 %v7258_v18  ;;  %5288 = vmatprep.subr.mxu0 %v9477_v57 }
 0x3a1   :  { %1840 = vmatpush1.msra.mxu1 %v7262_v59  ;;  %5289 = vmatpush3.msra.mxu0 %v7509_v12 }
 0x3a2   :  { %1841 = vmatprep.subr.mxu1 %v7266_v6  ;;  %5290 = vmatprep.subr.mxu0 %v9477_v57 }
 0x3a3   :  { %1842 = vmatpush1.msra.mxu1 %v7270_v8  ;;  %5291 = vmatpush3.msra.mxu0 %v7515_v14 }
 0x3a4   :  { %1843 = vmatprep.subr.mxu1 %v7274_v55  ;;  %5292 = vmatprep.subr.mxu0 %v9477_v57 }
 0x3a5   :  { %1844 = vmatpush1.msra.mxu1 %v7279_v45  ;;  %5293 = vmatpush3.msra.mxu0 %v7522_v32 }
 0x3a6   :  { %v5809_v33 = vpop.eup %5808  ;;  %1845 = vmatprep.subr.mxu1 %v7283_v40  ;;  %5294 = vmatprep.subr.mxu0 %v9477_v57 }
 0x3a7   :  { %v1664_v28 = vmul.f32 %v5809_v33, %v1647_v27  ;;  %1846 = vmatpush1.msra.mxu1 %v7287_v61  ;;  %5295 = vmatpush3.msra.mxu0 %v7528_v56  ;;  %v9590_v33 = vld [vmem:[#allocation57_spill] sm:$0xff] }
 0x3a8   :  { %1847 = vmatprep.subr.mxu1 %v7291_v44  ;;  %5296 = vmatprep.subr.mxu0 %v9477_v57 }
 0x3a9   :  { %v1665_v43 = vadd.f32 %v1664_v28, %v9588_v16  ;;  %1848 = vmatpush1.msra.mxu1 %v7296_v4  ;;  %5297 = vmatpush3.msra.mxu0 %v7535_v37  ;;  %v7583_v28 = vld [vmem:[#allocation10 + $0x28] sm:$0xff] }
 0x3aa   :  { %1849 = vmatprep.subr.mxu1 %v7300_v62  ;;  %5298 = vmatprep.subr.mxu0 %v9477_v57  ;;  %v5811_v53 = vpop.eup %5810  ;;  %9591 = vst [vmem:[#allocation64_spill] sm:$0xff] %v7583_v28 }
 0x3ab   :  { %5812 = vtanh.f32 %v1665_v43  ;;  %1850 = vmatpush1.msra.mxu1 %v7304_v5  ;;  %5299 = vmatpush3.msra.mxu0 %v7541_v22  ;;  %v1667_v39 = vsub.f32 1.0, %v5811_v53  ;;  %v1669_v43 = vmul.f32 %v5811_v53, %v7373_v42  ;;  %v9594_v53 = vld [vmem:[#allocation25_spill] sm:$0xff] }
 0x3ac   :  { %1851 = vmatprep.subr.mxu1 %v7308_v31  ;;  %5300 = vmatprep.subr.mxu0 %v9477_v57 }
 0x3ad   :  { %1852 = vmatpush1.msra.mxu1 %v7312_v7  ;;  %5301 = vmatpush3.msra.mxu0 %v7547_v48 }
 0x3ae   :  { %1853 = vmatprep.subr.mxu1 %v7316_v1  ;;  %5302 = vmatprep.subr.mxu0 %v9477_v57 }
 0x3af   :  { %1854 = vmatpush1.msra.mxu1 %v7320_v20  ;;  %5303 = vmatpush3.msra.mxu0 %v7553_v3 }
 0x3b0   :  { %1855 = vmatprep.subr.mxu1 %v7324_v9  ;;  %5304 = vmatprep.subr.mxu0 %v9477_v57 }
 0x3b1   :  { %1856 = vmatpush1.msra.mxu1 %v7328_v36  ;;  %5305 = vmatpush3.msra.mxu0 %v7559_v35 }
 0x3b2   :  { %1857 = vmatprep.subr.mxu1 %v7332_v11  ;;  %5306 = vmatprep.subr.mxu0 %v9477_v57 }
 0x3b3   :  { %1858 = vmatpush1.msra.mxu1 %v7336_v63  ;;  %5307 = vmatpush3.msra.mxu0 %v7565_v34 }
 0x3b4   :  { %1859 = vmatprep.subr.mxu1 %v7340_v47  ;;  %5308 = vmatprep.subr.mxu0 %v9477_v57 }
 0x3b5   :  { %1860 = vmatpush1.msra.mxu1 %v7344_v15  ;;  %5309 = vmatpush3.msra.mxu0 %v7571_v46 }
 0x3b6   :  { %1861 = vmatprep.subr.mxu1 %v7348_v50  ;;  %5310 = vmatprep.subr.mxu0 %v9477_v57 }
 0x3b7   :  { %1862 = vmatpush1.msra.mxu1 %v7352_v17  ;;  %5311 = vmatpush3.msra.mxu0 %v7577_v54 }
 0x3b8   :  { %v5813_v27 = vpop.eup %5812  ;;  %1863 = vmatprep.subr.mxu1 %v9590_v33  ;;  %5312 = vmatprep.subr.mxu0 %v9477_v57  ;;  %v7593_v33 = vld [vmem:[#allocation10 + $0x10] sm:$0xff] }
 0x3b9   :  { %1864 = vmatpush1.msra.mxu1 %v7360_v19  ;;  %5313 = vmatpush3.msra.mxu0 %v7583_v28  ;;  %v1668_v16 = vmul.f32 %v5813_v27, %v1667_v39  ;;  %9593 = vst [vmem:[#allocation61_spill] sm:$0xff] %v7593_v33  ;;  %v9596_v39 = vld [vmem:[#allocation26_spill] sm:$0xff]  ;;  %v9603_v27 = vld [vmem:[#allocation31_spill] sm:$0xff] }
 0x3ba   :  { %1865 = vmatprep.subr.mxu1 %v7365_v38  ;;  %5314 = vmatprep.subr.mxu0 %v9477_v57 }
 0x3bb   :  { %1866 = vmatpush1.msra.mxu1 %v7369_v21  ;;  %1899 = vmatprep.mubr.f32.mxu1 %v9477_v57  ;;  %v7591_v51 = vadd.f32 %v1669_v43, %v1668_v16  ;;  %v9604_v16 = vld [vmem:[#allocation91_spill] sm:$0xff]  ;;  %v9605_v43 = vld [vmem:[#allocation32_spill] sm:$0xff] }
 0x3bc   :  { %5315 = vmatpush3.msra.mxu0 %v7593_v33  ;;  %5316 = vmatprep.mubr.msk.f32.mxu0 %vm6322_vm0, %v9477_v57 }
 0x3bd   :  { %9592 = vst [vmem:[#allocation62_spill] sm:$0xff] %v7591_v51  ;;  %1900 = vmatmul.mubr.f32.vlgmr.msra.gmra.mxu1 %v7591_v51  ;;  %5317 = vmatmul.mubr.f32.vlgmr.msra.gmra.mxu0 %v7591_v51 }
 0x3be   :  { %1999 = vmatprep.subr.mxu1 %v7096_v10  ;;  %5319 = vmatprep.subr.mxu0 %v9477_v57  ;;  %v9595_v10 = vld [vmem:[#allocation88_spill] sm:$0xff] }
 0x3bf   :  { %2000 = vmatpush1.msra.mxu1 %v7100_v24  ;;  %5320 = vmatpush3.msra.mxu0 %v7383_v23  ;;  %v9597_v24 = vld [vmem:[#allocation27_spill] sm:$0xff]  ;;  %v9599_v23 = vld [vmem:[#allocation28_spill] sm:$0xff] }
 0x3c0   :  { %2001 = vmatprep.subr.mxu1 %v7104_v26  ;;  %5321 = vmatprep.subr.mxu0 %v9477_v57  ;;  %v9598_v26 = vld [vmem:[#allocation89_spill] sm:$0xff] }
 0x3c1   :  { %2002 = vmatpush1.msra.mxu1 %v7108_v30  ;;  %5322 = vmatpush3.msra.mxu0 %v7389_v25  ;;  %v9600_v30 = vld [vmem:[#allocation29_spill] sm:$0xff]  ;;  %v9602_v25 = vld [vmem:[#allocation30_spill] sm:$0xff] }
 0x3c2   :  { %2003 = vmatprep.subr.mxu1 %v7112_v0  ;;  %5323 = vmatprep.subr.mxu0 %v9477_v57  ;;  %v9601_v0 = vld [vmem:[#allocation90_spill] sm:$0xff] }
 0x3c3   :  { %2004 = vmatpush1.msra.mxu1 %v9594_v53  ;;  %5324 = vmatpush3.msra.mxu0 %v9595_v10  ;;  %v9606_v53 = vld [vmem:[#allocation33_spill] sm:$0xff]  ;;  %v9607_v10 = vld [vmem:[#allocation92_spill] sm:$0xff] }
 0x3c4   :  { %2005 = vmatprep.subr.mxu1 %v9596_v39  ;;  %5325 = vmatprep.subr.mxu0 %v9477_v57  ;;  %v9608_v39 = vld [vmem:[#allocation35_spill] sm:$0xff] }
 0x3c5   :  { %2006 = vmatpush1.msra.mxu1 %v9597_v24  ;;  %5326 = vmatpush3.msra.mxu0 %v9598_v26  ;;  %v9609_v24 = vld [vmem:[#allocation36_spill] sm:$0xff]  ;;  %v9610_v26 = vld [vmem:[#allocation93_spill] sm:$0xff] }
 0x3c6   :  { %2007 = vmatprep.subr.mxu1 %v9599_v23  ;;  %5327 = vmatprep.subr.mxu0 %v9477_v57  ;;  %v9611_v23 = vld [vmem:[#allocation38_spill] sm:$0xff] }
 0x3c7   :  { %2008 = vmatpush1.msra.mxu1 %v9600_v30  ;;  %5328 = vmatpush3.msra.mxu0 %v9601_v0  ;;  %v9612_v30 = vld [vmem:[#allocation39_spill] sm:$0xff]  ;;  %v9613_v0 = vld [vmem:[#allocation94_spill] sm:$0xff] }
 0x3c8   :  { %2009 = vmatprep.subr.mxu1 %v9602_v25  ;;  %5329 = vmatprep.subr.mxu0 %v9477_v57  ;;  %v9614_v25 = vld [vmem:[#allocation41_spill] sm:$0xff] }
 0x3c9   :  { %2010 = vmatpush1.msra.mxu1 %v9603_v27  ;;  %5330 = vmatpush3.msra.mxu0 %v9604_v16  ;;  %v9615_v27 = vld [vmem:[#allocation42_spill] sm:$0xff]  ;;  %v9616_v16 = vld [vmem:[#allocation95_spill] sm:$0xff] }
 0x3ca   :  { %2011 = vmatprep.subr.mxu1 %v9605_v43  ;;  %5331 = vmatprep.subr.mxu0 %v9477_v57  ;;  %v9617_v43 = vld [vmem:[#allocation44_spill] sm:$0xff] }
 0x3cb   :  { %2012 = vmatpush1.msra.mxu1 %v9606_v53  ;;  %5332 = vmatpush3.msra.mxu0 %v9607_v10  ;;  %v9618_v53 = vld [vmem:[#allocation45_spill] sm:$0xff]  ;;  %v9619_v10 = vld [vmem:[#allocation96_spill] sm:$0xff] }
 0x3cc   :  { %2013 = vmatprep.subr.mxu1 %v9608_v39  ;;  %5333 = vmatprep.subr.mxu0 %v9477_v57  ;;  %v9620_v39 = vld [vmem:[#allocation48_spill] sm:$0xff] }
 0x3cd   :  { %2014 = vmatpush1.msra.mxu1 %v9609_v24  ;;  %5334 = vmatpush3.msra.mxu0 %v9610_v26  ;;  %v9621_v24 = vld [vmem:[#allocation49_spill] sm:$0xff] }
 0x3ce   :  { %2015 = vmatprep.subr.mxu1 %v9611_v23  ;;  %5335 = vmatprep.subr.mxu0 %v9477_v57  ;;  %v9622_v26 = vld [vmem:[#allocation97_spill] sm:$0xff]  ;;  %v9623_v23 = vld [vmem:[#allocation51_spill] sm:$0xff] }
 0x3cf   :  { %2016 = vmatpush1.msra.mxu1 %v9612_v30  ;;  %5336 = vmatpush3.msra.mxu0 %v9613_v0  ;;  %v9624_v30 = vld [vmem:[#allocation34_spill] sm:$0xff] }
 0x3d0   :  { %2017 = vmatprep.subr.mxu1 %v9614_v25  ;;  %5337 = vmatprep.subr.mxu0 %v9477_v57  ;;  %v9625_v0 = vld [vmem:[#allocation98_spill] sm:$0xff]  ;;  %v9626_v25 = vld [vmem:[#allocation37_spill] sm:$0xff] }
 0x3d1   :  { %2018 = vmatpush1.msra.mxu1 %v9615_v27  ;;  %5338 = vmatpush3.msra.mxu0 %v9616_v16  ;;  %v9627_v27 = vld [vmem:[#allocation40_spill] sm:$0xff]  ;;  %v9628_v16 = vld [vmem:[#allocation99_spill] sm:$0xff] }
 0x3d2   :  { %2019 = vmatprep.subr.mxu1 %v9617_v43  ;;  %5339 = vmatprep.subr.mxu0 %v9477_v57  ;;  %v9629_v43 = vld [vmem:[#allocation43_spill] sm:$0xff] }
 0x3d3   :  { %2020 = vmatpush1.msra.mxu1 %v9618_v53  ;;  %5340 = vmatpush3.msra.mxu0 %v9619_v10  ;;  %v9630_v53 = vld [vmem:[#allocation46_spill] sm:$0xff]  ;;  %v9631_v10 = vld [vmem:[#allocation100_spill] sm:$0xff] }
 0x3d4   :  { %2021 = vmatprep.subr.mxu1 %v9620_v39  ;;  %5341 = vmatprep.subr.mxu0 %v9477_v57  ;;  %v9632_v39 = vld [vmem:[#allocation47_spill] sm:$0xff] }
 0x3d5   :  { %2022 = vmatpush1.msra.mxu1 %v9621_v24  ;;  %5342 = vmatpush3.msra.mxu0 %v9622_v26  ;;  %v9633_v24 = vld [vmem:[#allocation85_spill] sm:$0xff] }
 0x3d6   :  { %2023 = vmatprep.subr.mxu1 %v9623_v23  ;;  %5343 = vmatprep.subr.mxu0 %v9477_v57  ;;  %v9634_v26 = vld [vmem:[#allocation101_spill] sm:$0xff]  ;;  %v9635_v23 = vld [vmem:[#allocation50_spill] sm:$0xff] }
 0x3d7   :  { %2024 = vmatpush1.msra.mxu1 %v9624_v30  ;;  %5344 = vmatpush3.msra.mxu0 %v9625_v0 }
 0x3d8   :  { %2025 = vmatprep.subr.mxu1 %v9626_v25  ;;  %5345 = vmatprep.subr.mxu0 %v9477_v57  ;;  %v9636_v25 = vld [vmem:[#allocation71_spill] sm:$0xff] }
 0x3d9   :  { %2026 = vmatpush1.msra.mxu1 %v9627_v27  ;;  %5346 = vmatpush3.msra.mxu0 %v9628_v16 }
 0x3da   :  { %2027 = vmatprep.subr.mxu1 %v9629_v43  ;;  %5347 = vmatprep.subr.mxu0 %v9477_v57 }
 0x3db   :  { %2028 = vmatpush1.msra.mxu1 %v9630_v53  ;;  %5348 = vmatpush3.msra.mxu0 %v9631_v10  ;;  %v9637_v53 = vld [vmem:[#allocation67_spill] sm:$0xff] }
 0x3dc   :  { %2029 = vmatprep.subr.mxu1 %v9632_v39  ;;  %5349 = vmatprep.subr.mxu0 %v9477_v57 }
 0x3dd   :  { %2030 = vmatpush1.msra.mxu1 %v9633_v24  ;;  %2063 = vmatprep.mubr.f32.mxu1 %v9477_v57  ;;  %v9638_v24 = vld [vmem:[#allocation75_spill] sm:$0xff] }
 0x3de   :  { %5350 = vmatpush3.msra.mxu0 %v9634_v26  ;;  %5351 = vmatprep.mubr.msk.f32.mxu0 %vm6322_vm0, %v9477_v57  ;;  %v9639_v26 = vld [vmem:[#allocation68_spill] sm:$0xff] }
 0x3df   :  { %2161 = vmatprep.subr.mxu1 %v9635_v23  ;;  %5354 = vmatprep.subr.mxu0 %v9477_v57 }
 0x45c   :  { %v1739_v30 = vpop.f32.mrf.mxu1  ;;  %v1810_v0 = vpop.f32.mrf.mxu0 }
 0x45d   :  { %v1740_v27 = vadd.f32 %v1739_v30, %v9636_v25  ;;  %v9640_v30 = vld [vmem:[#allocation82_spill] sm:$0xff] }
 0x45e   :  { %v1741_v16 = vpop.f32.mrf.mxu1  ;;  %v5283_v43 = vpop.f32.mrf.mxu0 }
 0x45f   :  { %v1814_v10 = vadd.f32 %v1740_v27, %v9637_v53  ;;  %v1742_v42 = vadd.f32 %v1741_v16, %v9638_v24  ;;  %v9641_v43 = vld [vmem:[#allocation83_spill] sm:$0xff]  ;;  %v9642_v16 = vld [vmem:[#allocation58_spill] sm:$0xff] }
 0x460   :  { %v1811_v17 = vadd.f32 %v1810_v0, %v9641_v43 }
 0x461   :  { %v4667_v39 = vmul.f32 -1.442695, %v1814_v10  ;;  %v1821_v33 = vadd.f32 %v1742_v42, %v9639_v26 }
 0x463   :  { %5814 = vpow2.f32 %v4667_v39  ;;  %v4668_v21 = vmul.f32 -1.442695, %v1821_v33 }
 0x465   :  { %5816 = vpow2.f32 %v4668_v21 }
 0x470   :  { %v5815_v38 = vpop.eup %5814 }
 0x471   :  { %v1818_v23 = vadd.f32 1.0, %v5815_v38  ;;  %v9643_v38 = vld [vmem:[#allocation65_spill] sm:$0xff] }
 0x472   :  { %v5817_v51 = vpop.eup %5816 }
 0x473   :  { %5818 = vrcp.f32 %v1818_v23  ;;  %v1825_v28 = vadd.f32 1.0, %v5817_v51  ;;  %v9644_v51 = vld [vmem:[#allocation76_spill] sm:$0xff] }
 0x475   :  { %5820 = vrcp.f32 %v1825_v28 }
 0x47d   :  { %v1901_v19 = vpop.f32.mrf.mxu1  ;;  %v1972_v54 = vpop.f32.mrf.mxu0 }
 0x47e   :  { %v1902_v25 = vadd.f32 %v1901_v19, %v9640_v30 }
 0x47f   :  { %v1903_v27 = vpop.f32.mrf.mxu1  ;;  %v5318_v53 = vpop.f32.mrf.mxu0 }
 0x480   :  { %v5819_v10 = vpop.eup %5818  ;;  %v1976_v39 = vadd.f32 %v1902_v25, %v9642_v16  ;;  %v1904_v21 = vadd.f32 %v1903_v27, %v7011_v29  ;;  %v2398_v27 = vld [vmem:[#allocation11 + $0x1f8] sm:$0xff]  ;;  %v2397_v16 = vld [vmem:[#allocation11 + $0x1f0] sm:$0xff] }
 0x481   :  { %v1828_v24 = vmul.f32 %v5819_v10, %v1811_v17  ;;  %v2395_v10 = vld [vmem:[#allocation11 + $0x1e0] sm:$0xff] }
 0x482   :  { %v4669_v42 = vmul.f32 -1.442695, %v1976_v39  ;;  %v1983_v26 = vadd.f32 %v1904_v21, %v9644_v51  ;;  %v5821_v19 = vpop.eup %5820  ;;  %v2390_v39 = vld [vmem:[#allocation11 + $0x1b8] sm:$0xff]  ;;  %v2389_v21 = vld [vmem:[#allocation11 + $0x1b0] sm:$0xff] }
 0x483   :  { %v1829_v33 = vadd.f32 %v1828_v24, %v9643_v38  ;;  %v1831_v43 = vsub.f32 1.0, %v5821_v19  ;;  %v1833_v17 = vmul.f32 %v5821_v19, %v7492_v13  ;;  %v2401_v24 = vld [vmem:[#allocation11 + $0x210] sm:$0xff]  ;;  %v2391_v38 = vld [vmem:[#allocation11 + $0x1c0] sm:$0xff]  ;;  %v2386_v51 = vld [vmem:[#allocation11 + $0x198] sm:$0xff] }
 0x484   :  { %5822 = vpow2.f32 %v4669_v42  ;;  %v4670_v23 = vmul.f32 -1.442695, %v1983_v26  ;;  %v2392_v42 = vld [vmem:[#allocation11 + $0x1c8] sm:$0xff]  ;;  %v2383_v26 = vld [vmem:[#allocation11 + $0x180] sm:$0xff]  ;;  %v2378_v19 = vld [vmem:[#allocation11 + $0x158] sm:$0xff] }
 0x485   :  { %5824 = vtanh.f32 %v1829_v33  ;;  %v2384_v33 = vld [vmem:[#allocation11 + $0x188] sm:$0xff] }
 0x486   :  { %5826 = vpow2.f32 %v4670_v23  ;;  %v2385_v23 = vld [vmem:[#allocation11 + $0x190] sm:$0xff] }
 0x491   :  { %v5823_v0 = vpop.eup %5822 }
 0x492   :  { %v5825_v53 = vpop.eup %5824  ;;  %v1980_v30 = vadd.f32 1.0, %v5823_v0  ;;  %v2380_v0 = vld [vmem:[#allocation11 + $0x168] sm:$0xff] }
 0x493   :  { %v1832_v50 = vmul.f32 %v5825_v53, %v1831_v43  ;;  %v5827_v25 = vpop.eup %5826  ;;  %v2396_v43 = vld [vmem:[#allocation11 + $0x1e8] sm:$0xff]  ;;  %v2377_v53 = vld [vmem:[#allocation11 + $0x150] sm:$0xff] }
 0x494   :  { %5828 = vrcp.f32 %v1980_v30  ;;  %v2403_v30 = vld [vmem:[#allocation11 + $0x220] sm:$0xff] }
 0x495   :  { %v7680_v28 = vadd.f32 %v1833_v17, %v1832_v50  ;;  %v2427_v50 = vld [vmem:[#allocation11 + $0x2e0] sm:$0xff] }
 0x496   :  { %v2379_v17 = vld [vmem:[#allocation11 + $0x160] sm:$0xff] }
 0x497   :  { %2064 = vmatmul.mubr.f32.vlgmr.msra.gmra.mxu1 %v7680_v28  ;;  %5352 = vmatmul.mubr.f32.vlgmr.msra.gmra.mxu0 %v7680_v28 }
 0x498   :  { %2162 = vmatpush1.msra.mxu1 %v7246_v49  ;;  %5355 = vmatpush3.msra.mxu0 %v7497_v41  ;;  %v1987_v49 = vadd.f32 1.0, %v5827_v25  ;;  %v2420_v41 = vld [vmem:[#allocation11 + $0x2a8] sm:$0xff] }
 0x499   :  { %2163 = vmatprep.subr.mxu1 %v7250_v60  ;;  %5356 = vmatprep.subr.mxu0 %v9477_v57  ;;  %v1973_v60 = vadd.f32 %v1972_v54, %v7030_v52  ;;  %v2404_v54 = vld [vmem:[#allocation11 + $0x228] sm:$0xff] }
 0x49a   :  { %2164 = vmatpush1.msra.mxu1 %v7254_v58  ;;  %5357 = vmatpush3.msra.mxu0 %v7503_v2  ;;  %5830 = vrcp.f32 %v1987_v49  ;;  %v2422_v2 = vld [vmem:[#allocation11 + $0x2b8] sm:$0xff]  ;;  %v2372_v25 = vld [vmem:[#allocation11 + $0x128] sm:$0xff] }
 0x49b   :  { %2165 = vmatprep.subr.mxu1 %v7258_v18  ;;  %5358 = vmatprep.subr.mxu0 %v9477_v57  ;;  %v2374_v49 = vld [vmem:[#allocation11 + $0x138] sm:$0xff] }
 0x49c   :  { %2166 = vmatpush1.msra.mxu1 %v7262_v59  ;;  %5359 = vmatpush3.msra.mxu0 %v7509_v12  ;;  %v9645_v59 = vld [vmem:[#allocation77_spill] sm:$0xff]  ;;  %v2419_v12 = vld [vmem:[#allocation11 + $0x2a0] sm:$0xff] }
 0x49d   :  { %2167 = vmatprep.subr.mxu1 %v7266_v6  ;;  %5360 = vmatprep.subr.mxu0 %v9477_v57 }
 0x49e   :  { %2168 = vmatpush1.msra.mxu1 %v7270_v8  ;;  %5361 = vmatpush3.msra.mxu0 %v7515_v14  ;;  %v2421_v14 = vld [vmem:[#allocation11 + $0x2b0] sm:$0xff] }
 0x49f   :  { %2169 = vmatprep.subr.mxu1 %v7274_v55  ;;  %5362 = vmatprep.subr.mxu0 %v9477_v57  ;;  %v9646_v55 = vld [vmem:[#allocation60_spill] sm:$0xff] }
 0x4a0   :  { %2170 = vmatpush1.msra.mxu1 %v7279_v45  ;;  %5363 = vmatpush3.msra.mxu0 %v7522_v32  ;;  %v9647_v45 = vld [vmem:[#allocation66_spill] sm:$0xff] }
 0x4a1   :  { %v5829_v58 = vpop.eup %5828  ;;  %2171 = vmatprep.subr.mxu1 %v7283_v40  ;;  %5364 = vmatprep.subr.mxu0 %v9477_v57  ;;  %v9648_v40 = vld [vmem:[#allocation63_spill] sm:$0xff]  ;;  %v2414_v32 = vld [vmem:[#allocation11 + $0x278] sm:$0xff] }
 0x4a2   :  { %v1990_v18 = vmul.f32 %v5829_v58, %v1973_v60  ;;  %2172 = vmatpush1.msra.mxu1 %v7287_v61  ;;  %5365 = vmatpush3.msra.mxu0 %v7528_v56  ;;  %v2416_v56 = vld [vmem:[#allocation11 + $0x288] sm:$0xff]  ;;  %v2371_v60 = vld [vmem:[#allocation11 + $0x120] sm:$0xff]  ;;  %v2373_v58 = vld [vmem:[#allocation11 + $0x130] sm:$0xff] }
 0x4a3   :  { %2173 = vmatprep.subr.mxu1 %v7291_v44  ;;  %5366 = vmatprep.subr.mxu0 %v9477_v57 }
 0x4a4   :  { %v1991_v6 = vadd.f32 %v1990_v18, %v9645_v59  ;;  %2174 = vmatpush1.msra.mxu1 %v7296_v4  ;;  %5367 = vmatpush3.msra.mxu0 %v7535_v37  ;;  %v9649_v4 = vld [vmem:[#allocation57_spill] sm:$0xff]  ;;  %v2366_v18 = vld [vmem:[#allocation11 + $0xf8] sm:$0xff]  ;;  %v2368_v59 = vld [vmem:[#allocation11 + $0x108] sm:$0xff] }
 0x4a5   :  { %2175 = vmatprep.subr.mxu1 %v7300_v62  ;;  %5368 = vmatprep.subr.mxu0 %v9477_v57  ;;  %v9650_v62 = vld [vmem:[#allocation80_spill] sm:$0xff]  ;;  %v2413_v37 = vld [vmem:[#allocation11 + $0x270] sm:$0xff] }
 0x4a6   :  { %5832 = vtanh.f32 %v1991_v6  ;;  %2176 = vmatpush1.msra.mxu1 %v7304_v5  ;;  %5369 = vmatpush3.msra.mxu0 %v7541_v22  ;;  %v9651_v5 = vld [vmem:[#allocation64_spill] sm:$0xff]  ;;  %v2415_v22 = vld [vmem:[#allocation11 + $0x280] sm:$0xff]  ;;  %v2365_v6 = vld [vmem:[#allocation11 + $0xf0] sm:$0xff] }
 0x4a7   :  { %2177 = vmatprep.subr.mxu1 %v7308_v31  ;;  %5370 = vmatprep.subr.mxu0 %v9477_v57  ;;  %v5831_v8 = vpop.eup %5830 }
 0x4a8   :  { %2178 = vmatpush1.msra.mxu1 %v7312_v7  ;;  %5371 = vmatpush3.msra.mxu0 %v7547_v48  ;;  %v1993_v61 = vsub.f32 1.0, %v5831_v8  ;;  %v9652_v7 = vld [vmem:[#allocation62_spill] sm:$0xff]  ;;  %v2408_v48 = vld [vmem:[#allocation11 + $0x248] sm:$0xff] }
 0x4a9   :  { %2179 = vmatprep.subr.mxu1 %v7316_v1  ;;  %5372 = vmatprep.subr.mxu0 %v9477_v57  ;;  %v1995_v1 = vmul.f32 %v5831_v8, %v9652_v7  ;;  %v2367_v8 = vld [vmem:[#allocation11 + $0x100] sm:$0xff] }
 0x4aa   :  { %2180 = vmatpush1.msra.mxu1 %v7320_v20  ;;  %5373 = vmatpush3.msra.mxu0 %v7553_v3  ;;  %v9653_v20 = vld [vmem:[#allocation81_spill] sm:$0xff]  ;;  %v2410_v3 = vld [vmem:[#allocation11 + $0x258] sm:$0xff] }
 0x4ab   :  { %2181 = vmatprep.subr.mxu1 %v7324_v9  ;;  %5374 = vmatprep.subr.mxu0 %v9477_v57  ;;  %v9654_v9 = vld [vmem:[#allocation86_spill] sm:$0xff] }
 0x4ac   :  { %2182 = vmatpush1.msra.mxu1 %v7328_v36  ;;  %5375 = vmatpush3.msra.mxu0 %v7559_v35  ;;  %v2407_v35 = vld [vmem:[#allocation11 + $0x240] sm:$0xff] }
 0x4ad   :  { %2183 = vmatprep.subr.mxu1 %v7332_v11  ;;  %5376 = vmatprep.subr.mxu0 %v9477_v57  ;;  %v9655_v11 = vld [vmem:[#allocation61_spill] sm:$0xff] }
 0x4ae   :  { %2184 = vmatpush1.msra.mxu1 %v7336_v63  ;;  %5377 = vmatpush3.msra.mxu0 %v7565_v34  ;;  %v2426_v63 = vld [vmem:[#allocation11 + $0x2d8] sm:$0xff]  ;;  %v2409_v34 = vld [vmem:[#allocation11 + $0x250] sm:$0xff] }
 0x4af   :  { %2185 = vmatprep.subr.mxu1 %v7340_v47  ;;  %5378 = vmatprep.subr.mxu0 %v9477_v57  ;;  %v2428_v47 = vld [vmem:[#allocation11 + $0x2e8] sm:$0xff] }
 0x4b0   :  { %2186 = vmatpush1.msra.mxu1 %v7344_v15  ;;  %5379 = vmatpush3.msra.mxu0 %v7571_v46  ;;  %v2425_v15 = vld [vmem:[#allocation11 + $0x2d0] sm:$0xff]  ;;  %v2402_v46 = vld [vmem:[#allocation11 + $0x218] sm:$0xff] }
 0x4b1   :  { %2187 = vmatprep.subr.mxu1 %v9646_v55  ;;  %5380 = vmatprep.subr.mxu0 %v9477_v57  ;;  %v2360_v55 = vld [vmem:[#allocation11 + $0xc8] sm:$0xff] }
 0x4b2   :  { %2188 = vmatpush1.msra.mxu1 %v9647_v45  ;;  %5381 = vmatpush3.msra.mxu0 %v9648_v40  ;;  %v2362_v45 = vld [vmem:[#allocation11 + $0xd8] sm:$0xff]  ;;  %v2359_v40 = vld [vmem:[#allocation11 + $0xc0] sm:$0xff] }
 0x4b3   :  { %v5833_v44 = vpop.eup %5832  ;;  %2189 = vmatprep.subr.mxu1 %v9649_v4  ;;  %5382 = vmatprep.subr.mxu0 %v9477_v57  ;;  %v2356_v4 = vld [vmem:[#allocation11 + $0xa8] sm:$0xff] }
 0x4b4   :  { %2190 = vmatpush1.msra.mxu1 %v9650_v62  ;;  %5383 = vmatpush3.msra.mxu0 %v9651_v5  ;;  %v1994_v31 = vmul.f32 %v5833_v44, %v1993_v61  ;;  %v2361_v61 = vld [vmem:[#allocation11 + $0xd0] sm:$0xff]  ;;  %v2354_v44 = vld [vmem:[#allocation11 + $0x98] sm:$0xff]  ;;  %v2355_v5 = vld [vmem:[#allocation11 + $0xa0] sm:$0xff] }
 0x4b5   :  { %2191 = vmatprep.subr.mxu1 %v9653_v20  ;;  %5384 = vmatprep.subr.mxu0 %v9477_v57  ;;  %v2353_v62 = vld [vmem:[#allocation11 + $0x90] sm:$0xff]  ;;  %v2347_v20 = vld [vmem:[#allocation11 + $0x60] sm:$0xff] }
 0x4b6   :  { %2192 = vmatpush1.msra.mxu1 %v9654_v9  ;;  %2225 = vmatprep.mubr.f32.mxu1 %v9477_v57  ;;  %v7749_v36 = vadd.f32 %v1995_v1, %v1994_v31  ;;  %v2348_v31 = vld [vmem:[#allocation11 + $0x68] sm:$0xff]  ;;  %v2350_v1 = vld [vmem:[#allocation11 + $0x78] sm:$0xff]  ;;  %v2349_v9 = vld [vmem:[#allocation11 + $0x70] sm:$0xff] }
 0x4b7   :  { %5385 = vmatpush3.msra.mxu0 %v9655_v11  ;;  %5386 = vmatprep.mubr.msk.f32.mxu0 %vm6322_vm0, %v9477_v57  ;;  %v2342_v11 = vld [vmem:[#allocation11 + $0x38] sm:$0xff] }
 0x4b8   :  { %2226 = vmatmul.mubr.f32.vlgmr.msra.gmra.mxu1 %v7749_v36  ;;  %5387 = vmatmul.mubr.f32.vlgmr.msra.gmra.mxu0 %v7749_v36 }
 0x4b9   :  { %2559 = vmatprep.subr.mxu1 %v2426_v63  ;;  %2654 = vmatprep.subr.mxu0 %v2428_v47  ;;  %v2344_v63 = vld [vmem:[#allocation11 + $0x48] sm:$0xff]  ;;  %v2341_v47 = vld [vmem:[#allocation11 + $0x30] sm:$0xff] }
 0x4ba   :  { %2560 = vmatpush1.msra.mxu1 %v2425_v15  ;;  %2655 = vmatpush1.msra.mxu0 %v2427_v50  ;;  %v2343_v15 = vld [vmem:[#allocation11 + $0x40] sm:$0xff]  ;;  %v2336_v50 = vld [vmem:[#allocation11 + $0x8] sm:$0xff] }
 0x4bb   :  { %2561 = vmatprep.subr.mxu1 %v2420_v41  ;;  %2656 = vmatprep.subr.mxu0 %v2422_v2  ;;  %v2338_v41 = vld [vmem:[#allocation11 + $0x18] sm:$0xff]  ;;  %v2335_v2 = vld [vmem:[#allocation11] sm:$0xff] }
 0x4bc   :  { %2562 = vmatpush1.msra.mxu1 %v2419_v12  ;;  %2657 = vmatpush1.msra.mxu0 %v2421_v14  ;;  %v2337_v12 = vld [vmem:[#allocation11 + $0x10] sm:$0xff]  ;;  %v2522_v14 = vld [vmem:[#allocation11 + $0x5d8] sm:$0xff] }
 0x4bd   :  { %2563 = vmatprep.subr.mxu1 %v2414_v32  ;;  %2658 = vmatprep.subr.mxu0 %v2416_v56  ;;  %v2524_v32 = vld [vmem:[#allocation11 + $0x5e8] sm:$0xff]  ;;  %v2521_v56 = vld [vmem:[#allocation11 + $0x5d0] sm:$0xff] }
 0x4be   :  { %2564 = vmatpush1.msra.mxu1 %v2413_v37  ;;  %2659 = vmatpush1.msra.mxu0 %v2415_v22  ;;  %v2523_v37 = vld [vmem:[#allocation11 + $0x5e0] sm:$0xff]  ;;  %v2516_v22 = vld [vmem:[#allocation11 + $0x5a8] sm:$0xff] }
 0x4bf   :  { %2565 = vmatprep.subr.mxu1 %v2408_v48  ;;  %2660 = vmatprep.subr.mxu0 %v2410_v3  ;;  %v2518_v48 = vld [vmem:[#allocation11 + $0x5b8] sm:$0xff]  ;;  %v2515_v3 = vld [vmem:[#allocation11 + $0x5a0] sm:$0xff] }
 0x4c0   :  { %2566 = vmatpush1.msra.mxu1 %v2407_v35  ;;  %2661 = vmatpush1.msra.mxu0 %v2409_v34  ;;  %v2517_v35 = vld [vmem:[#allocation11 + $0x5b0] sm:$0xff]  ;;  %v2510_v34 = vld [vmem:[#allocation11 + $0x578] sm:$0xff] }
 0x4c1   :  { %2567 = vmatprep.subr.mxu1 %v2402_v46  ;;  %2662 = vmatprep.subr.mxu0 %v2404_v54  ;;  %v2512_v46 = vld [vmem:[#allocation11 + $0x588] sm:$0xff]  ;;  %v2509_v54 = vld [vmem:[#allocation11 + $0x570] sm:$0xff] }
 0x4c2   :  { %2568 = vmatpush1.msra.mxu1 %v2401_v24  ;;  %2663 = vmatpush1.msra.mxu0 %v2403_v30  ;;  %v2511_v24 = vld [vmem:[#allocation11 + $0x580] sm:$0xff]  ;;  %v2504_v30 = vld [vmem:[#allocation11 + $0x548] sm:$0xff] }
 0x4c3   :  { %2569 = vmatprep.subr.mxu1 %v2396_v43  ;;  %2664 = vmatprep.subr.mxu0 %v2398_v27  ;;  %v2506_v43 = vld [vmem:[#allocation11 + $0x558] sm:$0xff]  ;;  %v2503_v27 = vld [vmem:[#allocation11 + $0x540] sm:$0xff] }
 0x4c4   :  { %2570 = vmatpush1.msra.mxu1 %v2395_v10  ;;  %2665 = vmatpush1.msra.mxu0 %v2397_v16  ;;  %v2505_v10 = vld [vmem:[#allocation11 + $0x550] sm:$0xff]  ;;  %v2498_v16 = vld [vmem:[#allocation11 + $0x518] sm:$0xff] }
 0x4c5   :  { %2571 = vmatprep.subr.mxu1 %v2390_v39  ;;  %2666 = vmatprep.subr.mxu0 %v2392_v42  ;;  %v2500_v39 = vld [vmem:[#allocation11 + $0x528] sm:$0xff]  ;;  %v2497_v42 = vld [vmem:[#allocation11 + $0x510] sm:$0xff] }
 0x4c6   :  { %2572 = vmatpush1.msra.mxu1 %v2389_v21  ;;  %2667 = vmatpush1.msra.mxu0 %v2391_v38  ;;  %v2499_v21 = vld [vmem:[#allocation11 + $0x520] sm:$0xff]  ;;  %v2492_v38 = vld [vmem:[#allocation11 + $0x4e8] sm:$0xff] }
 0x4c7   :  { %2573 = vmatprep.subr.mxu1 %v2384_v33  ;;  %2668 = vmatprep.subr.mxu0 %v2386_v51  ;;  %v2494_v33 = vld [vmem:[#allocation11 + $0x4f8] sm:$0xff]  ;;  %v2491_v51 = vld [vmem:[#allocation11 + $0x4e0] sm:$0xff] }
 0x4c8   :  { %2574 = vmatpush1.msra.mxu1 %v2383_v26  ;;  %2669 = vmatpush1.msra.mxu0 %v2385_v23  ;;  %v2493_v26 = vld [vmem:[#allocation11 + $0x4f0] sm:$0xff]  ;;  %v2486_v23 = vld [vmem:[#allocation11 + $0x4b8] sm:$0xff] }
 0x4c9   :  { %2575 = vmatprep.subr.mxu1 %v2378_v19  ;;  %2670 = vmatprep.subr.mxu0 %v2380_v0  ;;  %v2488_v19 = vld [vmem:[#allocation11 + $0x4c8] sm:$0xff]  ;;  %v2485_v0 = vld [vmem:[#allocation11 + $0x4b0] sm:$0xff] }
 0x4ca   :  { %2576 = vmatpush1.msra.mxu1 %v2377_v53  ;;  %2671 = vmatpush1.msra.mxu0 %v2379_v17  ;;  %v2487_v53 = vld [vmem:[#allocation11 + $0x4c0] sm:$0xff]  ;;  %v2480_v17 = vld [vmem:[#allocation11 + $0x488] sm:$0xff] }
 0x4cb   :  { %2577 = vmatprep.subr.mxu1 %v2372_v25  ;;  %2672 = vmatprep.subr.mxu0 %v2374_v49  ;;  %v2482_v25 = vld [vmem:[#allocation11 + $0x498] sm:$0xff]  ;;  %v2479_v49 = vld [vmem:[#allocation11 + $0x480] sm:$0xff] }
 0x4cc   :  { %2578 = vmatpush1.msra.mxu1 %v2371_v60  ;;  %2673 = vmatpush1.msra.mxu0 %v2373_v58  ;;  %v2481_v60 = vld [vmem:[#allocation11 + $0x490] sm:$0xff]  ;;  %v2474_v58 = vld [vmem:[#allocation11 + $0x458] sm:$0xff] }
 0x4cd   :  { %2579 = vmatprep.subr.mxu1 %v2366_v18  ;;  %2674 = vmatprep.subr.mxu0 %v2368_v59  ;;  %v2476_v18 = vld [vmem:[#allocation11 + $0x468] sm:$0xff]  ;;  %v2473_v59 = vld [vmem:[#allocation11 + $0x450] sm:$0xff] }
 0x4ce   :  { %2580 = vmatpush1.msra.mxu1 %v2365_v6  ;;  %2675 = vmatpush1.msra.mxu0 %v2367_v8  ;;  %v2475_v6 = vld [vmem:[#allocation11 + $0x460] sm:$0xff]  ;;  %v2468_v8 = vld [vmem:[#allocation11 + $0x428] sm:$0xff] }
 0x4cf   :  { %2581 = vmatprep.subr.mxu1 %v2360_v55  ;;  %2676 = vmatprep.subr.mxu0 %v2362_v45  ;;  %v2470_v55 = vld [vmem:[#allocation11 + $0x438] sm:$0xff]  ;;  %v2467_v45 = vld [vmem:[#allocation11 + $0x420] sm:$0xff] }
 0x4d0   :  { %2582 = vmatpush1.msra.mxu1 %v2359_v40  ;;  %2677 = vmatpush1.msra.mxu0 %v2361_v61  ;;  %v2469_v40 = vld [vmem:[#allocation11 + $0x430] sm:$0xff]  ;;  %v2462_v61 = vld [vmem:[#allocation11 + $0x3f8] sm:$0xff] }
 0x4d1   :  { %2583 = vmatprep.subr.mxu1 %v2354_v44  ;;  %2678 = vmatprep.subr.mxu0 %v2356_v4  ;;  %v2464_v44 = vld [vmem:[#allocation11 + $0x408] sm:$0xff]  ;;  %v2461_v4 = vld [vmem:[#allocation11 + $0x3f0] sm:$0xff] }
 0x4d2   :  { %2584 = vmatpush1.msra.mxu1 %v2353_v62  ;;  %2679 = vmatpush1.msra.mxu0 %v2355_v5  ;;  %v2463_v62 = vld [vmem:[#allocation11 + $0x400] sm:$0xff]  ;;  %v2456_v5 = vld [vmem:[#allocation11 + $0x3c8] sm:$0xff] }
 0x4d3   :  { %2585 = vmatprep.subr.mxu1 %v2348_v31  ;;  %2680 = vmatprep.subr.mxu0 %v2350_v1  ;;  %v2458_v31 = vld [vmem:[#allocation11 + $0x3d8] sm:$0xff]  ;;  %v2455_v1 = vld [vmem:[#allocation11 + $0x3c0] sm:$0xff] }
 0x4d4   :  { %2586 = vmatpush1.msra.mxu1 %v2347_v20  ;;  %2681 = vmatpush1.msra.mxu0 %v2349_v9  ;;  %v2457_v20 = vld [vmem:[#allocation11 + $0x3d0] sm:$0xff]  ;;  %v2450_v9 = vld [vmem:[#allocation11 + $0x398] sm:$0xff] }
 0x4d5   :  { %2587 = vmatprep.subr.mxu1 %v2342_v11  ;;  %2682 = vmatprep.subr.mxu0 %v2344_v63  ;;  %v2452_v11 = vld [vmem:[#allocation11 + $0x3a8] sm:$0xff]  ;;  %v2449_v63 = vld [vmem:[#allocation11 + $0x390] sm:$0xff] }
 0x4d6   :  { %2588 = vmatpush1.msra.mxu1 %v2341_v47  ;;  %2683 = vmatpush1.msra.mxu0 %v2343_v15  ;;  %v2451_v47 = vld [vmem:[#allocation11 + $0x3a0] sm:$0xff]  ;;  %v2444_v15 = vld [vmem:[#allocation11 + $0x368] sm:$0xff] }
 0x4d7   :  { %2589 = vmatprep.subr.mxu1 %v2336_v50  ;;  %2684 = vmatprep.subr.mxu0 %v2338_v41  ;;  %v2446_v50 = vld [vmem:[#allocation11 + $0x378] sm:$0xff]  ;;  %v2443_v41 = vld [vmem:[#allocation11 + $0x360] sm:$0xff] }
 0x4d8   :  { %2590 = vmatpush1.msra.mxu1 %v2335_v2  ;;  %2685 = vmatpush1.msra.mxu0 %v2337_v12  ;;  %v2445_v2 = vld [vmem:[#allocation11 + $0x370] sm:$0xff]  ;;  %v2438_v12 = vld [vmem:[#allocation11 + $0x338] sm:$0xff] }
 0x4d9   :  { %2591 = vmatprep.subr.mxu1 %v2522_v14  ;;  %2686 = vmatprep.subr.mxu0 %v2524_v32  ;;  %v2440_v14 = vld [vmem:[#allocation11 + $0x348] sm:$0xff]  ;;  %v2437_v32 = vld [vmem:[#allocation11 + $0x330] sm:$0xff] }
 0x4da   :  { %2592 = vmatpush2.msra.mxu1 %v2521_v56  ;;  %2687 = vmatpush2.msra.mxu0 %v2523_v37  ;;  %v2439_v56 = vld [vmem:[#allocation11 + $0x340] sm:$0xff]  ;;  %v2432_v37 = vld [vmem:[#allocation11 + $0x308] sm:$0xff] }
 0x4db   :  { %2593 = vmatprep.subr.mxu1 %v2516_v22  ;;  %2688 = vmatprep.subr.mxu0 %v2518_v48  ;;  %v2434_v22 = vld [vmem:[#allocation11 + $0x318] sm:$0xff]  ;;  %v2431_v48 = vld [vmem:[#allocation11 + $0x300] sm:$0xff] }
 0x4dc   :  { %2594 = vmatpush2.msra.mxu1 %v2515_v3  ;;  %2689 = vmatpush2.msra.mxu0 %v2517_v35  ;;  %v2433_v3 = vld [vmem:[#allocation11 + $0x310] sm:$0xff]  ;;  %v2430_v35 = vld [vmem:[#allocation11 + $0x2f8] sm:$0xff] }
 0x4dd   :  { %2595 = vmatprep.subr.mxu1 %v2510_v34  ;;  %2690 = vmatprep.subr.mxu0 %v2512_v46  ;;  %v7756_v34 = vld [vmem:[#allocation13 + $0x170] sm:$0xff] }
 0x4de   :  { %2596 = vmatpush2.msra.mxu1 %v2509_v54  ;;  %2691 = vmatpush2.msra.mxu0 %v2511_v24  ;;  %v9656_v24 = vld [vmem:[#allocation71_spill] sm:$0xff] }
 0x4df   :  { %2597 = vmatprep.subr.mxu1 %v2504_v30  ;;  %2692 = vmatprep.subr.mxu0 %v2506_v43 }
 0x4e0   :  { %2598 = vmatpush2.msra.mxu1 %v2503_v27  ;;  %2693 = vmatpush2.msra.mxu0 %v2505_v10  ;;  %v9657_v10 = vld [vmem:[#allocation70_spill] sm:$0xff] }
 0x4e1   :  { %2599 = vmatprep.subr.mxu1 %v2498_v16  ;;  %2694 = vmatprep.subr.mxu0 %v2500_v39 }
 0x4e2   :  { %2600 = vmatpush2.msra.mxu1 %v2497_v42  ;;  %2695 = vmatpush2.msra.mxu0 %v2499_v21  ;;  %v9658_v42 = vld [vmem:[#allocation75_spill] sm:$0xff] }
 0x4e3   :  { %2601 = vmatprep.subr.mxu1 %v2492_v38  ;;  %2696 = vmatprep.subr.mxu0 %v2494_v33  ;;  %v9659_v38 = vld [vmem:[#allocation72_spill] sm:$0xff] }
 0x4e4   :  { %2602 = vmatpush2.msra.mxu1 %v2491_v51  ;;  %2697 = vmatpush2.msra.mxu0 %v2493_v26 }
 0x4e5   :  { %2603 = vmatprep.subr.mxu1 %v2486_v23  ;;  %2698 = vmatprep.subr.mxu0 %v2488_v19 }
 0x4e6   :  { %2604 = vmatpush2.msra.mxu1 %v2485_v0  ;;  %2699 = vmatpush2.msra.mxu0 %v2487_v53 }
 0x4e7   :  { %2605 = vmatprep.subr.mxu1 %v2480_v17  ;;  %2700 = vmatprep.subr.mxu0 %v2482_v25  ;;  %v9660_v25 = vld [vmem:[#allocation82_spill] sm:$0xff] }
 0x4e8   :  { %2606 = vmatpush2.msra.mxu1 %v2479_v49  ;;  %2701 = vmatpush2.msra.mxu0 %v2481_v60  ;;  %v9661_v60 = vld [vmem:[#allocation83_spill] sm:$0xff] }
 0x4e9   :  { %2607 = vmatprep.subr.mxu1 %v2474_v58  ;;  %2702 = vmatprep.subr.mxu0 %v2476_v18 }
 0x4ea   :  { %2608 = vmatpush2.msra.mxu1 %v2473_v59  ;;  %2703 = vmatpush2.msra.mxu0 %v2475_v6 }
 0x4eb   :  { %2609 = vmatprep.subr.mxu1 %v2468_v8  ;;  %2704 = vmatprep.subr.mxu0 %v2470_v55  ;;  %v9662_v8 = vld [vmem:[#allocation53_spill] sm:$0xff] }
 0x4ec   :  { %2610 = vmatpush2.msra.mxu1 %v2467_v45  ;;  %2705 = vmatpush2.msra.mxu0 %v2469_v40 }
 0x4ed   :  { %2611 = vmatprep.subr.mxu1 %v2462_v61  ;;  %2706 = vmatprep.subr.mxu0 %v2464_v44  ;;  %v9663_v44 = vld [vmem:[#allocation69_spill] sm:$0xff] }
 0x4ee   :  { %2612 = vmatpush2.msra.mxu1 %v2461_v4  ;;  %2707 = vmatpush2.msra.mxu0 %v2463_v62  ;;  %v9664_v62 = vld [vmem:[#allocation73_spill] sm:$0xff] }
 0x4ef   :  { %2613 = vmatprep.subr.mxu1 %v2456_v5  ;;  %2708 = vmatprep.subr.mxu0 %v2458_v31 }
 0x4f0   :  { %2614 = vmatpush2.msra.mxu1 %v2455_v1  ;;  %2709 = vmatpush2.msra.mxu0 %v2457_v20 }
 0x4f1   :  { %2615 = vmatprep.subr.mxu1 %v2450_v9  ;;  %2710 = vmatprep.subr.mxu0 %v2452_v11 }
 0x4f2   :  { %2616 = vmatpush2.msra.mxu1 %v2449_v63  ;;  %2711 = vmatpush2.msra.mxu0 %v2451_v47 }
 0x4f3   :  { %2617 = vmatprep.subr.mxu1 %v2444_v15  ;;  %2712 = vmatprep.subr.mxu0 %v2446_v50 }
 0x4f4   :  { %2618 = vmatpush2.msra.mxu1 %v2443_v41  ;;  %2713 = vmatpush2.msra.mxu0 %v2445_v2 }
 0x4f5   :  { %2619 = vmatprep.subr.mxu1 %v2438_v12  ;;  %2714 = vmatprep.subr.mxu0 %v2440_v14 }
 0x4f6   :  { %2620 = vmatpush2.msra.mxu1 %v2437_v32  ;;  %2715 = vmatpush2.msra.mxu0 %v2439_v56  ;;  %v9665_v32 = vld [vmem:[#allocation74_spill] sm:$0xff] }
 0x4f7   :  { %2621 = vmatprep.subr.mxu1 %v2432_v37  ;;  %2716 = vmatprep.subr.mxu0 %v2434_v22 }
 0x4f8   :  { %2622 = vmatpush2.msra.mxu1 %v2431_v48  ;;  %2717 = vmatpush2.msra.mxu0 %v2433_v3 }
 0x4f9   :  { %2749 = vmatprep.subr.mxu1 %v2430_v35  ;;  %2958 = vmatprep.subr.mxu0 %v7756_v34 }
 0x557   :  { %v2065_v46 = vpop.f32.mrf.mxu1  ;;  %v2136_v54 = vpop.f32.mrf.mxu0 }
 0x558   :  { %v2066_v30 = vadd.f32 %v2065_v46, %v9656_v24  ;;  %v2137_v58 = vadd.f32 %v2136_v54, %v9661_v60  ;;  %v2429_v54 = vld [vmem:[#allocation11 + $0x2f0] sm:$0xff]  ;;  %v7777_v24 = vld [vmem:[#allocation13 + $0x168] sm:$0xff]  ;;  %v2399_v60 = vld [vmem:[#allocation11 + $0x200] sm:$0xff] }
 0x559   :  { %v2067_v43 = vpop.f32.mrf.mxu1  ;;  %v5353_v27 = vpop.f32.mrf.mxu0 }
 0x55a   :  { %v2140_v16 = vadd.f32 %v2066_v30, %v9657_v10  ;;  %v2068_v21 = vadd.f32 %v2067_v43, %v9658_v42  ;;  %v2424_v30 = vld [vmem:[#allocation11 + $0x2c8] sm:$0xff]  ;;  %v7783_v43 = vld [vmem:[#allocation13 + $0x158] sm:$0xff]  ;;  %v2423_v27 = vld [vmem:[#allocation11 + $0x2c0] sm:$0xff] }
 0x55b   :  { %v7786_v10 = vld [vmem:[#allocation13 + $0x150] sm:$0xff] }
 0x55c   :  { %v4671_v39 = vmul.f32 -1.442695, %v2140_v16  ;;  %v2147_v33 = vadd.f32 %v2068_v21, %v9659_v38  ;;  %v2418_v16 = vld [vmem:[#allocation11 + $0x298] sm:$0xff]  ;;  %v2417_v42 = vld [vmem:[#allocation11 + $0x290] sm:$0xff]  ;;  %v9667_v38 = vld [vmem:[#allocation59_spill] sm:$0xff] }
 0x55d   :  { %v7794_v21 = vld [vmem:[#allocation13 + $0x138] sm:$0xff] }
 0x55e   :  { %5834 = vpow2.f32 %v4671_v39  ;;  %v4672_v51 = vmul.f32 -1.442695, %v2147_v33  ;;  %v7790_v39 = vld [vmem:[#allocation13 + $0x140] sm:$0xff]  ;;  %v2412_v33 = vld [vmem:[#allocation11 + $0x268] sm:$0xff] }
 0x560   :  { %5836 = vpow2.f32 %v4672_v51  ;;  %v7799_v51 = vld [vmem:[#allocation13 + $0x128] sm:$0xff] }
 0x56b   :  { %v5835_v26 = vpop.eup %5834 }
 0x56c   :  { %v2144_v23 = vadd.f32 1.0, %v5835_v26  ;;  %v2411_v26 = vld [vmem:[#allocation11 + $0x260] sm:$0xff] }
 0x56d   :  { %v5837_v19 = vpop.eup %5836 }
 0x56e   :  { %5838 = vrcp.f32 %v2144_v23  ;;  %v2151_v0 = vadd.f32 1.0, %v5837_v19  ;;  %v7802_v23 = vld [vmem:[#allocation13 + $0x120] sm:$0xff]  ;;  %v2406_v19 = vld [vmem:[#allocation11 + $0x238] sm:$0xff] }
 0x570   :  { %5840 = vrcp.f32 %v2151_v0  ;;  %v7806_v0 = vld [vmem:[#allocation13 + $0x110] sm:$0xff] }
 0x578   :  { %v2227_v53 = vpop.f32.mrf.mxu1  ;;  %v2298_v17 = vpop.f32.mrf.mxu0 }
 0x579   :  { %v2228_v49 = vadd.f32 %v2227_v53, %v9660_v25  ;;  %v2299_v2 = vadd.f32 %v2298_v17, %v7030_v52  ;;  %v9666_v52 = vld [vmem:[#allocation84_spill] sm:$0xff]  ;;  %v2405_v53 = vld [vmem:[#allocation11 + $0x230] sm:$0xff] }
 0x57a   :  { %v2229_v18 = vpop.f32.mrf.mxu1  ;;  %v5388_v59 = vpop.f32.mrf.mxu0  ;;  %v7810_v17 = vld [vmem:[#allocation13 + $0x108] sm:$0xff] }
 0x57b   :  { %v5839_v6 = vpop.eup %5838  ;;  %v2302_v55 = vadd.f32 %v2228_v49, %v9662_v8  ;;  %v2230_v61 = vadd.f32 %v2229_v18, %v7011_v29  ;;  %v2400_v25 = vld [vmem:[#allocation11 + $0x208] sm:$0xff]  ;;  %v7815_v49 = vld [vmem:[#allocation13 + $0xf8] sm:$0xff]  ;;  %v9668_v18 = vld [vmem:[#allocation87_spill] sm:$0xff] }
 0x57c   :  { %v2154_v45 = vmul.f32 %v5839_v6, %v2137_v58  ;;  %v7818_v58 = vld [vmem:[#allocation13 + $0xf0] sm:$0xff]  ;;  %v2394_v59 = vld [vmem:[#allocation11 + $0x1d8] sm:$0xff]  ;;  %v7822_v6 = vld [vmem:[#allocation13 + $0xe0] sm:$0xff] }
 0x57d   :  { %v4673_v40 = vmul.f32 -1.442695, %v2302_v55  ;;  %v2309_v5 = vadd.f32 %v2230_v61, %v9664_v62  ;;  %v5841_v1 = vpop.eup %5840  ;;  %v2393_v8 = vld [vmem:[#allocation11 + $0x1d0] sm:$0xff]  ;;  %v7826_v55 = vld [vmem:[#allocation13 + $0xd8] sm:$0xff]  ;;  %v2387_v61 = vld [vmem:[#allocation11 + $0x1a0] sm:$0xff] }
 0x57e   :  { %v2155_v4 = vadd.f32 %v2154_v45, %v9663_v44  ;;  %v2157_v9 = vsub.f32 1.0, %v5841_v1  ;;  %v2159_v15 = vmul.f32 %v5841_v1, %v7680_v28  ;;  %v2388_v45 = vld [vmem:[#allocation11 + $0x1a8] sm:$0xff]  ;;  %v7834_v44 = vld [vmem:[#allocation13 + $0xc0] sm:$0xff]  ;;  %v2382_v62 = vld [vmem:[#allocation11 + $0x178] sm:$0xff] }
 0x57f   :  { %5842 = vpow2.f32 %v4673_v40  ;;  %v4674_v31 = vmul.f32 -1.442695, %v2309_v5  ;;  %v7831_v40 = vld [vmem:[#allocation13 + $0xc8] sm:$0xff]  ;;  %v7838_v5 = vld [vmem:[#allocation13 + $0xb0] sm:$0xff] }
 0x580   :  { %5844 = vtanh.f32 %v2155_v4  ;;  %v9669_v4 = vld [vmem:[#allocation24_spill] sm:$0xff] }
 0x581   :  { %5846 = vpow2.f32 %v4674_v31  ;;  %v2381_v31 = vld [vmem:[#allocation11 + $0x170] sm:$0xff]  ;;  %v7842_v1 = vld [vmem:[#allocation13 + $0xa8] sm:$0xff] }
 0x58c   :  { %v5843_v20 = vpop.eup %5842 }
 0x58d   :  { %v5845_v11 = vpop.eup %5844  ;;  %v2306_v63 = vadd.f32 1.0, %v5843_v20  ;;  %v2376_v20 = vld [vmem:[#allocation11 + $0x148] sm:$0xff] }
 0x58e   :  { %v2158_v47 = vmul.f32 %v5845_v11, %v2157_v9  ;;  %v5847_v29 = vpop.eup %5846  ;;  %v7847_v9 = vld [vmem:[#allocation13 + $0x98] sm:$0xff]  ;;  %v2375_v11 = vld [vmem:[#allocation11 + $0x140] sm:$0xff] }
 0x58f   :  { %5848 = vrcp.f32 %v2306_v63  ;;  %v2313_v41 = vadd.f32 1.0, %v5847_v29  ;;  %v7850_v63 = vld [vmem:[#allocation13 + $0x90] sm:$0xff] }
 0x590   :  { %v7770_v50 = vadd.f32 %v2159_v15, %v2158_v47  ;;  %v2370_v47 = vld [vmem:[#allocation11 + $0x118] sm:$0xff]  ;;  %v7853_v15 = vld [vmem:[#allocation13 + $0x80] sm:$0xff]  ;;  %v2369_v29 = vld [vmem:[#allocation11 + $0x110] sm:$0xff] }
 0x591   :  { %5850 = vrcp.f32 %v2313_v41  ;;  %v7856_v41 = vld [vmem:[#allocation13 + $0x78] sm:$0xff] }
 0x59c   :  { %v5849_v12 = vpop.eup %5848 }
 0x59d   :  { %v2316_v14 = vmul.f32 %v5849_v12, %v2299_v2  ;;  %v2364_v2 = vld [vmem:[#allocation11 + $0xe8] sm:$0xff] }
 0x59e   :  { %v5851_v37 = vpop.eup %5850  ;;  %v7859_v12 = vld [vmem:[#allocation13 + $0x68] sm:$0xff] }
 0x59f   :  { %v2317_v56 = vadd.f32 %v2316_v14, %v9665_v32  ;;  %v2319_v22 = vsub.f32 1.0, %v5851_v37  ;;  %v2321_v35 = vmul.f32 %v5851_v37, %v7749_v36  ;;  %v2363_v14 = vld [vmem:[#allocation11 + $0xe0] sm:$0xff]  ;;  %v7865_v37 = vld [vmem:[#allocation13 + $0x50] sm:$0xff] }
 0x5a0   :  { %v7862_v32 = vld [vmem:[#allocation13 + $0x60] sm:$0xff] }
 0x5a1   :  { %5852 = vtanh.f32 %v2317_v56  ;;  %v2358_v56 = vld [vmem:[#allocation11 + $0xb8] sm:$0xff] }
 0x5ae   :  { %v5853_v48 = vpop.eup %5852 }
 0x5af   :  { %v2320_v3 = vmul.f32 %v5853_v48, %v2319_v22  ;;  %v2357_v22 = vld [vmem:[#allocation11 + $0xb0] sm:$0xff]  ;;  %v7868_v48 = vld [vmem:[#allocation13 + $0x48] sm:$0xff] }
 0x5b1   :  { %v7775_v46 = vadd.f32 %v2321_v35, %v2320_v3  ;;  %v2352_v3 = vld [vmem:[#allocation11 + $0x88] sm:$0xff]  ;;  %v7871_v35 = vld [vmem:[#allocation13 + $0x38] sm:$0xff] }
 0x5b3   :  { %2623 = vmatprep.mubr.f32.mxu1 %v7775_v46  ;;  %2718 = vmatprep.mubr.f32.mxu0 %v7775_v46 }
 0x5b4   :  { %2624 = vmatmul.mubr.f32.vlgmr.msra.gmra.mxu1 %v9666_v52  ;;  %2719 = vmatmul.mubr.f32.vlgmr.msra.gmra.mxu0 %v9666_v52 }
 0x5b5   :  { %2750 = vmatpush1.msra.mxu1 %v2429_v54  ;;  %2959 = vmatpush1.msra.mxu0 %v7777_v24  ;;  %v7874_v54 = vld [vmem:[#allocation13 + $0x30] sm:$0xff] }
 0x5b6   :  { %2629 = vmatprep.mubr.f32.mxu1 %v7749_v36  ;;  %2724 = vmatprep.mubr.f32.mxu0 %v7749_v36 }
 0x5b7   :  { %2751 = vmatprep.subr.mxu1 %v2424_v30  ;;  %2960 = vmatprep.subr.mxu0 %v7783_v43  ;;  %v2346_v30 = vld [vmem:[#allocation11 + $0x58] sm:$0xff] }
 0x5b8   :  { %2752 = vmatpush1.msra.mxu1 %v2423_v27  ;;  %2961 = vmatpush1.msra.mxu0 %v7786_v10  ;;  %v7877_v27 = vld [vmem:[#allocation13 + $0x20] sm:$0xff] }
 0x5b9   :  { %2753 = vmatprep.subr.mxu1 %v2418_v16  ;;  %2962 = vmatprep.subr.mxu0 %v7790_v39  ;;  %v2345_v16 = vld [vmem:[#allocation11 + $0x50] sm:$0xff] }
 0x5ba   :  { %2630 = vmatmul.mubr.f32.gmra.mxu1 %v9667_v38  ;;  %2725 = vmatmul.mubr.f32.gmra.mxu0 %v9667_v38 }
 0x5bb   :  { %2754 = vmatpush1.msra.mxu1 %v2417_v42  ;;  %2963 = vmatpush1.msra.mxu0 %v7794_v21  ;;  %v7880_v42 = vld [vmem:[#allocation13 + $0x18] sm:$0xff] }
 0x5bc   :  { %2635 = vmatprep.mubr.f32.mxu1 %v9652_v7  ;;  %2730 = vmatprep.mubr.f32.mxu0 %v9652_v7 }
 0x5bd   :  { %2755 = vmatprep.subr.mxu1 %v2412_v33  ;;  %2964 = vmatprep.subr.mxu0 %v7799_v51  ;;  %v2340_v33 = vld [vmem:[#allocation11 + $0x28] sm:$0xff] }
 0x5be   :  { %2756 = vmatpush1.msra.mxu1 %v2411_v26  ;;  %2965 = vmatpush1.msra.mxu0 %v7802_v23  ;;  %v7883_v26 = vld [vmem:[#allocation13 + $0x8] sm:$0xff] }
 0x5bf   :  { %2757 = vmatprep.subr.mxu1 %v2406_v19  ;;  %2966 = vmatprep.subr.mxu0 %v7806_v0  ;;  %v2339_v19 = vld [vmem:[#allocation11 + $0x20] sm:$0xff] }
 0x5c0   :  { %2636 = vmatmul.mubr.f32.gmra.mxu1 %v7492_v13  ;;  %2731 = vmatmul.mubr.f32.gmra.mxu0 %v7492_v13 }
 0x5c1   :  { %2758 = vmatpush1.msra.mxu1 %v2405_v53  ;;  %2967 = vmatpush1.msra.mxu0 %v7810_v17  ;;  %v7886_v53 = vld [vmem:[#allocation13] sm:$0xff] }
 0x5c2   :  { %2641 = vmatprep.mubr.f32.mxu1 %v9668_v18  ;;  %2736 = vmatprep.mubr.f32.mxu0 %v9668_v18 }
 0x5c3   :  { %2759 = vmatprep.subr.mxu1 %v2400_v25  ;;  %2968 = vmatprep.subr.mxu0 %v7815_v49  ;;  %v2526_v25 = vld [vmem:[#allocation11 + $0x5f8] sm:$0xff] }
 0x5c4   :  { %2760 = vmatpush1.msra.mxu1 %v2399_v60  ;;  %2969 = vmatpush1.msra.mxu0 %v7818_v58  ;;  %v2525_v60 = vld [vmem:[#allocation11 + $0x5f0] sm:$0xff] }
 0x5c5   :  { %2761 = vmatprep.subr.mxu1 %v2394_v59  ;;  %2970 = vmatprep.subr.mxu0 %v7822_v6  ;;  %v2520_v59 = vld [vmem:[#allocation11 + $0x5c8] sm:$0xff] }
 0x5c6   :  { %2642 = vmatmul.mubr.f32.gmra.mxu1 %v7680_v28  ;;  %2737 = vmatmul.mubr.f32.gmra.mxu0 %v7680_v28 }
 0x5c7   :  { %2762 = vmatpush1.msra.mxu1 %v2393_v8  ;;  %2971 = vmatpush1.msra.mxu0 %v7826_v55  ;;  %v7892_v8 = vld [vmem:[#allocation13 + $0x178] sm:$0xff] }
 0x5c8   :  { %2647 = vmatprep.mubr.f32.mxu1 %v9669_v4  ;;  %2742 = vmatprep.mubr.f32.mxu0 %v9669_v4 }
 0x5c9   :  { %2763 = vmatprep.subr.mxu1 %v2388_v45  ;;  %2972 = vmatprep.subr.mxu0 %v7831_v40  ;;  %v2519_v45 = vld [vmem:[#allocation11 + $0x5c0] sm:$0xff] }
 0x5ca   :  { %2764 = vmatpush1.msra.mxu1 %v2387_v61  ;;  %2973 = vmatpush1.msra.mxu0 %v7834_v44  ;;  %v2514_v61 = vld [vmem:[#allocation11 + $0x598] sm:$0xff] }
 0x5cb   :  { %2765 = vmatprep.subr.mxu1 %v2382_v62  ;;  %2974 = vmatprep.subr.mxu0 %v7838_v5  ;;  %v7896_v62 = vld [vmem:[#allocation13 + $0x160] sm:$0xff] }
 0x5cc   :  { %2648 = vmatmul.mubr.f32.gmra.mxu1 %v7770_v50  ;;  %2743 = vmatmul.mubr.f32.gmra.mxu0 %v7770_v50 }
 0x5cd   :  { %2766 = vmatpush1.msra.mxu1 %v2381_v31  ;;  %2975 = vmatpush1.msra.mxu0 %v7842_v1  ;;  %v2513_v31 = vld [vmem:[#allocation11 + $0x590] sm:$0xff] }
 0x5ce   :  { %2767 = vmatprep.subr.mxu1 %v2376_v20  ;;  %2813 = vmatprep.mubr.f32.mxu1 %v7775_v46  ;;  %v2351_v46 = vld [vmem:[#allocation11 + $0x80] sm:$0xff]  ;;  %v2508_v20 = vld [vmem:[#allocation11 + $0x568] sm:$0xff] }
 0x5cf   :  { %2976 = vmatprep.subr.mxu0 %v7847_v9  ;;  %2768 = vmatpush1.msra.mxu1 %v2375_v11  ;;  %v7900_v11 = vld [vmem:[#allocation13 + $0x148] sm:$0xff] }
 0x5d0   :  { %2977 = vmatpush1.msra.mxu0 %v7850_v63  ;;  %2769 = vmatprep.subr.mxu1 %v2370_v47  ;;  %v2507_v47 = vld [vmem:[#allocation11 + $0x560] sm:$0xff] }
 0x5d1   :  { %2978 = vmatprep.subr.mxu0 %v7853_v15  ;;  %2770 = vmatpush1.msra.mxu1 %v2369_v29  ;;  %v2502_v29 = vld [vmem:[#allocation11 + $0x538] sm:$0xff] }
 0x5d2   :  { %2979 = vmatpush1.msra.mxu0 %v7856_v41  ;;  %2771 = vmatprep.subr.mxu1 %v2364_v2  ;;  %v7904_v2 = vld [vmem:[#allocation13 + $0x130] sm:$0xff] }
 0x5d3   :  { %2980 = vmatprep.subr.mxu0 %v7859_v12  ;;  %2772 = vmatpush1.msra.mxu1 %v2363_v14  ;;  %v2501_v14 = vld [vmem:[#allocation11 + $0x530] sm:$0xff] }
 0x5d4   :  { %2981 = vmatpush1.msra.mxu0 %v7862_v32  ;;  %2773 = vmatprep.subr.mxu1 %v2358_v56  ;;  %v2496_v56 = vld [vmem:[#allocation11 + $0x508] sm:$0xff] }
 0x5d5   :  { %2982 = vmatprep.subr.mxu0 %v7865_v37  ;;  %2774 = vmatpush1.msra.mxu1 %v2357_v22  ;;  %v7908_v22 = vld [vmem:[#allocation13 + $0x118] sm:$0xff] }
 0x5d6   :  { %2983 = vmatpush1.msra.mxu0 %v7868_v48  ;;  %2775 = vmatprep.subr.mxu1 %v2352_v3  ;;  %v2495_v3 = vld [vmem:[#allocation11 + $0x500] sm:$0xff] }
 0x5d7   :  { %2984 = vmatprep.subr.mxu0 %v7871_v35  ;;  %2776 = vmatpush1.msra.mxu1 %v2351_v46  ;;  %v2490_v46 = vld [vmem:[#allocation11 + $0x4d8] sm:$0xff] }
 0x5d8   :  { %2985 = vmatpush1.msra.mxu0 %v7874_v54  ;;  %2777 = vmatprep.subr.mxu1 %v2346_v30  ;;  %v7912_v30 = vld [vmem:[#allocation13 + $0x100] sm:$0xff] }
 0x5d9   :  { %2986 = vmatprep.subr.mxu0 %v7877_v27  ;;  %2778 = vmatpush1.msra.mxu1 %v2345_v16  ;;  %v2489_v16 = vld [vmem:[#allocation11 + $0x4d0] sm:$0xff] }
 0x5da   :  { %2987 = vmatpush1.msra.mxu0 %v7880_v42  ;;  %2779 = vmatprep.subr.mxu1 %v2340_v33  ;;  %v2484_v33 = vld [vmem:[#allocation11 + $0x4a8] sm:$0xff] }
 0x5db   :  { %2988 = vmatprep.subr.mxu0 %v7883_v26  ;;  %2780 = vmatpush1.msra.mxu1 %v2339_v19  ;;  %v7916_v19 = vld [vmem:[#allocation13 + $0xe8] sm:$0xff] }
 0x5dc   :  { %2989 = vmatpush1.msra.mxu0 %v7886_v53  ;;  %3022 = vmatprep.mubr.f32.mxu0 %v9477_v57 }
 0x5dd   :  { %2781 = vmatprep.subr.mxu1 %v2526_v25  ;;  %3023 = vmatmul.mubr.f32.vlgmr.msra.gmra.mxu0 %v9477_v57  ;;  %v2483_v25 = vld [vmem:[#allocation11 + $0x4a0] sm:$0xff] }
 0x5de   :  { %2782 = vmatpush2.msra.mxu1 %v2525_v60  ;;  %5389 = vmatprep.subr.mxu0 %v9477_v57  ;;  %v2478_v60 = vld [vmem:[#allocation11 + $0x478] sm:$0xff] }
 0x5df   :  { %2783 = vmatprep.subr.mxu1 %v2520_v59  ;;  %5390 = vmatpush3.msra.mxu0 %v7892_v8  ;;  %v7920_v59 = vld [vmem:[#allocation13 + $0xd0] sm:$0xff] }
 0x5e0   :  { %2784 = vmatpush2.msra.mxu1 %v2519_v45  ;;  %5391 = vmatprep.subr.mxu0 %v9477_v57  ;;  %v2477_v45 = vld [vmem:[#allocation11 + $0x470] sm:$0xff] }
 0x5e1   :  { %2785 = vmatprep.subr.mxu1 %v2514_v61  ;;  %5392 = vmatpush3.msra.mxu0 %v7896_v62  ;;  %v2472_v61 = vld [vmem:[#allocation11 + $0x448] sm:$0xff] }
 0x5e2   :  { %2786 = vmatpush2.msra.mxu1 %v2513_v31  ;;  %5393 = vmatprep.subr.mxu0 %v9477_v57  ;;  %v7924_v31 = vld [vmem:[#allocation13 + $0xb8] sm:$0xff] }
 0x5e3   :  { %2787 = vmatprep.subr.mxu1 %v2508_v20  ;;  %5394 = vmatpush3.msra.mxu0 %v7900_v11  ;;  %v2471_v20 = vld [vmem:[#allocation11 + $0x440] sm:$0xff] }
 0x5e4   :  { %2788 = vmatpush2.msra.mxu1 %v2507_v47  ;;  %5395 = vmatprep.subr.mxu0 %v9477_v57  ;;  %v2466_v47 = vld [vmem:[#allocation11 + $0x418] sm:$0xff] }
 0x5e5   :  { %2789 = vmatprep.subr.mxu1 %v2502_v29  ;;  %5396 = vmatpush3.msra.mxu0 %v7904_v2  ;;  %v7928_v29 = vld [vmem:[#allocation13 + $0xa0] sm:$0xff] }
 0x5e6   :  { %2790 = vmatpush2.msra.mxu1 %v2501_v14  ;;  %5397 = vmatprep.subr.mxu0 %v9477_v57  ;;  %v2465_v14 = vld [vmem:[#allocation11 + $0x410] sm:$0xff] }
 0x5e7   :  { %2791 = vmatprep.subr.mxu1 %v2496_v56  ;;  %5398 = vmatpush3.msra.mxu0 %v7908_v22  ;;  %v2460_v56 = vld [vmem:[#allocation11 + $0x3e8] sm:$0xff] }
 0x5e8   :  { %2792 = vmatpush2.msra.mxu1 %v2495_v3  ;;  %5399 = vmatprep.subr.mxu0 %v9477_v57  ;;  %v7932_v3 = vld [vmem:[#allocation13 + $0x88] sm:$0xff] }
 0x5e9   :  { %2793 = vmatprep.subr.mxu1 %v2490_v46  ;;  %5400 = vmatpush3.msra.mxu0 %v7912_v30  ;;  %v2459_v46 = vld [vmem:[#allocation11 + $0x3e0] sm:$0xff] }
 0x5ea   :  { %2794 = vmatpush2.msra.mxu1 %v2489_v16  ;;  %5401 = vmatprep.subr.mxu0 %v9477_v57  ;;  %v2454_v16 = vld [vmem:[#allocation11 + $0x3b8] sm:$0xff] }
 0x5eb   :  { %2795 = vmatprep.subr.mxu1 %v2484_v33  ;;  %5402 = vmatpush3.msra.mxu0 %v7916_v19  ;;  %v7936_v33 = vld [vmem:[#allocation13 + $0x70] sm:$0xff] }
 0x5ec   :  { %2796 = vmatpush2.msra.mxu1 %v2483_v25  ;;  %5403 = vmatprep.subr.mxu0 %v9477_v57  ;;  %v2453_v25 = vld [vmem:[#allocation11 + $0x3b0] sm:$0xff] }
 0x5ed   :  { %2797 = vmatprep.subr.mxu1 %v2478_v60  ;;  %5404 = vmatpush3.msra.mxu0 %v7920_v59  ;;  %v2448_v60 = vld [vmem:[#allocation11 + $0x388] sm:$0xff] }
 0x5ee   :  { %2798 = vmatpush2.msra.mxu1 %v2477_v45  ;;  %5405 = vmatprep.subr.mxu0 %v9477_v57  ;;  %v7940_v45 = vld [vmem:[#allocation13 + $0x58] sm:$0xff] }
 0x5ef   :  { %2799 = vmatprep.subr.mxu1 %v2472_v61  ;;  %5406 = vmatpush3.msra.mxu0 %v7924_v31  ;;  %v2447_v61 = vld [vmem:[#allocation11 + $0x380] sm:$0xff] }
 0x5f0   :  { %2800 = vmatpush2.msra.mxu1 %v2471_v20  ;;  %5407 = vmatprep.subr.mxu0 %v9477_v57  ;;  %v2442_v20 = vld [vmem:[#allocation11 + $0x358] sm:$0xff] }
 0x5f1   :  { %2801 = vmatprep.subr.mxu1 %v2466_v47  ;;  %5408 = vmatpush3.msra.mxu0 %v7928_v29  ;;  %v7944_v47 = vld [vmem:[#allocation13 + $0x40] sm:$0xff] }
 0x5f2   :  { %2802 = vmatpush2.msra.mxu1 %v2465_v14  ;;  %5409 = vmatprep.subr.mxu0 %v9477_v57  ;;  %v2441_v14 = vld [vmem:[#allocation11 + $0x350] sm:$0xff] }
 0x5f3   :  { %2803 = vmatprep.subr.mxu1 %v2460_v56  ;;  %5410 = vmatpush3.msra.mxu0 %v7932_v3  ;;  %v2436_v56 = vld [vmem:[#allocation11 + $0x328] sm:$0xff] }
 0x5f4   :  { %2804 = vmatpush2.msra.mxu1 %v2459_v46  ;;  %5411 = vmatprep.subr.mxu0 %v9477_v57  ;;  %v7948_v46 = vld [vmem:[#allocation13 + $0x28] sm:$0xff] }
 0x5f5   :  { %2805 = vmatprep.subr.mxu1 %v2454_v16  ;;  %5412 = vmatpush3.msra.mxu0 %v7936_v33  ;;  %v2435_v16 = vld [vmem:[#allocation11 + $0x320] sm:$0xff] }
 0x5f6   :  { %2806 = vmatpush2.msra.mxu1 %v2453_v25  ;;  %5413 = vmatprep.subr.mxu0 %v9477_v57  ;;  %v7952_v25 = vld [vmem:[#allocation14 + $0x170] sm:$0xff] }
 0x5f7   :  { %2807 = vmatprep.subr.mxu1 %v2448_v60  ;;  %5414 = vmatpush3.msra.mxu0 %v7940_v45  ;;  %v7955_v60 = vld [vmem:[#allocation13 + $0x10] sm:$0xff] }
 0x5f8   :  { %2808 = vmatpush2.msra.mxu1 %v2447_v61  ;;  %5415 = vmatprep.subr.mxu0 %v9477_v57  ;;  %9670 = vst [vmem:[#allocation78_spill] sm:$0xff] %v7955_v60  ;;  %v7958_v61 = vld [vmem:[#allocation14 + $0x168] sm:$0xff] }
 0x5f9   :  { %2809 = vmatprep.subr.mxu1 %v2442_v20  ;;  %5416 = vmatpush3.msra.mxu0 %v7944_v47  ;;  %9671 = vst [vmem:[#allocation79_spill] sm:$0xff] %v7958_v61  ;;  %v7962_v20 = vld [vmem:[#allocation14 + $0x158] sm:$0xff] }
 0x5fa   :  { %2810 = vmatpush2.msra.mxu1 %v2441_v14  ;;  %5417 = vmatprep.subr.mxu0 %v9477_v57  ;;  %9672 = vst [vmem:[#allocation25_spill] sm:$0xff] %v7962_v20  ;;  %v7966_v14 = vld [vmem:[#allocation14 + $0x150] sm:$0xff] }
 0x5fb   :  { %2811 = vmatprep.subr.mxu1 %v2436_v56  ;;  %5418 = vmatpush3.msra.mxu0 %v7948_v46  ;;  %9673 = vst [vmem:[#allocation88_spill] sm:$0xff] %v7966_v14  ;;  %v7971_v56 = vld [vmem:[#allocation14 + $0x140] sm:$0xff] }
 0x5fc   :  { %2812 = vmatpush2.msra.mxu1 %v2435_v16  ;;  %5419 = vmatprep.subr.mxu0 %v9477_v57  ;;  %v7981_v16 = vld [vmem:[#allocation14 + $0x178] sm:$0xff] }
 0x5fd   :  { %2814 = vmatmul.mubr.f32.vlgmr.msra.gmra.mxu1 %v9666_v52  ;;  %3136 = vmatprep.subr.mxu1 %v7952_v25  ;;  %v7975_v52 = vld [vmem:[#allocation14 + $0x138] sm:$0xff] }
 0x5fe   :  { %2819 = vmatprep.mubr.f32.mxu1 %v7749_v36  ;;  %5420 = vmatpush3.msra.mxu0 %v7955_v60  ;;  %9674 = vst [vmem:[#allocation26_spill] sm:$0xff] %v7975_v52  ;;  %v7978_v36 = vld [vmem:[#allocation14 + $0x128] sm:$0xff]  ;;  %v7996_v60 = vld [vmem:[#allocation14 + $0xf8] sm:$0xff] }
 0x5ff   :  { %5421 = vmatprep.mubr.msk.f32.mxu0 %vm6322_vm0, %v9477_v57  ;;  %3137 = vmatpush1.msra.mxu1 %v7958_v61  ;;  %9675 = vst [vmem:[#allocation27_spill] sm:$0xff] %v7978_v36  ;;  %v7985_v61 = vld [vmem:[#allocation14 + $0x120] sm:$0xff]  ;;  %9678 = vst [vmem:[#allocation29_spill] sm:$0xff] %v7996_v60 }
 0x600   :  { %5422 = vmatmul.mubr.f32.vlgmr.msra.gmra.mxu0 %v9477_v57  ;;  %3138 = vmatprep.subr.mxu1 %v7962_v20  ;;  %9676 = vst [vmem:[#allocation89_spill] sm:$0xff] %v7985_v61  ;;  %v7989_v20 = vld [vmem:[#allocation14 + $0x110] sm:$0xff] }
 0x601   :  { %3139 = vmatpush1.msra.mxu1 %v7966_v14  ;;  %5424 = vmatprep.subr.mxu0 %v9477_v57  ;;  %v7992_v14 = vld [vmem:[#allocation14 + $0x108] sm:$0xff] }
 0x602   :  { %2820 = vmatmul.mubr.f32.gmra.mxu1 %v9667_v38  ;;  %3140 = vmatprep.subr.mxu1 %v7971_v56  ;;  %9677 = vst [vmem:[#allocation28_spill] sm:$0xff] %v7992_v14  ;;  %v7999_v38 = vld [vmem:[#allocation14 + $0x160] sm:$0xff] }
 0x603   :  { %2825 = vmatprep.mubr.f32.mxu1 %v9652_v7  ;;  %3141 = vmatpush1.msra.mxu1 %v7975_v52  ;;  %v8003_v7 = vld [vmem:[#allocation14 + $0xf0] sm:$0xff]  ;;  %v8014_v52 = vld [vmem:[#allocation14 + $0xc8] sm:$0xff] }
 0x604   :  { %3142 = vmatprep.subr.mxu1 %v7978_v36  ;;  %5425 = vmatpush3.msra.mxu0 %v7981_v16  ;;  %9679 = vst [vmem:[#allocation90_spill] sm:$0xff] %v8003_v7  ;;  %v8007_v36 = vld [vmem:[#allocation14 + $0xe0] sm:$0xff]  ;;  %9682 = vst [vmem:[#allocation91_spill] sm:$0xff] %v8014_v52 }
 0x605   :  { %3143 = vmatpush1.msra.mxu1 %v7985_v61  ;;  %5426 = vmatprep.subr.mxu0 %v9477_v57  ;;  %9680 = vst [vmem:[#allocation30_spill] sm:$0xff] %v8007_v36  ;;  %v8010_v61 = vld [vmem:[#allocation14 + $0xd8] sm:$0xff] }
 0x606   :  { %2826 = vmatmul.mubr.f32.gmra.mxu1 %v7492_v13  ;;  %3144 = vmatprep.subr.mxu1 %v7989_v20  ;;  %9681 = vst [vmem:[#allocation31_spill] sm:$0xff] %v8010_v61  ;;  %v8017_v13 = vld [vmem:[#allocation14 + $0x148] sm:$0xff] }
 0x607   :  { %2831 = vmatprep.mubr.f32.mxu1 %v9668_v18  ;;  %3145 = vmatpush1.msra.mxu1 %v7992_v14  ;;  %v8021_v18 = vld [vmem:[#allocation14 + $0xc0] sm:$0xff]  ;;  %v8032_v14 = vld [vmem:[#allocation14 + $0x98] sm:$0xff] }
 0x608   :  { %3146 = vmatprep.subr.mxu1 %v7996_v60  ;;  %5427 = vmatpush3.msra.mxu0 %v7999_v38  ;;  %9683 = vst [vmem:[#allocation32_spill] sm:$0xff] %v8021_v18  ;;  %v8025_v60 = vld [vmem:[#allocation14 + $0xb0] sm:$0xff]  ;;  %9686 = vst [vmem:[#allocation35_spill] sm:$0xff] %v8032_v14 }
 0x609   :  { %3147 = vmatpush1.msra.mxu1 %v8003_v7  ;;  %5428 = vmatprep.subr.mxu0 %v9477_v57  ;;  %9684 = vst [vmem:[#allocation33_spill] sm:$0xff] %v8025_v60  ;;  %v8028_v7 = vld [vmem:[#allocation14 + $0xa8] sm:$0xff] }
 0x60a   :  { %2832 = vmatmul.mubr.f32.gmra.mxu1 %v7680_v28  ;;  %3148 = vmatprep.subr.mxu1 %v8007_v36  ;;  %9685 = vst [vmem:[#allocation92_spill] sm:$0xff] %v8028_v7  ;;  %v8035_v28 = vld [vmem:[#allocation14 + $0x130] sm:$0xff]  ;;  %v8065_v36 = vld [vmem:[#allocation14 + $0xe8] sm:$0xff] }
 0x60b   :  { %2837 = vmatprep.mubr.f32.mxu1 %v9669_v4  ;;  %3149 = vmatpush1.msra.mxu1 %v8010_v61  ;;  %v8039_v4 = vld [vmem:[#allocation14 + $0x90] sm:$0xff]  ;;  %v8045_v61 = vld [vmem:[#allocation14 + $0x118] sm:$0xff]  ;;  %9695 = vst [vmem:[#allocation44_spill] sm:$0xff] %v8065_v36 }
 0x60c   :  { %3150 = vmatprep.subr.mxu1 %v8014_v52  ;;  %5429 = vmatpush3.msra.mxu0 %v8017_v13  ;;  %9687 = vst [vmem:[#allocation36_spill] sm:$0xff] %v8039_v4  ;;  %v8042_v52 = vld [vmem:[#allocation14 + $0x80] sm:$0xff]  ;;  %9689 = vst [vmem:[#allocation38_spill] sm:$0xff] %v8045_v61 }
 0x60d   :  { %3151 = vmatpush1.msra.mxu1 %v8021_v18  ;;  %5430 = vmatprep.subr.mxu0 %v9477_v57  ;;  %9688 = vst [vmem:[#allocation93_spill] sm:$0xff] %v8042_v52  ;;  %v8048_v18 = vld [vmem:[#allocation14 + $0x78] sm:$0xff] }
 0x60e   :  { %2838 = vmatmul.mubr.f32.gmra.mxu1 %v7770_v50  ;;  %3152 = vmatprep.subr.mxu1 %v8025_v60  ;;  %9690 = vst [vmem:[#allocation39_spill] sm:$0xff] %v8048_v18  ;;  %v8052_v50 = vld [vmem:[#allocation14 + $0x68] sm:$0xff]  ;;  %v8055_v60 = vld [vmem:[#allocation14 + $0x100] sm:$0xff] }
 0x60f   :  { %3153 = vmatpush1.msra.mxu1 %v8028_v7  ;;  %3200 = vmatprep.mubr.f32.mxu1 %v9477_v57  ;;  %9691 = vst [vmem:[#allocation94_spill] sm:$0xff] %v8052_v50  ;;  %9692 = vst [vmem:[#allocation41_spill] sm:$0xff] %v8055_v60  ;;  %v8058_v7 = vld [vmem:[#allocation14 + $0x60] sm:$0xff] }
 0x610   :  { %3154 = vmatprep.subr.mxu1 %v8032_v14  ;;  %5431 = vmatpush3.msra.mxu0 %v8035_v28  ;;  %9693 = vst [vmem:[#allocation42_spill] sm:$0xff] %v8058_v7  ;;  %v8062_v14 = vld [vmem:[#allocation14 + $0x50] sm:$0xff] }
 0x611   :  { %3155 = vmatpush1.msra.mxu1 %v8039_v4  ;;  %5432 = vmatprep.subr.mxu0 %v9477_v57  ;;  %9694 = vst [vmem:[#allocation95_spill] sm:$0xff] %v8062_v14  ;;  %v8068_v4 = vld [vmem:[#allocation14 + $0x48] sm:$0xff] }
 0x612   :  { %3156 = vmatprep.subr.mxu1 %v8042_v52  ;;  %5433 = vmatpush3.msra.mxu0 %v8045_v61  ;;  %9696 = vst [vmem:[#allocation45_spill] sm:$0xff] %v8068_v4  ;;  %v8072_v52 = vld [vmem:[#allocation14 + $0x38] sm:$0xff]  ;;  %v8075_v61 = vld [vmem:[#allocation14 + $0xd0] sm:$0xff] }
 0x613   :  { %3157 = vmatpush1.msra.mxu1 %v8048_v18  ;;  %5434 = vmatprep.subr.mxu0 %v9477_v57  ;;  %9697 = vst [vmem:[#allocation96_spill] sm:$0xff] %v8072_v52  ;;  %9698 = vst [vmem:[#allocation48_spill] sm:$0xff] %v8075_v61  ;;  %v8078_v18 = vld [vmem:[#allocation14 + $0x30] sm:$0xff] }
 0x614   :  { %3158 = vmatprep.subr.mxu1 %v8052_v50  ;;  %5435 = vmatpush3.msra.mxu0 %v8055_v60  ;;  %9699 = vst [vmem:[#allocation49_spill] sm:$0xff] %v8078_v18  ;;  %v8082_v50 = vld [vmem:[#allocation14 + $0x20] sm:$0xff]  ;;  %v8085_v60 = vld [vmem:[#allocation14 + $0xb8] sm:$0xff] }
 0x615   :  { %3159 = vmatpush1.msra.mxu1 %v8058_v7  ;;  %5436 = vmatprep.subr.mxu0 %v9477_v57  ;;  %9700 = vst [vmem:[#allocation97_spill] sm:$0xff] %v8082_v50  ;;  %9701 = vst [vmem:[#allocation51_spill] sm:$0xff] %v8085_v60  ;;  %v8088_v7 = vld [vmem:[#allocation14 + $0x18] sm:$0xff] }
 0x616   :  { %3160 = vmatprep.subr.mxu1 %v8062_v14  ;;  %5437 = vmatpush3.msra.mxu0 %v8065_v36  ;;  %9702 = vst [vmem:[#allocation34_spill] sm:$0xff] %v8088_v7  ;;  %v8092_v14 = vld [vmem:[#allocation14 + $0x8] sm:$0xff]  ;;  %v8095_v36 = vld [vmem:[#allocation14 + $0xa0] sm:$0xff] }
 0x617   :  { %3161 = vmatpush1.msra.mxu1 %v8068_v4  ;;  %5438 = vmatprep.subr.mxu0 %v9477_v57  ;;  %9703 = vst [vmem:[#allocation98_spill] sm:$0xff] %v8092_v14  ;;  %9704 = vst [vmem:[#allocation37_spill] sm:$0xff] %v8095_v36  ;;  %v8098_v4 = vld [vmem:[#allocation14] sm:$0xff] }
 0x618   :  { %3162 = vmatprep.subr.mxu1 %v8072_v52  ;;  %5439 = vmatpush3.msra.mxu0 %v8075_v61  ;;  %9705 = vst [vmem:[#allocation40_spill] sm:$0xff] %v8098_v4  ;;  %v8103_v52 = vld [vmem:[#allocation14 + $0x88] sm:$0xff] }
 0x619   :  { %3163 = vmatpush1.msra.mxu1 %v8078_v18  ;;  %5440 = vmatprep.subr.mxu0 %v9477_v57  ;;  %9706 = vst [vmem:[#allocation99_spill] sm:$0xff] %v8103_v52  ;;  %v8109_v18 = vld [vmem:[#allocation14 + $0x70] sm:$0xff] }
 0x61a   :  { %3164 = vmatprep.subr.mxu1 %v8082_v50  ;;  %5441 = vmatpush3.msra.mxu0 %v8085_v60  ;;  %9707 = vst [vmem:[#allocation43_spill] sm:$0xff] %v8109_v18 }
 0x61b   :  { %3165 = vmatpush1.msra.mxu1 %v8088_v7  ;;  %5442 = vmatprep.subr.mxu0 %v9477_v57  ;;  %v8114_v7 = vld [vmem:[#allocation14 + $0x58] sm:$0xff] }
 0x61c   :  { %3166 = vmatprep.subr.mxu1 %v8092_v14  ;;  %5443 = vmatpush3.msra.mxu0 %v8095_v36  ;;  %9708 = vst [vmem:[#allocation46_spill] sm:$0xff] %v8114_v7  ;;  %v8127_v14 = vld [vmem:[#allocation14 + $0x28] sm:$0xff] }
 0x61d   :  { %3167 = vmatpush1.msra.mxu1 %v8098_v4  ;;  %5444 = vmatprep.subr.mxu0 %v9477_v57  ;;  %v8121_v4 = vld [vmem:[#allocation14 + $0x40] sm:$0xff]  ;;  %9710 = vst [vmem:[#allocation47_spill] sm:$0xff] %v8127_v14 }
 0x61e   :  { %3201 = vmatmul.mubr.f32.vlgmr.msra.gmra.mxu1 %v9477_v57  ;;  %5445 = vmatpush3.msra.mxu0 %v8103_v52  ;;  %9709 = vst [vmem:[#allocation100_spill] sm:$0xff] %v8121_v4 }
 0x61f   :  { %5446 = vmatprep.subr.mxu0 %v9477_v57  ;;  %5456 = vmatprep.mubr.msk.f32.mxu0 %vm6322_vm0, %v9477_v57 }
 0x620   :  { %5447 = vmatpush3.msra.mxu0 %v8109_v18  ;;  %3306 = vmatprep.subr.mxu1 %v7756_v34  ;;  %v8133_v34 = vld [vmem:[#allocation14 + $0x10] sm:$0xff] }
 0x621   :  { %5448 = vmatprep.subr.mxu0 %v9477_v57  ;;  %3307 = vmatpush1.msra.mxu1 %v7777_v24  ;;  %9711 = vst [vmem:[#allocation85_spill] sm:$0xff] %v8133_v34  ;;  %v9712_v24 = vld [vmem:[#allocation78_spill] sm:$0xff] }
 0x622   :  { %5449 = vmatpush3.msra.mxu0 %v8114_v7  ;;  %3308 = vmatprep.subr.mxu1 %v7783_v43  ;;  %v2527_v43 = vld [vmem:[%s9128_s8] sm:$0x3f] }
 0x623   :  { %5450 = vmatprep.subr.mxu0 %v9477_v57  ;;  %3309 = vmatpush1.msra.mxu1 %v7786_v10  ;;  %v9713_v10 = vld [vmem:[#allocation52_spill] sm:$0xff] }
 0x624   :  { %5451 = vmatpush3.msra.mxu0 %v8121_v4  ;;  %3310 = vmatprep.subr.mxu1 %v7790_v39  ;;  %v9714_v39 = vsub.s32 3, %v9713_v10 }
 0x625   :  { %5452 = vmatprep.subr.mxu0 %v9477_v57  ;;  %3311 = vmatpush1.msra.mxu1 %v7794_v21 }
 0x626   :  { %5453 = vmatpush3.msra.mxu0 %v8127_v14  ;;  %3312 = vmatprep.subr.mxu1 %v7799_v51  ;;  %v8208_v21 = vrot.slane %v2527_v43, %v9714_v39 }
 0x627   :  { %5454 = vmatprep.subr.mxu0 %v9477_v57  ;;  %3313 = vmatpush1.msra.mxu1 %v7802_v23 }
 0x628   :  { %5455 = vmatpush3.msra.mxu0 %v8133_v34  ;;  %3314 = vmatprep.subr.mxu1 %v7806_v0 }
 0x629   :  { %5457 = vmatmul.mubr.f32.vlgmr.msra.gmra.mxu0 %v9477_v57  ;;  %5459 = vmatprep.subr.mxu0 %v9477_v57 }
 0x62a   :  { %5460 = vmatpush3.msra.mxu0 %v7892_v8  ;;  %3315 = vmatpush1.msra.mxu1 %v7810_v17 }
 0x62b   :  { %5461 = vmatprep.subr.mxu0 %v9477_v57  ;;  %3316 = vmatprep.subr.mxu1 %v7815_v49 }
 0x62c   :  { %5462 = vmatpush3.msra.mxu0 %v7896_v62  ;;  %3317 = vmatpush1.msra.mxu1 %v7818_v58  ;;  %v9716_v58 = vld [vmem:[#allocation55_spill] sm:$0xff] }
 0x62d   :  { %5463 = vmatprep.subr.mxu0 %v9477_v57  ;;  %3318 = vmatprep.subr.mxu1 %v7822_v6  ;;  %v2532_v6 = vrot.slane %v2527_v43, %v9716_v58 }
 0x62e   :  { %5464 = vmatpush3.msra.mxu0 %v7900_v11  ;;  %3319 = vmatpush1.msra.mxu1 %v7826_v55  ;;  %v9717_v55 = vld [vmem:[#allocation54_spill] sm:$0xff] }
 0x62f   :  { %5465 = vmatprep.subr.mxu0 %v9477_v57  ;;  %3320 = vmatprep.subr.mxu1 %v7831_v40  ;;  %v8217_v40 = vrot.slane %v2527_v43, %v9717_v55 }
 0x630   :  { %5466 = vmatpush3.msra.mxu0 %v7904_v2  ;;  %3321 = vmatpush1.msra.mxu1 %v7834_v44 }
 0x631   :  { %5467 = vmatprep.subr.mxu0 %v9477_v57  ;;  %3322 = vmatprep.subr.mxu1 %v7838_v5 }
 0x632   :  { %5468 = vmatpush3.msra.mxu0 %v7908_v22  ;;  %3323 = vmatpush1.msra.mxu1 %v7842_v1  ;;  %v9718_v1 = vld [vmem:[#allocation56_spill] sm:$0xff] }
 0x633   :  { %5469 = vmatprep.subr.mxu0 %v9477_v57  ;;  %3324 = vmatprep.subr.mxu1 %v7847_v9  ;;  %v2536_v9 = vrot.slane %v2527_v43, %v9718_v1 }
 0x634   :  { %5470 = vmatpush3.msra.mxu0 %v7912_v30  ;;  %3325 = vmatpush1.msra.mxu1 %v7850_v63 }
 0x635   :  { %5471 = vmatprep.subr.mxu0 %v9477_v57  ;;  %3326 = vmatprep.subr.mxu1 %v7853_v15 }
 0x636   :  { %5472 = vmatpush3.msra.mxu0 %v7916_v19  ;;  %3327 = vmatpush1.msra.mxu1 %v7856_v41 }
 0x637   :  { %5473 = vmatprep.subr.mxu0 %v9477_v57  ;;  %3328 = vmatprep.subr.mxu1 %v7859_v12 }
 0x638   :  { %5474 = vmatpush3.msra.mxu0 %v7920_v59  ;;  %3329 = vmatpush1.msra.mxu1 %v7862_v32 }
 0x639   :  { %5475 = vmatprep.subr.mxu0 %v9477_v57  ;;  %3330 = vmatprep.subr.mxu1 %v7865_v37 }
 0x63a   :  { %5476 = vmatpush3.msra.mxu0 %v7924_v31  ;;  %3331 = vmatpush1.msra.mxu1 %v7868_v48 }
 0x63b   :  { %5477 = vmatprep.subr.mxu0 %v9477_v57  ;;  %3332 = vmatprep.subr.mxu1 %v7871_v35 }
 0x63c   :  { %5478 = vmatpush3.msra.mxu0 %v7928_v29  ;;  %3333 = vmatpush1.msra.mxu1 %v7874_v54 }
 0x63d   :  { %5479 = vmatprep.subr.mxu0 %v9477_v57  ;;  %3334 = vmatprep.subr.mxu1 %v7877_v27 }
 0x63e   :  { %5480 = vmatpush3.msra.mxu0 %v7932_v3  ;;  %3335 = vmatpush1.msra.mxu1 %v7880_v42 }
 0x63f   :  { %5481 = vmatprep.subr.mxu0 %v9477_v57  ;;  %3336 = vmatprep.subr.mxu1 %v7883_v26 }
 0x640   :  { %5482 = vmatpush3.msra.mxu0 %v7936_v33  ;;  %3337 = vmatpush1.msra.mxu1 %v7886_v53 }
 0x641   :  { %5483 = vmatprep.subr.mxu0 %v9477_v57  ;;  %3370 = vmatprep.mubr.f32.mxu1 %v9477_v57 }
 0x642   :  { %5484 = vmatpush3.msra.mxu0 %v7940_v45  ;;  %5491 = vmatprep.mubr.msk.f32.mxu0 %vm6322_vm0, %v9477_v57 }
 0x643   :  { %5485 = vmatprep.subr.mxu0 %v9477_v57  ;;  %3468 = vmatprep.subr.mxu1 %v7952_v25 }
 0x644   :  { %5486 = vmatpush3.msra.mxu0 %v7944_v47 }
 0x645   :  { %5487 = vmatprep.subr.mxu0 %v9477_v57 }
 0x646   :  { %5488 = vmatpush3.msra.mxu0 %v7948_v46 }
 0x647   :  { %5489 = vmatprep.subr.mxu0 %v9477_v57 }
 0x648   :  { %5490 = vmatpush3.msra.mxu0 %v9712_v24 }
 0x649   :  { %5494 = vmatprep.subr.mxu0 %v9477_v57 }
 0x674   :  { %v2625_v51 = vpop.f32.mrf.mxu1  ;;  %v8210_v23 = vpop.f32.mrf.mxu0 }
 0x676   :  { %v2627_v0 = vpop.f32.mrf.mxu1  ;;  %v2722_v17 = vpop.f32.mrf.mxu0 }
 0x677   :  { %v8213_v49 = vadd.f32 %v2722_v17, %v8208_v21 }
 0x679   :  { %9715 = vst [vmem:[#allocation101_spill] sm:$0xff] %v8213_v49 }
 0x67a   :  { %v2631_v44 = vpop.f32.mrf.mxu1  ;;  %v2726_v5 = vpop.f32.mrf.mxu0 }
 0x67b   :  { %v8220_v63 = vadd.f32 %v2631_v44, %v2532_v6  ;;  %v8223_v15 = vadd.f32 %v2726_v5, %v8217_v40 }
 0x67c   :  { %v2633_v41 = vpop.f32.mrf.mxu1  ;;  %v2728_v12 = vpop.f32.mrf.mxu0 }
 0x67d   :  { %9719 = vst [vmem:[#allocation50_spill] sm:$0xff] %v8223_v15  ;;  %v8225_v32 = vadd.f32 %v2633_v41, %v2536_v9  ;;  %v8228_v37 = vadd.f32 %v2728_v12, %v8208_v21 }
 0x67f   :  { %9720 = vst [vmem:[#allocation67_spill] sm:$0xff] %v8225_v32  ;;  %9721 = vst [vmem:[#allocation68_spill] sm:$0xff] %v8228_v37  ;;  %v9735_v32 = vsub.s32 5, %v9713_v10 }
 0x680   :  { %v2637_v48 = vpop.f32.mrf.mxu1  ;;  %v2732_v35 = vpop.f32.mrf.mxu0 }
 0x681   :  { %v8230_v54 = vadd.f32 %v2637_v48, %v2532_v6  ;;  %v8233_v27 = vadd.f32 %v2732_v35, %v8217_v40 }
 0x682   :  { %v2639_v42 = vpop.f32.mrf.mxu1  ;;  %v2734_v26 = vpop.f32.mrf.mxu0 }
 0x683   :  { %9722 = vst [vmem:[#allocation58_spill] sm:$0xff] %v8230_v54  ;;  %9723 = vst [vmem:[#allocation65_spill] sm:$0xff] %v8233_v27  ;;  %v8235_v53 = vadd.f32 %v2639_v42, %v2536_v9  ;;  %v8238_v39 = vadd.f32 %v2734_v26, %v8208_v21 }
 0x685   :  { %9724 = vst [vmem:[#allocation76_spill] sm:$0xff] %v8235_v53  ;;  %9725 = vst [vmem:[#allocation77_spill] sm:$0xff] %v8238_v39 }
 0x686   :  { %v2643_v17 = vpop.f32.mrf.mxu1  ;;  %v2738_v44 = vpop.f32.mrf.mxu0 }
 0x687   :  { %v8240_v5 = vadd.f32 %v2643_v17, %v2532_v6  ;;  %v8243_v41 = vadd.f32 %v2738_v44, %v8217_v40  ;;  %v2892_v44 = vld [vmem:[%s9130_s10] sm:$0x7] }
 0x688   :  { %v2645_v12 = vpop.f32.mrf.mxu1  ;;  %v2740_v48 = vpop.f32.mrf.mxu0 }
 0x689   :  { %9726 = vst [vmem:[#allocation60_spill] sm:$0xff] %v8240_v5  ;;  %9727 = vst [vmem:[#allocation66_spill] sm:$0xff] %v8243_v41  ;;  %v8245_v49 = vadd.f32 %v2645_v12, %v2536_v9  ;;  %v8248_v35 = vadd.f32 %v2740_v48, %v8208_v21  ;;  %v8261_v12 = vrot.slane %v2892_v44, %v9716_v58 }
 0x68a   :  { %v2628_v5 = vadd.f32 %v2627_v0, %v2536_v9 }
 0x68b   :  { %9728 = vst [vmem:[#allocation63_spill] sm:$0xff] %v8245_v49  ;;  %9729 = vst [vmem:[#allocation57_spill] sm:$0xff] %v8248_v35  ;;  %v2626_v49 = vadd.f32 %v2625_v51, %v2532_v6  ;;  %v9734_v51 = vsub.s32 4, %v9713_v10 }
 0x68c   :  { %v2649_v37 = vpop.f32.mrf.mxu1  ;;  %v2744_v42 = vpop.f32.mrf.mxu0  ;;  %9733 = vst [vmem:[#allocation81_spill] sm:$0xff] %v8261_v12 }
 0x68d   :  { %v8250_v27 = vadd.f32 %v2649_v37, %v2532_v6  ;;  %v8253_v26 = vadd.f32 %v2744_v42, %v8217_v40  ;;  %v8272_v6 = vrot.slane %v2527_v43, %v9734_v51 }
 0x68e   :  { %v2651_v39 = vpop.f32.mrf.mxu1  ;;  %v8263_v41 = vpop.f32.mrf.mxu0 }
 0x68f   :  { %9730 = vst [vmem:[#allocation80_spill] sm:$0xff] %v8250_v27  ;;  %9731 = vst [vmem:[#allocation64_spill] sm:$0xff] %v8253_v26  ;;  %v8255_v17 = vadd.f32 %v2651_v39, %v2536_v9  ;;  %v8267_v27 = vrot.slane %v2892_v44, %v9718_v1 }
 0x691   :  { %9732 = vst [vmem:[#allocation62_spill] sm:$0xff] %v8255_v17 }
 0x69d   :  { %v3024_v48 = vpop.f32.mrf.mxu0 }
 0x69e   :  { %v3025_v37 = vadd.f32 %v3024_v48, %v8261_v12 }
 0x69f   :  { %v3026_v26 = vpop.f32.mrf.mxu0 }
 0x6a0   :  { %v3099_v42 = vadd.f32 %v3025_v37, %v2626_v49  ;;  %v3027_v17 = vadd.f32 %v3026_v26, %v8267_v27  ;;  %v8276_v49 = vrot.slane %v2527_v43, %v9735_v32  ;;  %v8279_v26 = vrot.slane %v2892_v44, %v9717_v55 }
 0x6a1   :  { %v2721_v43 = vadd.f32 %v8210_v23, %v8217_v40 }
 0x6a2   :  { %v4675_v39 = vmul.f32 -1.442695, %v3099_v42  ;;  %v3106_v53 = vadd.f32 %v3027_v17, %v2628_v5 }
 0x6a4   :  { %5854 = vpow2.f32 %v4675_v39  ;;  %v4676_v54 = vmul.f32 -1.442695, %v3106_v53 }
 0x6a6   :  { %5856 = vpow2.f32 %v4676_v54 }
 0x6b1   :  { %v5855_v35 = vpop.eup %5854 }
 0x6b2   :  { %v3103_v15 = vadd.f32 1.0, %v5855_v35 }
 0x6b3   :  { %v5857_v48 = vpop.eup %5856 }
 0x6b4   :  { %5858 = vrcp.f32 %v3103_v15  ;;  %v3110_v9 = vadd.f32 1.0, %v5857_v48 }
 0x6b6   :  { %5860 = vrcp.f32 %v3110_v9 }
 0x6bd   :  { %v2815_v37 = vpop.f32.mrf.mxu1 }
 0x6be   :  { %v8282_v0 = vadd.f32 %v2815_v37, %v8272_v6 }
 0x6bf   :  { %v2817_v54 = vpop.f32.mrf.mxu1 }
 0x6c0   :  { %9736 = vst [vmem:[#allocation86_spill] sm:$0xff] %v8282_v0  ;;  %v8285_v15 = vadd.f32 %v2817_v54, %v8276_v49  ;;  %v3095_v53 = vpop.f32.mrf.mxu0  ;;  %v9751_v0 = vld [vmem:[#allocation27_spill] sm:$0xff] }
 0x6c1   :  { %v5859_v5 = vpop.eup %5858  ;;  %v3096_v35 = vadd.f32 %v3095_v53, %v8279_v26 }
 0x6c2   :  { %9737 = vst [vmem:[#allocation61_spill] sm:$0xff] %v8285_v15  ;;  %v2821_v17 = vpop.f32.mrf.mxu1  ;;  %v5423_v10 = vpop.f32.mrf.mxu0 }
 0x6c3   :  { %v3113_v32 = vmul.f32 %v5859_v5, %v3096_v35  ;;  %v8291_v44 = vadd.f32 %v2821_v17, %v8272_v6  ;;  %v5861_v35 = vpop.eup %5860 }
 0x6c4   :  { %v2823_v42 = vpop.f32.mrf.mxu1  ;;  %v3116_v17 = vsub.f32 1.0, %v5861_v35 }
 0x6c5   :  { %9738 = vst [vmem:[#allocation71_spill] sm:$0xff] %v8291_v44  ;;  %v3114_v39 = vadd.f32 %v3113_v32, %v2721_v43  ;;  %v8294_v51 = vadd.f32 %v2823_v42, %v8276_v49  ;;  %v3118_v32 = vmul.f32 0.0, %v5861_v35  ;;  %v9752_v44 = vld [vmem:[#allocation89_spill] sm:$0xff] }
 0x6c6   :  { %v2827_v48 = vpop.f32.mrf.mxu1 }
 0x6c7   :  { %9739 = vst [vmem:[#allocation70_spill] sm:$0xff] %v8294_v51  ;;  %5862 = vtanh.f32 %v3114_v39  ;;  %v8297_v37 = vadd.f32 %v2827_v48, %v8272_v6  ;;  %v8313_v48 = vld [vmem:[%s9132_s12] sm:$0x7]  ;;  %s9083_s12 = sld [smem:[#allocation16 + $0x1]] }
 0x6c8   :  { %v2829_v54 = vpop.f32.mrf.mxu1  ;;  %v8338_v15 = vrot.slane %v8313_v48, %v9718_v1 }
 0x6c9   :  { %9740 = vst [vmem:[#allocation75_spill] sm:$0xff] %v8297_v37  ;;  %v8300_v53 = vadd.f32 %v2829_v54, %v8276_v49  ;;  %v9745_v54 = vld [vmem:[#allocation79_spill] sm:$0xff]  ;;  %v9755_v37 = vld [vmem:[#allocation29_spill] sm:$0xff] }
 0x6ca   :  { %v2833_v23 = vpop.f32.mrf.mxu1  ;;  %9750 = vst [vmem:[#allocation73_spill] sm:$0xff] %v8338_v15 }
 0x6cb   :  { %9741 = vst [vmem:[#allocation72_spill] sm:$0xff] %v8300_v53  ;;  %v8303_v40 = vadd.f32 %v2833_v23, %v8272_v6  ;;  %v8321_v23 = vrot.slane %v8313_v48, %v9716_v58  ;;  %v2747_v58 = vadd.f32 %v8263_v41, %v8208_v21  ;;  %v9753_v21 = vld [vmem:[#allocation28_spill] sm:$0xff]  ;;  %v9754_v41 = vld [vmem:[#allocation38_spill] sm:$0xff] }
 0x6cc   :  { %v2835_v9 = vpop.f32.mrf.mxu1 }
 0x6cd   :  { %9742 = vst [vmem:[#allocation82_spill] sm:$0xff] %v8303_v40  ;;  %v8306_v5 = vadd.f32 %v2835_v9, %v8276_v49  ;;  %9746 = vst [vmem:[#allocation69_spill] sm:$0xff] %v8321_v23  ;;  %v9747_v9 = vld [vmem:[#allocation25_spill] sm:$0xff] }
 0x6ce   :  { %v2839_v39 = vpop.f32.mrf.mxu1  ;;  %v9757_v40 = vld [vmem:[#allocation41_spill] sm:$0xff] }
 0x6cf   :  { %9743 = vst [vmem:[#allocation83_spill] sm:$0xff] %v8306_v5  ;;  %v9756_v5 = vld [vmem:[#allocation90_spill] sm:$0xff] }
 0x6d0   :  { %v8325_v35 = vpop.f32.mrf.mxu1 }
 0x6d4   :  { %v5863_v10 = vpop.eup %5862 }
 0x6d5   :  { %v3117_v43 = vmul.f32 %v5863_v10, %v3116_v17  ;;  %v9748_v17 = vld [vmem:[#allocation88_spill] sm:$0xff] }
 0x6d7   :  { %v8308_v42 = vadd.f32 %v3118_v32, %v3117_v43  ;;  %v9749_v43 = vld [vmem:[#allocation26_spill] sm:$0xff] }
 0x6d9   :  { %9744 = vst [vmem:[#allocation53_spill] sm:$0xff] %v8308_v42  ;;  %3371 = vmatmul.mubr.f32.vlgmr.msra.gmra.mxu1 %v8308_v42  ;;  %5492 = vmatmul.mubr.f32.vlgmr.msra.gmra.mxu0 %v8308_v42 }
 0x6da   :  { %3469 = vmatpush1.msra.mxu1 %v9745_v54  ;;  %5495 = vmatpush3.msra.mxu0 %v7981_v16 }
 0x6db   :  { %3470 = vmatprep.subr.mxu1 %v9747_v9  ;;  %5496 = vmatprep.subr.mxu0 %v9477_v57 }
 0x6dc   :  { %3471 = vmatpush1.msra.mxu1 %v9748_v17  ;;  %5497 = vmatpush3.msra.mxu0 %v7999_v38 }
 0x6dd   :  { %3472 = vmatprep.subr.mxu1 %v7971_v56  ;;  %5498 = vmatprep.subr.mxu0 %v9477_v57 }
 0x6de   :  { %v3202_v10 = vpop.f32.mrf.mxu1  ;;  %3473 = vmatpush1.msra.mxu1 %v9749_v43  ;;  %5499 = vmatpush3.msra.mxu0 %v8017_v13 }
 0x6df   :  { %v3203_v32 = vadd.f32 %v3202_v10, %v8321_v23  ;;  %3474 = vmatprep.subr.mxu1 %v9751_v0  ;;  %5500 = vmatprep.subr.mxu0 %v9477_v57 }
 0x6e0   :  { %v3204_v51 = vpop.f32.mrf.mxu1  ;;  %3475 = vmatpush1.msra.mxu1 %v9752_v44  ;;  %5501 = vmatpush3.msra.mxu0 %v8035_v28 }
 0x6e1   :  { %v3277_v53 = vadd.f32 %v3203_v32, %v2747_v58  ;;  %3476 = vmatprep.subr.mxu1 %v7989_v20  ;;  %5502 = vmatprep.subr.mxu0 %v9477_v57  ;;  %v3205_v10 = vadd.f32 %v3204_v51, %v8338_v15  ;;  %v2840_v58 = vadd.f32 %v2839_v39, %v8272_v6  ;;  %v9758_v32 = vld [vmem:[#allocation30_spill] sm:$0xff]  ;;  %v9761_v15 = vld [vmem:[#allocation91_spill] sm:$0xff]  ;;  %v9763_v6 = vld [vmem:[#allocation33_spill] sm:$0xff] }
 0x6e2   :  { %3477 = vmatpush1.msra.mxu1 %v9753_v21  ;;  %5503 = vmatpush3.msra.mxu0 %v9754_v41  ;;  %v9759_v21 = vld [vmem:[#allocation31_spill] sm:$0xff]  ;;  %v9764_v39 = vld [vmem:[#allocation92_spill] sm:$0xff] }
 0x6e3   :  { %v4677_v1 = vmul.f32 -1.442695, %v3277_v53  ;;  %3478 = vmatprep.subr.mxu1 %v9755_v37  ;;  %5504 = vmatprep.subr.mxu0 %v9477_v57  ;;  %v9760_v53 = vld [vmem:[#allocation44_spill] sm:$0xff]  ;;  %v3284_v51 = vadd.f32 %v3205_v10, %v2840_v58  ;;  %v9765_v10 = vld [vmem:[#allocation35_spill] sm:$0xff] }
 0x6e4   :  { %3479 = vmatpush1.msra.mxu1 %v9756_v5  ;;  %5505 = vmatpush3.msra.mxu0 %v9757_v40  ;;  %v9762_v37 = vld [vmem:[#allocation32_spill] sm:$0xff] }
 0x6e5   :  { %5864 = vpow2.f32 %v4677_v1  ;;  %3480 = vmatprep.subr.mxu1 %v9758_v32  ;;  %5506 = vmatprep.subr.mxu0 %v9477_v57  ;;  %v4678_v1 = vmul.f32 -1.442695, %v3284_v51  ;;  %v9766_v58 = vld [vmem:[#allocation36_spill] sm:$0xff]  ;;  %v9771_v51 = vld [vmem:[#allocation95_spill] sm:$0xff] }
 0x6e6   :  { %3481 = vmatpush1.msra.mxu1 %v9759_v21  ;;  %5507 = vmatpush3.msra.mxu0 %v9760_v53 }
 0x6e7   :  { %3482 = vmatprep.subr.mxu1 %v9761_v15  ;;  %5508 = vmatprep.subr.mxu0 %v9477_v57  ;;  %5866 = vpow2.f32 %v4678_v1  ;;  %v9774_v1 = vld [vmem:[#allocation49_spill] sm:$0xff] }
 0x6e8   :  { %3483 = vmatpush1.msra.mxu1 %v9762_v37  ;;  %5509 = vmatpush3.msra.mxu0 %v8075_v61  ;;  %v9767_v61 = vld [vmem:[#allocation93_spill] sm:$0xff] }
 0x6e9   :  { %v3273_v40 = vpop.f32.mrf.mxu0  ;;  %3484 = vmatprep.subr.mxu1 %v9763_v6  ;;  %5510 = vmatprep.subr.mxu0 %v9477_v57  ;;  %v9768_v6 = vld [vmem:[#allocation39_spill] sm:$0xff] }
 0x6ea   :  { %3485 = vmatpush1.msra.mxu1 %v9764_v39  ;;  %5511 = vmatpush3.msra.mxu0 %v8085_v60  ;;  %v9769_v60 = vld [vmem:[#allocation94_spill] sm:$0xff] }
 0x6eb   :  { %v5458_v53 = vpop.f32.mrf.mxu0  ;;  %3486 = vmatprep.subr.mxu1 %v9765_v10  ;;  %5512 = vmatprep.subr.mxu0 %v9477_v57 }
 0x6ec   :  { %3487 = vmatpush1.msra.mxu1 %v9766_v58  ;;  %5513 = vmatpush3.msra.mxu0 %v8095_v36  ;;  %v9770_v53 = vld [vmem:[#allocation42_spill] sm:$0xff]  ;;  %v9772_v36 = vld [vmem:[#allocation45_spill] sm:$0xff] }
 0x6ed   :  { %3488 = vmatprep.subr.mxu1 %v9767_v61  ;;  %5514 = vmatprep.subr.mxu0 %v9477_v57 }
 0x6ee   :  { %3489 = vmatpush1.msra.mxu1 %v9768_v6  ;;  %5515 = vmatpush3.msra.mxu0 %v8103_v52  ;;  %v9773_v52 = vld [vmem:[#allocation96_spill] sm:$0xff] }
 0x6ef   :  { %3490 = vmatprep.subr.mxu1 %v9769_v60  ;;  %5516 = vmatprep.subr.mxu0 %v9477_v57 }
 0x6f0   :  { %3491 = vmatpush1.msra.mxu1 %v9770_v53  ;;  %5517 = vmatpush3.msra.mxu0 %v8109_v18 }
 0x6f1   :  { %3492 = vmatprep.subr.mxu1 %v9771_v51  ;;  %5518 = vmatprep.subr.mxu0 %v9477_v57  ;;  %v9775_v51 = vld [vmem:[#allocation34_spill] sm:$0xff] }
 0x6f2   :  { %v5865_v61 = vpop.eup %5864  ;;  %3493 = vmatpush1.msra.mxu1 %v9772_v36  ;;  %5519 = vmatpush3.msra.mxu0 %v8114_v7  ;;  %v9776_v36 = vld [vmem:[#allocation98_spill] sm:$0xff] }
 0x6f3   :  { %v3281_v6 = vadd.f32 1.0, %v5865_v61  ;;  %3494 = vmatprep.subr.mxu1 %v9773_v52  ;;  %5520 = vmatprep.subr.mxu0 %v9477_v57  ;;  %v9777_v61 = vld [vmem:[#allocation40_spill] sm:$0xff] }
 0x6f4   :  { %3495 = vmatpush1.msra.mxu1 %v9774_v1  ;;  %5521 = vmatpush3.msra.mxu0 %v8121_v4 }
 0x6f5   :  { %5868 = vrcp.f32 %v3281_v6  ;;  %3496 = vmatprep.subr.mxu1 %v8082_v50  ;;  %5522 = vmatprep.subr.mxu0 %v9477_v57  ;;  %v8397_v6 = vld [vmem:[#allocation13 + $0x170] sm:$0xff] }
 0x6f6   :  { %3497 = vmatpush1.msra.mxu1 %v9775_v51  ;;  %5523 = vmatpush3.msra.mxu0 %v8127_v14  ;;  %9778 = vst [vmem:[#allocation74_spill] sm:$0xff] %v8397_v6  ;;  %v5867_v14 = vpop.eup %5866 }
 0x6f7   :  { %3498 = vmatprep.subr.mxu1 %v9776_v36  ;;  %5524 = vmatprep.subr.mxu0 %v9477_v57  ;;  %v8403_v36 = vrot.slane %v8313_v48, %v9717_v55  ;;  %v3288_v51 = vadd.f32 1.0, %v5867_v14  ;;  %v8412_v14 = vld [vmem:[#allocation13 + $0x168] sm:$0xff]  ;;  %v8452_v55 = vld [vmem:[#allocation13 + $0xf0] sm:$0xff] }
 0x6f8   :  { %3499 = vmatpush1.msra.mxu1 %v9777_v61  ;;  %3532 = vmatprep.mubr.f32.mxu1 %v9477_v57  ;;  %v8476_v48 = vld [vmem:[#allocation13 + $0xa8] sm:$0xff] }
 0x6f9   :  { %5525 = vmatpush3.msra.mxu0 %v8133_v34  ;;  %5526 = vmatprep.mubr.msk.f32.mxu0 %vm6322_vm0, %v9477_v57  ;;  %v3274_v61 = vadd.f32 %v3273_v40, %v8403_v36  ;;  %v2842_v34 = vadd.f32 %v8325_v35, %v8276_v49  ;;  %5870 = vrcp.f32 %v3288_v51  ;;  %v8460_v49 = vld [vmem:[#allocation13 + $0xd8] sm:$0xff]  ;;  %v8468_v40 = vld [vmem:[#allocation13 + $0xc0] sm:$0xff]  ;;  %v8484_v35 = vld [vmem:[#allocation13 + $0x90] sm:$0xff] }
 0x6fa   :  { %3638 = vmatprep.subr.mxu1 %v8397_v6  ;;  %5529 = vmatprep.subr.mxu0 %v9477_v57  ;;  %9780 = vst [vmem:[#allocation59_spill] sm:$0xff] %v8484_v35  ;;  %v8500_v51 = vld [vmem:[#allocation13 + $0x60] sm:$0xff] }
 0x6fb   :  { %9784 = vst [vmem:[#allocation52_spill] sm:$0xff] %v8500_v51 }
 0x702   :  { %v5869_v50 = vpop.eup %5868 }
 0x703   :  { %v3291_v4 = vmul.f32 %v5869_v50, %v3274_v61  ;;  %v8416_v50 = vld [vmem:[#allocation13 + $0x158] sm:$0xff]  ;;  %v8516_v61 = vld [vmem:[#allocation13 + $0x30] sm:$0xff] }
 0x704   :  { %9788 = vst [vmem:[#allocation79_spill] sm:$0xff] %v8516_v61 }
 0x705   :  { %v3292_v1 = vadd.f32 %v3291_v4, %v2842_v34  ;;  %v8436_v4 = vld [vmem:[#allocation13 + $0x120] sm:$0xff]  ;;  %v8444_v34 = vld [vmem:[#allocation13 + $0x108] sm:$0xff] }
 0x706   :  { %v5871_v52 = vpop.eup %5870 }
 0x707   :  { %5872 = vtanh.f32 %v3292_v1  ;;  %v3294_v6 = vsub.f32 1.0, %v5871_v52  ;;  %v3296_v53 = vmul.f32 0.0, %v5871_v52  ;;  %v8424_v52 = vld [vmem:[#allocation13 + $0x140] sm:$0xff]  ;;  %v8508_v1 = vld [vmem:[#allocation13 + $0x48] sm:$0xff] }
 0x708   :  { %9786 = vst [vmem:[#allocation54_spill] sm:$0xff] %v8508_v1 }
 0x714   :  { %v5873_v7 = vpop.eup %5872 }
 0x715   :  { %v3295_v18 = vmul.f32 %v5873_v7, %v3294_v6  ;;  %v8420_v7 = vld [vmem:[#allocation13 + $0x150] sm:$0xff]  ;;  %v8524_v6 = vld [vmem:[#allocation13 + $0x18] sm:$0xff] }
 0x716   :  { %9790 = vst [vmem:[#allocation88_spill] sm:$0xff] %v8524_v6 }
 0x717   :  { %v8408_v60 = vadd.f32 %v3296_v53, %v3295_v18  ;;  %v8428_v18 = vld [vmem:[#allocation13 + $0x138] sm:$0xff] }
 0x718   :  { %v8492_v53 = vld [vmem:[#allocation13 + $0x78] sm:$0xff] }
 0x719   :  { %9779 = vst [vmem:[#allocation84_spill] sm:$0xff] %v8408_v60  ;;  %3533 = vmatmul.mubr.f32.vlgmr.msra.gmra.mxu1 %v8408_v60  ;;  %5527 = vmatmul.mubr.f32.vlgmr.msra.gmra.mxu0 %v8408_v60  ;;  %9782 = vst [vmem:[#allocation24_spill] sm:$0xff] %v8492_v53 }
 0x71a   :  { %3639 = vmatpush1.msra.mxu1 %v8412_v14  ;;  %5530 = vmatpush3.msra.mxu0 %v7892_v8  ;;  %v8432_v8 = vld [vmem:[#allocation13 + $0x128] sm:$0xff] }
 0x71b   :  { %3640 = vmatprep.subr.mxu1 %v8416_v50  ;;  %5531 = vmatprep.subr.mxu0 %v9477_v57 }
 0x71c   :  { %3641 = vmatpush1.msra.mxu1 %v8420_v7  ;;  %5532 = vmatpush3.msra.mxu0 %v7896_v62  ;;  %v8440_v62 = vld [vmem:[#allocation13 + $0x110] sm:$0xff] }
 0x71d   :  { %3642 = vmatprep.subr.mxu1 %v8424_v52  ;;  %5533 = vmatprep.subr.mxu0 %v9477_v57 }
 0x71e   :  { %3643 = vmatpush1.msra.mxu1 %v8428_v18  ;;  %5534 = vmatpush3.msra.mxu0 %v7900_v11  ;;  %v8448_v11 = vld [vmem:[#allocation13 + $0xf8] sm:$0xff] }
 0x71f   :  { %3644 = vmatprep.subr.mxu1 %v8432_v8  ;;  %5535 = vmatprep.subr.mxu0 %v9477_v57 }
 0x720   :  { %3645 = vmatpush1.msra.mxu1 %v8436_v4  ;;  %5536 = vmatpush3.msra.mxu0 %v7904_v2  ;;  %v8456_v2 = vld [vmem:[#allocation13 + $0xe0] sm:$0xff] }
 0x721   :  { %3646 = vmatprep.subr.mxu1 %v8440_v62  ;;  %5537 = vmatprep.subr.mxu0 %v9477_v57 }
 0x722   :  { %3647 = vmatpush1.msra.mxu1 %v8444_v34  ;;  %5538 = vmatpush3.msra.mxu0 %v7908_v22  ;;  %v8464_v22 = vld [vmem:[#allocation13 + $0xc8] sm:$0xff] }
 0x723   :  { %3648 = vmatprep.subr.mxu1 %v8448_v11  ;;  %5539 = vmatprep.subr.mxu0 %v9477_v57 }
 0x724   :  { %3649 = vmatpush1.msra.mxu1 %v8452_v55  ;;  %5540 = vmatpush3.msra.mxu0 %v7912_v30  ;;  %v8472_v30 = vld [vmem:[#allocation13 + $0xb0] sm:$0xff] }
 0x725   :  { %3650 = vmatprep.subr.mxu1 %v8456_v2  ;;  %5541 = vmatprep.subr.mxu0 %v9477_v57 }
 0x726   :  { %3651 = vmatpush1.msra.mxu1 %v8460_v49  ;;  %5542 = vmatpush3.msra.mxu0 %v7916_v19  ;;  %v8480_v19 = vld [vmem:[#allocation13 + $0x98] sm:$0xff] }
 0x727   :  { %3652 = vmatprep.subr.mxu1 %v8464_v22  ;;  %5543 = vmatprep.subr.mxu0 %v9477_v57 }
 0x728   :  { %3653 = vmatpush1.msra.mxu1 %v8468_v40  ;;  %5544 = vmatpush3.msra.mxu0 %v7920_v59  ;;  %v8488_v59 = vld [vmem:[#allocation13 + $0x80] sm:$0xff] }
 0x729   :  { %3654 = vmatprep.subr.mxu1 %v8472_v30  ;;  %5545 = vmatprep.subr.mxu0 %v9477_v57  ;;  %9781 = vst [vmem:[#allocation87_spill] sm:$0xff] %v8488_v59 }
 0x72a   :  { %3655 = vmatpush1.msra.mxu1 %v8476_v48  ;;  %5546 = vmatpush3.msra.mxu0 %v7924_v31  ;;  %v8496_v31 = vld [vmem:[#allocation13 + $0x68] sm:$0xff] }
 0x72b   :  { %3656 = vmatprep.subr.mxu1 %v8480_v19  ;;  %5547 = vmatprep.subr.mxu0 %v9477_v57  ;;  %9783 = vst [vmem:[#allocation78_spill] sm:$0xff] %v8496_v31 }
 0x72c   :  { %3657 = vmatpush1.msra.mxu1 %v8484_v35  ;;  %5548 = vmatpush3.msra.mxu0 %v7928_v29  ;;  %v8504_v29 = vld [vmem:[#allocation13 + $0x50] sm:$0xff] }
 0x72d   :  { %3658 = vmatprep.subr.mxu1 %v8488_v59  ;;  %5549 = vmatprep.subr.mxu0 %v9477_v57  ;;  %9785 = vst [vmem:[#allocation55_spill] sm:$0xff] %v8504_v29 }
 0x72e   :  { %3659 = vmatpush1.msra.mxu1 %v8492_v53  ;;  %5550 = vmatpush3.msra.mxu0 %v7932_v3  ;;  %v8512_v3 = vld [vmem:[#allocation13 + $0x38] sm:$0xff] }
 0x72f   :  { %3660 = vmatprep.subr.mxu1 %v8496_v31  ;;  %5551 = vmatprep.subr.mxu0 %v9477_v57  ;;  %9787 = vst [vmem:[#allocation56_spill] sm:$0xff] %v8512_v3 }
 0x730   :  { %3661 = vmatpush1.msra.mxu1 %v8500_v51  ;;  %5552 = vmatpush3.msra.mxu0 %v7936_v33  ;;  %v8520_v33 = vld [vmem:[#allocation13 + $0x20] sm:$0xff] }
 0x731   :  { %3662 = vmatprep.subr.mxu1 %v8504_v29  ;;  %5553 = vmatprep.subr.mxu0 %v9477_v57  ;;  %9789 = vst [vmem:[#allocation25_spill] sm:$0xff] %v8520_v33 }
 0x732   :  { %3663 = vmatpush1.msra.mxu1 %v8508_v1  ;;  %5554 = vmatpush3.msra.mxu0 %v7940_v45  ;;  %v8528_v45 = vld [vmem:[#allocation13 + $0x8] sm:$0xff] }
 0x733   :  { %3664 = vmatprep.subr.mxu1 %v8512_v3  ;;  %5555 = vmatprep.subr.mxu0 %v9477_v57  ;;  %9791 = vst [vmem:[#allocation26_spill] sm:$0xff] %v8528_v45 }
 0x734   :  { %3665 = vmatpush1.msra.mxu1 %v8516_v61  ;;  %5556 = vmatpush3.msra.mxu0 %v7944_v47  ;;  %v8532_v61 = vld [vmem:[#allocation13] sm:$0xff] }
 0x735   :  { %3666 = vmatprep.subr.mxu1 %v8520_v33  ;;  %5557 = vmatprep.subr.mxu0 %v9477_v57  ;;  %9792 = vst [vmem:[#allocation27_spill] sm:$0xff] %v8532_v61 }
 0x736   :  { %3667 = vmatpush1.msra.mxu1 %v8524_v6  ;;  %5558 = vmatpush3.msra.mxu0 %v7948_v46 }
 0x737   :  { %3668 = vmatprep.subr.mxu1 %v8528_v45  ;;  %5559 = vmatprep.subr.mxu0 %v9477_v57 }
 0x738   :  { %3669 = vmatpush1.msra.mxu1 %v8532_v61  ;;  %3702 = vmatprep.mubr.f32.mxu1 %v9477_v57 }
 0x739   :  { %5560 = vmatpush3.msra.mxu0 %v9712_v24  ;;  %5561 = vmatprep.mubr.msk.f32.mxu0 %vm6322_vm0, %v9477_v57  ;;  %v9793_v24 = vld [vmem:[#allocation67_spill] sm:$0xff] }
 0x73a   :  { %3800 = vmatprep.subr.mxu1 %v7952_v25  ;;  %5564 = vmatprep.subr.mxu0 %v9477_v57 }
 0x799   :  { %v3372_v47 = vpop.f32.mrf.mxu1  ;;  %v3443_v46 = vpop.f32.mrf.mxu0 }
 0x79a   :  { %v3373_v45 = vadd.f32 %v3372_v47, %v8261_v12  ;;  %v3444_v35 = vadd.f32 %v3443_v46, %v8279_v26  ;;  %v9812_v46 = vld [vmem:[#allocation43_spill] sm:$0xff] }
 0x79b   :  { %v3374_v6 = vpop.f32.mrf.mxu1  ;;  %v5493_v33 = vpop.f32.mrf.mxu0 }
 0x79c   :  { %v3447_v3 = vadd.f32 %v3373_v45, %v8220_v63  ;;  %v3375_v1 = vadd.f32 %v3374_v6, %v8267_v27  ;;  %v9794_v33 = vld [vmem:[#allocation50_spill] sm:$0xff] }
 0x79e   :  { %v4680_v61 = vmul.f32 -1.442695, %v3447_v3  ;;  %v3454_v29 = vadd.f32 %v3375_v1, %v9793_v24  ;;  %v9809_v1 = vld [vmem:[#allocation99_spill] sm:$0xff] }
 0x7a0   :  { %5874 = vpow2.f32 %v4680_v61  ;;  %v4681_v51 = vmul.f32 -1.442695, %v3454_v29 }
 0x7a2   :  { %5876 = vpow2.f32 %v4681_v51 }
 0x7ad   :  { %v5875_v31 = vpop.eup %5874 }
 0x7ae   :  { %v3451_v25 = vadd.f32 1.0, %v5875_v31  ;;  %v9808_v31 = vld [vmem:[#allocation39_spill] sm:$0xff] }
 0x7af   :  { %v5877_v53 = vpop.eup %5876 }
 0x7b0   :  { %5878 = vrcp.f32 %v3451_v25  ;;  %v3458_v59 = vadd.f32 1.0, %v5877_v53  ;;  %v9804_v53 = vld [vmem:[#allocation33_spill] sm:$0xff] }
 0x7b1   :  { %v9814_v25 = vld [vmem:[#allocation45_spill] sm:$0xff] }
 0x7b2   :  { %5880 = vrcp.f32 %v3458_v59  ;;  %v9799_v59 = vld [vmem:[#allocation29_spill] sm:$0xff] }
 0x7bd   :  { %v5879_v47 = vpop.eup %5878 }
 0x7be   :  { %v3461_v12 = vmul.f32 %v5879_v47, %v3444_v35  ;;  %v9815_v47 = vld [vmem:[#allocation46_spill] sm:$0xff] }
 0x7bf   :  { %v5881_v3 = vpop.eup %5880 }
 0x7c0   :  { %v3462_v63 = vadd.f32 %v3461_v12, %v9794_v33  ;;  %v3464_v6 = vsub.f32 1.0, %v5881_v3  ;;  %v3466_v29 = vmul.f32 %v5881_v3, %v8308_v42  ;;  %v9817_v3 = vld [vmem:[#allocation49_spill] sm:$0xff]  ;;  %v9846_v42 = vld [vmem:[#allocation58_spill] sm:$0xff] }
 0x7c2   :  { %5882 = vtanh.f32 %v3462_v63  ;;  %v9816_v63 = vld [vmem:[#allocation96_spill] sm:$0xff] }
 0x7cf   :  { %v5883_v61 = vpop.eup %5882 }
 0x7d0   :  { %v3465_v45 = vmul.f32 %v5883_v61, %v3464_v6  ;;  %v9818_v6 = vld [vmem:[#allocation100_spill] sm:$0xff]  ;;  %v9819_v61 = vld [vmem:[#allocation97_spill] sm:$0xff] }
 0x7d2   :  { %v8548_v51 = vadd.f32 %v3466_v29, %v3465_v45  ;;  %v9820_v45 = vld [vmem:[#allocation34_spill] sm:$0xff]  ;;  %v9821_v29 = vld [vmem:[#allocation47_spill] sm:$0xff] }
 0x7d4   :  { %9795 = vst [vmem:[#allocation89_spill] sm:$0xff] %v8548_v51  ;;  %3703 = vmatmul.mubr.f32.vlgmr.msra.gmra.mxu1 %v8548_v51  ;;  %5562 = vmatmul.mubr.f32.vlgmr.msra.gmra.mxu0 %v8548_v51 }
 0x7d5   :  { %3801 = vmatpush1.msra.mxu1 %v9745_v54  ;;  %5565 = vmatpush3.msra.mxu0 %v7981_v16 }
 0x7d6   :  { %3802 = vmatprep.subr.mxu1 %v9747_v9  ;;  %5566 = vmatprep.subr.mxu0 %v9477_v57 }
 0x7d7   :  { %3803 = vmatpush1.msra.mxu1 %v9748_v17  ;;  %5567 = vmatpush3.msra.mxu0 %v7999_v38  ;;  %v9797_v17 = vld [vmem:[#allocation28_spill] sm:$0xff] }
 0x7d8   :  { %3804 = vmatprep.subr.mxu1 %v7971_v56  ;;  %5568 = vmatprep.subr.mxu0 %v9477_v57  ;;  %v9796_v56 = vld [vmem:[#allocation57_spill] sm:$0xff] }
 0x7d9   :  { %v3534_v12 = vpop.f32.mrf.mxu1  ;;  %v8560_v35 = vpop.f32.mrf.mxu0  ;;  %3805 = vmatpush1.msra.mxu1 %v9749_v43  ;;  %5569 = vmatpush3.msra.mxu0 %v8017_v13 }
 0x7da   :  { %v3535_v16 = vadd.f32 %v3534_v12, %v8321_v23  ;;  %3806 = vmatprep.subr.mxu1 %v9751_v0  ;;  %5570 = vmatprep.subr.mxu0 %v9477_v57  ;;  %v9798_v0 = vld [vmem:[#allocation73_spill] sm:$0xff]  ;;  %v9822_v12 = vld [vmem:[#allocation98_spill] sm:$0xff] }
 0x7db   :  { %v3536_v54 = vpop.f32.mrf.mxu1  ;;  %v5528_v9 = vpop.f32.mrf.mxu0  ;;  %3807 = vmatpush1.msra.mxu1 %v9752_v44  ;;  %5571 = vmatpush3.msra.mxu0 %v8035_v28  ;;  %v9800_v28 = vld [vmem:[#allocation41_spill] sm:$0xff]  ;;  %v9802_v44 = vld [vmem:[#allocation82_spill] sm:$0xff] }
 0x7dc   :  { %v3609_v38 = vadd.f32 %v3535_v16, %v9796_v56  ;;  %3808 = vmatprep.subr.mxu1 %v7989_v20  ;;  %5572 = vmatprep.subr.mxu0 %v9477_v57  ;;  %v3537_v43 = vadd.f32 %v3536_v54, %v9798_v0  ;;  %v9801_v20 = vld [vmem:[#allocation44_spill] sm:$0xff]  ;;  %v9824_v54 = vld [vmem:[#allocation85_spill] sm:$0xff]  ;;  %v9825_v9 = vld [vmem:[#allocation74_spill] sm:$0xff] }
 0x7dd   :  { %3809 = vmatpush1.msra.mxu1 %v9797_v17  ;;  %5573 = vmatpush3.msra.mxu0 %v9754_v41  ;;  %v9823_v16 = vld [vmem:[#allocation40_spill] sm:$0xff]  ;;  %v3606_v17 = vadd.f32 %v8560_v35, %v8403_v36  ;;  %v8634_v35 = vld [vmem:[#allocation13 + $0x178] sm:$0xff] }
 0x7de   :  { %v4682_v13 = vmul.f32 -1.442695, %v3609_v38  ;;  %3810 = vmatprep.subr.mxu1 %v9799_v59  ;;  %5574 = vmatprep.subr.mxu0 %v9477_v57  ;;  %v3616_v41 = vadd.f32 %v3537_v43, %v9802_v44  ;;  %v9826_v59 = vld [vmem:[#allocation83_spill] sm:$0xff] }
 0x7df   :  { %3811 = vmatpush1.msra.mxu1 %v9756_v5  ;;  %5575 = vmatpush3.msra.mxu0 %v9800_v28  ;;  %v9803_v5 = vld [vmem:[#allocation48_spill] sm:$0xff] }
 0x7e0   :  { %5884 = vpow2.f32 %v4682_v13  ;;  %3812 = vmatprep.subr.mxu1 %v9758_v32  ;;  %5576 = vmatprep.subr.mxu0 %v9477_v57  ;;  %v9805_v32 = vld [vmem:[#allocation51_spill] sm:$0xff] }
 0x7e1   :  { %3813 = vmatpush1.msra.mxu1 %v9759_v21  ;;  %5577 = vmatpush3.msra.mxu0 %v9801_v20  ;;  %v4683_v21 = vmul.f32 -1.442695, %v3616_v41 }
 0x7e2   :  { %3814 = vmatprep.subr.mxu1 %v9761_v15  ;;  %5578 = vmatprep.subr.mxu0 %v9477_v57  ;;  %v9806_v15 = vld [vmem:[#allocation37_spill] sm:$0xff] }
 0x7e3   :  { %3815 = vmatpush1.msra.mxu1 %v9762_v37  ;;  %5579 = vmatpush3.msra.mxu0 %v9803_v5  ;;  %v9807_v37 = vld [vmem:[#allocation93_spill] sm:$0xff]  ;;  %5886 = vpow2.f32 %v4683_v21  ;;  %v8640_v21 = vld [vmem:[#allocation13 + $0x160] sm:$0xff] }
 0x7e4   :  { %3816 = vmatprep.subr.mxu1 %v9804_v53  ;;  %5580 = vmatprep.subr.mxu0 %v9477_v57 }
 0x7e5   :  { %3817 = vmatpush1.msra.mxu1 %v9764_v39  ;;  %5581 = vmatpush3.msra.mxu0 %v9805_v32  ;;  %v9810_v39 = vld [vmem:[#allocation94_spill] sm:$0xff] }
 0x7e6   :  { %3818 = vmatprep.subr.mxu1 %v9765_v10  ;;  %5582 = vmatprep.subr.mxu0 %v9477_v57  ;;  %v9811_v10 = vld [vmem:[#allocation42_spill] sm:$0xff] }
 0x7e7   :  { %3819 = vmatpush1.msra.mxu1 %v9766_v58  ;;  %5583 = vmatpush3.msra.mxu0 %v9806_v15  ;;  %v9813_v58 = vld [vmem:[#allocation95_spill] sm:$0xff]  ;;  %v8646_v15 = vld [vmem:[#allocation13 + $0x148] sm:$0xff] }
 0x7e8   :  { %3820 = vmatprep.subr.mxu1 %v9807_v37  ;;  %5584 = vmatprep.subr.mxu0 %v9477_v57  ;;  %v8652_v37 = vld [vmem:[#allocation13 + $0x130] sm:$0xff] }
 0x7e9   :  { %3821 = vmatpush1.msra.mxu1 %v9808_v31  ;;  %5585 = vmatpush3.msra.mxu0 %v9809_v1  ;;  %v8658_v31 = vld [vmem:[#allocation13 + $0x118] sm:$0xff]  ;;  %v8664_v1 = vld [vmem:[#allocation13 + $0x100] sm:$0xff] }
 0x7ea   :  { %3822 = vmatprep.subr.mxu1 %v9810_v39  ;;  %5586 = vmatprep.subr.mxu0 %v9477_v57  ;;  %v8670_v39 = vld [vmem:[#allocation13 + $0xe8] sm:$0xff] }
 0x7eb   :  { %3823 = vmatpush1.msra.mxu1 %v9811_v10  ;;  %5587 = vmatpush3.msra.mxu0 %v9812_v46  ;;  %v8676_v10 = vld [vmem:[#allocation13 + $0xd0] sm:$0xff]  ;;  %v8682_v46 = vld [vmem:[#allocation13 + $0xb8] sm:$0xff] }
 0x7ec   :  { %3824 = vmatprep.subr.mxu1 %v9813_v58  ;;  %5588 = vmatprep.subr.mxu0 %v9477_v57  ;;  %v9827_v58 = vld [vmem:[#allocation59_spill] sm:$0xff] }
 0x7ed   :  { %v5885_v24 = vpop.eup %5884  ;;  %3825 = vmatpush1.msra.mxu1 %v9814_v25  ;;  %5589 = vmatpush3.msra.mxu0 %v9815_v47  ;;  %v9828_v25 = vld [vmem:[#allocation87_spill] sm:$0xff]  ;;  %v9829_v47 = vld [vmem:[#allocation24_spill] sm:$0xff] }
 0x7ee   :  { %v3613_v33 = vadd.f32 1.0, %v5885_v24  ;;  %3826 = vmatprep.subr.mxu1 %v9816_v63  ;;  %5590 = vmatprep.subr.mxu0 %v9477_v57  ;;  %v8688_v24 = vld [vmem:[#allocation13 + $0xa0] sm:$0xff]  ;;  %v9830_v63 = vld [vmem:[#allocation78_spill] sm:$0xff] }
 0x7ef   :  { %3827 = vmatpush1.msra.mxu1 %v9817_v3  ;;  %5591 = vmatpush3.msra.mxu0 %v9818_v6  ;;  %v9831_v3 = vld [vmem:[#allocation52_spill] sm:$0xff]  ;;  %v8700_v6 = vld [vmem:[#allocation13 + $0x70] sm:$0xff] }
 0x7f0   :  { %5888 = vrcp.f32 %v3613_v33  ;;  %3828 = vmatprep.subr.mxu1 %v9819_v61  ;;  %5592 = vmatprep.subr.mxu0 %v9477_v57  ;;  %v5887_v56 = vpop.eup %5886  ;;  %v8694_v33 = vld [vmem:[#allocation13 + $0x88] sm:$0xff]  ;;  %v9832_v61 = vld [vmem:[#allocation55_spill] sm:$0xff] }
 0x7f1   :  { %3829 = vmatpush1.msra.mxu1 %v9820_v45  ;;  %5593 = vmatpush3.msra.mxu0 %v9821_v29  ;;  %v3620_v38 = vadd.f32 1.0, %v5887_v56  ;;  %v9833_v45 = vld [vmem:[#allocation54_spill] sm:$0xff]  ;;  %v9838_v56 = vld [vmem:[#allocation25_spill] sm:$0xff] }
 0x7f2   :  { %3830 = vmatprep.subr.mxu1 %v9822_v12  ;;  %5594 = vmatprep.subr.mxu0 %v9477_v57  ;;  %v8706_v29 = vld [vmem:[#allocation13 + $0x58] sm:$0xff]  ;;  %v9835_v12 = vld [vmem:[#allocation56_spill] sm:$0xff] }
 0x7f3   :  { %3831 = vmatpush1.msra.mxu1 %v9823_v16  ;;  %3864 = vmatprep.mubr.f32.mxu1 %v9477_v57  ;;  %5890 = vrcp.f32 %v3620_v38  ;;  %9834 = vst [vmem:[#allocation38_spill] sm:$0xff] %v8706_v29  ;;  %v9836_v16 = vld [vmem:[#allocation79_spill] sm:$0xff]  ;;  %v9839_v38 = vld [vmem:[#allocation88_spill] sm:$0xff] }
 0x7f4   :  { %5595 = vmatpush3.msra.mxu0 %v9824_v54  ;;  %5596 = vmatprep.mubr.msk.f32.mxu0 %vm6322_vm0, %v9477_v57  ;;  %v8712_v54 = vld [vmem:[#allocation13 + $0x40] sm:$0xff] }
 0x7f5   :  { %3968 = vmatprep.subr.mxu1 %v9825_v9  ;;  %5599 = vmatprep.subr.mxu0 %v9477_v57  ;;  %9837 = vst [vmem:[#allocation90_spill] sm:$0xff] %v8712_v54 }
 0x7fd   :  { %v5889_v13 = vpop.eup %5888 }
 0x7fe   :  { %v3623_v43 = vmul.f32 %v5889_v13, %v3606_v17  ;;  %v8718_v17 = vld [vmem:[#allocation13 + $0x28] sm:$0xff]  ;;  %v9841_v13 = vld [vmem:[#allocation26_spill] sm:$0xff] }
 0x7ff   :  { %9840 = vst [vmem:[#allocation30_spill] sm:$0xff] %v8718_v17 }
 0x800   :  { %v3624_v28 = vadd.f32 %v3623_v43, %v9826_v59  ;;  %v5891_v20 = vpop.eup %5890  ;;  %v9842_v43 = vld [vmem:[#allocation27_spill] sm:$0xff]  ;;  %v8725_v59 = vld [vmem:[#allocation13 + $0x10] sm:$0xff] }
 0x801   :  { %v3626_v44 = vsub.f32 1.0, %v5891_v20  ;;  %v3628_v53 = vmul.f32 %v5891_v20, %v8408_v60  ;;  %9843 = vst [vmem:[#allocation31_spill] sm:$0xff] %v8725_v59 }
 0x802   :  { %5892 = vtanh.f32 %v3624_v28  ;;  %v8730_v28 = vld [vmem:[#allocation14 + $0x170] sm:$0xff] }
 0x803   :  { %9844 = vst [vmem:[#allocation91_spill] sm:$0xff] %v8730_v28 }
 0x80f   :  { %v5893_v41 = vpop.eup %5892 }
 0x810   :  { %v3627_v5 = vmul.f32 %v5893_v41, %v3626_v44  ;;  %v9845_v41 = vld [vmem:[#allocation81_spill] sm:$0xff] }
 0x812   :  { %v8629_v32 = vadd.f32 %v3628_v53, %v3627_v5 }
 0x814   :  { %3865 = vmatmul.mubr.f32.vlgmr.msra.gmra.mxu1 %v8629_v32  ;;  %5597 = vmatmul.mubr.f32.vlgmr.msra.gmra.mxu0 %v8629_v32 }
 0x815   :  { %3969 = vmatpush1.msra.mxu1 %v8412_v14  ;;  %5600 = vmatpush3.msra.mxu0 %v8634_v35 }
 0x816   :  { %3970 = vmatprep.subr.mxu1 %v8416_v50  ;;  %5601 = vmatprep.subr.mxu0 %v9477_v57 }
 0x817   :  { %3971 = vmatpush1.msra.mxu1 %v8420_v7  ;;  %5602 = vmatpush3.msra.mxu0 %v8640_v21 }
 0x818   :  { %3972 = vmatprep.subr.mxu1 %v8424_v52  ;;  %5603 = vmatprep.subr.mxu0 %v9477_v57 }
 0x819   :  { %3973 = vmatpush1.msra.mxu1 %v8428_v18  ;;  %5604 = vmatpush3.msra.mxu0 %v8646_v15 }
 0x81a   :  { %3974 = vmatprep.subr.mxu1 %v8432_v8  ;;  %5605 = vmatprep.subr.mxu0 %v9477_v57 }
 0x81b   :  { %3975 = vmatpush1.msra.mxu1 %v8436_v4  ;;  %5606 = vmatpush3.msra.mxu0 %v8652_v37 }
 0x81c   :  { %3976 = vmatprep.subr.mxu1 %v8440_v62  ;;  %5607 = vmatprep.subr.mxu0 %v9477_v57 }
 0x81d   :  { %3977 = vmatpush1.msra.mxu1 %v8444_v34  ;;  %5608 = vmatpush3.msra.mxu0 %v8658_v31 }
 0x81e   :  { %3978 = vmatprep.subr.mxu1 %v8448_v11  ;;  %5609 = vmatprep.subr.mxu0 %v9477_v57 }
 0x81f   :  { %3979 = vmatpush1.msra.mxu1 %v8452_v55  ;;  %5610 = vmatpush3.msra.mxu0 %v8664_v1 }
 0x820   :  { %3980 = vmatprep.subr.mxu1 %v8456_v2  ;;  %5611 = vmatprep.subr.mxu0 %v9477_v57 }
 0x821   :  { %3981 = vmatpush1.msra.mxu1 %v8460_v49  ;;  %5612 = vmatpush3.msra.mxu0 %v8670_v39 }
 0x822   :  { %3982 = vmatprep.subr.mxu1 %v8464_v22  ;;  %5613 = vmatprep.subr.mxu0 %v9477_v57 }
 0x823   :  { %3983 = vmatpush1.msra.mxu1 %v8468_v40  ;;  %5614 = vmatpush3.msra.mxu0 %v8676_v10 }
 0x824   :  { %3984 = vmatprep.subr.mxu1 %v8472_v30  ;;  %5615 = vmatprep.subr.mxu0 %v9477_v57 }
 0x825   :  { %3985 = vmatpush1.msra.mxu1 %v8476_v48  ;;  %5616 = vmatpush3.msra.mxu0 %v8682_v46 }
 0x826   :  { %3986 = vmatprep.subr.mxu1 %v8480_v19  ;;  %5617 = vmatprep.subr.mxu0 %v9477_v57 }
 0x827   :  { %3987 = vmatpush1.msra.mxu1 %v9827_v58  ;;  %5618 = vmatpush3.msra.mxu0 %v8688_v24 }
 0x828   :  { %3988 = vmatprep.subr.mxu1 %v9828_v25  ;;  %5619 = vmatprep.subr.mxu0 %v9477_v57 }
 0x829   :  { %3989 = vmatpush1.msra.mxu1 %v9829_v47  ;;  %5620 = vmatpush3.msra.mxu0 %v8694_v33 }
 0x82a   :  { %3990 = vmatprep.subr.mxu1 %v9830_v63  ;;  %5621 = vmatprep.subr.mxu0 %v9477_v57 }
 0x82b   :  { %3991 = vmatpush1.msra.mxu1 %v9831_v3  ;;  %5622 = vmatpush3.msra.mxu0 %v8700_v6 }
 0x82c   :  { %3992 = vmatprep.subr.mxu1 %v9832_v61  ;;  %5623 = vmatprep.subr.mxu0 %v9477_v57 }
 0x82d   :  { %3993 = vmatpush1.msra.mxu1 %v9833_v45  ;;  %5624 = vmatpush3.msra.mxu0 %v8706_v29 }
 0x82e   :  { %3994 = vmatprep.subr.mxu1 %v9835_v12  ;;  %5625 = vmatprep.subr.mxu0 %v9477_v57 }
 0x82f   :  { %3995 = vmatpush1.msra.mxu1 %v9836_v16  ;;  %5626 = vmatpush3.msra.mxu0 %v8712_v54 }
 0x830   :  { %3996 = vmatprep.subr.mxu1 %v9838_v56  ;;  %5627 = vmatprep.subr.mxu0 %v9477_v57 }
 0x831   :  { %3997 = vmatpush1.msra.mxu1 %v9839_v38  ;;  %5628 = vmatpush3.msra.mxu0 %v8718_v17  ;;  %v9847_v17 = vld [vmem:[#allocation76_spill] sm:$0xff] }
 0x832   :  { %3998 = vmatprep.subr.mxu1 %v9841_v13  ;;  %5629 = vmatprep.subr.mxu0 %v9477_v57 }
 0x833   :  { %3999 = vmatpush1.msra.mxu1 %v9842_v43  ;;  %4032 = vmatprep.mubr.f32.mxu1 %v9477_v57 }
 0x834   :  { %5630 = vmatpush3.msra.mxu0 %v8725_v59  ;;  %5631 = vmatprep.mubr.msk.f32.mxu0 %vm6322_vm0, %v9477_v57 }
 0x835   :  { %4130 = vmatprep.subr.mxu1 %v8730_v28  ;;  %5634 = vmatprep.subr.mxu0 %v9477_v57 }
 0x894   :  { %v3704_v20 = vpop.f32.mrf.mxu1  ;;  %v3775_v44 = vpop.f32.mrf.mxu0 }
 0x895   :  { %v3705_v5 = vadd.f32 %v3704_v20, %v9845_v41  ;;  %v3776_v29 = vadd.f32 %v3775_v44, %v8279_v26 }
 0x896   :  { %v3706_v53 = vpop.f32.mrf.mxu1  ;;  %v5563_v60 = vpop.f32.mrf.mxu0 }
 0x897   :  { %v3779_v43 = vadd.f32 %v3705_v5, %v9846_v42  ;;  %v3707_v59 = vadd.f32 %v3706_v53, %v8267_v27  ;;  %v9848_v60 = vld [vmem:[#allocation65_spill] sm:$0xff] }
 0x899   :  { %v4686_v13 = vmul.f32 -1.442695, %v3779_v43  ;;  %v3786_v38 = vadd.f32 %v3707_v59, %v9847_v17  ;;  %v8758_v17 = vld [vmem:[#allocation14 + $0x160] sm:$0xff] }
 0x89a   :  { %v8761_v59 = vld [vmem:[#allocation14 + $0x140] sm:$0xff] }
 0x89b   :  { %5894 = vpow2.f32 %v4686_v13  ;;  %v4687_v56 = vmul.f32 -1.442695, %v3786_v38 }
 0x89d   :  { %5896 = vpow2.f32 %v4687_v56 }
 0x8a8   :  { %v5895_v54 = vpop.eup %5894 }
 0x8a9   :  { %v3783_v28 = vadd.f32 1.0, %v5895_v54  ;;  %v8755_v54 = vld [vmem:[#allocation14 + $0x150] sm:$0xff] }
 0x8aa   :  { %v5897_v16 = vpop.eup %5896 }
 0x8ab   :  { %5898 = vrcp.f32 %v3783_v28  ;;  %v3790_v12 = vadd.f32 1.0, %v5897_v16  ;;  %v8745_v16 = vld [vmem:[#allocation14 + $0x168] sm:$0xff] }
 0x8ad   :  { %5900 = vrcp.f32 %v3790_v12  ;;  %v8751_v12 = vld [vmem:[#allocation14 + $0x158] sm:$0xff] }
 0x8b8   :  { %v5899_v20 = vpop.eup %5898 }
 0x8b9   :  { %v3793_v41 = vmul.f32 %v5899_v20, %v3776_v29  ;;  %v8748_v29 = vld [vmem:[#allocation14 + $0x178] sm:$0xff]  ;;  %v8770_v20 = vld [vmem:[#allocation14 + $0x148] sm:$0xff] }
 0x8ba   :  { %v5901_v43 = vpop.eup %5900  ;;  %9849 = vst [vmem:[#allocation32_spill] sm:$0xff] %v8770_v20 }
 0x8bb   :  { %v3794_v42 = vadd.f32 %v3793_v41, %v9848_v60  ;;  %v3796_v5 = vsub.f32 1.0, %v5901_v43  ;;  %v3798_v38 = vmul.f32 %v5901_v43, %v8548_v51  ;;  %v8767_v41 = vld [vmem:[#allocation14 + $0x138] sm:$0xff] }
 0x8bd   :  { %5902 = vtanh.f32 %v3794_v42  ;;  %v8774_v42 = vld [vmem:[#allocation14 + $0x128] sm:$0xff] }
 0x8be   :  { %9850 = vst [vmem:[#allocation92_spill] sm:$0xff] %v8774_v42 }
 0x8ca   :  { %v5903_v13 = vpop.eup %5902 }
 0x8cb   :  { %v3797_v53 = vmul.f32 %v5903_v13, %v3796_v5  ;;  %v8778_v13 = vld [vmem:[#allocation14 + $0x120] sm:$0xff] }
 0x8cc   :  { %9851 = vst [vmem:[#allocation35_spill] sm:$0xff] %v8778_v13 }
 0x8cd   :  { %v8741_v56 = vadd.f32 %v3798_v38, %v3797_v53  ;;  %v8781_v53 = vld [vmem:[#allocation14 + $0x130] sm:$0xff] }
 0x8ce   :  { %9852 = vst [vmem:[#allocation36_spill] sm:$0xff] %v8781_v53  ;;  %v9853_v38 = vld [vmem:[#allocation77_spill] sm:$0xff] }
 0x8cf   :  { %4033 = vmatmul.mubr.f32.vlgmr.msra.gmra.mxu1 %v8741_v56  ;;  %5632 = vmatmul.mubr.f32.vlgmr.msra.gmra.mxu0 %v8741_v56 }
 0x8d0   :  { %4131 = vmatpush1.msra.mxu1 %v8745_v16  ;;  %5635 = vmatpush3.msra.mxu0 %v8748_v29 }
 0x8d1   :  { %4132 = vmatprep.subr.mxu1 %v8751_v12  ;;  %5636 = vmatprep.subr.mxu0 %v9477_v57 }
 0x8d2   :  { %4133 = vmatpush1.msra.mxu1 %v8755_v54  ;;  %5637 = vmatpush3.msra.mxu0 %v8758_v17 }
 0x8d3   :  { %4134 = vmatprep.subr.mxu1 %v8761_v59  ;;  %5638 = vmatprep.subr.mxu0 %v9477_v57 }
 0x8d4   :  { %v3866_v28 = vpop.f32.mrf.mxu1  ;;  %v8765_v44 = vpop.f32.mrf.mxu0  ;;  %4135 = vmatpush1.msra.mxu1 %v8767_v41  ;;  %5639 = vmatpush3.msra.mxu0 %v8770_v20  ;;  %v8785_v20 = vld [vmem:[#allocation14 + $0x110] sm:$0xff] }
 0x8d5   :  { %v3867_v60 = vadd.f32 %v3866_v28, %v8321_v23  ;;  %4136 = vmatprep.subr.mxu1 %v8774_v42  ;;  %5640 = vmatprep.subr.mxu0 %v9477_v57  ;;  %9854 = vst [vmem:[#allocation67_spill] sm:$0xff] %v8785_v20  ;;  %v8789_v28 = vld [vmem:[#allocation14 + $0x108] sm:$0xff] }
 0x8d6   :  { %v3868_v43 = vpop.f32.mrf.mxu1  ;;  %v5598_v5 = vpop.f32.mrf.mxu0  ;;  %4137 = vmatpush1.msra.mxu1 %v8778_v13  ;;  %5641 = vmatpush3.msra.mxu0 %v8781_v53  ;;  %9855 = vst [vmem:[#allocation50_spill] sm:$0xff] %v8789_v28  ;;  %v8796_v53 = vld [vmem:[#allocation14 + $0xf8] sm:$0xff] }
 0x8d7   :  { %v3941_v51 = vadd.f32 %v3867_v60, %v9853_v38  ;;  %4138 = vmatprep.subr.mxu1 %v8785_v20  ;;  %5642 = vmatprep.subr.mxu0 %v9477_v57  ;;  %v8792_v5 = vld [vmem:[#allocation14 + $0x118] sm:$0xff]  ;;  %v3869_v42 = vadd.f32 %v3868_v43, %v9798_v0  ;;  %9857 = vst [vmem:[#allocation28_spill] sm:$0xff] %v8796_v53  ;;  %v8800_v60 = vld [vmem:[#allocation14 + $0xf0] sm:$0xff]  ;;  %v8803_v38 = vld [vmem:[#allocation14 + $0x100] sm:$0xff] }
 0x8d8   :  { %4139 = vmatpush1.msra.mxu1 %v8789_v28  ;;  %9856 = vst [vmem:[#allocation57_spill] sm:$0xff] %v8792_v5  ;;  %5643 = vmatpush3.msra.mxu0 %v8792_v5  ;;  %9858 = vst [vmem:[#allocation29_spill] sm:$0xff] %v8800_v60  ;;  %v8806_v28 = vld [vmem:[#allocation14 + $0xe0] sm:$0xff]  ;;  %v8813_v43 = vld [vmem:[#allocation14 + $0xe8] sm:$0xff] }
 0x8d9   :  { %v4688_v13 = vmul.f32 -1.442695, %v3941_v51  ;;  %4140 = vmatprep.subr.mxu1 %v8796_v53  ;;  %5644 = vmatprep.subr.mxu0 %v9477_v57  ;;  %9859 = vst [vmem:[#allocation41_spill] sm:$0xff] %v8803_v38  ;;  %9860 = vst [vmem:[#allocation44_spill] sm:$0xff] %v8806_v28  ;;  %v8810_v51 = vld [vmem:[#allocation14 + $0xd8] sm:$0xff]  ;;  %v8817_v0 = vld [vmem:[#allocation14 + $0xc8] sm:$0xff] }
 0x8da   :  { %4141 = vmatpush1.msra.mxu1 %v8800_v60  ;;  %5645 = vmatpush3.msra.mxu0 %v8803_v38  ;;  %9861 = vst [vmem:[#allocation82_spill] sm:$0xff] %v8810_v51  ;;  %9862 = vst [vmem:[#allocation48_spill] sm:$0xff] %v8813_v43  ;;  %v9863_v60 = vld [vmem:[#allocation75_spill] sm:$0xff] }
 0x8db   :  { %5904 = vpow2.f32 %v4688_v13  ;;  %4142 = vmatprep.subr.mxu1 %v8806_v28  ;;  %5646 = vmatprep.subr.mxu0 %v9477_v57  ;;  %v3948_v53 = vadd.f32 %v3869_v42, %v9863_v60  ;;  %9864 = vst [vmem:[#allocation33_spill] sm:$0xff] %v8817_v0  ;;  %v8821_v13 = vld [vmem:[#allocation14 + $0xc0] sm:$0xff]  ;;  %v8824_v28 = vld [vmem:[#allocation14 + $0xd0] sm:$0xff]  ;;  %v8831_v42 = vld [vmem:[#allocation14 + $0xa8] sm:$0xff] }
 0x8dc   :  { %4143 = vmatpush1.msra.mxu1 %v8810_v51  ;;  %5647 = vmatpush3.msra.mxu0 %v8813_v43  ;;  %9865 = vst [vmem:[#allocation51_spill] sm:$0xff] %v8821_v13  ;;  %9866 = vst [vmem:[#allocation37_spill] sm:$0xff] %v8824_v28  ;;  %v8827_v51 = vld [vmem:[#allocation14 + $0xb0] sm:$0xff]  ;;  %v8834_v60 = vld [vmem:[#allocation14 + $0xb8] sm:$0xff] }
 0x8dd   :  { %4144 = vmatprep.subr.mxu1 %v8817_v0  ;;  %5648 = vmatprep.subr.mxu0 %v9477_v57  ;;  %9867 = vst [vmem:[#allocation93_spill] sm:$0xff] %v8827_v51  ;;  %9868 = vst [vmem:[#allocation39_spill] sm:$0xff] %v8831_v42  ;;  %v4689_v0 = vmul.f32 -1.442695, %v3948_v53  ;;  %v8851_v53 = vld [vmem:[#allocation14 + $0x78] sm:$0xff] }
 0x8de   :  { %4145 = vmatpush1.msra.mxu1 %v8821_v13  ;;  %5649 = vmatpush3.msra.mxu0 %v8824_v28  ;;  %9869 = vst [vmem:[#allocation99_spill] sm:$0xff] %v8834_v60  ;;  %v8837_v13 = vld [vmem:[#allocation14 + $0x98] sm:$0xff]  ;;  %v8841_v28 = vld [vmem:[#allocation14 + $0x90] sm:$0xff]  ;;  %9874 = vst [vmem:[#allocation45_spill] sm:$0xff] %v8851_v53 }
 0x8df   :  { %4146 = vmatprep.subr.mxu1 %v8827_v51  ;;  %5650 = vmatprep.subr.mxu0 %v9477_v57  ;;  %9870 = vst [vmem:[#allocation94_spill] sm:$0xff] %v8837_v13  ;;  %9871 = vst [vmem:[#allocation42_spill] sm:$0xff] %v8841_v28  ;;  %v8844_v51 = vld [vmem:[#allocation14 + $0xa0] sm:$0xff]  ;;  %5906 = vpow2.f32 %v4689_v0 }
 0x8e0   :  { %4147 = vmatpush1.msra.mxu1 %v8831_v42  ;;  %5651 = vmatpush3.msra.mxu0 %v8834_v60  ;;  %9872 = vst [vmem:[#allocation43_spill] sm:$0xff] %v8844_v51  ;;  %v8847_v42 = vld [vmem:[#allocation14 + $0x80] sm:$0xff]  ;;  %v8877_v60 = vld [vmem:[#allocation14 + $0x38] sm:$0xff] }
 0x8e1   :  { %4148 = vmatprep.subr.mxu1 %v8837_v13  ;;  %5652 = vmatprep.subr.mxu0 %v9477_v57  ;;  %9873 = vst [vmem:[#allocation95_spill] sm:$0xff] %v8847_v42  ;;  %v8854_v13 = vld [vmem:[#allocation14 + $0x88] sm:$0xff]  ;;  %9882 = vst [vmem:[#allocation98_spill] sm:$0xff] %v8877_v60 }
 0x8e2   :  { %4149 = vmatpush1.msra.mxu1 %v8841_v28  ;;  %5653 = vmatpush3.msra.mxu0 %v8844_v51  ;;  %9875 = vst [vmem:[#allocation46_spill] sm:$0xff] %v8854_v13  ;;  %v8857_v28 = vld [vmem:[#allocation14 + $0x68] sm:$0xff]  ;;  %v8861_v51 = vld [vmem:[#allocation14 + $0x60] sm:$0xff] }
 0x8e3   :  { %4150 = vmatprep.subr.mxu1 %v8847_v42  ;;  %5654 = vmatprep.subr.mxu0 %v9477_v57  ;;  %9876 = vst [vmem:[#allocation96_spill] sm:$0xff] %v8857_v28  ;;  %9877 = vst [vmem:[#allocation49_spill] sm:$0xff] %v8861_v51  ;;  %v8864_v42 = vld [vmem:[#allocation14 + $0x70] sm:$0xff] }
 0x8e4   :  { %4151 = vmatpush1.msra.mxu1 %v8851_v53  ;;  %5655 = vmatpush3.msra.mxu0 %v8854_v13  ;;  %9878 = vst [vmem:[#allocation100_spill] sm:$0xff] %v8864_v42  ;;  %v8867_v53 = vld [vmem:[#allocation14 + $0x50] sm:$0xff]  ;;  %v8871_v13 = vld [vmem:[#allocation14 + $0x48] sm:$0xff] }
 0x8e5   :  { %4152 = vmatprep.subr.mxu1 %v8857_v28  ;;  %5656 = vmatprep.subr.mxu0 %v9477_v57  ;;  %9879 = vst [vmem:[#allocation97_spill] sm:$0xff] %v8867_v53  ;;  %9880 = vst [vmem:[#allocation34_spill] sm:$0xff] %v8871_v13  ;;  %v8874_v28 = vld [vmem:[#allocation14 + $0x58] sm:$0xff] }
 0x8e6   :  { %4153 = vmatpush1.msra.mxu1 %v8861_v51  ;;  %5657 = vmatpush3.msra.mxu0 %v8864_v42  ;;  %9881 = vst [vmem:[#allocation47_spill] sm:$0xff] %v8874_v28  ;;  %v8881_v42 = vld [vmem:[#allocation14 + $0x30] sm:$0xff] }
 0x8e7   :  { %4154 = vmatprep.subr.mxu1 %v8867_v53  ;;  %5658 = vmatprep.subr.mxu0 %v9477_v57  ;;  %9883 = vst [vmem:[#allocation40_spill] sm:$0xff] %v8881_v42  ;;  %v8884_v53 = vld [vmem:[#allocation14 + $0x40] sm:$0xff] }
 0x8e8   :  { %v5905_v0 = vpop.eup %5904  ;;  %4155 = vmatpush1.msra.mxu1 %v8871_v13  ;;  %5659 = vmatpush3.msra.mxu0 %v8874_v28  ;;  %9884 = vst [vmem:[#allocation85_spill] sm:$0xff] %v8884_v53  ;;  %v8887_v13 = vld [vmem:[#allocation14 + $0x20] sm:$0xff]  ;;  %v9891_v28 = vld [vmem:[#allocation72_spill] sm:$0xff] }
 0x8e9   :  { %v3945_v51 = vadd.f32 1.0, %v5905_v0  ;;  %4156 = vmatprep.subr.mxu1 %v8877_v60  ;;  %5660 = vmatprep.subr.mxu0 %v9477_v57  ;;  %9885 = vst [vmem:[#allocation74_spill] sm:$0xff] %v8887_v13  ;;  %v8891_v0 = vld [vmem:[#allocation14 + $0x18] sm:$0xff]  ;;  %v8894_v60 = vld [vmem:[#allocation14 + $0x28] sm:$0xff] }
 0x8ea   :  { %4157 = vmatpush1.msra.mxu1 %v8881_v42  ;;  %5661 = vmatpush3.msra.mxu0 %v8884_v53  ;;  %9886 = vst [vmem:[#allocation83_spill] sm:$0xff] %v8891_v0  ;;  %9887 = vst [vmem:[#allocation59_spill] sm:$0xff] %v8894_v60  ;;  %v8897_v42 = vld [vmem:[#allocation14 + $0x8] sm:$0xff] }
 0x8eb   :  { %5908 = vrcp.f32 %v3945_v51  ;;  %4158 = vmatprep.subr.mxu1 %v8887_v13  ;;  %5662 = vmatprep.subr.mxu0 %v9477_v57  ;;  %9888 = vst [vmem:[#allocation87_spill] sm:$0xff] %v8897_v42  ;;  %v8901_v51 = vld [vmem:[#allocation14] sm:$0xff]  ;;  %v8905_v13 = vld [vmem:[#allocation14 + $0x10] sm:$0xff] }
 0x8ec   :  { %4159 = vmatpush1.msra.mxu1 %v8891_v0  ;;  %5663 = vmatpush3.msra.mxu0 %v8894_v60  ;;  %9889 = vst [vmem:[#allocation24_spill] sm:$0xff] %v8901_v51  ;;  %9890 = vst [vmem:[#allocation78_spill] sm:$0xff] %v8905_v13  ;;  %v3938_v0 = vadd.f32 %v8765_v44, %v8403_v36 }
 0x8ed   :  { %4160 = vmatprep.subr.mxu1 %v8897_v42  ;;  %5664 = vmatprep.subr.mxu0 %v9477_v57  ;;  %v5907_v42 = vpop.eup %5906 }
 0x8ee   :  { %4161 = vmatpush1.msra.mxu1 %v8901_v51  ;;  %4194 = vmatprep.mubr.f32.mxu1 %v9477_v57  ;;  %v3952_v60 = vadd.f32 1.0, %v5907_v42  ;;  %v9913_v42 = vld [vmem:[#allocation67_spill] sm:$0xff] }
 0x8ef   :  { %5665 = vmatpush3.msra.mxu0 %v8905_v13  ;;  %5666 = vmatprep.mubr.msk.f32.mxu0 %vm6322_vm0, %v9477_v57 }
 0x8f0   :  { %4296 = vmatprep.subr.mxu1 %v9825_v9  ;;  %5669 = vmatprep.subr.mxu0 %v9477_v57  ;;  %5910 = vrcp.f32 %v3952_v60  ;;  %v9915_v60 = vld [vmem:[#allocation57_spill] sm:$0xff] }
 0x8f8   :  { %v5909_v53 = vpop.eup %5908 }
 0x8f9   :  { %v3955_v51 = vmul.f32 %v5909_v53, %v3938_v0  ;;  %v9916_v0 = vld [vmem:[#allocation73_spill] sm:$0xff] }
 0x8fb   :  { %v3956_v43 = vadd.f32 %v3955_v51, %v9891_v28 }
 0x8fd   :  { %5912 = vtanh.f32 %v3956_v43  ;;  %v5911_v38 = vpop.eup %5910  ;;  %v9912_v43 = vld [vmem:[#allocation68_spill] sm:$0xff] }
 0x8fe   :  { %v3958_v13 = vsub.f32 1.0, %v5911_v38  ;;  %v3960_v23 = vmul.f32 %v5911_v38, %v8629_v32 }
 0x90a   :  { %v5913_v5 = vpop.eup %5912 }
 0x90b   :  { %v3959_v20 = vmul.f32 %v5913_v5, %v3958_v13 }
 0x90d   :  { %v8916_v9 = vadd.f32 %v3960_v23, %v3959_v20  ;;  %v9892_v23 = vld [vmem:[#allocation38_spill] sm:$0xff] }
 0x90f   :  { %4195 = vmatmul.mubr.f32.vlgmr.msra.gmra.mxu1 %v8916_v9  ;;  %5667 = vmatmul.mubr.f32.vlgmr.msra.gmra.mxu0 %v8916_v9 }
 0x910   :  { %4297 = vmatpush1.msra.mxu1 %v8412_v14  ;;  %5670 = vmatpush3.msra.mxu0 %v8634_v35  ;;  %v9893_v14 = vld [vmem:[#allocation56_spill] sm:$0xff] }
 0x911   :  { %4298 = vmatprep.subr.mxu1 %v8416_v50  ;;  %5671 = vmatprep.subr.mxu0 %v9477_v57  ;;  %v9894_v50 = vld [vmem:[#allocation79_spill] sm:$0xff] }
 0x912   :  { %4299 = vmatpush1.msra.mxu1 %v8420_v7  ;;  %5672 = vmatpush3.msra.mxu0 %v8640_v21  ;;  %v9895_v7 = vld [vmem:[#allocation90_spill] sm:$0xff] }
 0x913   :  { %4300 = vmatprep.subr.mxu1 %v8424_v52  ;;  %5673 = vmatprep.subr.mxu0 %v9477_v57  ;;  %v9896_v52 = vld [vmem:[#allocation25_spill] sm:$0xff] }
 0x914   :  { %4301 = vmatpush1.msra.mxu1 %v8428_v18  ;;  %5674 = vmatpush3.msra.mxu0 %v8646_v15  ;;  %v9897_v18 = vld [vmem:[#allocation88_spill] sm:$0xff]  ;;  %v9905_v15 = vld [vmem:[#allocation63_spill] sm:$0xff] }
 0x915   :  { %4302 = vmatprep.subr.mxu1 %v8432_v8  ;;  %5675 = vmatprep.subr.mxu0 %v9477_v57  ;;  %v9898_v8 = vld [vmem:[#allocation30_spill] sm:$0xff] }
 0x916   :  { %4303 = vmatpush1.msra.mxu1 %v8436_v4  ;;  %5676 = vmatpush3.msra.mxu0 %v8652_v37  ;;  %v9899_v4 = vld [vmem:[#allocation26_spill] sm:$0xff] }
 0x917   :  { %4304 = vmatprep.subr.mxu1 %v8440_v62  ;;  %5677 = vmatprep.subr.mxu0 %v9477_v57  ;;  %v9900_v62 = vld [vmem:[#allocation27_spill] sm:$0xff] }
 0x918   :  { %4305 = vmatpush1.msra.mxu1 %v8444_v34  ;;  %5678 = vmatpush3.msra.mxu0 %v8658_v31  ;;  %v9901_v34 = vld [vmem:[#allocation31_spill] sm:$0xff] }
 0x919   :  { %4306 = vmatprep.subr.mxu1 %v8448_v11  ;;  %5679 = vmatprep.subr.mxu0 %v9477_v57  ;;  %v9902_v11 = vld [vmem:[#allocation91_spill] sm:$0xff] }
 0x91a   :  { %4307 = vmatpush1.msra.mxu1 %v8452_v55  ;;  %5680 = vmatpush3.msra.mxu0 %v8664_v1 }
 0x91b   :  { %4308 = vmatprep.subr.mxu1 %v8456_v2  ;;  %5681 = vmatprep.subr.mxu0 %v9477_v57 }
 0x91c   :  { %4309 = vmatpush1.msra.mxu1 %v8460_v49  ;;  %5682 = vmatpush3.msra.mxu0 %v8670_v39  ;;  %v9903_v49 = vld [vmem:[#allocation81_spill] sm:$0xff] }
 0x91d   :  { %4310 = vmatprep.subr.mxu1 %v8464_v22  ;;  %5683 = vmatprep.subr.mxu0 %v9477_v57 }
 0x91e   :  { %4311 = vmatpush1.msra.mxu1 %v8468_v40  ;;  %5684 = vmatpush3.msra.mxu0 %v8676_v10 }
 0x91f   :  { %4312 = vmatprep.subr.mxu1 %v8472_v30  ;;  %5685 = vmatprep.subr.mxu0 %v9477_v57 }
 0x920   :  { %4313 = vmatpush1.msra.mxu1 %v8476_v48  ;;  %5686 = vmatpush3.msra.mxu0 %v8682_v46  ;;  %v9904_v48 = vld [vmem:[#allocation60_spill] sm:$0xff] }
 0x921   :  { %4314 = vmatprep.subr.mxu1 %v8480_v19  ;;  %5687 = vmatprep.subr.mxu0 %v9477_v57 }
 0x922   :  { %4315 = vmatpush1.msra.mxu1 %v9827_v58  ;;  %5688 = vmatpush3.msra.mxu0 %v8688_v24 }
 0x923   :  { %4316 = vmatprep.subr.mxu1 %v9828_v25  ;;  %5689 = vmatprep.subr.mxu0 %v9477_v57 }
 0x924   :  { %4317 = vmatpush1.msra.mxu1 %v9829_v47  ;;  %5690 = vmatpush3.msra.mxu0 %v8694_v33  ;;  %v9906_v47 = vld [vmem:[#allocation66_spill] sm:$0xff] }
 0x925   :  { %4318 = vmatprep.subr.mxu1 %v9830_v63  ;;  %5691 = vmatprep.subr.mxu0 %v9477_v57 }
 0x926   :  { %4319 = vmatpush1.msra.mxu1 %v9831_v3  ;;  %5692 = vmatpush3.msra.mxu0 %v8700_v6 }
 0x927   :  { %4320 = vmatprep.subr.mxu1 %v9832_v61  ;;  %5693 = vmatprep.subr.mxu0 %v9477_v57 }
 0x928   :  { %4321 = vmatpush1.msra.mxu1 %v9833_v45  ;;  %5694 = vmatpush3.msra.mxu0 %v9892_v23  ;;  %v9917_v23 = vld [vmem:[#allocation28_spill] sm:$0xff] }
 0x929   :  { %4322 = vmatprep.subr.mxu1 %v9893_v14  ;;  %5695 = vmatprep.subr.mxu0 %v9477_v57  ;;  %v9918_v14 = vld [vmem:[#allocation29_spill] sm:$0xff] }
 0x92a   :  { %4323 = vmatpush1.msra.mxu1 %v9894_v50  ;;  %5696 = vmatpush3.msra.mxu0 %v9895_v7  ;;  %v9919_v50 = vld [vmem:[#allocation41_spill] sm:$0xff]  ;;  %v9920_v7 = vld [vmem:[#allocation44_spill] sm:$0xff] }
 0x92b   :  { %4324 = vmatprep.subr.mxu1 %v9896_v52  ;;  %5697 = vmatprep.subr.mxu0 %v9477_v57  ;;  %v9921_v52 = vld [vmem:[#allocation82_spill] sm:$0xff] }
 0x92c   :  { %4325 = vmatpush1.msra.mxu1 %v9897_v18  ;;  %5698 = vmatpush3.msra.mxu0 %v9898_v8  ;;  %v9922_v18 = vld [vmem:[#allocation48_spill] sm:$0xff]  ;;  %v9923_v8 = vld [vmem:[#allocation71_spill] sm:$0xff] }
 0x92d   :  { %4326 = vmatprep.subr.mxu1 %v9899_v4  ;;  %5699 = vmatprep.subr.mxu0 %v9477_v57 }
 0x92e   :  { %4327 = vmatpush1.msra.mxu1 %v9900_v62  ;;  %4360 = vmatprep.mubr.f32.mxu1 %v9477_v57  ;;  %v9924_v62 = vld [vmem:[#allocation33_spill] sm:$0xff] }
 0x92f   :  { %5700 = vmatpush3.msra.mxu0 %v9901_v34  ;;  %5701 = vmatprep.mubr.msk.f32.mxu0 %vm6322_vm0, %v9477_v57  ;;  %v9925_v34 = vld [vmem:[#allocation51_spill] sm:$0xff] }
 0x930   :  { %4458 = vmatprep.subr.mxu1 %v9902_v11  ;;  %5704 = vmatprep.subr.mxu0 %v9477_v57  ;;  %v9926_v11 = vld [vmem:[#allocation37_spill] sm:$0xff] }
 0x98f   :  { %v4034_v55 = vpop.f32.mrf.mxu1  ;;  %v4105_v2 = vpop.f32.mrf.mxu0 }
 0x990   :  { %v4035_v22 = vadd.f32 %v4034_v55, %v9903_v49  ;;  %v4106_v58 = vadd.f32 %v4105_v2, %v8279_v26  ;;  %v9927_v55 = vld [vmem:[#allocation93_spill] sm:$0xff]  ;;  %v9928_v2 = vld [vmem:[#allocation39_spill] sm:$0xff] }
 0x991   :  { %v4036_v40 = vpop.f32.mrf.mxu1  ;;  %v5633_v30 = vpop.f32.mrf.mxu0 }
 0x992   :  { %v4109_v19 = vadd.f32 %v4035_v22, %v9904_v48  ;;  %v4037_v21 = vadd.f32 %v4036_v40, %v8267_v27  ;;  %v9929_v22 = vld [vmem:[#allocation99_spill] sm:$0xff]  ;;  %v9930_v30 = vld [vmem:[#allocation94_spill] sm:$0xff] }
 0x993   :  { %v9931_v48 = vld [vmem:[#allocation42_spill] sm:$0xff] }
 0x994   :  { %v4691_v35 = vmul.f32 -1.442695, %v4109_v19  ;;  %v4116_v37 = vadd.f32 %v4037_v21, %v9905_v15  ;;  %v9932_v19 = vld [vmem:[#allocation43_spill] sm:$0xff]  ;;  %v9934_v21 = vld [vmem:[#allocation45_spill] sm:$0xff]  ;;  %v9935_v15 = vld [vmem:[#allocation46_spill] sm:$0xff] }
 0x996   :  { %5914 = vpow2.f32 %v4691_v35  ;;  %v4692_v31 = vmul.f32 -1.442695, %v4116_v37  ;;  %v9933_v35 = vld [vmem:[#allocation95_spill] sm:$0xff]  ;;  %v9936_v37 = vld [vmem:[#allocation96_spill] sm:$0xff] }
 0x998   :  { %5916 = vpow2.f32 %v4692_v31  ;;  %v9937_v31 = vld [vmem:[#allocation49_spill] sm:$0xff] }
 0x9a3   :  { %v5915_v1 = vpop.eup %5914 }
 0x9a4   :  { %v4113_v39 = vadd.f32 1.0, %v5915_v1  ;;  %v9938_v1 = vld [vmem:[#allocation100_spill] sm:$0xff] }
 0x9a5   :  { %v5917_v10 = vpop.eup %5916 }
 0x9a6   :  { %5918 = vrcp.f32 %v4113_v39  ;;  %v4120_v46 = vadd.f32 1.0, %v5917_v10  ;;  %v9939_v39 = vld [vmem:[#allocation97_spill] sm:$0xff] }
 0x9a8   :  { %5920 = vrcp.f32 %v4120_v46  ;;  %v9940_v46 = vld [vmem:[#allocation34_spill] sm:$0xff] }
 0x9b3   :  { %v5919_v24 = vpop.eup %5918 }
 0x9b4   :  { %v4123_v25 = vmul.f32 %v5919_v24, %v4106_v58  ;;  %v9941_v58 = vld [vmem:[#allocation47_spill] sm:$0xff] }
 0x9b5   :  { %v5921_v63 = vpop.eup %5920 }
 0x9b6   :  { %v4124_v33 = vadd.f32 %v4123_v25, %v9906_v47  ;;  %v4126_v3 = vsub.f32 1.0, %v5921_v63  ;;  %v4128_v45 = vmul.f32 %v5921_v63, %v8741_v56  ;;  %v9942_v25 = vld [vmem:[#allocation98_spill] sm:$0xff]  ;;  %v9943_v47 = vld [vmem:[#allocation40_spill] sm:$0xff] }
 0x9b7   :  { %v9945_v63 = vld [vmem:[#allocation74_spill] sm:$0xff] }
 0x9b8   :  { %5922 = vtanh.f32 %v4124_v33  ;;  %v9944_v33 = vld [vmem:[#allocation85_spill] sm:$0xff] }
 0x9c5   :  { %v5923_v6 = vpop.eup %5922 }
 0x9c6   :  { %v4127_v61 = vmul.f32 %v5923_v6, %v4126_v3  ;;  %v9946_v3 = vld [vmem:[#allocation83_spill] sm:$0xff] }
 0x9c7   :  { %v9947_v6 = vld [vmem:[#allocation59_spill] sm:$0xff] }
 0x9c8   :  { %v8994_v44 = vadd.f32 %v4128_v45, %v4127_v61  ;;  %v9948_v61 = vld [vmem:[#allocation87_spill] sm:$0xff]  ;;  %v9949_v45 = vld [vmem:[#allocation24_spill] sm:$0xff] }
 0x9ca   :  { %4361 = vmatmul.mubr.f32.vlgmr.msra.gmra.mxu1 %v8994_v44  ;;  %5702 = vmatmul.mubr.f32.vlgmr.msra.gmra.mxu0 %v8994_v44 }
 0x9cb   :  { %4459 = vmatpush1.msra.mxu1 %v8745_v16  ;;  %5705 = vmatpush3.msra.mxu0 %v8748_v29  ;;  %v9907_v16 = vld [vmem:[#allocation32_spill] sm:$0xff]  ;;  %v9908_v29 = vld [vmem:[#allocation69_spill] sm:$0xff] }
 0x9cc   :  { %4460 = vmatprep.subr.mxu1 %v8751_v12  ;;  %5706 = vmatprep.subr.mxu0 %v9477_v57  ;;  %v9909_v12 = vld [vmem:[#allocation92_spill] sm:$0xff] }
 0x9cd   :  { %4461 = vmatpush1.msra.mxu1 %v8755_v54  ;;  %5707 = vmatpush3.msra.mxu0 %v8758_v17  ;;  %v9910_v17 = vld [vmem:[#allocation35_spill] sm:$0xff] }
 0x9ce   :  { %4462 = vmatprep.subr.mxu1 %v8761_v59  ;;  %5708 = vmatprep.subr.mxu0 %v9477_v57  ;;  %v9911_v59 = vld [vmem:[#allocation36_spill] sm:$0xff] }
 0x9cf   :  { %v4196_v20 = vpop.f32.mrf.mxu1  ;;  %v9006_v28 = vpop.f32.mrf.mxu0  ;;  %4463 = vmatpush1.msra.mxu1 %v8767_v41  ;;  %5709 = vmatpush3.msra.mxu0 %v9907_v16  ;;  %v9914_v41 = vld [vmem:[#allocation50_spill] sm:$0xff] }
 0x9d0   :  { %v4197_v5 = vadd.f32 %v4196_v20, %v9908_v29  ;;  %4464 = vmatprep.subr.mxu1 %v9909_v12  ;;  %5710 = vmatprep.subr.mxu0 %v9477_v57  ;;  %v9950_v20 = vld [vmem:[#allocation78_spill] sm:$0xff]  ;;  %v4268_v12 = vadd.f32 %v9006_v28, %v8403_v36 }
 0x9d1   :  { %v4198_v54 = vpop.f32.mrf.mxu1  ;;  %v5668_v38 = vpop.f32.mrf.mxu0  ;;  %4465 = vmatpush1.msra.mxu1 %v9910_v17  ;;  %5711 = vmatpush3.msra.mxu0 %v9911_v59  ;;  %v9951_v17 = vld [vmem:[#allocation70_spill] sm:$0xff] }
 0x9d2   :  { %v4271_v13 = vadd.f32 %v4197_v5, %v9912_v43  ;;  %4466 = vmatprep.subr.mxu1 %v9913_v42  ;;  %5712 = vmatprep.subr.mxu0 %v9477_v57  ;;  %v4199_v51 = vadd.f32 %v4198_v54, %v9916_v0 }
 0x9d3   :  { %4467 = vmatpush1.msra.mxu1 %v9914_v41  ;;  %5713 = vmatpush3.msra.mxu0 %v9915_v60 }
 0x9d4   :  { %v4693_v53 = vmul.f32 -1.442695, %v4271_v13  ;;  %4468 = vmatprep.subr.mxu1 %v9917_v23  ;;  %5714 = vmatprep.subr.mxu0 %v9477_v57  ;;  %v4278_v4 = vadd.f32 %v4199_v51, %v9923_v8  ;;  %v9953_v8 = vld [vmem:[#allocation62_spill] sm:$0xff] }
 0x9d5   :  { %4469 = vmatpush1.msra.mxu1 %v9918_v14  ;;  %5715 = vmatpush3.msra.mxu0 %v9919_v50  ;;  %v9952_v50 = vld [vmem:[#allocation80_spill] sm:$0xff] }
 0x9d6   :  { %5924 = vpow2.f32 %v4693_v53  ;;  %4470 = vmatprep.subr.mxu1 %v9920_v7  ;;  %5716 = vmatprep.subr.mxu0 %v9477_v57  ;;  %v4694_v40 = vmul.f32 -1.442695, %v4278_v4 }
 0x9d7   :  { %4471 = vmatpush1.msra.mxu1 %v9921_v52  ;;  %5717 = vmatpush3.msra.mxu0 %v9922_v18 }
 0x9d8   :  { %4472 = vmatprep.subr.mxu1 %v9924_v62  ;;  %5718 = vmatprep.subr.mxu0 %v9477_v57  ;;  %5926 = vpow2.f32 %v4694_v40 }
 0x9d9   :  { %4473 = vmatpush1.msra.mxu1 %v9925_v34  ;;  %5719 = vmatpush3.msra.mxu0 %v9926_v11 }
 0x9da   :  { %4474 = vmatprep.subr.mxu1 %v9927_v55  ;;  %5720 = vmatprep.subr.mxu0 %v9477_v57 }
 0x9db   :  { %4475 = vmatpush1.msra.mxu1 %v9928_v2  ;;  %5721 = vmatpush3.msra.mxu0 %v9929_v22 }
 0x9dc   :  { %4476 = vmatprep.subr.mxu1 %v9930_v30  ;;  %5722 = vmatprep.subr.mxu0 %v9477_v57  ;;  %v9954_v30 = vld [vmem:[#allocation64_spill] sm:$0xff] }
 0x9dd   :  { %4477 = vmatpush1.msra.mxu1 %v9931_v48  ;;  %5723 = vmatpush3.msra.mxu0 %v9932_v19  ;;  %v3299_v19 = vstv %s9085_s5 }
 0x9de   :  { %4478 = vmatprep.subr.mxu1 %v9933_v35  ;;  %5724 = vmatprep.subr.mxu0 %v9477_v57  ;;  %v3963_v35 = vstv %s9087_s19 }
 0x9df   :  { %4479 = vmatpush1.msra.mxu1 %v9934_v21  ;;  %5725 = vmatpush3.msra.mxu0 %v9935_v15  ;;  %v9955_v21 = vld [vmem:[#allocation89_spill] sm:$0xff] }
 0x9e0   :  { %4480 = vmatprep.subr.mxu1 %v9936_v37  ;;  %5726 = vmatprep.subr.mxu0 %v9477_v57  ;;  %v9956_v37 = vld [vmem:[#allocation53_spill] sm:$0xff] }
 0x9e1   :  { %4481 = vmatpush1.msra.mxu1 %v9937_v31  ;;  %5727 = vmatpush3.msra.mxu0 %v9938_v1  ;;  %v3300_v31 = vmul.f32 %v3299_v19, %v9956_v37  ;;  %v3964_v1 = vmul.f32 %v3963_v35, %v8741_v56 }
 0x9e2   :  { %4482 = vmatprep.subr.mxu1 %v9939_v39  ;;  %5728 = vmatprep.subr.mxu0 %v9477_v57 }
 0x9e3   :  { %v5925_v10 = vpop.eup %5924  ;;  %4483 = vmatpush1.msra.mxu1 %v9940_v46  ;;  %5729 = vmatpush3.msra.mxu0 %v9941_v58  ;;  %v3635_v46 = vstv %s9089_s20 }
 0x9e4   :  { %v4275_v24 = vadd.f32 1.0, %v5925_v10  ;;  %4484 = vmatprep.subr.mxu1 %v9942_v25  ;;  %5730 = vmatprep.subr.mxu0 %v9477_v57 }
 0x9e5   :  { %4485 = vmatpush1.msra.mxu1 %v9943_v47  ;;  %5731 = vmatpush3.msra.mxu0 %v9944_v33  ;;  %v5927_v16 = vpop.eup %5926 }
 0x9e6   :  { %5928 = vrcp.f32 %v4275_v24  ;;  %4486 = vmatprep.subr.mxu1 %v9945_v63  ;;  %5732 = vmatprep.subr.mxu0 %v9477_v57  ;;  %v4282_v5 = vadd.f32 1.0, %v5927_v16  ;;  %v4292_v24 = vmul.f32 %v8994_v44, %v3635_v46 }
 0x9e7   :  { %4487 = vmatpush1.msra.mxu1 %v9946_v3  ;;  %5733 = vmatpush3.msra.mxu0 %v9947_v6  ;;  %v3303_v3 = vstv %s9093_s9 }
 0x9e8   :  { %4488 = vmatprep.subr.mxu1 %v9948_v61  ;;  %5734 = vmatprep.subr.mxu0 %v9477_v57  ;;  %5930 = vrcp.f32 %v4282_v5 }
 0x9e9   :  { %4489 = vmatpush1.msra.mxu1 %v9949_v45  ;;  %4522 = vmatprep.mubr.f32.mxu1 %v9477_v57  ;;  %v4625_v45 = vstv %s9134_s14  ;;  %s6323_s14 = smov 32  }
 0x9ea   :  { %5735 = vmatpush3.msra.mxu0 %v9950_v20  ;;  %5736 = vmatprep.mubr.msk.f32.mxu0 %vm6322_vm0, %v9477_v57 }
 0x9f3   :  { %v5929_v54 = vpop.eup %5928 }
 0x9f4   :  { %v4285_v38 = vmul.f32 %v5929_v54, %v4268_v12 }
 0x9f5   :  { %v5931_v43 = vpop.eup %5930 }
 0x9f6   :  { %v4286_v59 = vadd.f32 %v4285_v38, %v9951_v17  ;;  %v4288_v13 = vsub.f32 1.0, %v5931_v43  ;;  %v4290_v60 = vmul.f32 %v5931_v43, %v8916_v9 }
 0x9f8   :  { %5932 = vtanh.f32 %v4286_v59 }
 0xa05   :  { %v5933_v42 = vpop.eup %5932 }
 0xa06   :  { %v4289_v41 = vmul.f32 %v5933_v42, %v4288_v13  ;;  %v9958_v13 = vld [vmem:[#allocation86_spill] sm:$0xff] }
 0xa08   :  { %v9073_v53 = vadd.f32 %v4290_v60, %v4289_v41 }
 0xa0a   :  { %4523 = vmatmul.mubr.f32.vlgmr.msra.gmra.mxu1 %v9073_v53  ;;  %5737 = vmatmul.mubr.f32.vlgmr.msra.gmra.mxu0 %v9073_v53 }
 0xa8a   :  { %v4362_v57 = vpop.f32.mrf.mxu1  ;;  %v4433_v28 = vpop.f32.mrf.mxu0 }
 0xa8b   :  { %v4363_v51 = vadd.f32 %v4362_v57, %v9903_v49  ;;  %v4434_v22 = vadd.f32 %v4433_v28, %v8279_v26 }
 0xa8c   :  { %v4364_v23 = vpop.f32.mrf.mxu1  ;;  %v5703_v14 = vpop.f32.mrf.mxu0 }
 0xa8d   :  { %v4437_v7 = vadd.f32 %v4363_v51, %v9952_v50  ;;  %v4365_v18 = vadd.f32 %v4364_v23, %v8267_v27  ;;  %v3631_v27 = vstv %s9083_s12  ;;  %v9959_v50 = vld [vmem:[#allocation61_spill] sm:$0xff] }
 0xa8e   :  { %v3632_v15 = vmul.f32 %v3631_v27, %v9955_v21 }
 0xa8f   :  { %v4695_v52 = vmul.f32 -1.442695, %v4437_v7  ;;  %v4444_v4 = vadd.f32 %v4365_v18, %v9953_v8  ;;  %v9960_v18 = vld [vmem:[#allocation84_spill] sm:$0xff] }
 0xa90   :  { %v3633_v58 = vadd.f32 %v3632_v15, %v3300_v31  ;;  %v3304_v8 = vmul.f32 %v3303_v3, %v9960_v18 }
 0xa91   :  { %5934 = vpow2.f32 %v4695_v52  ;;  %v4696_v62 = vmul.f32 -1.442695, %v4444_v4  ;;  %v3966_v4 = vmul.f32 %v3963_v35, %v8916_v9 }
 0xa92   :  { %v3965_v33 = vadd.f32 %v3964_v1, %v3633_v58 }
 0xa93   :  { %5936 = vpow2.f32 %v4696_v62 }
 0xa94   :  { %v4293_v6 = vadd.f32 %v4292_v24, %v3965_v33 }
 0xa9e   :  { %v5935_v34 = vpop.eup %5934 }
 0xa9f   :  { %v4441_v11 = vadd.f32 1.0, %v5935_v34 }
 0xaa0   :  { %v5937_v55 = vpop.eup %5936 }
 0xaa1   :  { %5938 = vrcp.f32 %v4441_v11  ;;  %v4448_v2 = vadd.f32 1.0, %v5937_v55  ;;  %v4294_v55 = vmul.f32 %v9073_v53, %v3631_v27 }
 0xaa3   :  { %5940 = vrcp.f32 %v4448_v2 }
 0xaae   :  { %v5939_v49 = vpop.eup %5938 }
 0xaaf   :  { %v4451_v40 = vmul.f32 %v5939_v49, %v4434_v22 }
 0xab0   :  { %v5941_v26 = vpop.eup %5940 }
 0xab1   :  { %v4452_v48 = vadd.f32 %v4451_v40, %v9954_v30  ;;  %v4454_v39 = vsub.f32 1.0, %v5941_v26  ;;  %v4456_v47 = vmul.f32 %v5941_v26, %v8994_v44  ;;  %v9957_v44 = vld [vmem:[#allocation101_spill] sm:$0xff] }
 0xab3   :  { %5942 = vtanh.f32 %v4452_v48 }
 0xac0   :  { %v5943_v10 = vpop.eup %5942 }
 0xac1   :  { %v4455_v25 = vmul.f32 %v5943_v10, %v4454_v39 }
 0xac3   :  { %v4457_v63 = vadd.f32 %v4456_v47, %v4455_v25 }
 0xac5   :  { %v4620_v61 = vmul.f32 %v4457_v63, %v3303_v3 }
 0xac7   :  { %v4621_v20 = vadd.f32 %v4620_v61, %v4293_v6 }
 0xac9   :  { %v4626_v56 = vadd.f32 %v4625_v45, %v4621_v20 }
 0xaca   :  { %v4524_v16 = vpop.f32.mrf.mxu1  ;;  %v4595_v5 = vpop.f32.mrf.mxu0 }
 0xacb   :  { %v4525_v12 = vadd.f32 %v4524_v16, %v9908_v29  ;;  %4628 = vst.msk [vmem:[#allocation17] sm:$0xff] %vm4627_vm1, %v4626_v56  ;;  %v4596_v29 = vadd.f32 %v4595_v5, %v8403_v36 }
 0xacc   :  { %v4526_v54 = vpop.f32.mrf.mxu1  ;;  %v5738_v38 = vpop.f32.mrf.mxu0 }
 0xacd   :  { %v4599_v17 = vadd.f32 %v4525_v12, %v9957_v44  ;;  %v4527_v43 = vadd.f32 %v4526_v54, %v9916_v0  ;;  %v3636_v0 = vmul.f32 %v3635_v46, %v8629_v32 }
 0xacf   :  { %v4697_v59 = vmul.f32 -1.442695, %v4599_v17  ;;  %v4606_v42 = vadd.f32 %v4527_v43, %v9958_v13  ;;  %v3637_v11 = vadd.f32 %v3636_v0, %v3304_v8 }
 0xad1   :  { %5944 = vpow2.f32 %v4697_v59  ;;  %v4698_v41 = vmul.f32 -1.442695, %v4606_v42  ;;  %v3967_v22 = vadd.f32 %v3966_v4, %v3637_v11 }
 0xad3   :  { %5946 = vpow2.f32 %v4698_v41  ;;  %v4295_v40 = vadd.f32 %v4294_v55, %v3967_v22 }
 0xade   :  { %v5945_v60 = vpop.eup %5944 }
 0xadf   :  { %v4603_v57 = vadd.f32 1.0, %v5945_v60 }
 0xae0   :  { %v5947_v28 = vpop.eup %5946 }
 0xae1   :  { %5948 = vrcp.f32 %v4603_v57  ;;  %v4610_v51 = vadd.f32 1.0, %v5947_v28 }
 0xae3   :  { %5950 = vrcp.f32 %v4610_v51 }
 0xaee   :  { %v5949_v23 = vpop.eup %5948 }
 0xaef   :  { %v4613_v14 = vmul.f32 %v5949_v23, %v4596_v29 }
 0xaf0   :  { %v5951_v52 = vpop.eup %5950 }
 0xaf1   :  { %v4614_v7 = vadd.f32 %v4613_v14, %v9959_v50  ;;  %v4616_v62 = vsub.f32 1.0, %v5951_v52  ;;  %v4618_v36 = vmul.f32 %v5951_v52, %v9073_v53 }
 0xaf3   :  { %5952 = vtanh.f32 %v4614_v7 }
 0xb00   :  { %v5953_v34 = vpop.eup %5952 }
 0xb01   :  { %v4617_v2 = vmul.f32 %v5953_v34, %v4616_v62 }
 0xb03   :  { %v4619_v49 = vadd.f32 %v4618_v36, %v4617_v2 }
 0xb05   :  { %v4622_v30 = vmul.f32 %v4619_v49, %v3299_v19 }
 0xb07   :  { %v4623_v48 = vadd.f32 %v4622_v30, %v4295_v40 }
 0xb09   :  { %v4629_v26 = vadd.f32 %v4625_v45, %v4623_v48 }
 0xb0b   :  { %4631 = vrot.lane.b32.xlu0 %v4629_v26, %s6323_s14 }
 0xb7d   :  { %v4632_v32 = vpop.permute.xlu0 %4631 }
 0xb7e   :  { %4635 = vst.msk [vmem:[#allocation17] sm:$0xff] %vm4634_vm2, %v4632_v32 }
 0xb7f   :  { %6289 = shalt.err (!%p6286_p11)
}
 0xb80   :  { %4645 = dma.vmem_to_hbm [thread:$0]  %s4643_s21, 128, %s9135_s15, [#allocation6]  }
 0xb81   :  { %6308 = dma.done.wait [#allocation6], 128  }
 0xb82   :  { %6309 = vsyncadd [#allocation6], 4294967168 }
 0xb83   :  { %4649 = vsyncpa [#allocation5], 1 }
 0xb84   :  { %4650 = vsyncpa [#allocation9], 1 }
 0xb85   :  { %4651 = vsyncpa [#allocation12], 1 }
 0xb86   :  { %4652 = vsyncpa [#allocation15], 1 }
 0xb87   :  { %4653 = vsyncpa [#allocation6], 1 }
 0xb88   :  { %4654 = vsyncpa [#allocation7], 1 }

</bundles_post_ra>
